<compile_context>
chip_gen: v7x
topology: tpu7x:2x2x1
jax: 0.10.0
libtpu: 0.0.40
codegen_flags: <defaults>
</compile_context>

<pallas_src>
import functools
import math

import numpy as np

import jax
import jax.numpy as jnp
from jax.experimental import pallas as pl
from jax.experimental.pallas import tpu as pltpu  # noqa: F401  (TPU backend)

D_VOCAB = 23
D_MODEL = 16
NHEAD = 8
HEAD_DIM = D_MODEL // NHEAD          # 2
DIM_FF = 8
N_ENC = 2
N_DEC = 2
BS = 2
LN_EPS = 1e-5
BN_EPS = 1e-5
ATTN_SCALE = 1.0 / math.sqrt(HEAD_DIM)
SLAB_W = 128                          # lane width of the packed parameter slab
NEG_INF = -1e30


# ------------------------------ slab layout -----------------------------------

def _build_layout():
    entries = []

    def add(name, nrows, ncols):
        entries.append((name, nrows, ncols))

    for i in range(N_ENC):
        p = f"enc{i}_"
        add(p + "w_in", D_MODEL, 5 * D_MODEL)   # [q*s | k | v | swap(q)*s | swap(k)]
        add(p + "b_in", 1, 5 * D_MODEL)
        add(p + "w_out", D_MODEL, D_MODEL)
        add(p + "b_out", 1, D_MODEL)
        add(p + "ff1_w", D_MODEL, DIM_FF)
        add(p + "ff1_b", 1, DIM_FF)
        add(p + "ff2_w", DIM_FF, D_MODEL)
        add(p + "ff2_b", 1, D_MODEL)
        for n in ("ln1_g", "ln1_b", "ln2_g", "ln2_b"):
            add(p + n, 1, D_MODEL)

    for i in range(N_DEC):
        p = f"dec{i}_"
        add(p + "sa_w_in", D_MODEL, 5 * D_MODEL)
        add(p + "sa_b_in", 1, 5 * D_MODEL)
        add(p + "sa_w_out", D_MODEL, D_MODEL)
        add(p + "sa_b_out", 1, D_MODEL)
        add(p + "ca_wq", D_MODEL, 2 * D_MODEL)   # [q*s | swap(q)*s]
        add(p + "ca_bq", 1, 2 * D_MODEL)
        add(p + "ca_wkv", D_MODEL, 3 * D_MODEL)  # [k | v | swap(k)]
        add(p + "ca_bkv", 1, 3 * D_MODEL)
        add(p + "ca_w_out", D_MODEL, D_MODEL)
        add(p + "ca_b_out", 1, D_MODEL)
        add(p + "ff1_w", D_MODEL, DIM_FF)
        add(p + "ff1_b", 1, DIM_FF)
        add(p + "ff2_w", DIM_FF, D_MODEL)
        add(p + "ff2_b", 1, D_MODEL)
        for n in ("ln1_g", "ln1_b", "ln2_g", "ln2_b", "ln3_g", "ln3_b"):
            add(p + n, 1, D_MODEL)

    add("enc_norm_g", 1, D_MODEL)
    add("enc_norm_b", 1, D_MODEL)
    add("dec_norm_g", 1, D_MODEL)
    add("dec_norm_b", 1, D_MODEL)
    add("embT", D_MODEL, SLAB_W)     # emb.T, vocab padded 23 -> 128 lanes
    add("out_b", 1, SLAB_W)          # output bias, vocab padded to 128 lanes

    layout = {}
    row = 0
    for name, nr, nc in entries:
        layout[name] = (row, nr, nc)
        row += nr
    n_rows = -(-row // 8) * 8        # pad total rows to a multiple of 8
    return layout, n_rows


_PARAM_LAYOUT, _PARAM_ROWS = _build_layout()


# ------------------------- in-kernel building blocks -------------------------

def _layernorm(x, g, b):
    mean = jnp.mean(x, axis=-1, keepdims=True)
    var = jnp.mean(jnp.square(x - mean), axis=-1, keepdims=True)
    return (x - mean) * jax.lax.rsqrt(var + LN_EPS) * g + b


def _batch_bias(rq, rk, s_q, s_k):
    """Additive attention bias: 0 within a batch element, -1e30 across (BS == 2)."""
    bi = (jax.lax.broadcasted_iota(jnp.int32, (rq, 1), 0) >= s_q).astype(jnp.float32)
    bj = (jax.lax.broadcasted_iota(jnp.int32, (rk, 1), 0) >= s_k).astype(jnp.float32)
    # xor(bi, bj) expressed arithmetically -> 1.0 exactly where batches differ.
    xor = bi[:, None, :] + bj[None, :, :] - 2.0 * bi[:, None, :] * bj[None, :, :]
    return xor * jnp.float32(NEG_INF)                          # (rq, rk, 1)


def _attention(q, k, v, qs, ks, bias):
    """All heads + both batch elements at once; scale is pre-folded into q/qs.

    q,k,v,qs,ks: (R, 16) with q/k lane-pair-swapped copies in qs/ks, so
    s[i, j, l] = <q_i, k_j> restricted to head l//2, duplicated on both lanes
    of each head.  bias kills cross-batch positions.
    """
    s = (q[:, None, :] * k[None, :, :]
         + qs[:, None, :] * ks[None, :, :]
         + bias)                                               # (Rq, Rk, 16)
    m = jnp.max(s, axis=1, keepdims=True)                      # (Rq, 1, 16)
    p = jnp.exp(s - m)
    denom = jnp.sum(p, axis=1, keepdims=True)
    probs = p * pl.reciprocal(denom, approx=True)
    return jnp.sum(probs * v[None, :, :], axis=1)              # (Rq, 16)


def _mha_self(x, w_in, b_in, w_out, b_out, bias):
    proj = jnp.dot(x, w_in, preferred_element_type=jnp.float32) + b_in
    q = proj[:, 0 * D_MODEL:1 * D_MODEL]
    k = proj[:, 1 * D_MODEL:2 * D_MODEL]
    v = proj[:, 2 * D_MODEL:3 * D_MODEL]
    qs = proj[:, 3 * D_MODEL:4 * D_MODEL]
    ks = proj[:, 4 * D_MODEL:5 * D_MODEL]
    o = _attention(q, k, v, qs, ks, bias)
    return jnp.dot(o, w_out, preferred_element_type=jnp.float32) + b_out


def _mha_cross(xq, xkv, wq, bq, wkv, bkv, w_out, b_out, bias):
    qproj = jnp.dot(xq, wq, preferred_element_type=jnp.float32) + bq
    kvproj = jnp.dot(xkv, wkv, preferred_element_type=jnp.float32) + bkv
    q = qproj[:, :D_MODEL]
    qs = qproj[:, D_MODEL:2 * D_MODEL]
    k = kvproj[:, :D_MODEL]
    v = kvproj[:, D_MODEL:2 * D_MODEL]
    ks = kvproj[:, 2 * D_MODEL:3 * D_MODEL]
    o = _attention(q, k, v, qs, ks, bias)
    return jnp.dot(o, w_out, preferred_element_type=jnp.float32) + b_out


def _ffn(x, w1, b1, w2, b2):
    h = jnp.dot(x, w1, preferred_element_type=jnp.float32) + b1
    h = jnp.maximum(h, 0.0)
    return jnp.dot(h, w2, preferred_element_type=jnp.float32) + b2


# ------------------------------ the fused kernel ------------------------------

def _fused_forward_kernel(pslab_ref, act_ref, o_ref, *, s_src, s_tgt, r_src_pad):
    def get(name):
        r, nr, nc = _PARAM_LAYOUT[name]
        return pslab_ref[r:r + nr, 0:nc]

    r_src = BS * s_src
    r_tgt = BS * s_tgt
    src = act_ref[0:r_src, :]                       # (BS*s_src, D), b-major rows
    tgt = act_ref[r_src_pad:r_src_pad + r_tgt, :]   # (BS*s_tgt, D), b-major rows

    bias_enc = _batch_bias(r_src, r_src, s_src, s_src)
    bias_dec = _batch_bias(r_tgt, r_tgt, s_tgt, s_tgt)
    bias_crs = _batch_bias(r_tgt, r_src, s_tgt, s_src)

    # ---- encoder stack (post-norm; dropout == identity in eval) --------------
    mem = src
    for i in range(N_ENC):
        p = f"enc{i}_"
        a = _mha_self(mem, get(p + "w_in"), get(p + "b_in"),
                      get(p + "w_out"), get(p + "b_out"), bias_enc)
        x = _layernorm(mem + a, get(p + "ln1_g"), get(p + "ln1_b"))
        f = _ffn(x, get(p + "ff1_w"), get(p + "ff1_b"),
                 get(p + "ff2_w"), get(p + "ff2_b"))
        mem = _layernorm(x + f, get(p + "ln2_g"), get(p + "ln2_b"))
    mem = _layernorm(mem, get("enc_norm_g"), get("enc_norm_b"))

    # ---- decoder stack --------------------------------------------------------
    x = tgt
    for i in range(N_DEC):
        p = f"dec{i}_"
        a = _mha_self(x, get(p + "sa_w_in"), get(p + "sa_b_in"),
                      get(p + "sa_w_out"), get(p + "sa_b_out"), bias_dec)
        x = _layernorm(x + a, get(p + "ln1_g"), get(p + "ln1_b"))
        a = _mha_cross(x, mem, get(p + "ca_wq"), get(p + "ca_bq"),
                       get(p + "ca_wkv"), get(p + "ca_bkv"),
                       get(p + "ca_w_out"), get(p + "ca_b_out"), bias_crs)
        x = _layernorm(x + a, get(p + "ln2_g"), get(p + "ln2_b"))
        f = _ffn(x, get(p + "ff1_w"), get(p + "ff1_b"),
                 get(p + "ff2_w"), get(p + "ff2_b"))
        x = _layernorm(x + f, get(p + "ln3_g"), get(p + "ln3_b"))
    x = _layernorm(x, get("dec_norm_g"), get("dec_norm_b"))

    # ---- tied output projection against vocab-padded emb.T --------------------
    logits = jnp.dot(x, get("embT"), preferred_element_type=jnp.float32)
    logits = logits + get("out_b")                  # (BS*s_tgt, 128)
    o_ref[...] = logits.astype(o_ref.dtype)         # single unmasked store


# --------------------------------- wrapper -----------------------------------

@jax.jit
def forward(packed, src_ids, tgt_ids):
    s_src, bs_s = src_ids.shape
    s_tgt, bs_t = tgt_ids.shape
    assert bs_s == BS and bs_t == BS
    assert BS == 2  # batch-membership trick in _batch_bias assumes 2 sequences

    embed = packed["embed"]
    # Embedding gathers, buffer add and eval-mode BatchNorm1d affine run as
    # tiny XLA ops fused around the pallas_call (b-major row order: row = b*S + s).
    src = jnp.take(embed, src_ids.T.reshape(-1).astype(jnp.int32), axis=0)
    src = src + packed["src_bias"]                              # (BS*s_src, D)
    tgt = jnp.take(embed, tgt_ids.T.reshape(-1).astype(jnp.int32), axis=0)
    tgt = (tgt * jnp.repeat(packed["bn_scale"], s_tgt)[:, None]
           + jnp.repeat(packed["bn_shift"], s_tgt)[:, None])    # (BS*s_tgt, D)

    r_src = BS * s_src
    r_tgt = BS * s_tgt
    r_src_pad = -(-r_src // 8) * 8
    src_p = jnp.pad(src, ((0, r_src_pad - r_src), (0, 0)))
    act = jnp.concatenate([src_p, tgt], axis=0).astype(jnp.float32)

    out = pl.pallas_call(
        functools.partial(_fused_forward_kernel,
                          s_src=s_src, s_tgt=s_tgt, r_src_pad=r_src_pad),
        out_shape=jax.ShapeDtypeStruct((r_tgt, SLAB_W), jnp.float32),
    )(packed["pslab"], act)

    # b-major (BS*s_tgt, 128) -> (s_tgt, BS, V)  (cheap XLA slice + transpose)
    return out[:, :D_VOCAB].reshape(BS, s_tgt, D_VOCAB).transpose(1, 0, 2)


# ---------------------------- host-side packing -------------------------------

def pack_params(params):
    """Pack all parameters into one (rows, 128) f32 slab + tiny aux arrays."""
    slab = np.zeros((_PARAM_ROWS, SLAB_W), np.float32)

    def put(name, val):
        val = np.asarray(val, np.float32)
        r, nr, nc = _PARAM_LAYOUT[name]
        assert val.shape == (nr, nc), (name, val.shape, (nr, nc))
        slab[r:r + nr, :nc] = val

    # lane-pair swap permutation (head_dim == 2): SWAP[d, d^1] = 1
    swap = np.zeros((D_MODEL, D_MODEL), np.float32)
    for d in range(D_MODEL):
        swap[d, d ^ 1] = 1.0

    def split_qkv(w_in, b_in):
        w_in = np.asarray(w_in, np.float32)
        b_in = np.asarray(b_in, np.float32)
        return (w_in[:, :D_MODEL], w_in[:, D_MODEL:2 * D_MODEL], w_in[:, 2 * D_MODEL:],
                b_in[:, :D_MODEL], b_in[:, D_MODEL:2 * D_MODEL], b_in[:, 2 * D_MODEL:])

    def self_attn_ext(w_in, b_in):
        wq, wk, wv, bq, bk, bv = split_qkv(w_in, b_in)
        w_ext = np.concatenate(
            [wq * ATTN_SCALE, wk, wv, (wq @ swap) * ATTN_SCALE, wk @ swap], axis=1)
        b_ext = np.concatenate(
            [bq * ATTN_SCALE, bk, bv, (bq @ swap) * ATTN_SCALE, bk @ swap], axis=1)
        return w_ext, b_ext

    def cross_attn_ext(w_in, b_in):
        wq, wk, wv, bq, bk, bv = split_qkv(w_in, b_in)
        wq_ext = np.concatenate([wq * ATTN_SCALE, (wq @ swap) * ATTN_SCALE], axis=1)
        bq_ext = np.concatenate([bq * ATTN_SCALE, (bq @ swap) * ATTN_SCALE], axis=1)
        wkv_ext = np.concatenate([wk, wv, wk @ swap], axis=1)
        bkv_ext = np.concatenate([bk, bv, bk @ swap], axis=1)
        return wq_ext, bq_ext, wkv_ext, bkv_ext

    for i, lp in enumerate(params["enc_layers"]):
        p = f"enc{i}_"
        w_ext, b_ext = self_attn_ext(lp["w_in"], lp["b_in"])
        put(p + "w_in", w_ext)
        put(p + "b_in", b_ext)
        put(p + "w_out", lp["w_out"])
        put(p + "b_out", lp["b_out"])
        put(p + "ff1_w", lp["ff1_w"])
        put(p + "ff1_b", lp["ff1_b"])
        put(p + "ff2_w", lp["ff2_w"])
        put(p + "ff2_b", lp["ff2_b"])
        for n in ("ln1_g", "ln1_b", "ln2_g", "ln2_b"):
            put(p + n, lp[n])

    for i, lp in enumerate(params["dec_layers"]):
        p = f"dec{i}_"
        w_ext, b_ext = self_attn_ext(lp["sa_w_in"], lp["sa_b_in"])
        put(p + "sa_w_in", w_ext)
        put(p + "sa_b_in", b_ext)
        put(p + "sa_w_out", lp["sa_w_out"])
        put(p + "sa_b_out", lp["sa_b_out"])
        wq_e, bq_e, wkv_e, bkv_e = cross_attn_ext(lp["ca_w_in"], lp["ca_b_in"])
        put(p + "ca_wq", wq_e)
        put(p + "ca_bq", bq_e)
        put(p + "ca_wkv", wkv_e)
        put(p + "ca_bkv", bkv_e)
        put(p + "ca_w_out", lp["ca_w_out"])
        put(p + "ca_b_out", lp["ca_b_out"])
        put(p + "ff1_w", lp["ff1_w"])
        put(p + "ff1_b", lp["ff1_b"])
        put(p + "ff2_w", lp["ff2_w"])
        put(p + "ff2_b", lp["ff2_b"])
        for n in ("ln1_g", "ln1_b", "ln2_g", "ln2_b", "ln3_g", "ln3_b"):
            put(p + n, lp[n])

    put("enc_norm_g", params["enc_norm_g"])
    put("enc_norm_b", params["enc_norm_b"])
    put("dec_norm_g", params["dec_norm_g"])
    put("dec_norm_b", params["dec_norm_b"])

    embT = np.zeros((D_MODEL, SLAB_W), np.float32)
    embT[:, :D_VOCAB] = np.asarray(params["embed"], np.float32).T
    put("embT", embT)
    out_b = np.zeros((1, SLAB_W), np.float32)
    out_b[:, :D_VOCAB] = np.asarray(params["out_b"], np.float32)
    put("out_b", out_b)

    src_bias = (np.asarray(params["vocab_bias"], np.float32)
                + np.asarray(params["long_buffer"]).astype(np.float32))  # (1, D)
    bn_scale = (np.asarray(params["bn_gamma"], np.float32)
                / np.sqrt(np.asarray(params["bn_var"], np.float32) + BN_EPS))
    bn_shift = (np.asarray(params["bn_beta"], np.float32)
                - np.asarray(params["bn_mean"], np.float32) * bn_scale)

    return dict(
        pslab=jnp.asarray(slab),
        embed=jnp.asarray(params["embed"], jnp.float32),
        src_bias=jnp.asarray(src_bias),
        bn_scale=jnp.asarray(bn_scale),
        bn_shift=jnp.asarray(bn_shift),
    )


# ------------------------------- parameters ----------------------------------

def init_params(key):
    keys = iter(jax.random.split(key, 64))

    def nrm(shape, scale=0.02):
        return (scale * jax.random.normal(next(keys), shape)).astype(jnp.float32)

    def ones(shape):
        return jnp.ones(shape, jnp.float32)

    def zeros(shape):
        return jnp.zeros(shape, jnp.float32)

    def attn(prefix=""):
        return {
            prefix + "w_in": nrm((D_MODEL, 3 * D_MODEL)),   # fused Q/K/V projection
            prefix + "b_in": zeros((1, 3 * D_MODEL)),
            prefix + "w_out": nrm((D_MODEL, D_MODEL)),
            prefix + "b_out": zeros((1, D_MODEL)),
        }

    def enc_layer():
        d = attn()
        d.update(
            ff1_w=nrm((D_MODEL, DIM_FF)), ff1_b=zeros((1, DIM_FF)),
            ff2_w=nrm((DIM_FF, D_MODEL)), ff2_b=zeros((1, D_MODEL)),
            ln1_g=ones((1, D_MODEL)), ln1_b=zeros((1, D_MODEL)),
            ln2_g=ones((1, D_MODEL)), ln2_b=zeros((1, D_MODEL)),
        )
        return d

    def dec_layer():
        d = {}
        d.update(attn("sa_"))
        d.update(attn("ca_"))
        d.update(
            ff1_w=nrm((D_MODEL, DIM_FF)), ff1_b=zeros((1, DIM_FF)),
            ff2_w=nrm((DIM_FF, D_MODEL)), ff2_b=zeros((1, D_MODEL)),
            ln1_g=ones((1, D_MODEL)), ln1_b=zeros((1, D_MODEL)),
            ln2_g=ones((1, D_MODEL)), ln2_b=zeros((1, D_MODEL)),
            ln3_g=ones((1, D_MODEL)), ln3_b=zeros((1, D_MODEL)),
        )
        return d

    return dict(
        embed=nrm((D_VOCAB, D_MODEL), scale=1.0),         # nn.Embedding weight (tied)
        vocab_bias=ones((1, D_MODEL)),                    # buffer: ones(d_model)
        long_buffer=jnp.zeros((1, D_MODEL), jnp.int32),   # buffer: zeros (long)
        bn_gamma=ones((BS,)), bn_beta=zeros((BS,)),
        bn_mean=zeros((BS,)), bn_var=ones((BS,)),
        enc_layers=[enc_layer() for _ in range(N_ENC)],
        dec_layers=[dec_layer() for _ in range(N_DEC)],
        enc_norm_g=ones((1, D_MODEL)), enc_norm_b=zeros((1, D_MODEL)),
        dec_norm_g=ones((1, D_MODEL)), dec_norm_b=zeros((1, D_MODEL)),
        out_b=zeros((1, D_VOCAB)),
    )


# ------------------------- pure-JAX reference (check) -------------------------

def reference_forward(params, src_ids, tgt_ids):
    """Seq-first (S, B, D) pure-JAX reference mirroring nn.Transformer eval-mode."""
    hp = jax.lax.Precision.HIGHEST
    emb = params["embed"]

    def layernorm(x, g, b):
        m = jnp.mean(x, axis=-1, keepdims=True)
        v = jnp.mean(jnp.square(x - m), axis=-1, keepdims=True)
        return (x - m) * jax.lax.rsqrt(v + LN_EPS) * g.reshape(-1) + b.reshape(-1)

    def mha(xq, xkv, w_in, b_in, w_out, b_out):
        sq, bsz, d = xq.shape
        sk = xkv.shape[0]
        q = jnp.einsum("sbd,de->sbe", xq, w_in[:, :d], precision=hp) + b_in[0, :d]
        k = jnp.einsum("sbd,de->sbe", xkv, w_in[:, d:2 * d], precision=hp) + b_in[0, d:2 * d]
        v = jnp.einsum("sbd,de->sbe", xkv, w_in[:, 2 * d:], precision=hp) + b_in[0, 2 * d:]
        q = q.reshape(sq, bsz, NHEAD, HEAD_DIM)
        k = k.reshape(sk, bsz, NHEAD, HEAD_DIM)
        v = v.reshape(sk, bsz, NHEAD, HEAD_DIM)
        s = jnp.einsum("qbhd,kbhd->bhqk", q, k, precision=hp) * ATTN_SCALE
        pr = jax.nn.softmax(s, axis=-1)
        o = jnp.einsum("bhqk,kbhd->qbhd", pr, v, precision=hp).reshape(sq, bsz, d)
        return jnp.einsum("sbd,de->sbe", o, w_out, precision=hp) + b_out[0]

    def ffn(x, lp):
        h = jnp.maximum(
            jnp.einsum("sbd,df->sbf", x, lp["ff1_w"], precision=hp) + lp["ff1_b"][0], 0.0)
        return jnp.einsum("sbf,fd->sbd", h, lp["ff2_w"], precision=hp) + lp["ff2_b"][0]

    src = jnp.take(emb, src_ids, axis=0) + params["vocab_bias"][0] \
        + params["long_buffer"][0].astype(jnp.float32)
    tgt = jnp.take(emb, tgt_ids, axis=0)
    scale = params["bn_gamma"] * jax.lax.rsqrt(params["bn_var"] + BN_EPS)
    shift = params["bn_beta"] - params["bn_mean"] * scale
    tgt = tgt * scale[None, :, None] + shift[None, :, None]

    mem = src
    for lp in params["enc_layers"]:
        a = mha(mem, mem, lp["w_in"], lp["b_in"], lp["w_out"], lp["b_out"])
        x = layernorm(mem + a, lp["ln1_g"], lp["ln1_b"])
        x = layernorm(x + ffn(x, lp), lp["ln2_g"], lp["ln2_b"])
        mem = x
    mem = layernorm(mem, params["enc_norm_g"], params["enc_norm_b"])

    x = tgt
    for lp in params["dec_layers"]:
        a = mha(x, x, lp["sa_w_in"], lp["sa_b_in"], lp["sa_w_out"], lp["sa_b_out"])
        x = layernorm(x + a, lp["ln1_g"], lp["ln1_b"])
        a = mha(x, mem, lp["ca_w_in"], lp["ca_b_in"], lp["ca_w_out"], lp["ca_b_out"])
        x = layernorm(x + a, lp["ln2_g"], lp["ln2_b"])
        x = layernorm(x + ffn(x, lp), lp["ln3_g"], lp["ln3_b"])
    x = layernorm(x, params["dec_norm_g"], params["dec_norm_b"])

    return jnp.einsum("sbd,vd->sbv", x, emb, precision=hp) + params["out_b"][0]


if __name__ == "__main__":
    params = init_params(jax.random.PRNGKey(0))
    packed = pack_params(params)

    # TransformerWithSharedParams.get_input():
    #   src = arange(12).view(6, bs), tgt = arange(bs*4).view(4, bs)
    src_ids = jnp.arange(6 * BS, dtype=jnp.int32).reshape(6, BS)
    tgt_ids = jnp.arange(BS * 4, dtype=jnp.int32).reshape(4, BS)

    out = forward(packed, src_ids, tgt_ids)
    out = jax.block_until_ready(out)
    assert out.shape == (4, BS, D_VOCAB), out.shape
    assert bool(jnp.all(jnp.isfinite(out)))

    ref = reference_forward(params, src_ids, tgt_ids)
    max_err = float(jnp.max(jnp.abs(out - ref)))
    assert bool(jnp.allclose(out, ref, atol=1e-1, rtol=1e-1)), max_err

    print("KERNEL_OK")
</pallas_src>

<mosaic_0001>
module attributes {stable_mosaic.version = 11 : i64} {
  func.func @_fused_forward_kernel(%arg0: memref<384x128xf32, #tpu.memory_space<vmem>>, %arg1: memref<24x16xf32, #tpu.memory_space<vmem>>, %arg2: memref<8x128xf32, #tpu.memory_space<vmem>>) attributes {dimension_semantics = [], scalar_prefetch = 0 : i64, scratch_operands = 0 : i64, tpu.core_type = #tpu.core_type<tc>} {
    %c0 = arith.constant 0 : index
    %c0_0 = arith.constant 0 : index
    %0 = vector.load %arg1[%c0, %c0_0] : memref<24x16xf32, #tpu.memory_space<vmem>>, vector<12x16xf32>
    %c16 = arith.constant 16 : index
    %c0_1 = arith.constant 0 : index
    %1 = vector.load %arg1[%c16, %c0_1] : memref<24x16xf32, #tpu.memory_space<vmem>>, vector<8x16xf32>
    %2 = tpu.iota {dimensions = array<i32: 0>} : vector<12x1xi32>
    %c6_i32 = arith.constant 6 : i32
    %3 = vector.broadcast %c6_i32 : i32 to vector<12x1xi32>
    %4 = arith.cmpi sge, %2, %3 : vector<12x1xi32>
    %5 = arith.extui %4 : vector<12x1xi1> to vector<12x1xi32>
    %6 = arith.sitofp %5 : vector<12x1xi32> to vector<12x1xf32>
    %7 = tpu.iota {dimensions = array<i32: 0>} : vector<12x1xi32>
    %c6_i32_2 = arith.constant 6 : i32
    %8 = vector.broadcast %c6_i32_2 : i32 to vector<12x1xi32>
    %9 = arith.cmpi sge, %7, %8 : vector<12x1xi32>
    %10 = arith.extui %9 : vector<12x1xi1> to vector<12x1xi32>
    %11 = arith.sitofp %10 : vector<12x1xi32> to vector<12x1xf32>
    %12 = vector.shape_cast %6 : vector<12x1xf32> to vector<12x1x1xf32>
    %13 = vector.shape_cast %11 : vector<12x1xf32> to vector<1x12x1xf32>
    %14 = vector.broadcast %12 : vector<12x1x1xf32> to vector<12x12x1xf32>
    %15 = vector.broadcast %13 : vector<1x12x1xf32> to vector<12x12x1xf32>
    %16 = arith.addf %14, %15 : vector<12x12x1xf32>
    %17 = vector.shape_cast %6 : vector<12x1xf32> to vector<12x1x1xf32>
    %cst = arith.constant 2.000000e+00 : f32
    %18 = vector.broadcast %cst : f32 to vector<12x1x1xf32>
    %19 = arith.mulf %18, %17 : vector<12x1x1xf32>
    %20 = vector.shape_cast %11 : vector<12x1xf32> to vector<1x12x1xf32>
    %21 = vector.broadcast %19 : vector<12x1x1xf32> to vector<12x12x1xf32>
    %22 = vector.broadcast %20 : vector<1x12x1xf32> to vector<12x12x1xf32>
    %23 = arith.mulf %21, %22 : vector<12x12x1xf32>
    %24 = arith.subf %16, %23 : vector<12x12x1xf32>
    %cst_3 = arith.constant -1.000000e+30 : f32
    %25 = vector.broadcast %cst_3 : f32 to vector<12x12x1xf32>
    %26 = arith.mulf %24, %25 : vector<12x12x1xf32>
    %27 = tpu.iota {dimensions = array<i32: 0>} : vector<8x1xi32>
    %c4_i32 = arith.constant 4 : i32
    %28 = vector.broadcast %c4_i32 : i32 to vector<8x1xi32>
    %29 = arith.cmpi sge, %27, %28 : vector<8x1xi32>
    %30 = arith.extui %29 : vector<8x1xi1> to vector<8x1xi32>
    %31 = arith.sitofp %30 : vector<8x1xi32> to vector<8x1xf32>
    %32 = tpu.iota {dimensions = array<i32: 0>} : vector<8x1xi32>
    %c4_i32_4 = arith.constant 4 : i32
    %33 = vector.broadcast %c4_i32_4 : i32 to vector<8x1xi32>
    %34 = arith.cmpi sge, %32, %33 : vector<8x1xi32>
    %35 = arith.extui %34 : vector<8x1xi1> to vector<8x1xi32>
    %36 = arith.sitofp %35 : vector<8x1xi32> to vector<8x1xf32>
    %37 = vector.shape_cast %31 : vector<8x1xf32> to vector<8x1x1xf32>
    %38 = vector.shape_cast %36 : vector<8x1xf32> to vector<1x8x1xf32>
    %39 = vector.broadcast %37 : vector<8x1x1xf32> to vector<8x8x1xf32>
    %40 = vector.broadcast %38 : vector<1x8x1xf32> to vector<8x8x1xf32>
    %41 = arith.addf %39, %40 : vector<8x8x1xf32>
    %42 = vector.shape_cast %31 : vector<8x1xf32> to vector<8x1x1xf32>
    %cst_5 = arith.constant 2.000000e+00 : f32
    %43 = vector.broadcast %cst_5 : f32 to vector<8x1x1xf32>
    %44 = arith.mulf %43, %42 : vector<8x1x1xf32>
    %45 = vector.shape_cast %36 : vector<8x1xf32> to vector<1x8x1xf32>
    %46 = vector.broadcast %44 : vector<8x1x1xf32> to vector<8x8x1xf32>
    %47 = vector.broadcast %45 : vector<1x8x1xf32> to vector<8x8x1xf32>
    %48 = arith.mulf %46, %47 : vector<8x8x1xf32>
    %49 = arith.subf %41, %48 : vector<8x8x1xf32>
    %cst_6 = arith.constant -1.000000e+30 : f32
    %50 = vector.broadcast %cst_6 : f32 to vector<8x8x1xf32>
    %51 = arith.mulf %49, %50 : vector<8x8x1xf32>
    %52 = tpu.iota {dimensions = array<i32: 0>} : vector<8x1xi32>
    %c4_i32_7 = arith.constant 4 : i32
    %53 = vector.broadcast %c4_i32_7 : i32 to vector<8x1xi32>
    %54 = arith.cmpi sge, %52, %53 : vector<8x1xi32>
    %55 = arith.extui %54 : vector<8x1xi1> to vector<8x1xi32>
    %56 = arith.sitofp %55 : vector<8x1xi32> to vector<8x1xf32>
    %57 = tpu.iota {dimensions = array<i32: 0>} : vector<12x1xi32>
    %c6_i32_8 = arith.constant 6 : i32
    %58 = vector.broadcast %c6_i32_8 : i32 to vector<12x1xi32>
    %59 = arith.cmpi sge, %57, %58 : vector<12x1xi32>
    %60 = arith.extui %59 : vector<12x1xi1> to vector<12x1xi32>
    %61 = arith.sitofp %60 : vector<12x1xi32> to vector<12x1xf32>
    %62 = vector.shape_cast %56 : vector<8x1xf32> to vector<8x1x1xf32>
    %63 = vector.shape_cast %61 : vector<12x1xf32> to vector<1x12x1xf32>
    %64 = vector.broadcast %62 : vector<8x1x1xf32> to vector<8x12x1xf32>
    %65 = vector.broadcast %63 : vector<1x12x1xf32> to vector<8x12x1xf32>
    %66 = arith.addf %64, %65 : vector<8x12x1xf32>
    %67 = vector.shape_cast %56 : vector<8x1xf32> to vector<8x1x1xf32>
    %cst_9 = arith.constant 2.000000e+00 : f32
    %68 = vector.broadcast %cst_9 : f32 to vector<8x1x1xf32>
    %69 = arith.mulf %68, %67 : vector<8x1x1xf32>
    %70 = vector.shape_cast %61 : vector<12x1xf32> to vector<1x12x1xf32>
    %71 = vector.broadcast %69 : vector<8x1x1xf32> to vector<8x12x1xf32>
    %72 = vector.broadcast %70 : vector<1x12x1xf32> to vector<8x12x1xf32>
    %73 = arith.mulf %71, %72 : vector<8x12x1xf32>
    %74 = arith.subf %66, %73 : vector<8x12x1xf32>
    %cst_10 = arith.constant -1.000000e+30 : f32
    %75 = vector.broadcast %cst_10 : f32 to vector<8x12x1xf32>
    %76 = arith.mulf %74, %75 : vector<8x12x1xf32>
    %c0_11 = arith.constant 0 : index
    %c0_12 = arith.constant 0 : index
    %77 = vector.load %arg0[%c0_11, %c0_12] : memref<384x128xf32, #tpu.memory_space<vmem>>, vector<16x80xf32>
    %c16_13 = arith.constant 16 : index
    %c0_14 = arith.constant 0 : index
    %78 = vector.load %arg0[%c16_13, %c0_14] : memref<384x128xf32, #tpu.memory_space<vmem>>, vector<1x80xf32>
    %c17 = arith.constant 17 : index
    %c0_15 = arith.constant 0 : index
    %79 = vector.load %arg0[%c17, %c0_15] : memref<384x128xf32, #tpu.memory_space<vmem>>, vector<16x16xf32>
    %c33 = arith.constant 33 : index
    %c0_16 = arith.constant 0 : index
    %80 = vector.load %arg0[%c33, %c0_16] : memref<384x128xf32, #tpu.memory_space<vmem>>, vector<1x16xf32>
    %cst_17 = arith.constant dense<0.000000e+00> : vector<12x80xf32>
    %81 = tpu.matmul %0, %77, %cst_17 {dimension_numbers = #tpu.dot_dimension_numbers<[1], [0], [0], [1], [0, 0, 1, 1], [], []>} : vector<12x16xf32>, vector<16x80xf32>, vector<12x80xf32> -> vector<12x80xf32>
    %82 = vector.broadcast %78 : vector<1x80xf32> to vector<12x80xf32>
    %83 = arith.addf %81, %82 : vector<12x80xf32>
    %84 = vector.extract_strided_slice %83 {offsets = [0, 0], sizes = [12, 16], strides = [1, 1]} : vector<12x80xf32> to vector<12x16xf32>
    %85 = vector.extract_strided_slice %83 {offsets = [0, 16], sizes = [12, 16], strides = [1, 1]} : vector<12x80xf32> to vector<12x16xf32>
    %86 = vector.extract_strided_slice %83 {offsets = [0, 32], sizes = [12, 16], strides = [1, 1]} : vector<12x80xf32> to vector<12x16xf32>
    %87 = vector.extract_strided_slice %83 {offsets = [0, 48], sizes = [12, 16], strides = [1, 1]} : vector<12x80xf32> to vector<12x16xf32>
    %88 = vector.extract_strided_slice %83 {offsets = [0, 64], sizes = [12, 16], strides = [1, 1]} : vector<12x80xf32> to vector<12x16xf32>
    %89 = vector.shape_cast %84 : vector<12x16xf32> to vector<12x1x16xf32>
    %90 = vector.shape_cast %85 : vector<12x16xf32> to vector<1x12x16xf32>
    %91 = vector.broadcast %89 : vector<12x1x16xf32> to vector<12x12x16xf32>
    %92 = vector.broadcast %90 : vector<1x12x16xf32> to vector<12x12x16xf32>
    %93 = arith.mulf %91, %92 : vector<12x12x16xf32>
    %94 = vector.shape_cast %87 : vector<12x16xf32> to vector<12x1x16xf32>
    %95 = vector.shape_cast %88 : vector<12x16xf32> to vector<1x12x16xf32>
    %96 = vector.broadcast %94 : vector<12x1x16xf32> to vector<12x12x16xf32>
    %97 = vector.broadcast %95 : vector<1x12x16xf32> to vector<12x12x16xf32>
    %98 = arith.mulf %96, %97 : vector<12x12x16xf32>
    %99 = arith.addf %93, %98 : vector<12x12x16xf32>
    %100 = vector.broadcast %26 : vector<12x12x1xf32> to vector<12x12x16xf32>
    %101 = arith.addf %99, %100 : vector<12x12x16xf32>
    %cst_18 = arith.constant dense<0xFF800000> : vector<12x16xf32>
    %102 = vector.multi_reduction <maximumf>, %101, %cst_18 [1] : vector<12x12x16xf32> to vector<12x16xf32>
    %103 = vector.shape_cast %102 : vector<12x16xf32> to vector<12x1x16xf32>
    %104 = vector.broadcast %103 : vector<12x1x16xf32> to vector<12x12x16xf32>
    %105 = arith.subf %101, %104 : vector<12x12x16xf32>
    %106 = math.exp %105 : vector<12x12x16xf32>
    %cst_19 = arith.constant dense<0.000000e+00> : vector<12x16xf32>
    %107 = vector.multi_reduction <add>, %106, %cst_19 [1] : vector<12x12x16xf32> to vector<12x16xf32>
    %108 = vector.shape_cast %107 : vector<12x16xf32> to vector<12x1x16xf32>
    %109 = tpu.reciprocal %108 {approx = true} : vector<12x1x16xf32> -> vector<12x1x16xf32>
    %110 = vector.broadcast %109 : vector<12x1x16xf32> to vector<12x12x16xf32>
    %111 = arith.mulf %106, %110 : vector<12x12x16xf32>
    %112 = vector.shape_cast %86 : vector<12x16xf32> to vector<1x12x16xf32>
    %113 = vector.broadcast %112 : vector<1x12x16xf32> to vector<12x12x16xf32>
    %114 = arith.mulf %111, %113 : vector<12x12x16xf32>
    %cst_20 = arith.constant dense<0.000000e+00> : vector<12x16xf32>
    %115 = vector.multi_reduction <add>, %114, %cst_20 [1] : vector<12x12x16xf32> to vector<12x16xf32>
    %cst_21 = arith.constant dense<0.000000e+00> : vector<12x16xf32>
    %116 = tpu.matmul %115, %79, %cst_21 {dimension_numbers = #tpu.dot_dimension_numbers<[1], [0], [0], [1], [0, 0, 1, 1], [], []>} : vector<12x16xf32>, vector<16x16xf32>, vector<12x16xf32> -> vector<12x16xf32>
    %117 = vector.broadcast %80 : vector<1x16xf32> to vector<12x16xf32>
    %118 = arith.addf %116, %117 : vector<12x16xf32>
    %119 = arith.addf %0, %118 : vector<12x16xf32>
    %c60 = arith.constant 60 : index
    %c0_22 = arith.constant 0 : index
    %120 = vector.load %arg0[%c60, %c0_22] : memref<384x128xf32, #tpu.memory_space<vmem>>, vector<1x16xf32>
    %c61 = arith.constant 61 : index
    %c0_23 = arith.constant 0 : index
    %121 = vector.load %arg0[%c61, %c0_23] : memref<384x128xf32, #tpu.memory_space<vmem>>, vector<1x16xf32>
    %cst_24 = arith.constant dense<0.000000e+00> : vector<12xf32>
    %122 = vector.multi_reduction <add>, %119, %cst_24 [1] : vector<12x16xf32> to vector<12xf32>
    %123 = vector.shape_cast %122 : vector<12xf32> to vector<12x1xf32>
    %cst_25 = arith.constant 1.600000e+01 : f32
    %124 = vector.broadcast %cst_25 : f32 to vector<12x1xf32>
    %125 = arith.divf %123, %124 : vector<12x1xf32>
    %126 = vector.broadcast %125 : vector<12x1xf32> to vector<12x16xf32>
    %127 = arith.subf %119, %126 : vector<12x16xf32>
    %128 = arith.mulf %127, %127 : vector<12x16xf32>
    %cst_26 = arith.constant dense<0.000000e+00> : vector<12xf32>
    %129 = vector.multi_reduction <add>, %128, %cst_26 [1] : vector<12x16xf32> to vector<12xf32>
    %130 = vector.shape_cast %129 : vector<12xf32> to vector<12x1xf32>
    %cst_27 = arith.constant 1.600000e+01 : f32
    %131 = vector.broadcast %cst_27 : f32 to vector<12x1xf32>
    %132 = arith.divf %130, %131 : vector<12x1xf32>
    %133 = vector.broadcast %125 : vector<12x1xf32> to vector<12x16xf32>
    %134 = arith.subf %119, %133 : vector<12x16xf32>
    %cst_28 = arith.constant 9.99999974E-6 : f32
    %135 = vector.broadcast %cst_28 : f32 to vector<12x1xf32>
    %136 = arith.addf %132, %135 : vector<12x1xf32>
    %137 = math.rsqrt %136 : vector<12x1xf32>
    %138 = vector.broadcast %137 : vector<12x1xf32> to vector<12x16xf32>
    %139 = arith.mulf %134, %138 : vector<12x16xf32>
    %140 = vector.broadcast %120 : vector<1x16xf32> to vector<12x16xf32>
    %141 = arith.mulf %139, %140 : vector<12x16xf32>
    %142 = vector.broadcast %121 : vector<1x16xf32> to vector<12x16xf32>
    %143 = arith.addf %141, %142 : vector<12x16xf32>
    %c34 = arith.constant 34 : index
    %c0_29 = arith.constant 0 : index
    %144 = vector.load %arg0[%c34, %c0_29] : memref<384x128xf32, #tpu.memory_space<vmem>>, vector<16x8xf32>
    %c50 = arith.constant 50 : index
    %c0_30 = arith.constant 0 : index
    %145 = vector.load %arg0[%c50, %c0_30] : memref<384x128xf32, #tpu.memory_space<vmem>>, vector<1x8xf32>
    %c51 = arith.constant 51 : index
    %c0_31 = arith.constant 0 : index
    %146 = vector.load %arg0[%c51, %c0_31] : memref<384x128xf32, #tpu.memory_space<vmem>>, vector<8x16xf32>
    %c59 = arith.constant 59 : index
    %c0_32 = arith.constant 0 : index
    %147 = vector.load %arg0[%c59, %c0_32] : memref<384x128xf32, #tpu.memory_space<vmem>>, vector<1x16xf32>
    %cst_33 = arith.constant dense<0.000000e+00> : vector<12x8xf32>
    %148 = tpu.matmul %143, %144, %cst_33 {dimension_numbers = #tpu.dot_dimension_numbers<[1], [0], [0], [1], [0, 0, 1, 1], [], []>} : vector<12x16xf32>, vector<16x8xf32>, vector<12x8xf32> -> vector<12x8xf32>
    %149 = vector.broadcast %145 : vector<1x8xf32> to vector<12x8xf32>
    %150 = arith.addf %148, %149 : vector<12x8xf32>
    %cst_34 = arith.constant 0.000000e+00 : f32
    %151 = vector.broadcast %cst_34 : f32 to vector<12x8xf32>
    %152 = arith.maximumf %150, %151 : vector<12x8xf32>
    %cst_35 = arith.constant dense<0.000000e+00> : vector<12x16xf32>
    %153 = tpu.matmul %152, %146, %cst_35 {dimension_numbers = #tpu.dot_dimension_numbers<[1], [0], [0], [1], [0, 0, 1, 1], [], []>} : vector<12x8xf32>, vector<8x16xf32>, vector<12x16xf32> -> vector<12x16xf32>
    %154 = vector.broadcast %147 : vector<1x16xf32> to vector<12x16xf32>
    %155 = arith.addf %153, %154 : vector<12x16xf32>
    %156 = arith.addf %143, %155 : vector<12x16xf32>
    %c62 = arith.constant 62 : index
    %c0_36 = arith.constant 0 : index
    %157 = vector.load %arg0[%c62, %c0_36] : memref<384x128xf32, #tpu.memory_space<vmem>>, vector<1x16xf32>
    %c63 = arith.constant 63 : index
    %c0_37 = arith.constant 0 : index
    %158 = vector.load %arg0[%c63, %c0_37] : memref<384x128xf32, #tpu.memory_space<vmem>>, vector<1x16xf32>
    %cst_38 = arith.constant dense<0.000000e+00> : vector<12xf32>
    %159 = vector.multi_reduction <add>, %156, %cst_38 [1] : vector<12x16xf32> to vector<12xf32>
    %160 = vector.shape_cast %159 : vector<12xf32> to vector<12x1xf32>
    %cst_39 = arith.constant 1.600000e+01 : f32
    %161 = vector.broadcast %cst_39 : f32 to vector<12x1xf32>
    %162 = arith.divf %160, %161 : vector<12x1xf32>
    %163 = vector.broadcast %162 : vector<12x1xf32> to vector<12x16xf32>
    %164 = arith.subf %156, %163 : vector<12x16xf32>
    %165 = arith.mulf %164, %164 : vector<12x16xf32>
    %cst_40 = arith.constant dense<0.000000e+00> : vector<12xf32>
    %166 = vector.multi_reduction <add>, %165, %cst_40 [1] : vector<12x16xf32> to vector<12xf32>
    %167 = vector.shape_cast %166 : vector<12xf32> to vector<12x1xf32>
    %cst_41 = arith.constant 1.600000e+01 : f32
    %168 = vector.broadcast %cst_41 : f32 to vector<12x1xf32>
    %169 = arith.divf %167, %168 : vector<12x1xf32>
    %170 = vector.broadcast %162 : vector<12x1xf32> to vector<12x16xf32>
    %171 = arith.subf %156, %170 : vector<12x16xf32>
    %cst_42 = arith.constant 9.99999974E-6 : f32
    %172 = vector.broadcast %cst_42 : f32 to vector<12x1xf32>
    %173 = arith.addf %169, %172 : vector<12x1xf32>
    %174 = math.rsqrt %173 : vector<12x1xf32>
    %175 = vector.broadcast %174 : vector<12x1xf32> to vector<12x16xf32>
    %176 = arith.mulf %171, %175 : vector<12x16xf32>
    %177 = vector.broadcast %157 : vector<1x16xf32> to vector<12x16xf32>
    %178 = arith.mulf %176, %177 : vector<12x16xf32>
    %179 = vector.broadcast %158 : vector<1x16xf32> to vector<12x16xf32>
    %180 = arith.addf %178, %179 : vector<12x16xf32>
    %c64 = arith.constant 64 : index
    %c0_43 = arith.constant 0 : index
    %181 = vector.load %arg0[%c64, %c0_43] : memref<384x128xf32, #tpu.memory_space<vmem>>, vector<16x80xf32>
    %c80 = arith.constant 80 : index
    %c0_44 = arith.constant 0 : index
    %182 = vector.load %arg0[%c80, %c0_44] : memref<384x128xf32, #tpu.memory_space<vmem>>, vector<1x80xf32>
    %c81 = arith.constant 81 : index
    %c0_45 = arith.constant 0 : index
    %183 = vector.load %arg0[%c81, %c0_45] : memref<384x128xf32, #tpu.memory_space<vmem>>, vector<16x16xf32>
    %c97 = arith.constant 97 : index
    %c0_46 = arith.constant 0 : index
    %184 = vector.load %arg0[%c97, %c0_46] : memref<384x128xf32, #tpu.memory_space<vmem>>, vector<1x16xf32>
    %cst_47 = arith.constant dense<0.000000e+00> : vector<12x80xf32>
    %185 = tpu.matmul %180, %181, %cst_47 {dimension_numbers = #tpu.dot_dimension_numbers<[1], [0], [0], [1], [0, 0, 1, 1], [], []>} : vector<12x16xf32>, vector<16x80xf32>, vector<12x80xf32> -> vector<12x80xf32>
    %186 = vector.broadcast %182 : vector<1x80xf32> to vector<12x80xf32>
    %187 = arith.addf %185, %186 : vector<12x80xf32>
    %188 = vector.extract_strided_slice %187 {offsets = [0, 0], sizes = [12, 16], strides = [1, 1]} : vector<12x80xf32> to vector<12x16xf32>
    %189 = vector.extract_strided_slice %187 {offsets = [0, 16], sizes = [12, 16], strides = [1, 1]} : vector<12x80xf32> to vector<12x16xf32>
    %190 = vector.extract_strided_slice %187 {offsets = [0, 32], sizes = [12, 16], strides = [1, 1]} : vector<12x80xf32> to vector<12x16xf32>
    %191 = vector.extract_strided_slice %187 {offsets = [0, 48], sizes = [12, 16], strides = [1, 1]} : vector<12x80xf32> to vector<12x16xf32>
    %192 = vector.extract_strided_slice %187 {offsets = [0, 64], sizes = [12, 16], strides = [1, 1]} : vector<12x80xf32> to vector<12x16xf32>
    %193 = vector.shape_cast %188 : vector<12x16xf32> to vector<12x1x16xf32>
    %194 = vector.shape_cast %189 : vector<12x16xf32> to vector<1x12x16xf32>
    %195 = vector.broadcast %193 : vector<12x1x16xf32> to vector<12x12x16xf32>
    %196 = vector.broadcast %194 : vector<1x12x16xf32> to vector<12x12x16xf32>
    %197 = arith.mulf %195, %196 : vector<12x12x16xf32>
    %198 = vector.shape_cast %191 : vector<12x16xf32> to vector<12x1x16xf32>
    %199 = vector.shape_cast %192 : vector<12x16xf32> to vector<1x12x16xf32>
    %200 = vector.broadcast %198 : vector<12x1x16xf32> to vector<12x12x16xf32>
    %201 = vector.broadcast %199 : vector<1x12x16xf32> to vector<12x12x16xf32>
    %202 = arith.mulf %200, %201 : vector<12x12x16xf32>
    %203 = arith.addf %197, %202 : vector<12x12x16xf32>
    %204 = vector.broadcast %26 : vector<12x12x1xf32> to vector<12x12x16xf32>
    %205 = arith.addf %203, %204 : vector<12x12x16xf32>
    %cst_48 = arith.constant dense<0xFF800000> : vector<12x16xf32>
    %206 = vector.multi_reduction <maximumf>, %205, %cst_48 [1] : vector<12x12x16xf32> to vector<12x16xf32>
    %207 = vector.shape_cast %206 : vector<12x16xf32> to vector<12x1x16xf32>
    %208 = vector.broadcast %207 : vector<12x1x16xf32> to vector<12x12x16xf32>
    %209 = arith.subf %205, %208 : vector<12x12x16xf32>
    %210 = math.exp %209 : vector<12x12x16xf32>
    %cst_49 = arith.constant dense<0.000000e+00> : vector<12x16xf32>
    %211 = vector.multi_reduction <add>, %210, %cst_49 [1] : vector<12x12x16xf32> to vector<12x16xf32>
    %212 = vector.shape_cast %211 : vector<12x16xf32> to vector<12x1x16xf32>
    %213 = tpu.reciprocal %212 {approx = true} : vector<12x1x16xf32> -> vector<12x1x16xf32>
    %214 = vector.broadcast %213 : vector<12x1x16xf32> to vector<12x12x16xf32>
    %215 = arith.mulf %210, %214 : vector<12x12x16xf32>
    %216 = vector.shape_cast %190 : vector<12x16xf32> to vector<1x12x16xf32>
    %217 = vector.broadcast %216 : vector<1x12x16xf32> to vector<12x12x16xf32>
    %218 = arith.mulf %215, %217 : vector<12x12x16xf32>
    %cst_50 = arith.constant dense<0.000000e+00> : vector<12x16xf32>
    %219 = vector.multi_reduction <add>, %218, %cst_50 [1] : vector<12x12x16xf32> to vector<12x16xf32>
    %cst_51 = arith.constant dense<0.000000e+00> : vector<12x16xf32>
    %220 = tpu.matmul %219, %183, %cst_51 {dimension_numbers = #tpu.dot_dimension_numbers<[1], [0], [0], [1], [0, 0, 1, 1], [], []>} : vector<12x16xf32>, vector<16x16xf32>, vector<12x16xf32> -> vector<12x16xf32>
    %221 = vector.broadcast %184 : vector<1x16xf32> to vector<12x16xf32>
    %222 = arith.addf %220, %221 : vector<12x16xf32>
    %223 = arith.addf %180, %222 : vector<12x16xf32>
    %c124 = arith.constant 124 : index
    %c0_52 = arith.constant 0 : index
    %224 = vector.load %arg0[%c124, %c0_52] : memref<384x128xf32, #tpu.memory_space<vmem>>, vector<1x16xf32>
    %c125 = arith.constant 125 : index
    %c0_53 = arith.constant 0 : index
    %225 = vector.load %arg0[%c125, %c0_53] : memref<384x128xf32, #tpu.memory_space<vmem>>, vector<1x16xf32>
    %cst_54 = arith.constant dense<0.000000e+00> : vector<12xf32>
    %226 = vector.multi_reduction <add>, %223, %cst_54 [1] : vector<12x16xf32> to vector<12xf32>
    %227 = vector.shape_cast %226 : vector<12xf32> to vector<12x1xf32>
    %cst_55 = arith.constant 1.600000e+01 : f32
    %228 = vector.broadcast %cst_55 : f32 to vector<12x1xf32>
    %229 = arith.divf %227, %228 : vector<12x1xf32>
    %230 = vector.broadcast %229 : vector<12x1xf32> to vector<12x16xf32>
    %231 = arith.subf %223, %230 : vector<12x16xf32>
    %232 = arith.mulf %231, %231 : vector<12x16xf32>
    %cst_56 = arith.constant dense<0.000000e+00> : vector<12xf32>
    %233 = vector.multi_reduction <add>, %232, %cst_56 [1] : vector<12x16xf32> to vector<12xf32>
    %234 = vector.shape_cast %233 : vector<12xf32> to vector<12x1xf32>
    %cst_57 = arith.constant 1.600000e+01 : f32
    %235 = vector.broadcast %cst_57 : f32 to vector<12x1xf32>
    %236 = arith.divf %234, %235 : vector<12x1xf32>
    %237 = vector.broadcast %229 : vector<12x1xf32> to vector<12x16xf32>
    %238 = arith.subf %223, %237 : vector<12x16xf32>
    %cst_58 = arith.constant 9.99999974E-6 : f32
    %239 = vector.broadcast %cst_58 : f32 to vector<12x1xf32>
    %240 = arith.addf %236, %239 : vector<12x1xf32>
    %241 = math.rsqrt %240 : vector<12x1xf32>
    %242 = vector.broadcast %241 : vector<12x1xf32> to vector<12x16xf32>
    %243 = arith.mulf %238, %242 : vector<12x16xf32>
    %244 = vector.broadcast %224 : vector<1x16xf32> to vector<12x16xf32>
    %245 = arith.mulf %243, %244 : vector<12x16xf32>
    %246 = vector.broadcast %225 : vector<1x16xf32> to vector<12x16xf32>
    %247 = arith.addf %245, %246 : vector<12x16xf32>
    %c98 = arith.constant 98 : index
    %c0_59 = arith.constant 0 : index
    %248 = vector.load %arg0[%c98, %c0_59] : memref<384x128xf32, #tpu.memory_space<vmem>>, vector<16x8xf32>
    %c114 = arith.constant 114 : index
    %c0_60 = arith.constant 0 : index
    %249 = vector.load %arg0[%c114, %c0_60] : memref<384x128xf32, #tpu.memory_space<vmem>>, vector<1x8xf32>
    %c115 = arith.constant 115 : index
    %c0_61 = arith.constant 0 : index
    %250 = vector.load %arg0[%c115, %c0_61] : memref<384x128xf32, #tpu.memory_space<vmem>>, vector<8x16xf32>
    %c123 = arith.constant 123 : index
    %c0_62 = arith.constant 0 : index
    %251 = vector.load %arg0[%c123, %c0_62] : memref<384x128xf32, #tpu.memory_space<vmem>>, vector<1x16xf32>
    %cst_63 = arith.constant dense<0.000000e+00> : vector<12x8xf32>
    %252 = tpu.matmul %247, %248, %cst_63 {dimension_numbers = #tpu.dot_dimension_numbers<[1], [0], [0], [1], [0, 0, 1, 1], [], []>} : vector<12x16xf32>, vector<16x8xf32>, vector<12x8xf32> -> vector<12x8xf32>
    %253 = vector.broadcast %249 : vector<1x8xf32> to vector<12x8xf32>
    %254 = arith.addf %252, %253 : vector<12x8xf32>
    %cst_64 = arith.constant 0.000000e+00 : f32
    %255 = vector.broadcast %cst_64 : f32 to vector<12x8xf32>
    %256 = arith.maximumf %254, %255 : vector<12x8xf32>
    %cst_65 = arith.constant dense<0.000000e+00> : vector<12x16xf32>
    %257 = tpu.matmul %256, %250, %cst_65 {dimension_numbers = #tpu.dot_dimension_numbers<[1], [0], [0], [1], [0, 0, 1, 1], [], []>} : vector<12x8xf32>, vector<8x16xf32>, vector<12x16xf32> -> vector<12x16xf32>
    %258 = vector.broadcast %251 : vector<1x16xf32> to vector<12x16xf32>
    %259 = arith.addf %257, %258 : vector<12x16xf32>
    %260 = arith.addf %247, %259 : vector<12x16xf32>
    %c126 = arith.constant 126 : index
    %c0_66 = arith.constant 0 : index
    %261 = vector.load %arg0[%c126, %c0_66] : memref<384x128xf32, #tpu.memory_space<vmem>>, vector<1x16xf32>
    %c127 = arith.constant 127 : index
    %c0_67 = arith.constant 0 : index
    %262 = vector.load %arg0[%c127, %c0_67] : memref<384x128xf32, #tpu.memory_space<vmem>>, vector<1x16xf32>
    %cst_68 = arith.constant dense<0.000000e+00> : vector<12xf32>
    %263 = vector.multi_reduction <add>, %260, %cst_68 [1] : vector<12x16xf32> to vector<12xf32>
    %264 = vector.shape_cast %263 : vector<12xf32> to vector<12x1xf32>
    %cst_69 = arith.constant 1.600000e+01 : f32
    %265 = vector.broadcast %cst_69 : f32 to vector<12x1xf32>
    %266 = arith.divf %264, %265 : vector<12x1xf32>
    %267 = vector.broadcast %266 : vector<12x1xf32> to vector<12x16xf32>
    %268 = arith.subf %260, %267 : vector<12x16xf32>
    %269 = arith.mulf %268, %268 : vector<12x16xf32>
    %cst_70 = arith.constant dense<0.000000e+00> : vector<12xf32>
    %270 = vector.multi_reduction <add>, %269, %cst_70 [1] : vector<12x16xf32> to vector<12xf32>
    %271 = vector.shape_cast %270 : vector<12xf32> to vector<12x1xf32>
    %cst_71 = arith.constant 1.600000e+01 : f32
    %272 = vector.broadcast %cst_71 : f32 to vector<12x1xf32>
    %273 = arith.divf %271, %272 : vector<12x1xf32>
    %274 = vector.broadcast %266 : vector<12x1xf32> to vector<12x16xf32>
    %275 = arith.subf %260, %274 : vector<12x16xf32>
    %cst_72 = arith.constant 9.99999974E-6 : f32
    %276 = vector.broadcast %cst_72 : f32 to vector<12x1xf32>
    %277 = arith.addf %273, %276 : vector<12x1xf32>
    %278 = math.rsqrt %277 : vector<12x1xf32>
    %279 = vector.broadcast %278 : vector<12x1xf32> to vector<12x16xf32>
    %280 = arith.mulf %275, %279 : vector<12x16xf32>
    %281 = vector.broadcast %261 : vector<1x16xf32> to vector<12x16xf32>
    %282 = arith.mulf %280, %281 : vector<12x16xf32>
    %283 = vector.broadcast %262 : vector<1x16xf32> to vector<12x16xf32>
    %284 = arith.addf %282, %283 : vector<12x16xf32>
    %c362 = arith.constant 362 : index
    %c0_73 = arith.constant 0 : index
    %285 = vector.load %arg0[%c362, %c0_73] : memref<384x128xf32, #tpu.memory_space<vmem>>, vector<1x16xf32>
    %c363 = arith.constant 363 : index
    %c0_74 = arith.constant 0 : index
    %286 = vector.load %arg0[%c363, %c0_74] : memref<384x128xf32, #tpu.memory_space<vmem>>, vector<1x16xf32>
    %cst_75 = arith.constant dense<0.000000e+00> : vector<12xf32>
    %287 = vector.multi_reduction <add>, %284, %cst_75 [1] : vector<12x16xf32> to vector<12xf32>
    %288 = vector.shape_cast %287 : vector<12xf32> to vector<12x1xf32>
    %cst_76 = arith.constant 1.600000e+01 : f32
    %289 = vector.broadcast %cst_76 : f32 to vector<12x1xf32>
    %290 = arith.divf %288, %289 : vector<12x1xf32>
    %291 = vector.broadcast %290 : vector<12x1xf32> to vector<12x16xf32>
    %292 = arith.subf %284, %291 : vector<12x16xf32>
    %293 = arith.mulf %292, %292 : vector<12x16xf32>
    %cst_77 = arith.constant dense<0.000000e+00> : vector<12xf32>
    %294 = vector.multi_reduction <add>, %293, %cst_77 [1] : vector<12x16xf32> to vector<12xf32>
    %295 = vector.shape_cast %294 : vector<12xf32> to vector<12x1xf32>
    %cst_78 = arith.constant 1.600000e+01 : f32
    %296 = vector.broadcast %cst_78 : f32 to vector<12x1xf32>
    %297 = arith.divf %295, %296 : vector<12x1xf32>
    %298 = vector.broadcast %290 : vector<12x1xf32> to vector<12x16xf32>
    %299 = arith.subf %284, %298 : vector<12x16xf32>
    %cst_79 = arith.constant 9.99999974E-6 : f32
    %300 = vector.broadcast %cst_79 : f32 to vector<12x1xf32>
    %301 = arith.addf %297, %300 : vector<12x1xf32>
    %302 = math.rsqrt %301 : vector<12x1xf32>
    %303 = vector.broadcast %302 : vector<12x1xf32> to vector<12x16xf32>
    %304 = arith.mulf %299, %303 : vector<12x16xf32>
    %305 = vector.broadcast %285 : vector<1x16xf32> to vector<12x16xf32>
    %306 = arith.mulf %304, %305 : vector<12x16xf32>
    %307 = vector.broadcast %286 : vector<1x16xf32> to vector<12x16xf32>
    %308 = arith.addf %306, %307 : vector<12x16xf32>
    %c128 = arith.constant 128 : index
    %c0_80 = arith.constant 0 : index
    %309 = vector.load %arg0[%c128, %c0_80] : memref<384x128xf32, #tpu.memory_space<vmem>>, vector<16x80xf32>
    %c144 = arith.constant 144 : index
    %c0_81 = arith.constant 0 : index
    %310 = vector.load %arg0[%c144, %c0_81] : memref<384x128xf32, #tpu.memory_space<vmem>>, vector<1x80xf32>
    %c145 = arith.constant 145 : index
    %c0_82 = arith.constant 0 : index
    %311 = vector.load %arg0[%c145, %c0_82] : memref<384x128xf32, #tpu.memory_space<vmem>>, vector<16x16xf32>
    %c161 = arith.constant 161 : index
    %c0_83 = arith.constant 0 : index
    %312 = vector.load %arg0[%c161, %c0_83] : memref<384x128xf32, #tpu.memory_space<vmem>>, vector<1x16xf32>
    %cst_84 = arith.constant dense<0.000000e+00> : vector<8x80xf32>
    %313 = tpu.matmul %1, %309, %cst_84 {dimension_numbers = #tpu.dot_dimension_numbers<[1], [0], [0], [1], [0, 0, 1, 1], [], []>} : vector<8x16xf32>, vector<16x80xf32>, vector<8x80xf32> -> vector<8x80xf32>
    %314 = vector.broadcast %310 : vector<1x80xf32> to vector<8x80xf32>
    %315 = arith.addf %313, %314 : vector<8x80xf32>
    %316 = vector.extract_strided_slice %315 {offsets = [0, 0], sizes = [8, 16], strides = [1, 1]} : vector<8x80xf32> to vector<8x16xf32>
    %317 = vector.extract_strided_slice %315 {offsets = [0, 16], sizes = [8, 16], strides = [1, 1]} : vector<8x80xf32> to vector<8x16xf32>
    %318 = vector.extract_strided_slice %315 {offsets = [0, 32], sizes = [8, 16], strides = [1, 1]} : vector<8x80xf32> to vector<8x16xf32>
    %319 = vector.extract_strided_slice %315 {offsets = [0, 48], sizes = [8, 16], strides = [1, 1]} : vector<8x80xf32> to vector<8x16xf32>
    %320 = vector.extract_strided_slice %315 {offsets = [0, 64], sizes = [8, 16], strides = [1, 1]} : vector<8x80xf32> to vector<8x16xf32>
    %321 = vector.shape_cast %316 : vector<8x16xf32> to vector<8x1x16xf32>
    %322 = vector.shape_cast %317 : vector<8x16xf32> to vector<1x8x16xf32>
    %323 = vector.broadcast %321 : vector<8x1x16xf32> to vector<8x8x16xf32>
    %324 = vector.broadcast %322 : vector<1x8x16xf32> to vector<8x8x16xf32>
    %325 = arith.mulf %323, %324 : vector<8x8x16xf32>
    %326 = vector.shape_cast %319 : vector<8x16xf32> to vector<8x1x16xf32>
    %327 = vector.shape_cast %320 : vector<8x16xf32> to vector<1x8x16xf32>
    %328 = vector.broadcast %326 : vector<8x1x16xf32> to vector<8x8x16xf32>
    %329 = vector.broadcast %327 : vector<1x8x16xf32> to vector<8x8x16xf32>
    %330 = arith.mulf %328, %329 : vector<8x8x16xf32>
    %331 = arith.addf %325, %330 : vector<8x8x16xf32>
    %332 = vector.broadcast %51 : vector<8x8x1xf32> to vector<8x8x16xf32>
    %333 = arith.addf %331, %332 : vector<8x8x16xf32>
    %cst_85 = arith.constant dense<0xFF800000> : vector<8x16xf32>
    %334 = vector.multi_reduction <maximumf>, %333, %cst_85 [1] : vector<8x8x16xf32> to vector<8x16xf32>
    %335 = vector.shape_cast %334 : vector<8x16xf32> to vector<8x1x16xf32>
    %336 = vector.broadcast %335 : vector<8x1x16xf32> to vector<8x8x16xf32>
    %337 = arith.subf %333, %336 : vector<8x8x16xf32>
    %338 = math.exp %337 : vector<8x8x16xf32>
    %cst_86 = arith.constant dense<0.000000e+00> : vector<8x16xf32>
    %339 = vector.multi_reduction <add>, %338, %cst_86 [1] : vector<8x8x16xf32> to vector<8x16xf32>
    %340 = vector.shape_cast %339 : vector<8x16xf32> to vector<8x1x16xf32>
    %341 = tpu.reciprocal %340 {approx = true} : vector<8x1x16xf32> -> vector<8x1x16xf32>
    %342 = vector.broadcast %341 : vector<8x1x16xf32> to vector<8x8x16xf32>
    %343 = arith.mulf %338, %342 : vector<8x8x16xf32>
    %344 = vector.shape_cast %318 : vector<8x16xf32> to vector<1x8x16xf32>
    %345 = vector.broadcast %344 : vector<1x8x16xf32> to vector<8x8x16xf32>
    %346 = arith.mulf %343, %345 : vector<8x8x16xf32>
    %cst_87 = arith.constant dense<0.000000e+00> : vector<8x16xf32>
    %347 = vector.multi_reduction <add>, %346, %cst_87 [1] : vector<8x8x16xf32> to vector<8x16xf32>
    %cst_88 = arith.constant dense<0.000000e+00> : vector<8x16xf32>
    %348 = tpu.matmul %347, %311, %cst_88 {dimension_numbers = #tpu.dot_dimension_numbers<[1], [0], [0], [1], [0, 0, 1, 1], [], []>} : vector<8x16xf32>, vector<16x16xf32>, vector<8x16xf32> -> vector<8x16xf32>
    %349 = vector.broadcast %312 : vector<1x16xf32> to vector<8x16xf32>
    %350 = arith.addf %348, %349 : vector<8x16xf32>
    %351 = arith.addf %1, %350 : vector<8x16xf32>
    %c239 = arith.constant 239 : index
    %c0_89 = arith.constant 0 : index
    %352 = vector.load %arg0[%c239, %c0_89] : memref<384x128xf32, #tpu.memory_space<vmem>>, vector<1x16xf32>
    %c240 = arith.constant 240 : index
    %c0_90 = arith.constant 0 : index
    %353 = vector.load %arg0[%c240, %c0_90] : memref<384x128xf32, #tpu.memory_space<vmem>>, vector<1x16xf32>
    %cst_91 = arith.constant dense<0.000000e+00> : vector<8xf32>
    %354 = vector.multi_reduction <add>, %351, %cst_91 [1] : vector<8x16xf32> to vector<8xf32>
    %355 = vector.shape_cast %354 : vector<8xf32> to vector<8x1xf32>
    %cst_92 = arith.constant 1.600000e+01 : f32
    %356 = vector.broadcast %cst_92 : f32 to vector<8x1xf32>
    %357 = arith.divf %355, %356 : vector<8x1xf32>
    %358 = vector.broadcast %357 : vector<8x1xf32> to vector<8x16xf32>
    %359 = arith.subf %351, %358 : vector<8x16xf32>
    %360 = arith.mulf %359, %359 : vector<8x16xf32>
    %cst_93 = arith.constant dense<0.000000e+00> : vector<8xf32>
    %361 = vector.multi_reduction <add>, %360, %cst_93 [1] : vector<8x16xf32> to vector<8xf32>
    %362 = vector.shape_cast %361 : vector<8xf32> to vector<8x1xf32>
    %cst_94 = arith.constant 1.600000e+01 : f32
    %363 = vector.broadcast %cst_94 : f32 to vector<8x1xf32>
    %364 = arith.divf %362, %363 : vector<8x1xf32>
    %365 = vector.broadcast %357 : vector<8x1xf32> to vector<8x16xf32>
    %366 = arith.subf %351, %365 : vector<8x16xf32>
    %cst_95 = arith.constant 9.99999974E-6 : f32
    %367 = vector.broadcast %cst_95 : f32 to vector<8x1xf32>
    %368 = arith.addf %364, %367 : vector<8x1xf32>
    %369 = math.rsqrt %368 : vector<8x1xf32>
    %370 = vector.broadcast %369 : vector<8x1xf32> to vector<8x16xf32>
    %371 = arith.mulf %366, %370 : vector<8x16xf32>
    %372 = vector.broadcast %352 : vector<1x16xf32> to vector<8x16xf32>
    %373 = arith.mulf %371, %372 : vector<8x16xf32>
    %374 = vector.broadcast %353 : vector<1x16xf32> to vector<8x16xf32>
    %375 = arith.addf %373, %374 : vector<8x16xf32>
    %c162 = arith.constant 162 : index
    %c0_96 = arith.constant 0 : index
    %376 = vector.load %arg0[%c162, %c0_96] : memref<384x128xf32, #tpu.memory_space<vmem>>, vector<16x32xf32>
    %c178 = arith.constant 178 : index
    %c0_97 = arith.constant 0 : index
    %377 = vector.load %arg0[%c178, %c0_97] : memref<384x128xf32, #tpu.memory_space<vmem>>, vector<1x32xf32>
    %c179 = arith.constant 179 : index
    %c0_98 = arith.constant 0 : index
    %378 = vector.load %arg0[%c179, %c0_98] : memref<384x128xf32, #tpu.memory_space<vmem>>, vector<16x48xf32>
    %c195 = arith.constant 195 : index
    %c0_99 = arith.constant 0 : index
    %379 = vector.load %arg0[%c195, %c0_99] : memref<384x128xf32, #tpu.memory_space<vmem>>, vector<1x48xf32>
    %c196 = arith.constant 196 : index
    %c0_100 = arith.constant 0 : index
    %380 = vector.load %arg0[%c196, %c0_100] : memref<384x128xf32, #tpu.memory_space<vmem>>, vector<16x16xf32>
    %c212 = arith.constant 212 : index
    %c0_101 = arith.constant 0 : index
    %381 = vector.load %arg0[%c212, %c0_101] : memref<384x128xf32, #tpu.memory_space<vmem>>, vector<1x16xf32>
    %cst_102 = arith.constant dense<0.000000e+00> : vector<8x32xf32>
    %382 = tpu.matmul %375, %376, %cst_102 {dimension_numbers = #tpu.dot_dimension_numbers<[1], [0], [0], [1], [0, 0, 1, 1], [], []>} : vector<8x16xf32>, vector<16x32xf32>, vector<8x32xf32> -> vector<8x32xf32>
    %383 = vector.broadcast %377 : vector<1x32xf32> to vector<8x32xf32>
    %384 = arith.addf %382, %383 : vector<8x32xf32>
    %cst_103 = arith.constant dense<0.000000e+00> : vector<12x48xf32>
    %385 = tpu.matmul %308, %378, %cst_103 {dimension_numbers = #tpu.dot_dimension_numbers<[1], [0], [0], [1], [0, 0, 1, 1], [], []>} : vector<12x16xf32>, vector<16x48xf32>, vector<12x48xf32> -> vector<12x48xf32>
    %386 = vector.broadcast %379 : vector<1x48xf32> to vector<12x48xf32>
    %387 = arith.addf %385, %386 : vector<12x48xf32>
    %388 = vector.extract_strided_slice %384 {offsets = [0, 0], sizes = [8, 16], strides = [1, 1]} : vector<8x32xf32> to vector<8x16xf32>
    %389 = vector.extract_strided_slice %384 {offsets = [0, 16], sizes = [8, 16], strides = [1, 1]} : vector<8x32xf32> to vector<8x16xf32>
    %390 = vector.extract_strided_slice %387 {offsets = [0, 0], sizes = [12, 16], strides = [1, 1]} : vector<12x48xf32> to vector<12x16xf32>
    %391 = vector.extract_strided_slice %387 {offsets = [0, 16], sizes = [12, 16], strides = [1, 1]} : vector<12x48xf32> to vector<12x16xf32>
    %392 = vector.extract_strided_slice %387 {offsets = [0, 32], sizes = [12, 16], strides = [1, 1]} : vector<12x48xf32> to vector<12x16xf32>
    %393 = vector.shape_cast %388 : vector<8x16xf32> to vector<8x1x16xf32>
    %394 = vector.shape_cast %390 : vector<12x16xf32> to vector<1x12x16xf32>
    %395 = vector.broadcast %393 : vector<8x1x16xf32> to vector<8x12x16xf32>
    %396 = vector.broadcast %394 : vector<1x12x16xf32> to vector<8x12x16xf32>
    %397 = arith.mulf %395, %396 : vector<8x12x16xf32>
    %398 = vector.shape_cast %389 : vector<8x16xf32> to vector<8x1x16xf32>
    %399 = vector.shape_cast %392 : vector<12x16xf32> to vector<1x12x16xf32>
    %400 = vector.broadcast %398 : vector<8x1x16xf32> to vector<8x12x16xf32>
    %401 = vector.broadcast %399 : vector<1x12x16xf32> to vector<8x12x16xf32>
    %402 = arith.mulf %400, %401 : vector<8x12x16xf32>
    %403 = arith.addf %397, %402 : vector<8x12x16xf32>
    %404 = vector.broadcast %76 : vector<8x12x1xf32> to vector<8x12x16xf32>
    %405 = arith.addf %403, %404 : vector<8x12x16xf32>
    %cst_104 = arith.constant dense<0xFF800000> : vector<8x16xf32>
    %406 = vector.multi_reduction <maximumf>, %405, %cst_104 [1] : vector<8x12x16xf32> to vector<8x16xf32>
    %407 = vector.shape_cast %406 : vector<8x16xf32> to vector<8x1x16xf32>
    %408 = vector.broadcast %407 : vector<8x1x16xf32> to vector<8x12x16xf32>
    %409 = arith.subf %405, %408 : vector<8x12x16xf32>
    %410 = math.exp %409 : vector<8x12x16xf32>
    %cst_105 = arith.constant dense<0.000000e+00> : vector<8x16xf32>
    %411 = vector.multi_reduction <add>, %410, %cst_105 [1] : vector<8x12x16xf32> to vector<8x16xf32>
    %412 = vector.shape_cast %411 : vector<8x16xf32> to vector<8x1x16xf32>
    %413 = tpu.reciprocal %412 {approx = true} : vector<8x1x16xf32> -> vector<8x1x16xf32>
    %414 = vector.broadcast %413 : vector<8x1x16xf32> to vector<8x12x16xf32>
    %415 = arith.mulf %410, %414 : vector<8x12x16xf32>
    %416 = vector.shape_cast %391 : vector<12x16xf32> to vector<1x12x16xf32>
    %417 = vector.broadcast %416 : vector<1x12x16xf32> to vector<8x12x16xf32>
    %418 = arith.mulf %415, %417 : vector<8x12x16xf32>
    %cst_106 = arith.constant dense<0.000000e+00> : vector<8x16xf32>
    %419 = vector.multi_reduction <add>, %418, %cst_106 [1] : vector<8x12x16xf32> to vector<8x16xf32>
    %cst_107 = arith.constant dense<0.000000e+00> : vector<8x16xf32>
    %420 = tpu.matmul %419, %380, %cst_107 {dimension_numbers = #tpu.dot_dimension_numbers<[1], [0], [0], [1], [0, 0, 1, 1], [], []>} : vector<8x16xf32>, vector<16x16xf32>, vector<8x16xf32> -> vector<8x16xf32>
    %421 = vector.broadcast %381 : vector<1x16xf32> to vector<8x16xf32>
    %422 = arith.addf %420, %421 : vector<8x16xf32>
    %423 = arith.addf %375, %422 : vector<8x16xf32>
    %c241 = arith.constant 241 : index
    %c0_108 = arith.constant 0 : index
    %424 = vector.load %arg0[%c241, %c0_108] : memref<384x128xf32, #tpu.memory_space<vmem>>, vector<1x16xf32>
    %c242 = arith.constant 242 : index
    %c0_109 = arith.constant 0 : index
    %425 = vector.load %arg0[%c242, %c0_109] : memref<384x128xf32, #tpu.memory_space<vmem>>, vector<1x16xf32>
    %cst_110 = arith.constant dense<0.000000e+00> : vector<8xf32>
    %426 = vector.multi_reduction <add>, %423, %cst_110 [1] : vector<8x16xf32> to vector<8xf32>
    %427 = vector.shape_cast %426 : vector<8xf32> to vector<8x1xf32>
    %cst_111 = arith.constant 1.600000e+01 : f32
    %428 = vector.broadcast %cst_111 : f32 to vector<8x1xf32>
    %429 = arith.divf %427, %428 : vector<8x1xf32>
    %430 = vector.broadcast %429 : vector<8x1xf32> to vector<8x16xf32>
    %431 = arith.subf %423, %430 : vector<8x16xf32>
    %432 = arith.mulf %431, %431 : vector<8x16xf32>
    %cst_112 = arith.constant dense<0.000000e+00> : vector<8xf32>
    %433 = vector.multi_reduction <add>, %432, %cst_112 [1] : vector<8x16xf32> to vector<8xf32>
    %434 = vector.shape_cast %433 : vector<8xf32> to vector<8x1xf32>
    %cst_113 = arith.constant 1.600000e+01 : f32
    %435 = vector.broadcast %cst_113 : f32 to vector<8x1xf32>
    %436 = arith.divf %434, %435 : vector<8x1xf32>
    %437 = vector.broadcast %429 : vector<8x1xf32> to vector<8x16xf32>
    %438 = arith.subf %423, %437 : vector<8x16xf32>
    %cst_114 = arith.constant 9.99999974E-6 : f32
    %439 = vector.broadcast %cst_114 : f32 to vector<8x1xf32>
    %440 = arith.addf %436, %439 : vector<8x1xf32>
    %441 = math.rsqrt %440 : vector<8x1xf32>
    %442 = vector.broadcast %441 : vector<8x1xf32> to vector<8x16xf32>
    %443 = arith.mulf %438, %442 : vector<8x16xf32>
    %444 = vector.broadcast %424 : vector<1x16xf32> to vector<8x16xf32>
    %445 = arith.mulf %443, %444 : vector<8x16xf32>
    %446 = vector.broadcast %425 : vector<1x16xf32> to vector<8x16xf32>
    %447 = arith.addf %445, %446 : vector<8x16xf32>
    %c213 = arith.constant 213 : index
    %c0_115 = arith.constant 0 : index
    %448 = vector.load %arg0[%c213, %c0_115] : memref<384x128xf32, #tpu.memory_space<vmem>>, vector<16x8xf32>
    %c229 = arith.constant 229 : index
    %c0_116 = arith.constant 0 : index
    %449 = vector.load %arg0[%c229, %c0_116] : memref<384x128xf32, #tpu.memory_space<vmem>>, vector<1x8xf32>
    %c230 = arith.constant 230 : index
    %c0_117 = arith.constant 0 : index
    %450 = vector.load %arg0[%c230, %c0_117] : memref<384x128xf32, #tpu.memory_space<vmem>>, vector<8x16xf32>
    %c238 = arith.constant 238 : index
    %c0_118 = arith.constant 0 : index
    %451 = vector.load %arg0[%c238, %c0_118] : memref<384x128xf32, #tpu.memory_space<vmem>>, vector<1x16xf32>
    %cst_119 = arith.constant dense<0.000000e+00> : vector<8x8xf32>
    %452 = tpu.matmul %447, %448, %cst_119 {dimension_numbers = #tpu.dot_dimension_numbers<[1], [0], [0], [1], [0, 0, 1, 1], [], []>} : vector<8x16xf32>, vector<16x8xf32>, vector<8x8xf32> -> vector<8x8xf32>
    %453 = vector.broadcast %449 : vector<1x8xf32> to vector<8x8xf32>
    %454 = arith.addf %452, %453 : vector<8x8xf32>
    %cst_120 = arith.constant 0.000000e+00 : f32
    %455 = vector.broadcast %cst_120 : f32 to vector<8x8xf32>
    %456 = arith.maximumf %454, %455 : vector<8x8xf32>
    %cst_121 = arith.constant dense<0.000000e+00> : vector<8x16xf32>
    %457 = tpu.matmul %456, %450, %cst_121 {dimension_numbers = #tpu.dot_dimension_numbers<[1], [0], [0], [1], [0, 0, 1, 1], [], []>} : vector<8x8xf32>, vector<8x16xf32>, vector<8x16xf32> -> vector<8x16xf32>
    %458 = vector.broadcast %451 : vector<1x16xf32> to vector<8x16xf32>
    %459 = arith.addf %457, %458 : vector<8x16xf32>
    %460 = arith.addf %447, %459 : vector<8x16xf32>
    %c243 = arith.constant 243 : index
    %c0_122 = arith.constant 0 : index
    %461 = vector.load %arg0[%c243, %c0_122] : memref<384x128xf32, #tpu.memory_space<vmem>>, vector<1x16xf32>
    %c244 = arith.constant 244 : index
    %c0_123 = arith.constant 0 : index
    %462 = vector.load %arg0[%c244, %c0_123] : memref<384x128xf32, #tpu.memory_space<vmem>>, vector<1x16xf32>
    %cst_124 = arith.constant dense<0.000000e+00> : vector<8xf32>
    %463 = vector.multi_reduction <add>, %460, %cst_124 [1] : vector<8x16xf32> to vector<8xf32>
    %464 = vector.shape_cast %463 : vector<8xf32> to vector<8x1xf32>
    %cst_125 = arith.constant 1.600000e+01 : f32
    %465 = vector.broadcast %cst_125 : f32 to vector<8x1xf32>
    %466 = arith.divf %464, %465 : vector<8x1xf32>
    %467 = vector.broadcast %466 : vector<8x1xf32> to vector<8x16xf32>
    %468 = arith.subf %460, %467 : vector<8x16xf32>
    %469 = arith.mulf %468, %468 : vector<8x16xf32>
    %cst_126 = arith.constant dense<0.000000e+00> : vector<8xf32>
    %470 = vector.multi_reduction <add>, %469, %cst_126 [1] : vector<8x16xf32> to vector<8xf32>
    %471 = vector.shape_cast %470 : vector<8xf32> to vector<8x1xf32>
    %cst_127 = arith.constant 1.600000e+01 : f32
    %472 = vector.broadcast %cst_127 : f32 to vector<8x1xf32>
    %473 = arith.divf %471, %472 : vector<8x1xf32>
    %474 = vector.broadcast %466 : vector<8x1xf32> to vector<8x16xf32>
    %475 = arith.subf %460, %474 : vector<8x16xf32>
    %cst_128 = arith.constant 9.99999974E-6 : f32
    %476 = vector.broadcast %cst_128 : f32 to vector<8x1xf32>
    %477 = arith.addf %473, %476 : vector<8x1xf32>
    %478 = math.rsqrt %477 : vector<8x1xf32>
    %479 = vector.broadcast %478 : vector<8x1xf32> to vector<8x16xf32>
    %480 = arith.mulf %475, %479 : vector<8x16xf32>
    %481 = vector.broadcast %461 : vector<1x16xf32> to vector<8x16xf32>
    %482 = arith.mulf %480, %481 : vector<8x16xf32>
    %483 = vector.broadcast %462 : vector<1x16xf32> to vector<8x16xf32>
    %484 = arith.addf %482, %483 : vector<8x16xf32>
    %c245 = arith.constant 245 : index
    %c0_129 = arith.constant 0 : index
    %485 = vector.load %arg0[%c245, %c0_129] : memref<384x128xf32, #tpu.memory_space<vmem>>, vector<16x80xf32>
    %c261 = arith.constant 261 : index
    %c0_130 = arith.constant 0 : index
    %486 = vector.load %arg0[%c261, %c0_130] : memref<384x128xf32, #tpu.memory_space<vmem>>, vector<1x80xf32>
    %c262 = arith.constant 262 : index
    %c0_131 = arith.constant 0 : index
    %487 = vector.load %arg0[%c262, %c0_131] : memref<384x128xf32, #tpu.memory_space<vmem>>, vector<16x16xf32>
    %c278 = arith.constant 278 : index
    %c0_132 = arith.constant 0 : index
    %488 = vector.load %arg0[%c278, %c0_132] : memref<384x128xf32, #tpu.memory_space<vmem>>, vector<1x16xf32>
    %cst_133 = arith.constant dense<0.000000e+00> : vector<8x80xf32>
    %489 = tpu.matmul %484, %485, %cst_133 {dimension_numbers = #tpu.dot_dimension_numbers<[1], [0], [0], [1], [0, 0, 1, 1], [], []>} : vector<8x16xf32>, vector<16x80xf32>, vector<8x80xf32> -> vector<8x80xf32>
    %490 = vector.broadcast %486 : vector<1x80xf32> to vector<8x80xf32>
    %491 = arith.addf %489, %490 : vector<8x80xf32>
    %492 = vector.extract_strided_slice %491 {offsets = [0, 0], sizes = [8, 16], strides = [1, 1]} : vector<8x80xf32> to vector<8x16xf32>
    %493 = vector.extract_strided_slice %491 {offsets = [0, 16], sizes = [8, 16], strides = [1, 1]} : vector<8x80xf32> to vector<8x16xf32>
    %494 = vector.extract_strided_slice %491 {offsets = [0, 32], sizes = [8, 16], strides = [1, 1]} : vector<8x80xf32> to vector<8x16xf32>
    %495 = vector.extract_strided_slice %491 {offsets = [0, 48], sizes = [8, 16], strides = [1, 1]} : vector<8x80xf32> to vector<8x16xf32>
    %496 = vector.extract_strided_slice %491 {offsets = [0, 64], sizes = [8, 16], strides = [1, 1]} : vector<8x80xf32> to vector<8x16xf32>
    %497 = vector.shape_cast %492 : vector<8x16xf32> to vector<8x1x16xf32>
    %498 = vector.shape_cast %493 : vector<8x16xf32> to vector<1x8x16xf32>
    %499 = vector.broadcast %497 : vector<8x1x16xf32> to vector<8x8x16xf32>
    %500 = vector.broadcast %498 : vector<1x8x16xf32> to vector<8x8x16xf32>
    %501 = arith.mulf %499, %500 : vector<8x8x16xf32>
    %502 = vector.shape_cast %495 : vector<8x16xf32> to vector<8x1x16xf32>
    %503 = vector.shape_cast %496 : vector<8x16xf32> to vector<1x8x16xf32>
    %504 = vector.broadcast %502 : vector<8x1x16xf32> to vector<8x8x16xf32>
    %505 = vector.broadcast %503 : vector<1x8x16xf32> to vector<8x8x16xf32>
    %506 = arith.mulf %504, %505 : vector<8x8x16xf32>
    %507 = arith.addf %501, %506 : vector<8x8x16xf32>
    %508 = vector.broadcast %51 : vector<8x8x1xf32> to vector<8x8x16xf32>
    %509 = arith.addf %507, %508 : vector<8x8x16xf32>
    %cst_134 = arith.constant dense<0xFF800000> : vector<8x16xf32>
    %510 = vector.multi_reduction <maximumf>, %509, %cst_134 [1] : vector<8x8x16xf32> to vector<8x16xf32>
    %511 = vector.shape_cast %510 : vector<8x16xf32> to vector<8x1x16xf32>
    %512 = vector.broadcast %511 : vector<8x1x16xf32> to vector<8x8x16xf32>
    %513 = arith.subf %509, %512 : vector<8x8x16xf32>
    %514 = math.exp %513 : vector<8x8x16xf32>
    %cst_135 = arith.constant dense<0.000000e+00> : vector<8x16xf32>
    %515 = vector.multi_reduction <add>, %514, %cst_135 [1] : vector<8x8x16xf32> to vector<8x16xf32>
    %516 = vector.shape_cast %515 : vector<8x16xf32> to vector<8x1x16xf32>
    %517 = tpu.reciprocal %516 {approx = true} : vector<8x1x16xf32> -> vector<8x1x16xf32>
    %518 = vector.broadcast %517 : vector<8x1x16xf32> to vector<8x8x16xf32>
    %519 = arith.mulf %514, %518 : vector<8x8x16xf32>
    %520 = vector.shape_cast %494 : vector<8x16xf32> to vector<1x8x16xf32>
    %521 = vector.broadcast %520 : vector<1x8x16xf32> to vector<8x8x16xf32>
    %522 = arith.mulf %519, %521 : vector<8x8x16xf32>
    %cst_136 = arith.constant dense<0.000000e+00> : vector<8x16xf32>
    %523 = vector.multi_reduction <add>, %522, %cst_136 [1] : vector<8x8x16xf32> to vector<8x16xf32>
    %cst_137 = arith.constant dense<0.000000e+00> : vector<8x16xf32>
    %524 = tpu.matmul %523, %487, %cst_137 {dimension_numbers = #tpu.dot_dimension_numbers<[1], [0], [0], [1], [0, 0, 1, 1], [], []>} : vector<8x16xf32>, vector<16x16xf32>, vector<8x16xf32> -> vector<8x16xf32>
    %525 = vector.broadcast %488 : vector<1x16xf32> to vector<8x16xf32>
    %526 = arith.addf %524, %525 : vector<8x16xf32>
    %527 = arith.addf %484, %526 : vector<8x16xf32>
    %c356 = arith.constant 356 : index
    %c0_138 = arith.constant 0 : index
    %528 = vector.load %arg0[%c356, %c0_138] : memref<384x128xf32, #tpu.memory_space<vmem>>, vector<1x16xf32>
    %c357 = arith.constant 357 : index
    %c0_139 = arith.constant 0 : index
    %529 = vector.load %arg0[%c357, %c0_139] : memref<384x128xf32, #tpu.memory_space<vmem>>, vector<1x16xf32>
    %cst_140 = arith.constant dense<0.000000e+00> : vector<8xf32>
    %530 = vector.multi_reduction <add>, %527, %cst_140 [1] : vector<8x16xf32> to vector<8xf32>
    %531 = vector.shape_cast %530 : vector<8xf32> to vector<8x1xf32>
    %cst_141 = arith.constant 1.600000e+01 : f32
    %532 = vector.broadcast %cst_141 : f32 to vector<8x1xf32>
    %533 = arith.divf %531, %532 : vector<8x1xf32>
    %534 = vector.broadcast %533 : vector<8x1xf32> to vector<8x16xf32>
    %535 = arith.subf %527, %534 : vector<8x16xf32>
    %536 = arith.mulf %535, %535 : vector<8x16xf32>
    %cst_142 = arith.constant dense<0.000000e+00> : vector<8xf32>
    %537 = vector.multi_reduction <add>, %536, %cst_142 [1] : vector<8x16xf32> to vector<8xf32>
    %538 = vector.shape_cast %537 : vector<8xf32> to vector<8x1xf32>
    %cst_143 = arith.constant 1.600000e+01 : f32
    %539 = vector.broadcast %cst_143 : f32 to vector<8x1xf32>
    %540 = arith.divf %538, %539 : vector<8x1xf32>
    %541 = vector.broadcast %533 : vector<8x1xf32> to vector<8x16xf32>
    %542 = arith.subf %527, %541 : vector<8x16xf32>
    %cst_144 = arith.constant 9.99999974E-6 : f32
    %543 = vector.broadcast %cst_144 : f32 to vector<8x1xf32>
    %544 = arith.addf %540, %543 : vector<8x1xf32>
    %545 = math.rsqrt %544 : vector<8x1xf32>
    %546 = vector.broadcast %545 : vector<8x1xf32> to vector<8x16xf32>
    %547 = arith.mulf %542, %546 : vector<8x16xf32>
    %548 = vector.broadcast %528 : vector<1x16xf32> to vector<8x16xf32>
    %549 = arith.mulf %547, %548 : vector<8x16xf32>
    %550 = vector.broadcast %529 : vector<1x16xf32> to vector<8x16xf32>
    %551 = arith.addf %549, %550 : vector<8x16xf32>
    %c279 = arith.constant 279 : index
    %c0_145 = arith.constant 0 : index
    %552 = vector.load %arg0[%c279, %c0_145] : memref<384x128xf32, #tpu.memory_space<vmem>>, vector<16x32xf32>
    %c295 = arith.constant 295 : index
    %c0_146 = arith.constant 0 : index
    %553 = vector.load %arg0[%c295, %c0_146] : memref<384x128xf32, #tpu.memory_space<vmem>>, vector<1x32xf32>
    %c296 = arith.constant 296 : index
    %c0_147 = arith.constant 0 : index
    %554 = vector.load %arg0[%c296, %c0_147] : memref<384x128xf32, #tpu.memory_space<vmem>>, vector<16x48xf32>
    %c312 = arith.constant 312 : index
    %c0_148 = arith.constant 0 : index
    %555 = vector.load %arg0[%c312, %c0_148] : memref<384x128xf32, #tpu.memory_space<vmem>>, vector<1x48xf32>
    %c313 = arith.constant 313 : index
    %c0_149 = arith.constant 0 : index
    %556 = vector.load %arg0[%c313, %c0_149] : memref<384x128xf32, #tpu.memory_space<vmem>>, vector<16x16xf32>
    %c329 = arith.constant 329 : index
    %c0_150 = arith.constant 0 : index
    %557 = vector.load %arg0[%c329, %c0_150] : memref<384x128xf32, #tpu.memory_space<vmem>>, vector<1x16xf32>
    %cst_151 = arith.constant dense<0.000000e+00> : vector<8x32xf32>
    %558 = tpu.matmul %551, %552, %cst_151 {dimension_numbers = #tpu.dot_dimension_numbers<[1], [0], [0], [1], [0, 0, 1, 1], [], []>} : vector<8x16xf32>, vector<16x32xf32>, vector<8x32xf32> -> vector<8x32xf32>
    %559 = vector.broadcast %553 : vector<1x32xf32> to vector<8x32xf32>
    %560 = arith.addf %558, %559 : vector<8x32xf32>
    %cst_152 = arith.constant dense<0.000000e+00> : vector<12x48xf32>
    %561 = tpu.matmul %308, %554, %cst_152 {dimension_numbers = #tpu.dot_dimension_numbers<[1], [0], [0], [1], [0, 0, 1, 1], [], []>} : vector<12x16xf32>, vector<16x48xf32>, vector<12x48xf32> -> vector<12x48xf32>
    %562 = vector.broadcast %555 : vector<1x48xf32> to vector<12x48xf32>
    %563 = arith.addf %561, %562 : vector<12x48xf32>
    %564 = vector.extract_strided_slice %560 {offsets = [0, 0], sizes = [8, 16], strides = [1, 1]} : vector<8x32xf32> to vector<8x16xf32>
    %565 = vector.extract_strided_slice %560 {offsets = [0, 16], sizes = [8, 16], strides = [1, 1]} : vector<8x32xf32> to vector<8x16xf32>
    %566 = vector.extract_strided_slice %563 {offsets = [0, 0], sizes = [12, 16], strides = [1, 1]} : vector<12x48xf32> to vector<12x16xf32>
    %567 = vector.extract_strided_slice %563 {offsets = [0, 16], sizes = [12, 16], strides = [1, 1]} : vector<12x48xf32> to vector<12x16xf32>
    %568 = vector.extract_strided_slice %563 {offsets = [0, 32], sizes = [12, 16], strides = [1, 1]} : vector<12x48xf32> to vector<12x16xf32>
    %569 = vector.shape_cast %564 : vector<8x16xf32> to vector<8x1x16xf32>
    %570 = vector.shape_cast %566 : vector<12x16xf32> to vector<1x12x16xf32>
    %571 = vector.broadcast %569 : vector<8x1x16xf32> to vector<8x12x16xf32>
    %572 = vector.broadcast %570 : vector<1x12x16xf32> to vector<8x12x16xf32>
    %573 = arith.mulf %571, %572 : vector<8x12x16xf32>
    %574 = vector.shape_cast %565 : vector<8x16xf32> to vector<8x1x16xf32>
    %575 = vector.shape_cast %568 : vector<12x16xf32> to vector<1x12x16xf32>
    %576 = vector.broadcast %574 : vector<8x1x16xf32> to vector<8x12x16xf32>
    %577 = vector.broadcast %575 : vector<1x12x16xf32> to vector<8x12x16xf32>
    %578 = arith.mulf %576, %577 : vector<8x12x16xf32>
    %579 = arith.addf %573, %578 : vector<8x12x16xf32>
    %580 = vector.broadcast %76 : vector<8x12x1xf32> to vector<8x12x16xf32>
    %581 = arith.addf %579, %580 : vector<8x12x16xf32>
    %cst_153 = arith.constant dense<0xFF800000> : vector<8x16xf32>
    %582 = vector.multi_reduction <maximumf>, %581, %cst_153 [1] : vector<8x12x16xf32> to vector<8x16xf32>
    %583 = vector.shape_cast %582 : vector<8x16xf32> to vector<8x1x16xf32>
    %584 = vector.broadcast %583 : vector<8x1x16xf32> to vector<8x12x16xf32>
    %585 = arith.subf %581, %584 : vector<8x12x16xf32>
    %586 = math.exp %585 : vector<8x12x16xf32>
    %cst_154 = arith.constant dense<0.000000e+00> : vector<8x16xf32>
    %587 = vector.multi_reduction <add>, %586, %cst_154 [1] : vector<8x12x16xf32> to vector<8x16xf32>
    %588 = vector.shape_cast %587 : vector<8x16xf32> to vector<8x1x16xf32>
    %589 = tpu.reciprocal %588 {approx = true} : vector<8x1x16xf32> -> vector<8x1x16xf32>
    %590 = vector.broadcast %589 : vector<8x1x16xf32> to vector<8x12x16xf32>
    %591 = arith.mulf %586, %590 : vector<8x12x16xf32>
    %592 = vector.shape_cast %567 : vector<12x16xf32> to vector<1x12x16xf32>
    %593 = vector.broadcast %592 : vector<1x12x16xf32> to vector<8x12x16xf32>
    %594 = arith.mulf %591, %593 : vector<8x12x16xf32>
    %cst_155 = arith.constant dense<0.000000e+00> : vector<8x16xf32>
    %595 = vector.multi_reduction <add>, %594, %cst_155 [1] : vector<8x12x16xf32> to vector<8x16xf32>
    %cst_156 = arith.constant dense<0.000000e+00> : vector<8x16xf32>
    %596 = tpu.matmul %595, %556, %cst_156 {dimension_numbers = #tpu.dot_dimension_numbers<[1], [0], [0], [1], [0, 0, 1, 1], [], []>} : vector<8x16xf32>, vector<16x16xf32>, vector<8x16xf32> -> vector<8x16xf32>
    %597 = vector.broadcast %557 : vector<1x16xf32> to vector<8x16xf32>
    %598 = arith.addf %596, %597 : vector<8x16xf32>
    %599 = arith.addf %551, %598 : vector<8x16xf32>
    %c358 = arith.constant 358 : index
    %c0_157 = arith.constant 0 : index
    %600 = vector.load %arg0[%c358, %c0_157] : memref<384x128xf32, #tpu.memory_space<vmem>>, vector<1x16xf32>
    %c359 = arith.constant 359 : index
    %c0_158 = arith.constant 0 : index
    %601 = vector.load %arg0[%c359, %c0_158] : memref<384x128xf32, #tpu.memory_space<vmem>>, vector<1x16xf32>
    %cst_159 = arith.constant dense<0.000000e+00> : vector<8xf32>
    %602 = vector.multi_reduction <add>, %599, %cst_159 [1] : vector<8x16xf32> to vector<8xf32>
    %603 = vector.shape_cast %602 : vector<8xf32> to vector<8x1xf32>
    %cst_160 = arith.constant 1.600000e+01 : f32
    %604 = vector.broadcast %cst_160 : f32 to vector<8x1xf32>
    %605 = arith.divf %603, %604 : vector<8x1xf32>
    %606 = vector.broadcast %605 : vector<8x1xf32> to vector<8x16xf32>
    %607 = arith.subf %599, %606 : vector<8x16xf32>
    %608 = arith.mulf %607, %607 : vector<8x16xf32>
    %cst_161 = arith.constant dense<0.000000e+00> : vector<8xf32>
    %609 = vector.multi_reduction <add>, %608, %cst_161 [1] : vector<8x16xf32> to vector<8xf32>
    %610 = vector.shape_cast %609 : vector<8xf32> to vector<8x1xf32>
    %cst_162 = arith.constant 1.600000e+01 : f32
    %611 = vector.broadcast %cst_162 : f32 to vector<8x1xf32>
    %612 = arith.divf %610, %611 : vector<8x1xf32>
    %613 = vector.broadcast %605 : vector<8x1xf32> to vector<8x16xf32>
    %614 = arith.subf %599, %613 : vector<8x16xf32>
    %cst_163 = arith.constant 9.99999974E-6 : f32
    %615 = vector.broadcast %cst_163 : f32 to vector<8x1xf32>
    %616 = arith.addf %612, %615 : vector<8x1xf32>
    %617 = math.rsqrt %616 : vector<8x1xf32>
    %618 = vector.broadcast %617 : vector<8x1xf32> to vector<8x16xf32>
    %619 = arith.mulf %614, %618 : vector<8x16xf32>
    %620 = vector.broadcast %600 : vector<1x16xf32> to vector<8x16xf32>
    %621 = arith.mulf %619, %620 : vector<8x16xf32>
    %622 = vector.broadcast %601 : vector<1x16xf32> to vector<8x16xf32>
    %623 = arith.addf %621, %622 : vector<8x16xf32>
    %c330 = arith.constant 330 : index
    %c0_164 = arith.constant 0 : index
    %624 = vector.load %arg0[%c330, %c0_164] : memref<384x128xf32, #tpu.memory_space<vmem>>, vector<16x8xf32>
    %c346 = arith.constant 346 : index
    %c0_165 = arith.constant 0 : index
    %625 = vector.load %arg0[%c346, %c0_165] : memref<384x128xf32, #tpu.memory_space<vmem>>, vector<1x8xf32>
    %c347 = arith.constant 347 : index
    %c0_166 = arith.constant 0 : index
    %626 = vector.load %arg0[%c347, %c0_166] : memref<384x128xf32, #tpu.memory_space<vmem>>, vector<8x16xf32>
    %c355 = arith.constant 355 : index
    %c0_167 = arith.constant 0 : index
    %627 = vector.load %arg0[%c355, %c0_167] : memref<384x128xf32, #tpu.memory_space<vmem>>, vector<1x16xf32>
    %cst_168 = arith.constant dense<0.000000e+00> : vector<8x8xf32>
    %628 = tpu.matmul %623, %624, %cst_168 {dimension_numbers = #tpu.dot_dimension_numbers<[1], [0], [0], [1], [0, 0, 1, 1], [], []>} : vector<8x16xf32>, vector<16x8xf32>, vector<8x8xf32> -> vector<8x8xf32>
    %629 = vector.broadcast %625 : vector<1x8xf32> to vector<8x8xf32>
    %630 = arith.addf %628, %629 : vector<8x8xf32>
    %cst_169 = arith.constant 0.000000e+00 : f32
    %631 = vector.broadcast %cst_169 : f32 to vector<8x8xf32>
    %632 = arith.maximumf %630, %631 : vector<8x8xf32>
    %cst_170 = arith.constant dense<0.000000e+00> : vector<8x16xf32>
    %633 = tpu.matmul %632, %626, %cst_170 {dimension_numbers = #tpu.dot_dimension_numbers<[1], [0], [0], [1], [0, 0, 1, 1], [], []>} : vector<8x8xf32>, vector<8x16xf32>, vector<8x16xf32> -> vector<8x16xf32>
    %634 = vector.broadcast %627 : vector<1x16xf32> to vector<8x16xf32>
    %635 = arith.addf %633, %634 : vector<8x16xf32>
    %636 = arith.addf %623, %635 : vector<8x16xf32>
    %c360 = arith.constant 360 : index
    %c0_171 = arith.constant 0 : index
    %637 = vector.load %arg0[%c360, %c0_171] : memref<384x128xf32, #tpu.memory_space<vmem>>, vector<1x16xf32>
    %c361 = arith.constant 361 : index
    %c0_172 = arith.constant 0 : index
    %638 = vector.load %arg0[%c361, %c0_172] : memref<384x128xf32, #tpu.memory_space<vmem>>, vector<1x16xf32>
    %cst_173 = arith.constant dense<0.000000e+00> : vector<8xf32>
    %639 = vector.multi_reduction <add>, %636, %cst_173 [1] : vector<8x16xf32> to vector<8xf32>
    %640 = vector.shape_cast %639 : vector<8xf32> to vector<8x1xf32>
    %cst_174 = arith.constant 1.600000e+01 : f32
    %641 = vector.broadcast %cst_174 : f32 to vector<8x1xf32>
    %642 = arith.divf %640, %641 : vector<8x1xf32>
    %643 = vector.broadcast %642 : vector<8x1xf32> to vector<8x16xf32>
    %644 = arith.subf %636, %643 : vector<8x16xf32>
    %645 = arith.mulf %644, %644 : vector<8x16xf32>
    %cst_175 = arith.constant dense<0.000000e+00> : vector<8xf32>
    %646 = vector.multi_reduction <add>, %645, %cst_175 [1] : vector<8x16xf32> to vector<8xf32>
    %647 = vector.shape_cast %646 : vector<8xf32> to vector<8x1xf32>
    %cst_176 = arith.constant 1.600000e+01 : f32
    %648 = vector.broadcast %cst_176 : f32 to vector<8x1xf32>
    %649 = arith.divf %647, %648 : vector<8x1xf32>
    %650 = vector.broadcast %642 : vector<8x1xf32> to vector<8x16xf32>
    %651 = arith.subf %636, %650 : vector<8x16xf32>
    %cst_177 = arith.constant 9.99999974E-6 : f32
    %652 = vector.broadcast %cst_177 : f32 to vector<8x1xf32>
    %653 = arith.addf %649, %652 : vector<8x1xf32>
    %654 = math.rsqrt %653 : vector<8x1xf32>
    %655 = vector.broadcast %654 : vector<8x1xf32> to vector<8x16xf32>
    %656 = arith.mulf %651, %655 : vector<8x16xf32>
    %657 = vector.broadcast %637 : vector<1x16xf32> to vector<8x16xf32>
    %658 = arith.mulf %656, %657 : vector<8x16xf32>
    %659 = vector.broadcast %638 : vector<1x16xf32> to vector<8x16xf32>
    %660 = arith.addf %658, %659 : vector<8x16xf32>
    %c364 = arith.constant 364 : index
    %c0_178 = arith.constant 0 : index
    %661 = vector.load %arg0[%c364, %c0_178] : memref<384x128xf32, #tpu.memory_space<vmem>>, vector<1x16xf32>
    %c365 = arith.constant 365 : index
    %c0_179 = arith.constant 0 : index
    %662 = vector.load %arg0[%c365, %c0_179] : memref<384x128xf32, #tpu.memory_space<vmem>>, vector<1x16xf32>
    %cst_180 = arith.constant dense<0.000000e+00> : vector<8xf32>
    %663 = vector.multi_reduction <add>, %660, %cst_180 [1] : vector<8x16xf32> to vector<8xf32>
    %664 = vector.shape_cast %663 : vector<8xf32> to vector<8x1xf32>
    %cst_181 = arith.constant 1.600000e+01 : f32
    %665 = vector.broadcast %cst_181 : f32 to vector<8x1xf32>
    %666 = arith.divf %664, %665 : vector<8x1xf32>
    %667 = vector.broadcast %666 : vector<8x1xf32> to vector<8x16xf32>
    %668 = arith.subf %660, %667 : vector<8x16xf32>
    %669 = arith.mulf %668, %668 : vector<8x16xf32>
    %cst_182 = arith.constant dense<0.000000e+00> : vector<8xf32>
    %670 = vector.multi_reduction <add>, %669, %cst_182 [1] : vector<8x16xf32> to vector<8xf32>
    %671 = vector.shape_cast %670 : vector<8xf32> to vector<8x1xf32>
    %cst_183 = arith.constant 1.600000e+01 : f32
    %672 = vector.broadcast %cst_183 : f32 to vector<8x1xf32>
    %673 = arith.divf %671, %672 : vector<8x1xf32>
    %674 = vector.broadcast %666 : vector<8x1xf32> to vector<8x16xf32>
    %675 = arith.subf %660, %674 : vector<8x16xf32>
    %cst_184 = arith.constant 9.99999974E-6 : f32
    %676 = vector.broadcast %cst_184 : f32 to vector<8x1xf32>
    %677 = arith.addf %673, %676 : vector<8x1xf32>
    %678 = math.rsqrt %677 : vector<8x1xf32>
    %679 = vector.broadcast %678 : vector<8x1xf32> to vector<8x16xf32>
    %680 = arith.mulf %675, %679 : vector<8x16xf32>
    %681 = vector.broadcast %661 : vector<1x16xf32> to vector<8x16xf32>
    %682 = arith.mulf %680, %681 : vector<8x16xf32>
    %683 = vector.broadcast %662 : vector<1x16xf32> to vector<8x16xf32>
    %684 = arith.addf %682, %683 : vector<8x16xf32>
    %c366 = arith.constant 366 : index
    %c0_185 = arith.constant 0 : index
    %685 = vector.load %arg0[%c366, %c0_185] : memref<384x128xf32, #tpu.memory_space<vmem>>, vector<16x128xf32>
    %cst_186 = arith.constant dense<0.000000e+00> : vector<8x128xf32>
    %686 = tpu.matmul %684, %685, %cst_186 {dimension_numbers = #tpu.dot_dimension_numbers<[1], [0], [0], [1], [0, 0, 1, 1], [], []>} : vector<8x16xf32>, vector<16x128xf32>, vector<8x128xf32> -> vector<8x128xf32>
    %c382 = arith.constant 382 : index
    %c0_187 = arith.constant 0 : index
    %687 = vector.load %arg0[%c382, %c0_187] : memref<384x128xf32, #tpu.memory_space<vmem>>, vector<1x128xf32>
    %688 = vector.broadcast %687 : vector<1x128xf32> to vector<8x128xf32>
    %689 = arith.addf %686, %688 : vector<8x128xf32>
    %c0_188 = arith.constant 0 : index
    %c0_189 = arith.constant 0 : index
    %690 = vector.load %arg2[%c0_188, %c0_189] : memref<8x128xf32, #tpu.memory_space<vmem>>, vector<8x128xf32>
    tpu.vector_store %arg2[%c0_188, %c0_189], %689 {strides = array<i32>} : memref<8x128xf32, #tpu.memory_space<vmem>>, vector<8x128xf32>,
    return
  }
}

</mosaic_0001>

<bundles_post_ra>
// kernel: forward.1
= control target key start
LH: loop header
LB: loop body
LE: loop exit
PB: predicated region body
PF: predicated region fallthrough
CT: control target
= control target key end

     0   :  { %vm351_vm0 = vcmask 130048   ;;  %s6819_s19 = smov 112   ;;  %v14_v10 = vlaneseq  ;;  %v6820_v11 = vmov 1966171168   ;;  %s6821_s20 = smov 80   ;;  %vm743_vm2 = vcmask 125952   ;;  %s9619_s0 = inlined_call_operand.vmem [shape: f32[384,128], index: 0, kind: input, shape index: {}]   ;;  %s9620_s1 = inlined_call_operand.vmem [shape: f32[24,16], index: 1, kind: input, shape index: {}]   ;;  %s9621_s2 = inlined_call_operand.vmem [shape: f32[8,128], index: 2, kind: output, shape index: {}]  }
   0x1   :  { %v341_v0 = vld [vmem:[%s9619_s0] sm:$0xff]  ;;  %v342_v1 = vld [vmem:[%s9619_s0 + $0x8] sm:$0xff]  ;;  %v6098_v5 = vld [vmem:[%s9619_s0 + $0x10] ss:$0 sm:$0xff]  ;;  %v437_v12 = vunpack.c.l.s4 %v6820_v11  ;;  %s6822_s21 = smov 96   ;;  %vm1223_vm3 = vcmask 1042434  }
   0x2   :  { %v11_v2 = vld [vmem:[%s9620_s1] sm:$0xff]  ;;  %v6406_v3 = vpack.c.bf16 %v342_v1, %v341_v0  ;;  %v12_v4 = vld [vmem:[%s9620_s1 + $0x8] sm:$0xf]  ;;  %v6867_v13 = vshrl.u32 %v14_v10, 7  ;;  %vm1221_vm4 = vcmask 1041409   ;;  %vm1225_vm5 = vcmask 1043459  }
   0x3   :  { %6257 = vmatprep.mubr.msk.f32.mxu0 %vm351_vm0, %v11_v2  ;;  %v438_v14 = vunpack.c.0.s8 %v437_v12  ;;  %vm1227_vm6 = vcmask 1044484   ;;  %vm1229_vm7 = vcmask 1045509   ;;  %vm1231_vm8 = vcmask 1046534  }
   0x4   :  { %6407 = vmatprep.subr.bf16.mxu0 %v6406_v3  ;;  %9674 = vst [vmem:[#allocation2_spill] sm:$0xff] %v6867_v13  ;;  %v6877_v20 = vsub.s32 0, %v6867_v13  ;;  %vm17_vm1 = vcmp.ge.s32.totalorder %v6867_v13, 6  ;;  %v7034_v12 = vsub.s32 1, %v6867_v13  ;;  %vm1233_vm9 = vcmask 1047559  }
   0x5   :  { %6409 = vmatpush3.bf16.msra.mxu0 %v6406_v3  ;;  %v6870_v15 = vsub.s32 %v438_v14, %v6867_v13  ;;  %vm1456_vm10 = vcmask 64512   ;;  %vm6826_vm11 = vmmov 0  }
   0x6   :  { %9676 = vst [vmem:[#allocation4_spill] sm:$0xff] %v6877_v20  ;;  %9684 = vst [vmem:[#allocation12_spill] sm:$0xff] %v7034_v12 }
   0x7   :  { %9675 = vst [vmem:[#allocation3_spill] sm:$0xff] %v6870_v15 }
   0x8   :  { %6258 = vmatmul.mubr.msk.f32.vlgmr.msra.gmra.mrb[0].mxu0 %vm351_vm0, %v12_v4 }
  0xdb   :  { %v6259_v6 = vpop.f32.mrb[0].mxu0 }
  0xdc   :  { %v424_v7 = vpop.f32.mrb[1].mxu0  ;;  %v6863_v9 = vadd.f32 %v6259_v6, %v6098_v5 }
  0xdd   :  { %v6859_v8 = vadd.f32 %v6098_v5, %v424_v7 }
  0xde   :  { %v490_v42 = vrot.slane %v6863_v9, %v6870_v15 }
  0xdf   :  { %568 = vrot.lane.b32.xlu0 %v6859_v8, %s6819_s19  ;;  %v442_v16 = vrot.slane %v6859_v8, %v6870_v15  ;;  %v435_v21 = vcombine.high %v6859_v8, %v6859_v8 }
  0xe0   :  { %v491_v47 = vcombine.high %v490_v42, %v490_v42  ;;  %v498_v48 = vrot.slane %v490_v42, %v6870_v15 }
  0xe1   :  { %v450_v17 = vcombine.high %v442_v16, %v442_v16  ;;  %v458_v19 = vrot.slane %v442_v16, %v6870_v15  ;;  %v449_v29 = vrot.slane %v435_v21, %v6870_v15  ;;  %v9624_v21 = vsub.s32 4, %v6867_v13 }
  0xe2   :  { %v543_v52 = vrot.slane %v498_v48, %v6877_v20  ;;  %v505_v53 = vrot.slane %v491_v47, %v6870_v15  ;;  %v506_v61 = vcombine.high %v498_v48, %v498_v48 }
  0xe3   :  { %570 = vrot.lane.b32.xlu0 %v6863_v9, %s6819_s19  ;;  %v472_v18 = vrot.slane %v450_v17, %v6870_v15  ;;  %v480_v23 = vcombine.high %v458_v19, %v458_v19  ;;  %v6890_v26 = vrot.slane %v458_v19, %v6877_v20  ;;  %v465_v34 = vrot.slane %v449_v29, %v6870_v15 }
  0xe4   :  { %v451_v35 = vcombine.high %v449_v29, %v449_v29  ;;  %v547_v56 = vrot.slane %v505_v53, %v6877_v20  ;;  %v551_v0 = vrot.slane %v506_v61, %v6877_v20  ;;  %v507_v1 = vcombine.high %v505_v53, %v505_v53 }
  0xe5   :  { %v515_v22 = vrot.slane %v472_v18, %v6877_v20  ;;  %v519_v27 = vrot.slane %v480_v23, %v6877_v20  ;;  %v482_v28 = vcombine.high %v472_v18, %v472_v18  ;;  %v527_v38 = vrot.slane %v465_v34, %v6877_v20 }
  0xe6   :  { %v479_v39 = vrot.slane %v451_v35, %v6870_v15  ;;  %v481_v44 = vcombine.high %v465_v34, %v465_v34  ;;  %v555_v4 = vrot.slane %v507_v1, %v6877_v20  ;;  %v7042_v17 = vsub.s32 2, %v6867_v13 }
  0xe7   :  { %v523_v33 = vrot.slane %v482_v28, %v6877_v20  ;;  %v7045_v19 = vsub.s32 3, %v6867_v13  ;;  %v9622_v28 = vsub.s32 6, %v6867_v13 }
  0xe8   :  { %v531_v43 = vrot.slane %v479_v39, %v6877_v20  ;;  %v535_v49 = vrot.slane %v481_v44, %v6877_v20  ;;  %v483_v57 = vcombine.high %v479_v39, %v479_v39  ;;  %9686 = vst [vmem:[#allocation14_spill] sm:$0xff] %v7042_v17 }
  0xe9   :  { %9687 = vst [vmem:[#allocation15_spill] sm:$0xff] %v7045_v19 }
  0xea   :  { %v539_v60 = vrot.slane %v483_v57, %v6877_v20 }
 0x151   :  { %v6882_v24 = vpop.permute.xlu0 %568 }
 0x152   :  { %v6885_v25 = vmul.f32 %v6882_v24, %v515_v22  ;;  %v6901_v32 = vmul.f32 %v6882_v24, %v519_v27  ;;  %v6913_v37 = vmul.f32 %v6882_v24, %v523_v33  ;;  %v6925_v41 = vmul.f32 %v6882_v24, %v527_v38 }
 0x153   :  { %v6938_v46 = vmul.f32 %v6882_v24, %v531_v43  ;;  %v6950_v51 = vmul.f32 %v6882_v24, %v535_v49  ;;  %v6962_v55 = vmul.f32 %v6882_v24, %v543_v52  ;;  %v6973_v59 = vmul.f32 %v6882_v24, %v547_v56 }
 0x154   :  { %626 = vrot.lane.b32.xlu0 %v6885_v25, %s6821_s20  ;;  %v6984_v63 = vmul.f32 %v6882_v24, %v539_v60  ;;  %v6995_v3 = vmul.f32 %v6882_v24, %v551_v0  ;;  %v7006_v6 = vmul.f32 %v6882_v24, %v555_v4  ;;  %v7014_v7 = vmul.f32 %v6882_v24, %v6890_v26 }
 0x155   :  { %v6894_v30 = vpop.permute.xlu0 %570 }
 0x156   :  { %v6898_v31 = vmul.f32 %v6894_v30, %v6890_v26  ;;  %v6910_v36 = vmul.f32 %v6894_v30, %v515_v22  ;;  %v6922_v40 = vmul.f32 %v6894_v30, %v519_v27  ;;  %v6935_v45 = vmul.f32 %v6894_v30, %v523_v33  ;;  %9678 = vst [vmem:[#allocation6_spill] sm:$0xff] %v6995_v3 }
 0x157   :  { %v6947_v50 = vmul.f32 %v6894_v30, %v527_v38  ;;  %v6959_v54 = vmul.f32 %v6894_v30, %v531_v43  ;;  %v6970_v58 = vmul.f32 %v6894_v30, %v535_v49  ;;  %v6981_v62 = vmul.f32 %v6894_v30, %v543_v52  ;;  %9680 = vst [vmem:[#allocation8_spill] sm:$0xff] %v7006_v6 }
 0x158   :  { %9677 = vst [vmem:[#allocation5_spill] sm:$0xff] %v6898_v31  ;;  %624 = vrot.lane.b32.xlu1 %v6898_v31, %s6821_s20  ;;  %630 = vrot.lane.b32.xlu0 %v6901_v32, %s6821_s20  ;;  %v6992_v2 = vmul.f32 %v6894_v30, %v547_v56  ;;  %v7003_v5 = vmul.f32 %v6894_v30, %v539_v60  ;;  %9681 = vst [vmem:[#allocation9_spill] sm:$0xff] %v7014_v7  ;;  %v9623_v22 = vsub.s32 5, %v6867_v13  ;;  %v9627_v43 = vmov 1.0  }
 0x159   :  { %v7021_v10 = vmul.f32 %v6894_v30, %v551_v0  ;;  %v7026_v11 = vmul.f32 %v6894_v30, %v555_v4  ;;  %v7077_v44 = vrot.slane %v9627_v43, %v6877_v20  ;;  %v7085_v61 = vrot.slane %v9627_v43, %v7034_v12 }
 0x15a   :  { %9679 = vst [vmem:[#allocation7_spill] sm:$0xff] %v7003_v5 }
 0x15b   :  { %9682 = vst [vmem:[#allocation10_spill] sm:$0xff] %v7021_v10  ;;  %9683 = vst [vmem:[#allocation11_spill] sm:$0xff] %v7026_v11  ;;  %v7101_v15 = vmul.f32 2.0, %v7085_v61 }
 0x15c   :  { %628 = vrot.lane.b32.xlu1 %v6910_v36, %s6821_s20  ;;  %634 = vrot.lane.b32.xlu0 %v6913_v37, %s6821_s20 }
 0x160   :  { %632 = vrot.lane.b32.xlu1 %v6922_v40, %s6821_s20  ;;  %638 = vrot.lane.b32.xlu0 %v6925_v41, %s6821_s20 }
 0x164   :  { %636 = vrot.lane.b32.xlu1 %v6935_v45, %s6821_s20  ;;  %642 = vrot.lane.b32.xlu0 %v6938_v46, %s6821_s20 }
 0x168   :  { %640 = vrot.lane.b32.xlu1 %v6947_v50, %s6821_s20  ;;  %646 = vrot.lane.b32.xlu0 %v6950_v51, %s6821_s20 }
 0x16c   :  { %644 = vrot.lane.b32.xlu1 %v6959_v54, %s6821_s20  ;;  %654 = vrot.lane.b32.xlu0 %v6962_v55, %s6821_s20 }
 0x170   :  { %648 = vrot.lane.b32.xlu1 %v6970_v58, %s6821_s20  ;;  %658 = vrot.lane.b32.xlu0 %v6973_v59, %s6821_s20 }
 0x174   :  { %656 = vrot.lane.b32.xlu1 %v6981_v62, %s6821_s20  ;;  %650 = vrot.lane.b32.xlu0 %v6984_v63, %s6821_s20 }
 0x178   :  { %660 = vrot.lane.b32.xlu1 %v6992_v2, %s6821_s20  ;;  %662 = vrot.lane.b32.xlu0 %v6995_v3, %s6821_s20 }
 0x17c   :  { %652 = vrot.lane.b32.xlu1 %v7003_v5, %s6821_s20  ;;  %666 = vrot.lane.b32.xlu0 %v7006_v6, %s6821_s20 }
 0x180   :  { %622 = vrot.lane.b32.xlu1 %v7014_v7, %s6821_s20  ;;  %1067 = vrot.lane.b32.xlu0 %v6859_v8, %s6822_s21  ;;  %v9625_v8 = vmov 0.0  }
 0x181   :  { %v7037_v14 = vsel %vm17_vm1, 1.0, %v9625_v8 }
 0x182   :  { %9685 = vst [vmem:[#allocation13_spill] sm:$0xff] %v7037_v14  ;;  %v32_v16 = vrot.slane %v7037_v14, %v7034_v12  ;;  %v40_v26 = vrot.slane %v7037_v14, %v7045_v19  ;;  %v7057_v27 = vrot.slane %v7037_v14, %v6877_v20  ;;  %v44_v30 = vrot.slane %v7037_v14, %v9624_v21 }
 0x183   :  { %v48_v33 = vrot.slane %v7037_v14, %v9623_v22  ;;  %v52_v42 = vrot.slane %v7037_v14, %v9622_v28  ;;  %v139_v31 = vmul.f32 %v7037_v14, %v7101_v15 }
 0x184   :  { %664 = vrot.lane.b32.xlu1 %v7021_v10, %s6821_s20  ;;  %v110_v18 = vmul.f32 2.0, %v32_v16  ;;  %v87_v23 = vadd.f32 %v7037_v14, %v32_v16  ;;  %v112_v35 = vmul.f32 2.0, %v40_v26  ;;  %v7067_v38 = vadd.f32 1.0, %v7057_v27 }
 0x185   :  { %v7070_v39 = vmul.f32 2.0, %v7057_v27  ;;  %v88_v49 = vadd.f32 1.0, %v32_v16  ;;  %v113_v52 = vmul.f32 2.0, %v44_v30  ;;  %v114_v53 = vmul.f32 2.0, %v48_v33 }
 0x186   :  { %v123_v24 = vmul.f32 %v7037_v14, %v110_v18  ;;  %v91_v56 = vadd.f32 %v7037_v14, %v40_v26  ;;  %v127_v57 = vmul.f32 %v7037_v14, %v112_v35  ;;  %v7094_v16 = vmul.f32 2.0, %v7077_v44 }
 0x187   :  { %v148_v28 = vsub.f32 %v88_v49, %v110_v18  ;;  %v93_v22 = vadd.f32 %v7037_v14, %v44_v30  ;;  %v129_v21 = vmul.f32 %v7037_v14, %v113_v52  ;;  %v95_v8 = vadd.f32 %v7037_v14, %v48_v33 }
 0x188   :  { %668 = vrot.lane.b32.xlu1 %v7026_v11, %s6821_s20  ;;  %v147_v34 = vsub.f32 %v87_v23, %v123_v24  ;;  %v7091_v23 = vmul.f32 2.0, %v52_v42  ;;  %v94_v43 = vadd.f32 1.0, %v44_v30  ;;  %v151_v12 = vsub.f32 %v91_v56, %v127_v57 }
 0x189   :  { %v96_v4 = vadd.f32 1.0, %v48_v33  ;;  %v137_v30 = vmul.f32 %v7037_v14, %v7094_v16  ;;  %v7115_v49 = vmul.f32 -1e+30, %v148_v28  ;;  %v153_v57 = vsub.f32 %v93_v22, %v129_v21 }
 0x18a   :  { %v7087_v0 = vmul.f32 -1e+30, %v147_v34  ;;  %v131_v34 = vmul.f32 %v7037_v14, %v114_v53  ;;  %v154_v6 = vsub.f32 %v94_v43, %v113_v52  ;;  %v9641_v10 = vsub.s32 7, %v6867_v13 }
 0x18b   :  { %v156_v7 = vsub.f32 %v96_v4, %v114_v53  ;;  %v98_v3 = vadd.f32 1.0, %v52_v42  ;;  %v7133_v52 = vmul.f32 -1e+30, %v153_v57 }
 0x18c   :  { %1069 = vrot.lane.b32.xlu1 %v6863_v9, %s6822_s21  ;;  %v36_v9 = vrot.slane %v7037_v14, %v7042_v17 }
 0x18d   :  { %9690 = vst [vmem:[#allocation18_spill] sm:$0xff] %v7133_v52 }
 0x18e   :  { %v111_v29 = vmul.f32 2.0, %v36_v9  ;;  %v89_v47 = vadd.f32 %v7037_v14, %v36_v9  ;;  %v90_v60 = vadd.f32 1.0, %v36_v9  ;;  %v92_v9 = vadd.f32 1.0, %v40_v26 }
 0x18f   :  { %v133_v26 = vmul.f32 %v7037_v14, %v7091_v23 }
 0x190   :  { %v125_v48 = vmul.f32 %v7037_v14, %v111_v29  ;;  %v150_v20 = vsub.f32 %v90_v60, %v111_v29  ;;  %v152_v56 = vsub.f32 %v92_v9, %v112_v35  ;;  %v155_v60 = vsub.f32 %v95_v8, %v131_v34 }
 0x192   :  { %v149_v24 = vsub.f32 %v89_v47, %v125_v48  ;;  %v97_v47 = vadd.f32 %v7037_v14, %v52_v42  ;;  %v101_v48 = vadd.f32 %v7037_v14, %v7077_v44  ;;  %v7124_v28 = vmul.f32 -1e+30, %v150_v20 }
 0x193   :  { %v7131_v43 = vmul.f32 -1e+30, %v152_v56  ;;  %v7135_v53 = vmul.f32 -1e+30, %v155_v60  ;;  %v7142_v20 = vrot.slane %v7037_v14, %v9641_v10 }
 0x194   :  { %v7113_v33 = vmul.f32 -1e+30, %v149_v24  ;;  %v157_v35 = vsub.f32 %v97_v47, %v133_v26  ;;  %v161_v21 = vsub.f32 %v101_v48, %v137_v30  ;;  %v7147_v24 = vmul.f32 -1e+30, %v156_v7 }
 0x195   :  { %9689 = vst [vmem:[#allocation17_spill] sm:$0xff] %v7131_v43  ;;  %9691 = vst [vmem:[#allocation19_spill] sm:$0xff] %v7135_v53  ;;  %v9696_v47 = vmov 1.0   ;;  %v102_v30 = vadd.f32 1.0, %v7077_v44  ;;  %v7190_v44 = vadd.f32 %v7037_v14, %v7142_v20 }
 0x196   :  { %9693 = vst [vmem:[#allocation21_spill] sm:$0xff] %v7147_v24  ;;  %v7157_v26 = vrot.slane %v9696_v47, %v7042_v17 }
 0x1c6   :  { %v627_v1 = vpop.permute.xlu0 %626 }
 0x1c7   :  { %v696_v29 = vadd.f32 %v627_v1, %v6885_v25  ;;  %v7122_v25 = vmul.f32 -1e+30, %v151_v12  ;;  %v7137_v12 = vmul.f32 -1e+30, %v154_v6  ;;  %v7153_v6 = vmul.f32 -1e+30, %v161_v21 }
 0x1c9   :  { %v7127_v8 = vadd.f32 %v696_v29, %v7087_v0  ;;  %9692 = vst [vmem:[#allocation20_spill] sm:$0xff] %v7137_v12  ;;  %9695 = vst [vmem:[#allocation23_spill] sm:$0xff] %v7153_v6  ;;  %v7175_v29 = vmul.f32 2.0, %v7142_v20 }
 0x1ca   :  { %v7103_v11 = vpop.permute.xlu1 %624  ;;  %v631_v18 = vpop.permute.xlu0 %630 }
 0x1cb   :  { %9688 = vst [vmem:[#allocation16_spill] sm:$0xff] %v7103_v11  ;;  %v103_v11 = vadd.f32 %v7037_v14, %v7085_v61  ;;  %v698_v22 = vadd.f32 %v631_v18, %v6901_v32  ;;  %v158_v32 = vsub.f32 %v98_v3, %v7091_v23  ;;  %v7151_v18 = vmul.f32 -1e+30, %v157_v35  ;;  %v344_v3 = vld [vmem:[%s9619_s0 + $0x11] sm:$0xff] }
 0x1cc   :  { %v752_v48 = vsel %vm351_vm0, %v7127_v8, -inf }
 0x1cd   :  { %9694 = vst [vmem:[#allocation22_spill] sm:$0xff] %v7151_v18  ;;  %v7162_v7 = vadd.f32 %v698_v22, %v7113_v33  ;;  %v7180_v60 = vmul.f32 -1e+30, %v158_v32 }
 0x1ce   :  { %v629_v5 = vpop.permute.xlu1 %628  ;;  %v635_v1 = vpop.permute.xlu0 %634 }
 0x1cf   :  { %v697_v42 = vadd.f32 %v629_v5, %v6910_v36  ;;  %v163_v36 = vsub.f32 %v103_v11, %v139_v31  ;;  %v700_v5 = vadd.f32 %v635_v1, %v6913_v37  ;;  %v345_v11 = vld [vmem:[%s9619_s0 + $0x19] sm:$0xff]  ;;  %9697 = vst [vmem:[#allocation24_spill] sm:$0xff] %v7180_v60  ;;  %v104_v1 = vadd.f32 1.0, %v7085_v61 }
 0x1d0   :  { %v6410_v56 = vpack.c.bf16 %v345_v11, %v344_v3  ;;  %v761_v32 = vsel %vm351_vm0, %v7162_v7, -inf  ;;  %v7204_v3 = vmul.f32 %v7037_v14, %v7175_v29 }
 0x1d1   :  { %v7145_v4 = vadd.f32 %v697_v42, %v7115_v49  ;;  %v7186_v21 = vadd.f32 %v700_v5, %v7122_v25  ;;  %v164_v17 = vsub.f32 %v104_v1, %v7101_v15 }
 0x1d2   :  { %v633_v9 = vpop.permute.xlu1 %632  ;;  %v639_v34 = vpop.permute.xlu0 %638  ;;  %6411 = vmatprep.subr.bf16.mxu1 %v6410_v56 }
 0x1d3   :  { %v753_v31 = vsel %vm743_vm2, %v7145_v4, -inf  ;;  %v699_v37 = vadd.f32 %v633_v9, %v6922_v40  ;;  %v7182_v40 = vmul.f32 -1e+30, %v163_v36  ;;  %v7193_v9 = vmul.f32 2.0, %v7157_v26  ;;  %6413 = vmatpush3.bf16.msra.mxu1 %v6410_v56 }
 0x1d4   :  { %v754_v23 = vmax.f32 %v752_v48, %v753_v31  ;;  %v702_v36 = vadd.f32 %v639_v34, %v6925_v41  ;;  %v7213_v41 = vadd.f32 %v7037_v14, %v7157_v26  ;;  %v770_v34 = vsel %vm351_vm0, %v7186_v21, -inf }
 0x1d5   :  { %v7178_v57 = vadd.f32 %v699_v37, %v7124_v28  ;;  %9698 = vst [vmem:[#allocation25_spill] sm:$0xff] %v7182_v40  ;;  %v162_v37 = vsub.f32 %v102_v30, %v7094_v16  ;;  %v7219_v56 = vmul.f32 %v7037_v14, %v7193_v9 }
 0x1d6   :  { %v755_v35 = vrot.slane %v754_v23, 4  ;;  %v637_v22 = vpop.permute.xlu1 %636  ;;  %v643_v42 = vpop.permute.xlu0 %642 }
 0x1d7   :  { %v762_v61 = vsel %vm743_vm2, %v7178_v57, -inf  ;;  %v701_v5 = vadd.f32 %v637_v22, %v6935_v45  ;;  %v704_v10 = vadd.f32 %v643_v42, %v6938_v46 }
 0x1d8   :  { %v756_v48 = vmax.f32 %v754_v23, %v755_v35  ;;  %v763_v31 = vmax.f32 %v761_v32, %v762_v61  ;;  %v7222_v35 = vadd.f32 %v702_v36, %v7133_v52  ;;  %v7228_v61 = vmul.f32 -1e+30, %v162_v37 }
 0x1d9   :  { %v7207_v11 = vadd.f32 %v701_v5, %v7131_v43  ;;  %v7231_v5 = vadd.f32 %v704_v10, %v7135_v53  ;;  %v7238_v52 = vmul.f32 -1e+30, %v164_v17  ;;  %v7260_v36 = vrot.slane %v9696_v47, %v7045_v19 }
 0x1da   :  { %v757_v45 = vrot.slane %v756_v48, 2  ;;  %v764_v16 = vrot.slane %v763_v31, 4  ;;  %v641_v23 = vpop.permute.xlu1 %640  ;;  %v647_v30 = vpop.permute.xlu0 %646  ;;  %9699 = vst [vmem:[#allocation26_spill] sm:$0xff] %v7228_v61 }
 0x1db   :  { %v771_v15 = vsel %vm743_vm2, %v7207_v11, -inf  ;;  %v703_v46 = vadd.f32 %v641_v23, %v6947_v50  ;;  %v706_v1 = vadd.f32 %v647_v30, %v6950_v51  ;;  %9700 = vst [vmem:[#allocation27_spill] sm:$0xff] %v7238_v52 }
 0x1dc   :  { %v758_v22 = vmax.f32 %v756_v48, %v757_v45  ;;  %v765_v42 = vmax.f32 %v763_v31, %v764_v16  ;;  %v772_v32 = vmax.f32 %v770_v34, %v771_v15  ;;  %v779_v31 = vsel %vm351_vm0, %v7222_v35, -inf }
 0x1dd   :  { %v7234_v13 = vadd.f32 %v703_v46, %v7137_v12  ;;  %v7247_v37 = vadd.f32 %v706_v1, %v7151_v18  ;;  %v788_v15 = vsel %vm351_vm0, %v7231_v5, -inf  ;;  %v7256_v48 = vadd.f32 1.0, %v7142_v20 }
 0x1de   :  { %v759_v43 = vrot.slane %v758_v22, 1  ;;  %v766_v50 = vrot.slane %v765_v42, 2  ;;  %v773_v23 = vrot.slane %v772_v32, 4  ;;  %v645_v51 = vpop.permute.xlu1 %644 }
 0x1df   :  { %v780_v10 = vsel %vm743_vm2, %v7234_v13, -inf  ;;  %v705_v45 = vadd.f32 %v645_v51, %v6959_v54 }
 0x1e0   :  { %v760_v17 = vmax.f32 %v758_v22, %v759_v43  ;;  %v767_v34 = vmax.f32 %v765_v42, %v766_v50  ;;  %v774_v16 = vmax.f32 %v772_v32, %v773_v23  ;;  %v781_v30 = vmax.f32 %v779_v31, %v780_v10  ;;  %v655_v42 = vpop.permute.xlu0 %654 }
 0x1e1   :  { %v7253_v46 = vadd.f32 %v705_v45, %v7147_v24  ;;  %v797_v23 = vsel %vm351_vm0, %v7247_v37, -inf }
 0x1e2   :  { %v853_v1 = vsub.f32 %v7127_v8, %v760_v17  ;;  %v854_v54 = vsub.f32 %v7145_v4, %v760_v17  ;;  %v768_v43 = vrot.slane %v767_v34, 1  ;;  %v775_v22 = vrot.slane %v774_v16, 2  ;;  %v649_v32 = vpop.permute.xlu1 %648 }
 0x1e3   :  { %v782_v50 = vrot.slane %v781_v30, 4  ;;  %v789_v20 = vsel %vm743_vm2, %v7253_v46, -inf  ;;  %v707_v51 = vadd.f32 %v649_v32, %v6970_v58  ;;  %v710_v4 = vadd.f32 %v655_v42, %v6962_v55 }
 0x1e4   :  { %v879_v31 = vmul.f32 1.442695, %v853_v1  ;;  %v881_v47 = vmul.f32 1.442695, %v854_v54  ;;  %v769_v10 = vmax.f32 %v767_v34, %v768_v43  ;;  %v776_v45 = vmax.f32 %v774_v16, %v775_v22  ;;  %v659_v22 = vpop.permute.xlu0 %658 }
 0x1e5   :  { %v783_v8 = vmax.f32 %v781_v30, %v782_v50  ;;  %v790_v19 = vmax.f32 %v788_v15, %v789_v20  ;;  %v7271_v17 = vadd.f32 %v707_v51, %v7180_v60 }
 0x1e6   :  { %6479 = vpow2.f32 %v879_v31  ;;  %v855_v18 = vsub.f32 %v7162_v7, %v769_v10  ;;  %v856_v24 = vsub.f32 %v7178_v57, %v769_v10  ;;  %v777_v53 = vrot.slane %v776_v45, 1  ;;  %v657_v12 = vpop.permute.xlu1 %656 }
 0x1e7   :  { %6481 = vpow2.f32 %v881_v47  ;;  %v784_v58 = vrot.slane %v783_v8, 2  ;;  %v791_v1 = vrot.slane %v790_v19, 4  ;;  %v798_v34 = vsel %vm743_vm2, %v7271_v17, -inf }
 0x1e8   :  { %v883_v16 = vmul.f32 1.442695, %v855_v18  ;;  %v885_v30 = vmul.f32 1.442695, %v856_v24  ;;  %v778_v15 = vmax.f32 %v776_v45, %v777_v53  ;;  %v799_v55 = vmax.f32 %v797_v23, %v798_v34 }
 0x1e9   :  { %v785_v54 = vmax.f32 %v783_v8, %v784_v58  ;;  %v792_v43 = vmax.f32 %v790_v19, %v791_v1  ;;  %v711_v42 = vadd.f32 %v657_v12, %v6981_v62  ;;  %v160_v7 = vsub.f32 %v7256_v48, %v7175_v29 }
 0x1ea   :  { %6483 = vpow2.f32 %v883_v16  ;;  %v857_v57 = vsub.f32 %v7186_v21, %v778_v15  ;;  %v858_v32 = vsub.f32 %v7207_v11, %v778_v15  ;;  %v800_v50 = vrot.slane %v799_v55, 4  ;;  %v661_v20 = vpop.permute.xlu1 %660 }
 0x1eb   :  { %6485 = vpow2.f32 %v885_v30  ;;  %v786_v18 = vrot.slane %v785_v54, 1  ;;  %v793_v24 = vrot.slane %v792_v43, 2  ;;  %v7283_v53 = vadd.f32 %v710_v4, %v7153_v6  ;;  %v9716_v6 = vld [vmem:[#allocation11_spill] sm:$0xff] }
 0x1ec   :  { %v801_v19 = vmax.f32 %v799_v55, %v800_v50  ;;  %v712_v23 = vadd.f32 %v659_v22, %v6973_v59  ;;  %v7287_v62 = vadd.f32 %v711_v42, %v7228_v61  ;;  %v7290_v12 = vmul.f32 2.0, %v7260_v36 }
 0x1ed   :  { %v887_v21 = vmul.f32 1.442695, %v857_v57  ;;  %v787_v51 = vmax.f32 %v785_v54, %v786_v18  ;;  %v794_v11 = vmax.f32 %v792_v43, %v793_v24  ;;  %v713_v31 = vadd.f32 %v661_v20, %v6992_v2 }
 0x1ee   :  { %v889_v47 = vmul.f32 1.442695, %v858_v32  ;;  %v802_v10 = vrot.slane %v801_v19, 2  ;;  %v816_v45 = vsel %vm743_vm2, %v7287_v62, -inf  ;;  %v7297_v8 = vadd.f32 %v7037_v14, %v7260_v36 }
 0x1ef   :  { %v859_v59 = vsub.f32 %v7222_v35, %v787_v51  ;;  %v860_v4 = vsub.f32 %v7234_v13, %v787_v51  ;;  %v795_v58 = vrot.slane %v794_v11, 1  ;;  %v815_v1 = vsel %vm351_vm0, %v7283_v53, -inf }
 0x1f0   :  { %v7303_v34 = vpop.eup %6479  ;;  %v803_v2 = vmax.f32 %v801_v19, %v802_v10  ;;  %v7306_v16 = vadd.f32 %v712_v23, %v7182_v40  ;;  %v817_v30 = vmax.f32 %v815_v1, %v816_v45  ;;  %v7309_v15 = vadd.f32 %v713_v31, %v7238_v52 }
 0x1f1   :  { %v7311_v55 = vpop.eup %6481  ;;  %6487 = vpow2.f32 %v887_v21  ;;  %v891_v35 = vmul.f32 1.442695, %v859_v59  ;;  %v893_v54 = vmul.f32 1.442695, %v860_v4  ;;  %v796_v13 = vmax.f32 %v794_v11, %v795_v58  ;;  %v651_v59 = vpop.permute.xlu0 %650 }
 0x1f2   :  { %v932_v43 = vsel %vm351_vm0, %v7303_v34, 0.0  ;;  %6489 = vpow2.f32 %v889_v47  ;;  %v804_v22 = vrot.slane %v803_v2, 1  ;;  %v818_v42 = vrot.slane %v817_v30, 4 }
 0x1f3   :  { %v933_v57 = vsel %vm743_vm2, %v7311_v55, 0.0  ;;  %6491 = vpow2.f32 %v891_v35  ;;  %v861_v32 = vsub.f32 %v7231_v5, %v796_v13  ;;  %v862_v50 = vsub.f32 %v7253_v46, %v796_v13 }
 0x1f4   :  { %v7319_v20 = vpop.eup %6483  ;;  %6493 = vpow2.f32 %v893_v54  ;;  %v805_v18 = vmax.f32 %v803_v2, %v804_v22  ;;  %v819_v24 = vmax.f32 %v817_v30, %v818_v42  ;;  %v825_v19 = vsel %vm743_vm2, %v7309_v15, -inf }
 0x1f5   :  { %v7323_v23 = vpop.eup %6485  ;;  %v941_v21 = vsel %vm351_vm0, %v7319_v20, 0.0  ;;  %v895_v51 = vmul.f32 1.442695, %v861_v32  ;;  %v897_v11 = vmul.f32 1.442695, %v862_v50  ;;  %v824_v5 = vsel %vm351_vm0, %v7306_v16, -inf }
 0x1f6   :  { %v942_v46 = vsel %vm743_vm2, %v7323_v23, 0.0  ;;  %v863_v31 = vsub.f32 %v7247_v37, %v805_v18  ;;  %v864_v47 = vsub.f32 %v7271_v17, %v805_v18  ;;  %v820_v10 = vrot.slane %v819_v24, 2 }
 0x1f7   :  { %v934_v45 = vadd.f32 %v933_v57, %v932_v43  ;;  %6495 = vpow2.f32 %v895_v51  ;;  %v826_v4 = vmax.f32 %v824_v5, %v825_v19  ;;  %v143_v58 = vmul.f32 %v7037_v14, %v7290_v12  ;;  %v653_v57 = vpop.permute.xlu1 %652 }
 0x1f8   :  { %6497 = vpow2.f32 %v897_v11  ;;  %v899_v1 = vmul.f32 1.442695, %v863_v31  ;;  %v901_v2 = vmul.f32 1.442695, %v864_v47  ;;  %v821_v30 = vmax.f32 %v819_v24, %v820_v10  ;;  %v9708_v11 = vld [vmem:[#allocation7_spill] sm:$0xff] }
 0x1f9   :  { %v943_v35 = vadd.f32 %v942_v46, %v941_v21  ;;  %v827_v54 = vrot.slane %v826_v4, 4  ;;  %v85_v13 = vadd.f32 %v7037_v14, %v7057_v27  ;;  %v121_v37 = vmul.f32 %v7037_v14, %v7070_v39 }
 0x1fa   :  { %6499 = vpow2.f32 %v899_v1  ;;  %v822_v17 = vrot.slane %v821_v30, 1  ;;  %v9701_v43 = vsub.f32 %v7190_v44, %v7204_v3  ;;  %v708_v42 = vadd.f32 %v651_v59, %v6984_v63 }
 0x1fb   :  { %v7345_v32 = vpop.eup %6487  ;;  %v9703_v50 = vsub.f32 %v7067_v38, %v7070_v39  ;;  %v935_v27 = vrot.slane %v934_v45, 4  ;;  %6501 = vpow2.f32 %v901_v2  ;;  %v9705_v24 = vsub.f32 %v7213_v41, %v7219_v56 }
 0x1fc   :  { %v7342_v22 = vmul.f32 -1e+30, %v9701_v43  ;;  %v7357_v44 = vpop.eup %6489  ;;  %v823_v3 = vmax.f32 %v821_v30, %v822_v17  ;;  %v828_v21 = vmax.f32 %v826_v4, %v827_v54  ;;  %v7362_v63 = vmul.f32 -1e+30, %v160_v7  ;;  %v9710_v43 = vld [vmem:[#allocation5_spill] sm:$0xff] }
 0x1fd   :  { %v7350_v18 = vmul.f32 -1e+30, %v9703_v50  ;;  %v7355_v19 = vmul.f32 -1e+30, %v9705_v24  ;;  %v167_v38 = vsub.f32 %v7297_v8, %v143_v58  ;;  %v7365_v39 = vpop.eup %6491  ;;  %v944_v51 = vrot.slane %v943_v35, 4 }
 0x1fe   :  { %9702 = vst [vmem:[#allocation28_spill] sm:$0xff] %v7342_v22  ;;  %9707 = vst [vmem:[#allocation31_spill] sm:$0xff] %v7362_v63  ;;  %v709_v5 = vadd.f32 %v653_v57, %v9708_v11  ;;  %v145_v46 = vsub.f32 %v85_v13, %v121_v37  ;;  %v106_v41 = vadd.f32 1.0, %v7157_v26  ;;  %v7369_v56 = vpop.eup %6493  ;;  %v867_v31 = vsub.f32 %v7283_v53, %v823_v3 }
 0x1ff   :  { %9704 = vst [vmem:[#allocation29_spill] sm:$0xff] %v7350_v18  ;;  %9706 = vst [vmem:[#allocation30_spill] sm:$0xff] %v7355_v19  ;;  %v868_v47 = vsub.f32 %v7287_v62, %v823_v3  ;;  %v7374_v29 = vadd.f32 %v708_v42, %v7342_v22  ;;  %v829_v48 = vrot.slane %v828_v21, 2  ;;  %v936_v7 = vadd.f32 %v935_v27, %v934_v45  ;;  %v9711_v42 = vld [vmem:[#allocation16_spill] sm:$0xff] }
 0x200   :  { %v950_v8 = vsel %vm351_vm0, %v7345_v32, 0.0  ;;  %v951_v10 = vsel %vm743_vm2, %v7357_v44, 0.0  ;;  %v959_v26 = vsel %vm351_vm0, %v7365_v39, 0.0  ;;  %v960_v59 = vsel %vm743_vm2, %v7369_v56, 0.0 }
 0x201   :  { %v907_v53 = vmul.f32 1.442695, %v867_v31  ;;  %v909_v4 = vmul.f32 1.442695, %v868_v47  ;;  %v830_v62 = vmax.f32 %v828_v21, %v829_v48  ;;  %v7384_v58 = vpop.eup %6495  ;;  %v945_v1 = vadd.f32 %v944_v51, %v943_v35  ;;  %v623_v51 = vpop.permute.xlu1 %622 }
 0x202   :  { %v7387_v45 = vadd.f32 %v709_v5, %v7362_v63  ;;  %v7389_v2 = vmul.f32 -1e+30, %v167_v38  ;;  %v7391_v30 = vmul.f32 -1e+30, %v145_v46  ;;  %v7393_v54 = vpop.eup %6497  ;;  %v952_v13 = vadd.f32 %v951_v10, %v950_v8  ;;  %v663_v46 = vpop.permute.xlu0 %662 }
 0x203   :  { %6503 = vpow2.f32 %v907_v53  ;;  %v831_v37 = vrot.slane %v830_v62, 1  ;;  %v166_v17 = vsub.f32 %v106_v41, %v7193_v9  ;;  %v695_v57 = vadd.f32 %v9711_v42, %v9710_v43  ;;  %v9712_v43 = vld [vmem:[#allocation6_spill] sm:$0xff] }
 0x204   :  { %9709 = vst [vmem:[#allocation7_spill] sm:$0xff] %v7391_v30  ;;  %v961_v50 = vadd.f32 %v960_v59, %v959_v26  ;;  %6505 = vpow2.f32 %v909_v4  ;;  %v108_v35 = vadd.f32 1.0, %v7260_v36  ;;  %v7399_v27 = vpop.eup %6499  ;;  %v937_v24 = vrot.slane %v936_v7, 2 }
 0x205   :  { %v806_v3 = vsel %vm351_vm0, %v7374_v29, -inf  ;;  %v832_v21 = vmax.f32 %v830_v62, %v831_v37  ;;  %v807_v38 = vsel %vm743_vm2, %v7387_v45, -inf  ;;  %v7405_v11 = vpop.eup %6501  ;;  %v946_v9 = vrot.slane %v945_v1, 2 }
 0x206   :  { %v968_v5 = vsel %vm351_vm0, %v7384_v58, 0.0  ;;  %v969_v36 = vsel %vm743_vm2, %v7393_v54, 0.0  ;;  %v808_v41 = vmax.f32 %v806_v3, %v807_v38  ;;  %v953_v31 = vrot.slane %v952_v13, 4 }
 0x207   :  { %v977_v47 = vsel %vm351_vm0, %v7399_v27, 0.0  ;;  %v978_v48 = vsel %vm743_vm2, %v7405_v11, 0.0  ;;  %v869_v8 = vsub.f32 %v7306_v16, %v832_v21  ;;  %v962_v10 = vrot.slane %v961_v50, 4 }
 0x208   :  { %v870_v26 = vsub.f32 %v7309_v15, %v832_v21  ;;  %v809_v59 = vrot.slane %v808_v41, 4  ;;  %v168_v53 = vsub.f32 %v108_v35, %v7290_v12  ;;  %v938_v4 = vadd.f32 %v937_v24, %v936_v7  ;;  %v665_v15 = vpop.permute.xlu1 %664  ;;  %v9713_v7 = vld [vmem:[#allocation9_spill] sm:$0xff] }
 0x209   :  { %v970_v62 = vadd.f32 %v969_v36, %v968_v5  ;;  %v911_v37 = vmul.f32 1.442695, %v869_v8  ;;  %v714_v42 = vadd.f32 %v663_v46, %v9712_v43  ;;  %v979_v3 = vadd.f32 %v978_v48, %v977_v47  ;;  %v9714_v48 = vld [vmem:[#allocation10_spill] sm:$0xff]  ;;  %v9715_v43 = vld [vmem:[#allocation8_spill] sm:$0xff] }
 0x20a   :  { %v913_v38 = vmul.f32 1.442695, %v870_v26  ;;  %v810_v14 = vmax.f32 %v808_v41, %v809_v59  ;;  %v7419_v63 = vmul.f32 -1e+30, %v166_v17  ;;  %v7422_v22 = vadd.f32 %v695_v57, %v7350_v18 }
 0x20b   :  { %v947_v16 = vadd.f32 %v946_v9, %v945_v1  ;;  %v954_v52 = vadd.f32 %v953_v31, %v952_v13  ;;  %6507 = vpow2.f32 %v911_v37  ;;  %v963_v21 = vadd.f32 %v962_v10, %v961_v50  ;;  %v667_v9 = vpop.permute.xlu0 %666 }
 0x20c   :  { %6509 = vpow2.f32 %v913_v38  ;;  %v811_v12 = vrot.slane %v810_v14, 2  ;;  %v694_v35 = vadd.f32 %v623_v51, %v9713_v7  ;;  %v939_v5 = vrot.slane %v938_v4, 1 }
 0x20d   :  { %v7425_v24 = vpop.eup %6503  ;;  %v971_v36 = vrot.slane %v970_v62, 4  ;;  %v7428_v46 = vadd.f32 %v714_v42, %v7355_v19  ;;  %v7430_v17 = vmul.f32 -1e+30, %v168_v53  ;;  %v980_v1 = vrot.slane %v979_v3, 4 }
 0x20e   :  { %v7432_v57 = vpop.eup %6505  ;;  %v995_v13 = vsel %vm351_vm0, %v7425_v24, 0.0  ;;  %v812_v50 = vmax.f32 %v810_v14, %v811_v12  ;;  %v7437_v41 = vadd.f32 %v694_v35, %v7391_v30  ;;  %v948_v51 = vrot.slane %v947_v16, 1  ;;  %v669_v12 = vpop.permute.xlu1 %668 }
 0x20f   :  { %v955_v31 = vrot.slane %v954_v52, 2  ;;  %v996_v47 = vsel %vm743_vm2, %v7432_v57, 0.0  ;;  %v715_v8 = vadd.f32 %v665_v15, %v9714_v48  ;;  %v744_v10 = vsel %vm743_vm2, %v7422_v22, -inf }
 0x210   :  { %v964_v26 = vrot.slane %v963_v21, 2  ;;  %v813_v59 = vrot.slane %v812_v50, 1  ;;  %v742_v53 = vsel %vm351_vm0, %v7437_v41, -inf  ;;  %v997_v14 = vadd.f32 %v996_v47, %v995_v13 }
 0x211   :  { %v833_v37 = vsel %vm351_vm0, %v7428_v46, -inf  ;;  %v716_v42 = vadd.f32 %v667_v9, %v9715_v43  ;;  %v745_v38 = vmax.f32 %v742_v53, %v744_v10  ;;  %v972_v7 = vadd.f32 %v971_v36, %v970_v62 }
 0x212   :  { %v981_v35 = vadd.f32 %v980_v1, %v979_v3  ;;  %v814_v19 = vmax.f32 %v812_v50, %v813_v59  ;;  %v7450_v15 = vadd.f32 %v715_v8, %v7419_v63  ;;  %v940_v48 = vadd.f32 %v939_v5, %v938_v4 }
 0x213   :  { %v949_v30 = vadd.f32 %v948_v51, %v947_v16  ;;  %v956_v18 = vadd.f32 %v955_v31, %v954_v52  ;;  %v746_v40 = vrot.slane %v745_v38, 4  ;;  %v965_v61 = vadd.f32 %v964_v26, %v963_v21 }
 0x214   :  { %v865_v13 = vsub.f32 %v7374_v29, %v814_v19  ;;  %v866_v47 = vsub.f32 %v7387_v45, %v814_v19  ;;  %v717_v60 = vadd.f32 %v669_v12, %v9716_v6  ;;  %v998_v10 = vrot.slane %v997_v14, 4 }
 0x215   :  { %v7455_v9 = vpop.eup %6507  ;;  %v7458_v62 = vadd.f32 %v716_v42, %v7389_v2  ;;  %v747_v3 = vmax.f32 %v745_v38, %v746_v40  ;;  %v834_v4 = vsel %vm743_vm2, %v7450_v15, -inf  ;;  %v973_v52 = vrot.slane %v972_v7, 2 }
 0x216   :  { %v7462_v16 = vpop.eup %6509  ;;  %v982_v21 = vrot.slane %v981_v35, 2  ;;  %v1004_v29 = vsel %vm351_vm0, %v7455_v9, 0.0  ;;  %v903_v19 = vmul.f32 1.442695, %v865_v13  ;;  %v905_v45 = vmul.f32 1.442695, %v866_v47 }
 0x217   :  { %v1005_v6 = vsel %vm743_vm2, %v7462_v16, 0.0  ;;  %v748_v5 = vrot.slane %v747_v3, 2  ;;  %v835_v36 = vmax.f32 %v833_v37, %v834_v4  ;;  %v957_v1 = vrot.slane %v956_v18, 1 }
 0x218   :  { %v1006_v50 = vadd.f32 %v1005_v6, %v1004_v29  ;;  %6511 = vpow2.f32 %v903_v19  ;;  %v7469_v40 = vadd.f32 %v717_v60, %v7430_v17  ;;  %v999_v51 = vadd.f32 %v998_v10, %v997_v14 }
 0x219   :  { %6513 = vpow2.f32 %v905_v45  ;;  %v749_v31 = vmax.f32 %v747_v3, %v748_v5  ;;  %v836_v8 = vrot.slane %v835_v36, 4  ;;  %v966_v26 = vrot.slane %v965_v61, 1 }
 0x21a   :  { %v974_v59 = vadd.f32 %v973_v52, %v972_v7  ;;  %v1007_v53 = vrot.slane %v1006_v50, 4  ;;  %v842_v43 = vsel %vm351_vm0, %v7458_v62, -inf  ;;  %v983_v42 = vadd.f32 %v982_v21, %v981_v35 }
 0x21b   :  { %v750_v38 = vrot.slane %v749_v31, 1  ;;  %v837_v12 = vmax.f32 %v835_v36, %v836_v8  ;;  %v843_v37 = vsel %vm743_vm2, %v7469_v40, -inf  ;;  %v958_v13 = vadd.f32 %v957_v1, %v956_v18 }
 0x21c   :  { %v1008_v47 = vadd.f32 %v1007_v53, %v1006_v50  ;;  %v844_v60 = vmax.f32 %v842_v43, %v843_v37  ;;  %6515 = vrcp.f32 %v940_v48  ;;  %v1000_v14 = vrot.slane %v999_v51, 2 }
 0x21d   :  { %v751_v10 = vmax.f32 %v749_v31, %v750_v38  ;;  %v838_v3 = vrot.slane %v837_v12, 2  ;;  %6517 = vrcp.f32 %v949_v30  ;;  %v967_v4 = vadd.f32 %v966_v26, %v965_v61 }
 0x21e   :  { %v975_v7 = vrot.slane %v974_v59, 1  ;;  %v845_v52 = vrot.slane %v844_v60, 4  ;;  %v984_v29 = vrot.slane %v983_v42, 1  ;;  %6519 = vrcp.f32 %v958_v13 }
 0x21f   :  { %v851_v19 = vsub.f32 %v7437_v41, %v751_v10  ;;  %v852_v35 = vsub.f32 %v7422_v22, %v751_v10  ;;  %v839_v21 = vmax.f32 %v837_v12, %v838_v3  ;;  %v1009_v6 = vrot.slane %v1008_v47, 2 }
 0x220   :  { %v846_v45 = vmax.f32 %v844_v60, %v845_v52  ;;  %v1001_v18 = vadd.f32 %v1000_v14, %v999_v51  ;;  %6521 = vrcp.f32 %v967_v4  ;;  %v976_v30 = vadd.f32 %v975_v7, %v974_v59 }
 0x221   :  { %v875_v5 = vmul.f32 1.442695, %v851_v19  ;;  %v877_v36 = vmul.f32 1.442695, %v852_v35  ;;  %v840_v48 = vrot.slane %v839_v21, 1  ;;  %v985_v31 = vadd.f32 %v984_v29, %v983_v42 }
 0x222   :  { %v7477_v1 = vpop.eup %6511  ;;  %v847_v61 = vrot.slane %v846_v45, 2  ;;  %v1010_v8 = vadd.f32 %v1009_v6, %v1008_v47  ;;  %v1002_v53 = vrot.slane %v1001_v18, 1 }
 0x223   :  { %v7479_v50 = vpop.eup %6513  ;;  %v986_v41 = vsel %vm351_vm0, %v7477_v1, 0.0  ;;  %6523 = vpow2.f32 %v875_v5  ;;  %v841_v22 = vmax.f32 %v839_v21, %v840_v48 }
 0x224   :  { %v987_v51 = vsel %vm743_vm2, %v7479_v50, 0.0  ;;  %6525 = vpow2.f32 %v877_v36  ;;  %v848_v26 = vmax.f32 %v846_v45, %v847_v61  ;;  %v1011_v47 = vrot.slane %v1010_v8, 1 }
 0x225   :  { %v988_v43 = vadd.f32 %v987_v51, %v986_v41  ;;  %v871_v38 = vsub.f32 %v7428_v46, %v841_v22  ;;  %v872_v59 = vsub.f32 %v7450_v15, %v841_v22  ;;  %6527 = vrcp.f32 %v976_v30  ;;  %v7502_v22 = vpop.permute.xlu0 %1067 }
 0x226   :  { %v849_v12 = vrot.slane %v848_v26, 1  ;;  %v6516_v42 = vpop.eup %6515  ;;  %6529 = vrcp.f32 %v985_v31  ;;  %v1003_v3 = vadd.f32 %v1002_v53, %v1001_v18  ;;  %v1012_v19 = vadd.f32 %v1011_v47, %v1010_v8  ;;  %v7504_v8 = vpop.permute.xlu1 %1069 }
 0x227   :  { %v989_v37 = vrot.slane %v988_v43, 4  ;;  %v915_v13 = vmul.f32 1.442695, %v871_v38  ;;  %v917_v60 = vmul.f32 1.442695, %v872_v59  ;;  %v6518_v14 = vpop.eup %6517  ;;  %v1045_v45 = vmul.f32 %v6516_v42, %v7303_v34 }
 0x228   :  { %v850_v10 = vmax.f32 %v848_v26, %v849_v12  ;;  %v6520_v7 = vpop.eup %6519  ;;  %v1046_v36 = vmul.f32 %v6516_v42, %v7311_v55  ;;  %v1048_v34 = vmul.f32 %v6518_v14, %v7323_v23 }
 0x229   :  { %v990_v4 = vadd.f32 %v989_v37, %v988_v43  ;;  %6531 = vpow2.f32 %v915_v13  ;;  %v1049_v31 = vmul.f32 %v6520_v7, %v7345_v32  ;;  %v1075_v51 = vmul.f32 %v7502_v22, %v1045_v45 }
 0x22a   :  { %6533 = vpow2.f32 %v917_v60  ;;  %v873_v52 = vsub.f32 %v7458_v62, %v850_v10  ;;  %v874_v46 = vsub.f32 %v7469_v40, %v850_v10  ;;  %v6522_v29 = vpop.eup %6521  ;;  %v1047_v40 = vmul.f32 %v6518_v14, %v7319_v20 }
 0x22b   :  { %v991_v15 = vrot.slane %v990_v4, 2  ;;  %6535 = vrcp.f32 %v1003_v3  ;;  %v1050_v26 = vmul.f32 %v6520_v7, %v7357_v44  ;;  %v1051_v53 = vmul.f32 %v6522_v29, %v7365_v39 }
 0x22c   :  { %v919_v35 = vmul.f32 1.442695, %v873_v52  ;;  %v921_v21 = vmul.f32 1.442695, %v874_v46  ;;  %v1076_v38 = vmul.f32 %v7504_v8, %v1046_v36  ;;  %v1052_v32 = vmul.f32 %v6522_v29, %v7369_v56 }
 0x22d   :  { %v7489_v6 = vpop.eup %6523  ;;  %v992_v5 = vadd.f32 %v991_v15, %v990_v4  ;;  %v1077_v12 = vmul.f32 %v7502_v22, %v1047_v40  ;;  %v1078_v39 = vmul.f32 %v7504_v8, %v1048_v34  ;;  %v1079_v13 = vmul.f32 %v7502_v22, %v1049_v31 }
 0x22e   :  { %v7492_v18 = vpop.eup %6525  ;;  %v923_v62 = vsel %vm351_vm0, %v7489_v6, 0.0  ;;  %6537 = vpow2.f32 %v919_v35  ;;  %v1080_v3 = vmul.f32 %v7504_v8, %v1050_v26  ;;  %v1081_v4 = vmul.f32 %v7502_v22, %v1051_v53 }
 0x22f   :  { %v993_v48 = vrot.slane %v992_v5, 1  ;;  %v924_v30 = vsel %vm743_vm2, %v7492_v18, 0.0  ;;  %6539 = vpow2.f32 %v921_v21  ;;  %v6528_v61 = vpop.eup %6527  ;;  %v1082_v52 = vmul.f32 %v7504_v8, %v1052_v32 }
 0x230   :  { %6541 = vrcp.f32 %v1012_v19  ;;  %v925_v41 = vadd.f32 %v924_v30, %v923_v62  ;;  %v6530_v20 = vpop.eup %6529  ;;  %v1053_v59 = vmul.f32 %v6528_v61, %v7384_v58  ;;  %v1054_v60 = vmul.f32 %v6528_v61, %v7393_v54 }
 0x231   :  { %v994_v55 = vadd.f32 %v993_v48, %v992_v5  ;;  %v1056_v14 = vmul.f32 %v6530_v20, %v7405_v11  ;;  %v1055_v58 = vmul.f32 %v6530_v20, %v7399_v27  ;;  %v1106_v54 = vsel %vm351_vm0, %v1075_v51, 0.0 }
 0x232   :  { %v926_v43 = vrot.slane %v925_v41, 4  ;;  %v1083_v46 = vmul.f32 %v7502_v22, %v1053_v59  ;;  %v1107_v11 = vsel %vm743_vm2, %v1076_v38, 0.0  ;;  %v1115_v27 = vsel %vm351_vm0, %v1077_v12, 0.0 }
 0x233   :  { %v7510_v23 = vpop.eup %6531  ;;  %6543 = vrcp.f32 %v994_v55  ;;  %v1116_v35 = vsel %vm743_vm2, %v1078_v39, 0.0  ;;  %v1084_v5 = vmul.f32 %v7504_v8, %v1054_v60  ;;  %v1085_v36 = vmul.f32 %v7502_v22, %v1055_v58 }
 0x234   :  { %v7515_v42 = vpop.eup %6533  ;;  %v927_v37 = vadd.f32 %v926_v43, %v925_v41  ;;  %v1013_v44 = vsel %vm351_vm0, %v7510_v23, 0.0  ;;  %v1086_v62 = vmul.f32 %v7504_v8, %v1056_v14  ;;  %v1108_v34 = vadd.f32 %v1107_v11, %v1106_v54 }
 0x235   :  { %v1014_v56 = vsel %vm743_vm2, %v7515_v42, 0.0  ;;  %v6536_v7 = vpop.eup %6535  ;;  %v1117_v55 = vadd.f32 %v1116_v35, %v1115_v27  ;;  %v1124_v51 = vsel %vm351_vm0, %v1079_v13, 0.0  ;;  %v1125_v53 = vsel %vm743_vm2, %v1080_v3, 0.0 }
 0x236   :  { %v928_v47 = vrot.slane %v927_v37, 2  ;;  %v1015_v10 = vadd.f32 %v1014_v56, %v1013_v44  ;;  %v1059_v31 = vmul.f32 %v6536_v7, %v7425_v24  ;;  %v1133_v43 = vsel %vm351_vm0, %v1081_v4, 0.0 }
 0x237   :  { %v1060_v13 = vmul.f32 %v6536_v7, %v7432_v57  ;;  %v1142_v14 = vsel %vm351_vm0, %v1083_v46, 0.0  ;;  %v1143_v56 = vsel %vm743_vm2, %v1084_v5, 0.0  ;;  %v1118_v3 = vrot.slane %v1117_v55, 4 }
 0x238   :  { %v7532_v15 = vpop.eup %6537  ;;  %v929_v29 = vadd.f32 %v928_v47, %v927_v37  ;;  %v1016_v19 = vrot.slane %v1015_v10, 4  ;;  %v1134_v37 = vsel %vm743_vm2, %v1082_v52, 0.0  ;;  %v1109_v47 = vrot.slane %v1108_v34, 4 }
 0x239   :  { %v7536_v21 = vpop.eup %6539  ;;  %v1022_v45 = vsel %vm351_vm0, %v7532_v15, 0.0  ;;  %v1126_v4 = vadd.f32 %v1125_v53, %v1124_v51  ;;  %v1135_v52 = vadd.f32 %v1134_v37, %v1133_v43  ;;  %v1144_v54 = vadd.f32 %v1143_v56, %v1142_v14 }
 0x23a   :  { %v6542_v40 = vpop.eup %6541  ;;  %v930_v48 = vrot.slane %v929_v29, 1  ;;  %v1017_v30 = vadd.f32 %v1016_v19, %v1015_v10  ;;  %v1023_v61 = vsel %vm743_vm2, %v7536_v21, 0.0  ;;  %v1151_v46 = vsel %vm351_vm0, %v1085_v36, 0.0 }
 0x23b   :  { %v1024_v41 = vadd.f32 %v1023_v61, %v1022_v45  ;;  %v1061_v32 = vmul.f32 %v6542_v40, %v7455_v9  ;;  %v1062_v59 = vmul.f32 %v6542_v40, %v7462_v16  ;;  %v1152_v11 = vsel %vm743_vm2, %v1086_v62, 0.0 }
 0x23c   :  { %v931_v20 = vadd.f32 %v930_v48, %v929_v29  ;;  %v1018_v26 = vrot.slane %v1017_v30, 2  ;;  %v1089_v29 = vmul.f32 %v7502_v22, %v1059_v31  ;;  %v1090_v35 = vmul.f32 %v7504_v8, %v1060_v13 }
 0x23d   :  { %v6544_v38 = vpop.eup %6543  ;;  %v1025_v12 = vrot.slane %v1024_v41, 4  ;;  %v1092_v57 = vmul.f32 %v7504_v8, %v1062_v59  ;;  %v1110_v5 = vadd.f32 %v1109_v47, %v1108_v34  ;;  %v1127_v40 = vrot.slane %v1126_v4, 4 }
 0x23e   :  { %6545 = vrcp.f32 %v931_v20  ;;  %v1019_v24 = vadd.f32 %v1018_v26, %v1017_v30  ;;  %v1057_v44 = vmul.f32 %v6544_v38, %v7477_v1  ;;  %v1058_v39 = vmul.f32 %v6544_v38, %v7479_v50 }
 0x23f   :  { %v1026_v60 = vadd.f32 %v1025_v12, %v1024_v41  ;;  %v1091_v50 = vmul.f32 %v7502_v22, %v1061_v32  ;;  %v1153_v48 = vadd.f32 %v1152_v11, %v1151_v46  ;;  %v1179_v61 = vsel %vm743_vm2, %v1092_v57, 0.0 }
 0x240   :  { %v1020_v58 = vrot.slane %v1019_v24, 1  ;;  %v1087_v9 = vmul.f32 %v7502_v22, %v1057_v44  ;;  %v1088_v16 = vmul.f32 %v7504_v8, %v1058_v39  ;;  %v1119_v41 = vadd.f32 %v1118_v3, %v1117_v55 }
 0x241   :  { %v1027_v10 = vrot.slane %v1026_v60, 2  ;;  %v1178_v30 = vsel %vm351_vm0, %v1091_v50, 0.0  ;;  %v1136_v31 = vrot.slane %v1135_v52, 4  ;;  %v1145_v20 = vrot.slane %v1144_v54, 4 }
 0x242   :  { %v1021_v1 = vadd.f32 %v1020_v58, %v1019_v24  ;;  %v1160_v19 = vsel %vm351_vm0, %v1087_v9, 0.0  ;;  %v1161_v27 = vsel %vm743_vm2, %v1088_v16, 0.0  ;;  %v1169_v26 = vsel %vm351_vm0, %v1089_v29, 0.0 }
 0x243   :  { %v1028_v7 = vadd.f32 %v1027_v10, %v1026_v60  ;;  %v1162_v62 = vadd.f32 %v1161_v27, %v1160_v19  ;;  %v1170_v53 = vsel %vm743_vm2, %v1090_v35, 0.0  ;;  %v1180_v38 = vadd.f32 %v1179_v61, %v1178_v30 }
 0x244   :  { %6547 = vrcp.f32 %v1021_v1  ;;  %v1111_v32 = vrot.slane %v1110_v5, 2  ;;  %v1128_v59 = vadd.f32 %v1127_v40, %v1126_v4  ;;  %v1154_v12 = vrot.slane %v1153_v48, 4 }
 0x245   :  { %v1029_v45 = vrot.slane %v1028_v7, 1  ;;  %v1163_v24 = vrot.slane %v1162_v62, 4  ;;  %v1171_v44 = vadd.f32 %v1170_v53, %v1169_v26  ;;  %v1120_v39 = vrot.slane %v1119_v41, 2 }
 0x246   :  { %v1137_v13 = vadd.f32 %v1136_v31, %v1135_v52  ;;  %v1181_v56 = vrot.slane %v1180_v38, 4  ;;  %v1112_v9 = vadd.f32 %v1111_v32, %v1110_v5  ;;  %v1129_v16 = vrot.slane %v1128_v59, 2 }
 0x247   :  { %v1030_v36 = vadd.f32 %v1029_v45, %v1028_v7  ;;  %v1155_v47 = vadd.f32 %v1154_v12, %v1153_v48  ;;  %v1164_v3 = vadd.f32 %v1163_v24, %v1162_v62  ;;  %v1172_v1 = vrot.slane %v1171_v44, 4 }
 0x248   :  { %v6546_v51 = vpop.eup %6545  ;;  %v1121_v57 = vadd.f32 %v1120_v39, %v1119_v41  ;;  %v1138_v52 = vrot.slane %v1137_v13, 2  ;;  %v1182_v11 = vadd.f32 %v1181_v56, %v1180_v38  ;;  %v1113_v19 = vrot.slane %v1112_v9, 1 }
 0x249   :  { %v1043_v43 = vmul.f32 %v6546_v51, %v7489_v6  ;;  %v1044_v34 = vmul.f32 %v6546_v51, %v7492_v18  ;;  %6549 = vrcp.f32 %v1030_v36  ;;  %v1146_v6 = vadd.f32 %v1145_v20, %v1144_v54 }
 0x24a   :  { %v1130_v27 = vadd.f32 %v1129_v16, %v1128_v59  ;;  %v1156_v35 = vrot.slane %v1155_v47, 2  ;;  %v1122_v41 = vrot.slane %v1121_v57, 1  ;;  %v1139_v62 = vadd.f32 %v1138_v52, %v1137_v13 }
 0x24b   :  { %v1073_v37 = vmul.f32 %v7502_v22, %v1043_v43  ;;  %v1074_v55 = vmul.f32 %v7504_v8, %v1044_v34  ;;  %v1147_v7 = vrot.slane %v1146_v6, 2  ;;  %v1183_v31 = vrot.slane %v1182_v11, 2 }
 0x24c   :  { %v1131_v34 = vrot.slane %v1130_v27, 1  ;;  %v1157_v38 = vadd.f32 %v1156_v35, %v1155_v47  ;;  %v1114_v13 = vadd.f32 %v1113_v19, %v1112_v9 }
 0x24d   :  { %v1097_v60 = vsel %vm351_vm0, %v1073_v37, 0.0  ;;  %v1098_v14 = vsel %vm743_vm2, %v1074_v55, 0.0  ;;  %v1148_v51 = vadd.f32 %v1147_v7, %v1146_v6  ;;  %v1140_v55 = vrot.slane %v1139_v62, 1 }
 0x24e   :  { %v6548_v18 = vpop.eup %6547  ;;  %v1099_v58 = vadd.f32 %v1098_v14, %v1097_v60  ;;  %v1184_v24 = vadd.f32 %v1183_v31, %v1182_v11  ;;  %v1158_v14 = vrot.slane %v1157_v38, 1 }
 0x24f   :  { %v1064_v10 = vmul.f32 %v6548_v18, %v7515_v42  ;;  %v1063_v4 = vmul.f32 %v6548_v18, %v7510_v23  ;;  %v1165_v42 = vrot.slane %v1164_v3, 2  ;;  %v1173_v23 = vadd.f32 %v1172_v1, %v1171_v44 }
 0x250   :  { %v1100_v50 = vrot.slane %v1099_v58, 4  ;;  %v1132_v18 = vadd.f32 %v1131_v34, %v1130_v27  ;;  %v1159_v7 = vadd.f32 %v1158_v14, %v1157_v38 }
 0x251   :  { %v1093_v46 = vmul.f32 %v7502_v22, %v1063_v4  ;;  %v1094_v54 = vmul.f32 %v7504_v8, %v1064_v10  ;;  %v1166_v32 = vadd.f32 %v1165_v42, %v1164_v3  ;;  %v1141_v10 = vadd.f32 %v1140_v55, %v1139_v62 }
 0x252   :  { %v1101_v29 = vadd.f32 %v1100_v50, %v1099_v58  ;;  %v1185_v4 = vrot.slane %v1184_v24, 1 }
 0x253   :  { %v6550_v45 = vpop.eup %6549  ;;  %v1187_v5 = vsel %vm351_vm0, %v1093_v46, 0.0  ;;  %v1188_v40 = vsel %vm743_vm2, %v1094_v54, 0.0  ;;  %v1167_v58 = vrot.slane %v1166_v32, 1 }
 0x254   :  { %v1066_v48 = vmul.f32 %v6550_v45, %v7536_v21  ;;  %v1102_v30 = vrot.slane %v1101_v29, 2  ;;  %v1065_v61 = vmul.f32 %v6550_v45, %v7532_v15  ;;  %v1189_v36 = vadd.f32 %v1188_v40, %v1187_v5 }
 0x255   :  { %v1174_v21 = vrot.slane %v1173_v23, 2  ;;  %v1168_v11 = vadd.f32 %v1167_v58, %v1166_v32  ;;  %v1186_v27 = vadd.f32 %v1185_v4, %v1184_v24 }
 0x256   :  { %v1103_v20 = vadd.f32 %v1102_v30, %v1101_v29  ;;  %v1095_v26 = vmul.f32 %v7502_v22, %v1065_v61  ;;  %v1096_v53 = vmul.f32 %v7504_v8, %v1066_v48  ;;  %v1190_v43 = vrot.slane %v1189_v36, 4 }
 0x257   :  { %v1149_v22 = vrot.slane %v1148_v51, 1  ;;  %v1123_v8 = vadd.f32 %v1122_v41, %v1121_v57  ;;  %v1175_v6 = vadd.f32 %v1174_v21, %v1173_v23 }
 0x258   :  { %v1104_v59 = vrot.slane %v1103_v20, 1  ;;  %v1191_v12 = vadd.f32 %v1190_v43, %v1189_v36  ;;  %v1196_v15 = vsel %vm351_vm0, %v1095_v26, 0.0  ;;  %v1197_v37 = vsel %vm743_vm2, %v1096_v53, 0.0  ;;  %v6101_v36 = vld [vmem:[%s9619_s0 + $0x21] ss:$0 sm:$0xff] }
 0x259   :  { %v1198_v44 = vadd.f32 %v1197_v37, %v1196_v15  ;;  %v1150_v50 = vadd.f32 %v1149_v22, %v1148_v51  ;;  %v1176_v46 = vrot.slane %v1175_v6, 1  ;;  %v6818_v53 = vld [vmem:[%s9620_s1] sm:$0xff]  ;;  %v1361_v22 = vld [vmem:[%s9619_s0 + $0x2a] sm:$0xff] }
 0x25a   :  { %v1105_v39 = vadd.f32 %v1104_v59, %v1103_v20  ;;  %v1192_v60 = vrot.slane %v1191_v12, 2  ;;  %v6817_v20 = vld [vmem:[%s9620_s1 + $0x8] sm:$0xf] }
 0x25b   :  { %v1199_v56 = vrot.slane %v1198_v44, 4  ;;  %v1177_v23 = vadd.f32 %v1176_v46, %v1175_v6  ;;  %v6106_v46 = vld [vmem:[%s9619_s0 + $0x32] ss:$0 sm:$0xff] }
 0x25c   :  { %v1222_v16 = vsel %vm1221_vm4, %v1114_v13, %v1105_v39  ;;  %v1193_v47 = vadd.f32 %v1192_v60, %v1191_v12  ;;  %v1360_v13 = vld [vmem:[%s9619_s0 + $0x22] sm:$0xff] }
 0x25d   :  { %v1224_v3 = vsel %vm1223_vm3, %v1123_v8, %v1222_v16  ;;  %v1200_v1 = vadd.f32 %v1199_v56, %v1198_v44  ;;  %v1235_v48 = vsel %vm1221_vm4, %v1186_v27, %v1177_v23  ;;  %v6414_v60 = vpack.c.bf16 %v1361_v22, %v1360_v13  ;;  %v6112_v13 = vld [vmem:[%s9619_s0 + $0x3e] ss:$0 sm:$0xff] }
 0x25e   :  { %v1226_v52 = vsel %vm1225_vm5, %v1132_v18, %v1224_v3  ;;  %v1194_v9 = vrot.slane %v1193_v47, 1  ;;  %v6105_v3 = vld [vmem:[%s9619_s0 + $0x3d] ss:$0 sm:$0xff] }
 0x25f   :  { %v1228_v57 = vsel %vm1227_vm6, %v1141_v10, %v1226_v52  ;;  %v1201_v54 = vrot.slane %v1200_v1, 2  ;;  %6415 = vmatprep.subr.bf16.mxu0 %v6414_v60 }
 0x260   :  { %v1230_v29 = vsel %vm1229_vm7, %v1150_v50, %v1228_v57  ;;  %v1195_v42 = vadd.f32 %v1194_v9, %v1193_v47  ;;  %6417 = vmatpush3.bf16.msra.mxu0 %v6414_v60  ;;  %v6104_v47 = vld [vmem:[%s9619_s0 + $0x3c] ss:$0 sm:$0xff]  ;;  %v1363_v57 = vld [vmem:[%s9619_s0 + $0x33] sm:$0xff] }
 0x261   :  { %v1232_v19 = vsel %vm1231_vm8, %v1159_v7, %v1230_v29  ;;  %v1202_v35 = vadd.f32 %v1201_v54, %v1200_v1  ;;  %6274 = vmatprep.subr.mxu1 %v1363_v57 }
 0x262   :  { %v1234_v45 = vsel %vm1233_vm9, %v1168_v11, %v1232_v19  ;;  %v1236_v30 = vsel %vm1223_vm3, %v1195_v42, %v1235_v48 }
 0x263   :  { %6264 = vmatprep.mubr.msk.f32.mxu1 %vm351_vm0, %v1234_v45  ;;  %v1203_v5 = vrot.slane %v1202_v35, 1  ;;  %v6109_v45 = vld [vmem:[%s9619_s0 + $0x3b] ss:$0 sm:$0xff] }
 0x265   :  { %v1204_v40 = vadd.f32 %v1203_v5, %v1202_v35 }
 0x267   :  { %v1237_v61 = vsel %vm1225_vm5, %v1204_v40, %v1236_v30 }
 0x268   :  { %6265 = vmatmul.mubr.msk.f32.vlgmr.msra.gmra.mrb[0].mxu1 %vm351_vm0, %v1237_v61 }
 0x269   :  { %6275 = vmatpush3.msra.mxu1 %v1363_v57  ;;  %v9718_v57 = vld [vmem:[#allocation4_spill] sm:$0xff] }
 0x33b   :  { %v6266_v41 = vpop.f32.mrb[0].mxu1 }
 0x33c   :  { %v1314_v62 = vadd.f32 %v6266_v41, %v6101_v36  ;;  %v1308_v51 = vpop.f32.mrb[1].mxu1 }
 0x33d   :  { %v1309_v31 = vadd.f32 %v6101_v36, %v1308_v51 }
 0x33e   :  { %v1318_v26 = vadd.f32 %v6817_v20, %v1314_v62 }
 0x33f   :  { %v1317_v43 = vadd.f32 %v6818_v53, %v1309_v31 }
 0x340   :  { %v1324_v34 = vsel %vm743_vm2, %v1318_v26, 0.0 }
 0x341   :  { %1325 = vadd.xlane.f32.xlu1 %v1324_v34  ;;  %v1321_v38 = vsel %vm351_vm0, %v1317_v43, 0.0 }
 0x342   :  { %1322 = vadd.xlane.f32.xlu0 %v1321_v38 }
 0x3ce   :  { %v1326_v32 = vpop.xlane.xlu1 %1325 }
 0x3cf   :  { %v1329_v21 = vmul.f32 0.0625, %v1326_v32  ;;  %v1323_v59 = vpop.xlane.xlu0 %1322  ;;  %v1580_v32 = vld [vmem:[%s9619_s0 + $0x40] sm:$0xff] }
 0x3d0   :  { %v1328_v12 = vmul.f32 0.0625, %v1323_v59 }
 0x3d1   :  { %v1331_v15 = vsub.f32 %v1318_v26, %v1329_v21  ;;  %v1581_v21 = vld [vmem:[%s9619_s0 + $0x48] sm:$0xff] }
 0x3d2   :  { %v1330_v37 = vsub.f32 %v1317_v43, %v1328_v12  ;;  %v6418_v59 = vpack.c.bf16 %v1581_v21, %v1580_v32 }
 0x3d3   :  { %v1333_v44 = vmul.f32 %v1331_v15, %v1331_v15 }
 0x3d4   :  { %v1332_v55 = vmul.f32 %v1330_v37, %v1330_v37  ;;  %6419 = vmatprep.subr.bf16.mxu0 %v6418_v59 }
 0x3d5   :  { %v1337_v39 = vsel %vm743_vm2, %v1333_v44, 0.0 }
 0x3d6   :  { %v1334_v24 = vsel %vm351_vm0, %v1332_v55, 0.0 }
 0x3d7   :  { %1335 = vadd.xlane.f32.xlu0 %v1334_v24 }
 0x3db   :  { %1338 = vadd.xlane.f32.xlu0 %v1337_v39 }
 0x464   :  { %v1336_v8 = vpop.xlane.xlu0 %1335 }
 0x465   :  { %v1340_v14 = vmul.f32 0.0625, %v1336_v8 }
 0x467   :  { %v1342_v6 = vadd.f32 1e-05, %v1340_v14  ;;  %v6113_v14 = vld [vmem:[%s9619_s0 + $0x3f] ss:$0 sm:$0xff] }
 0x468   :  { %v1339_v56 = vpop.xlane.xlu0 %1338 }
 0x469   :  { %6551 = vrsqrt.f32 %v1342_v6  ;;  %v1341_v18 = vmul.f32 0.0625, %v1339_v56 }
 0x46b   :  { %v1343_v58 = vadd.f32 1e-05, %v1341_v18 }
 0x46d   :  { %6553 = vrsqrt.f32 %v1343_v58 }
 0x473   :  { %v6552_v16 = vpop.eup %6551 }
 0x474   :  { %v1346_v10 = vmul.f32 %v6552_v16, %v1330_v37  ;;  %v6114_v16 = vld [vmem:[%s9619_s0 + $0x50] ss:$0 sm:$0xff] }
 0x476   :  { %v1352_v4 = vmul.f32 %v6104_v47, %v1346_v10 }
 0x477   :  { %v6554_v1 = vpop.eup %6553 }
 0x478   :  { %v1347_v50 = vmul.f32 %v6554_v1, %v1331_v15  ;;  %v1358_v52 = vadd.f32 %v6105_v3, %v1352_v4  ;;  %v9717_v1 = vld [vmem:[#allocation3_spill] sm:$0xff] }
 0x47a   :  { %v1353_v9 = vmul.f32 %v6104_v47, %v1347_v50  ;;  %6271 = vmatprep.mubr.msk.f32.mxu0 %vm351_vm0, %v1358_v52 }
 0x47c   :  { %v1359_v7 = vadd.f32 %v6105_v3, %v1353_v9 }
 0x47e   :  { %6272 = vmatmul.mubr.msk.f32.vlgmr.msra.gmra.mrb[2].mxu0 %vm351_vm0, %v1359_v7 }
 0x47f   :  { %6421 = vmatpush3.bf16.msra.mxu0 %v6418_v59 }
 0x551   :  { %v6273_v54 = vpop.f32.mrb[2].mxu0 }
 0x552   :  { %v1447_v11 = vadd.f32 %v6273_v54, %v6106_v46  ;;  %v1441_v29 = vpop.f32.mrb[3].mxu0 }
 0x553   :  { %v1442_v19 = vadd.f32 %v6106_v46, %v1441_v29 }
 0x554   :  { %v1451_v35 = vmax.f32 %v1447_v11, 0.0 }
 0x555   :  { %v1450_v27 = vmax.f32 %v1442_v19, 0.0 }
 0x557   :  { %6276 = vmatprep.mubr.msk.f32.mxu1 %vm1456_vm10, %v1450_v27 }
 0x558   :  { %6277 = vmatmul.mubr.msk.f32.vlgmr.msra.gmra.mrb[2].mxu1 %vm1456_vm10, %v1451_v35 }
 0x62b   :  { %v6278_v42 = vpop.f32.mrb[2].mxu1 }
 0x62c   :  { %v1535_v23 = vadd.f32 %v6278_v42, %v6109_v45  ;;  %v1529_v5 = vpop.f32.mrb[3].mxu1 }
 0x62d   :  { %v1530_v40 = vadd.f32 %v6109_v45, %v1529_v5 }
 0x62e   :  { %v1539_v48 = vadd.f32 %v1535_v23, %v1359_v7 }
 0x62f   :  { %v1538_v30 = vadd.f32 %v1530_v40, %v1358_v52 }
 0x630   :  { %v1545_v61 = vsel %vm743_vm2, %v1539_v48, 0.0 }
 0x631   :  { %1546 = vadd.xlane.f32.xlu0 %v1545_v61  ;;  %v1542_v36 = vsel %vm351_vm0, %v1538_v30, 0.0 }
 0x632   :  { %1543 = vadd.xlane.f32.xlu1 %v1542_v36 }
 0x6be   :  { %v1547_v41 = vpop.xlane.xlu0 %1546 }
 0x6bf   :  { %v1549_v62 = vmul.f32 0.0625, %v1547_v41  ;;  %v1544_v51 = vpop.xlane.xlu1 %1543 }
 0x6c0   :  { %v1548_v31 = vmul.f32 0.0625, %v1544_v51 }
 0x6c1   :  { %v1551_v20 = vsub.f32 %v1539_v48, %v1549_v62 }
 0x6c2   :  { %v1550_v26 = vsub.f32 %v1538_v30, %v1548_v31 }
 0x6c3   :  { %v1553_v53 = vmul.f32 %v1551_v20, %v1551_v20 }
 0x6c4   :  { %v1552_v43 = vmul.f32 %v1550_v26, %v1550_v26 }
 0x6c5   :  { %v1557_v34 = vsel %vm743_vm2, %v1553_v53, 0.0 }
 0x6c6   :  { %1558 = vadd.xlane.f32.xlu0 %v1557_v34  ;;  %v1554_v38 = vsel %vm351_vm0, %v1552_v43, 0.0 }
 0x6c7   :  { %1555 = vadd.xlane.f32.xlu1 %v1554_v38 }
 0x753   :  { %v1559_v12 = vpop.xlane.xlu0 %1558 }
 0x754   :  { %v1561_v15 = vmul.f32 0.0625, %v1559_v12  ;;  %v1556_v37 = vpop.xlane.xlu1 %1555 }
 0x755   :  { %v1560_v55 = vmul.f32 0.0625, %v1556_v37 }
 0x756   :  { %v1563_v24 = vadd.f32 1e-05, %v1561_v15 }
 0x757   :  { %v1562_v44 = vadd.f32 1e-05, %v1560_v55 }
 0x758   :  { %6555 = vrsqrt.f32 %v1563_v24 }
 0x759   :  { %6557 = vrsqrt.f32 %v1562_v44 }
 0x762   :  { %v6556_v39 = vpop.eup %6555 }
 0x763   :  { %v6558_v22 = vpop.eup %6557  ;;  %v1567_v60 = vmul.f32 %v6556_v39, %v1551_v20 }
 0x764   :  { %v1566_v8 = vmul.f32 %v6558_v22, %v1550_v26 }
 0x765   :  { %v1573_v6 = vmul.f32 %v6112_v13, %v1567_v60 }
 0x766   :  { %v1572_v56 = vmul.f32 %v6112_v13, %v1566_v8 }
 0x767   :  { %v7657_v58 = vadd.f32 %v6113_v14, %v1573_v6 }
 0x768   :  { %v7655_v18 = vadd.f32 %v6113_v14, %v1572_v56 }
 0x76a   :  { %6283 = vmatprep.mubr.msk.f32.mxu0 %vm351_vm0, %v7655_v18 }
 0x76b   :  { %6284 = vmatmul.mubr.msk.f32.vlgmr.msra.gmra.mrb[4].mxu0 %vm351_vm0, %v7657_v58 }
 0x83e   :  { %v6285_v47 = vpop.f32.mrb[4].mxu0 }
 0x83f   :  { %v7666_v10 = vadd.f32 %v6285_v47, %v6114_v16  ;;  %v1662_v3 = vpop.f32.mrb[5].mxu0 }
 0x840   :  { %v7668_v4 = vadd.f32 %v6114_v16, %v1662_v3 }
 0x841   :  { %1808 = vrot.lane.b32.xlu0 %v7666_v10, %s6819_s19  ;;  %v1728_v53 = vrot.slane %v7666_v10, %v9717_v1 }
 0x842   :  { %1806 = vrot.lane.b32.xlu1 %v7668_v4, %s6819_s19  ;;  %v1680_v50 = vrot.slane %v7668_v4, %v9717_v1  ;;  %v1673_v54 = vcombine.high %v7668_v4, %v7668_v4 }
 0x843   :  { %v1729_v21 = vcombine.high %v1728_v53, %v1728_v53  ;;  %v1736_v59 = vrot.slane %v1728_v53, %v9717_v1 }
 0x844   :  { %v1688_v52 = vcombine.high %v1680_v50, %v1680_v50  ;;  %v1696_v9 = vrot.slane %v1680_v50, %v9717_v1  ;;  %v1687_v5 = vrot.slane %v1673_v54, %v9717_v1 }
 0x845   :  { %v1781_v55 = vrot.slane %v1736_v59, %v9718_v57  ;;  %v1743_v24 = vrot.slane %v1729_v21, %v9717_v1  ;;  %v1744_v6 = vcombine.high %v1736_v59, %v1736_v59 }
 0x846   :  { %v1710_v7 = vrot.slane %v1688_v52, %v9717_v1  ;;  %v7679_v46 = vrot.slane %v1696_v9, %v9718_v57  ;;  %v1718_v19 = vcombine.high %v1696_v9, %v1696_v9  ;;  %v1703_v61 = vrot.slane %v1687_v5, %v9717_v1 }
 0x847   :  { %v1689_v36 = vcombine.high %v1687_v5, %v1687_v5  ;;  %v1785_v13 = vrot.slane %v1743_v24, %v9718_v57  ;;  %v1789_v47 = vrot.slane %v1744_v6, %v9718_v57  ;;  %v1745_v3 = vcombine.high %v1743_v24, %v1743_v24 }
 0x848   :  { %v1753_v29 = vrot.slane %v1710_v7, %v9718_v57  ;;  %v1757_v42 = vrot.slane %v1718_v19, %v9718_v57  ;;  %v1720_v23 = vcombine.high %v1710_v7, %v1710_v7  ;;  %v1765_v51 = vrot.slane %v1703_v61, %v9718_v57 }
 0x849   :  { %v1717_v31 = vrot.slane %v1689_v36, %v9717_v1  ;;  %v1719_v34 = vcombine.high %v1703_v61, %v1703_v61  ;;  %v1793_v9 = vrot.slane %v1745_v3, %v9718_v57 }
 0x84a   :  { %v1761_v30 = vrot.slane %v1720_v23, %v9718_v57 }
 0x84b   :  { %v1769_v43 = vrot.slane %v1717_v31, %v9718_v57  ;;  %v1773_v12 = vrot.slane %v1719_v34, %v9718_v57  ;;  %v1721_v22 = vcombine.high %v1717_v31, %v1717_v31 }
 0x84d   :  { %v1777_v14 = vrot.slane %v1721_v22, %v9718_v57  ;;  %v9719_v22 = vld [vmem:[#allocation17_spill] sm:$0xff] }
 0x8b3   :  { %v7683_v11 = vpop.permute.xlu0 %1808 }
 0x8b4   :  { %v7686_v27 = vpop.permute.xlu1 %1806  ;;  %v7690_v35 = vmul.f32 %v7683_v11, %v7679_v46  ;;  %v7702_v40 = vmul.f32 %v7683_v11, %v1753_v29  ;;  %v7714_v41 = vmul.f32 %v7683_v11, %v1757_v42  ;;  %v7726_v20 = vmul.f32 %v7683_v11, %v1761_v30 }
 0x8b5   :  { %v7693_v45 = vmul.f32 %v7686_v27, %v1753_v29  ;;  %v7705_v48 = vmul.f32 %v7686_v27, %v1757_v42  ;;  %v7717_v62 = vmul.f32 %v7686_v27, %v1761_v30  ;;  %v7729_v26 = vmul.f32 %v7686_v27, %v1765_v51 }
 0x8b6   :  { %1862 = vrot.lane.b32.xlu1 %v7690_v35, %s6821_s20  ;;  %v7739_v38 = vmul.f32 %v7683_v11, %v1765_v51  ;;  %v7742_v32 = vmul.f32 %v7686_v27, %v1769_v43  ;;  %v7751_v15 = vmul.f32 %v7683_v11, %v1769_v43  ;;  %v7754_v37 = vmul.f32 %v7686_v27, %v1773_v12  ;;  %v1584_v43 = vld [vmem:[%s9619_s0 + $0x59] sm:$0xff] }
 0x8b7   :  { %1864 = vrot.lane.b32.xlu0 %v7693_v45, %s6821_s20  ;;  %v7763_v44 = vmul.f32 %v7683_v11, %v1773_v12  ;;  %v7766_v39 = vmul.f32 %v7686_v27, %v1781_v55  ;;  %v7774_v60 = vmul.f32 %v7683_v11, %v1781_v55  ;;  %v7777_v8 = vmul.f32 %v7686_v27, %v1785_v13 }
 0x8b8   :  { %v7785_v56 = vmul.f32 %v7683_v11, %v1785_v13  ;;  %v7788_v16 = vmul.f32 %v7686_v27, %v1777_v14  ;;  %v7796_v50 = vmul.f32 %v7683_v11, %v1777_v14  ;;  %v7799_v52 = vmul.f32 %v7686_v27, %v1789_v47 }
 0x8b9   :  { %v7808_v7 = vmul.f32 %v7686_v27, %v7679_v46  ;;  %v7811_v54 = vmul.f32 %v7686_v27, %v1793_v9  ;;  %v7818_v29 = vmul.f32 %v7683_v11, %v1789_v47  ;;  %v7825_v46 = vmul.f32 %v7683_v11, %v1793_v9 }
 0x8ba   :  { %1866 = vrot.lane.b32.xlu1 %v7702_v40, %s6821_s20 }
 0x8bb   :  { %1868 = vrot.lane.b32.xlu0 %v7705_v48, %s6821_s20 }
 0x8be   :  { %1870 = vrot.lane.b32.xlu1 %v7714_v41, %s6821_s20 }
 0x8bf   :  { %1872 = vrot.lane.b32.xlu0 %v7717_v62, %s6821_s20 }
 0x8c2   :  { %1874 = vrot.lane.b32.xlu1 %v7726_v20, %s6821_s20 }
 0x8c3   :  { %1876 = vrot.lane.b32.xlu0 %v7729_v26, %s6821_s20 }
 0x8c6   :  { %1878 = vrot.lane.b32.xlu1 %v7739_v38, %s6821_s20 }
 0x8c7   :  { %1880 = vrot.lane.b32.xlu0 %v7742_v32, %s6821_s20 }
 0x8ca   :  { %1882 = vrot.lane.b32.xlu1 %v7751_v15, %s6821_s20 }
 0x8cb   :  { %1884 = vrot.lane.b32.xlu0 %v7754_v37, %s6821_s20 }
 0x8ce   :  { %1886 = vrot.lane.b32.xlu1 %v7763_v44, %s6821_s20 }
 0x8cf   :  { %1892 = vrot.lane.b32.xlu0 %v7766_v39, %s6821_s20 }
 0x8d2   :  { %1894 = vrot.lane.b32.xlu1 %v7774_v60, %s6821_s20 }
 0x8d3   :  { %1896 = vrot.lane.b32.xlu0 %v7777_v8, %s6821_s20 }
 0x8d6   :  { %1898 = vrot.lane.b32.xlu1 %v7785_v56, %s6821_s20 }
 0x8d7   :  { %1888 = vrot.lane.b32.xlu0 %v7788_v16, %s6821_s20 }
 0x8da   :  { %1890 = vrot.lane.b32.xlu1 %v7796_v50, %s6821_s20 }
 0x8db   :  { %1900 = vrot.lane.b32.xlu0 %v7799_v52, %s6821_s20 }
 0x8de   :  { %1860 = vrot.lane.b32.xlu1 %v7808_v7, %s6821_s20 }
 0x8df   :  { %1904 = vrot.lane.b32.xlu0 %v7811_v54, %s6821_s20 }
 0x8e2   :  { %1902 = vrot.lane.b32.xlu1 %v7818_v29, %s6821_s20 }
 0x8e3   :  { %2304 = vrot.lane.b32.xlu0 %v7668_v4, %s6822_s21 }
 0x8e6   :  { %1906 = vrot.lane.b32.xlu1 %v7825_v46, %s6821_s20 }
 0x8ea   :  { %2306 = vrot.lane.b32.xlu1 %v7666_v10, %s6822_s21 }
 0x928   :  { %v7831_v19 = vpop.permute.xlu1 %1862 }
 0x929   :  { %v1865_v27 = vpop.permute.xlu0 %1864 }
 0x92a   :  { %v1934_v42 = vadd.f32 %v1865_v27, %v7693_v45 }
 0x92c   :  { %v1867_v23 = vpop.permute.xlu1 %1866  ;;  %v7835_v5 = vadd.f32 %v1934_v42, %v7087_v0 }
 0x92d   :  { %v1935_v4 = vadd.f32 %v1867_v23, %v7702_v40  ;;  %v1869_v30 = vpop.permute.xlu0 %1868 }
 0x92e   :  { %v1936_v11 = vadd.f32 %v1869_v30, %v7705_v48  ;;  %v1989_v10 = vsel %vm351_vm0, %v7835_v5, -inf }
 0x92f   :  { %v7840_v61 = vadd.f32 %v1935_v4, %v7115_v49  ;;  %v1583_v49 = vld [vmem:[%s9619_s0 + $0x51] sm:$0xff] }
 0x930   :  { %v1871_v36 = vpop.permute.xlu1 %1870  ;;  %v7847_v45 = vadd.f32 %v1936_v11, %v7113_v33  ;;  %v6422_v21 = vpack.c.bf16 %v1584_v43, %v1583_v49  ;;  %v9721_v11 = vld [vmem:[#allocation20_spill] sm:$0xff] }
 0x931   :  { %v1990_v51 = vsel %vm743_vm2, %v7840_v61, -inf  ;;  %v1937_v0 = vadd.f32 %v1871_v36, %v7714_v41  ;;  %v1873_v31 = vpop.permute.xlu0 %1872 }
 0x932   :  { %v1991_v40 = vmax.f32 %v1989_v10, %v1990_v51  ;;  %v1938_v53 = vadd.f32 %v1873_v31, %v7717_v62  ;;  %v1998_v41 = vsel %vm351_vm0, %v7847_v45, -inf  ;;  %6423 = vmatprep.subr.bf16.mxu1 %v6422_v21 }
 0x933   :  { %v7852_v48 = vadd.f32 %v1937_v0, %v7124_v28  ;;  %6425 = vmatpush3.bf16.msra.mxu1 %v6422_v21 }
 0x934   :  { %v1992_v34 = vrot.slane %v1991_v40, 4  ;;  %v1875_v33 = vpop.permute.xlu1 %1874  ;;  %v7865_v28 = vadd.f32 %v1938_v53, %v7122_v25 }
 0x935   :  { %v1999_v62 = vsel %vm743_vm2, %v7852_v48, -inf  ;;  %v1939_v59 = vadd.f32 %v1875_v33, %v7726_v20  ;;  %v1877_v12 = vpop.permute.xlu0 %1876  ;;  %v9720_v20 = vld [vmem:[#allocation18_spill] sm:$0xff] }
 0x936   :  { %v1993_v55 = vmax.f32 %v1991_v40, %v1992_v34  ;;  %v2000_v24 = vmax.f32 %v1998_v41, %v1999_v62  ;;  %v1940_v13 = vadd.f32 %v1877_v12, %v7729_v26  ;;  %v2007_v9 = vsel %vm351_vm0, %v7865_v28, -inf  ;;  %v9723_v12 = vld [vmem:[#allocation21_spill] sm:$0xff] }
 0x937   :  { %v7870_v14 = vadd.f32 %v1939_v59, %v9719_v22 }
 0x938   :  { %v1994_v6 = vrot.slane %v1993_v55, 2  ;;  %v2001_v47 = vrot.slane %v2000_v24, 4  ;;  %v1879_v3 = vpop.permute.xlu1 %1878  ;;  %v7877_v27 = vadd.f32 %v1940_v13, %v9720_v20 }
 0x939   :  { %v2008_v25 = vsel %vm743_vm2, %v7870_v14, -inf  ;;  %v1941_v42 = vadd.f32 %v1879_v3, %v7739_v38  ;;  %v1881_v26 = vpop.permute.xlu0 %1880  ;;  %v9722_v38 = vld [vmem:[#allocation19_spill] sm:$0xff] }
 0x93a   :  { %v1995_v23 = vmax.f32 %v1993_v55, %v1994_v6  ;;  %v2002_v4 = vmax.f32 %v2000_v24, %v2001_v47  ;;  %v2009_v30 = vmax.f32 %v2007_v9, %v2008_v25  ;;  %v1942_v10 = vadd.f32 %v1881_v26, %v7742_v32  ;;  %v9724_v25 = vld [vmem:[#allocation22_spill] sm:$0xff] }
 0x93b   :  { %v7881_v36 = vadd.f32 %v1941_v42, %v9721_v11  ;;  %v2016_v53 = vsel %vm351_vm0, %v7877_v27, -inf }
 0x93c   :  { %v1996_v51 = vrot.slane %v1995_v23, 1  ;;  %v2003_v0 = vrot.slane %v2002_v4, 2  ;;  %v2010_v31 = vrot.slane %v2009_v30, 4  ;;  %v1883_v40 = vpop.permute.xlu1 %1882  ;;  %v7889_v43 = vadd.f32 %v1942_v10, %v9722_v38  ;;  %v9725_v10 = vld [vmem:[#allocation24_spill] sm:$0xff] }
 0x93d   :  { %v2017_v49 = vsel %vm743_vm2, %v7881_v36, -inf  ;;  %v1943_v34 = vadd.f32 %v1883_v40, %v7751_v15  ;;  %v1885_v33 = vpop.permute.xlu0 %1884 }
 0x93e   :  { %v1997_v21 = vmax.f32 %v1995_v23, %v1996_v51  ;;  %v2004_v41 = vmax.f32 %v2002_v4, %v2003_v0  ;;  %v2011_v62 = vmax.f32 %v2009_v30, %v2010_v31  ;;  %v2018_v32 = vmax.f32 %v2016_v53, %v2017_v49 }
 0x93f   :  { %v2025_v59 = vsel %vm351_vm0, %v7889_v43, -inf  ;;  %v7895_v55 = vadd.f32 %v1943_v34, %v9723_v12  ;;  %v1944_v24 = vadd.f32 %v1885_v33, %v7754_v37 }
 0x940   :  { %v2090_v13 = vsub.f32 %v7835_v5, %v1997_v21  ;;  %v2091_v22 = vsub.f32 %v7840_v61, %v1997_v21  ;;  %v2005_v6 = vrot.slane %v2004_v41, 1  ;;  %v2012_v47 = vrot.slane %v2011_v62, 2  ;;  %v1887_v15 = vpop.permute.xlu1 %1886 }
 0x941   :  { %v2019_v3 = vrot.slane %v2018_v32, 4  ;;  %v2026_v9 = vsel %vm743_vm2, %v7895_v55, -inf  ;;  %v7903_v20 = vadd.f32 %v1944_v24, %v9724_v25  ;;  %v1945_v42 = vadd.f32 %v1887_v15, %v7763_v44  ;;  %v1893_v30 = vpop.permute.xlu0 %1892 }
 0x942   :  { %v2116_v26 = vmul.f32 1.442695, %v2090_v13  ;;  %v2118_v23 = vmul.f32 1.442695, %v2091_v22  ;;  %v2006_v4 = vmax.f32 %v2004_v41, %v2005_v6  ;;  %v2013_v37 = vmax.f32 %v2011_v62, %v2012_v47  ;;  %v9726_v47 = vld [vmem:[#allocation23_spill] sm:$0xff] }
 0x943   :  { %v2020_v5 = vmax.f32 %v2018_v32, %v2019_v3  ;;  %v2027_v11 = vmax.f32 %v2025_v59, %v2026_v9  ;;  %v2034_v61 = vsel %vm351_vm0, %v7903_v20, -inf  ;;  %v7909_v51 = vadd.f32 %v1945_v42, %v9725_v10 }
 0x944   :  { %6559 = vpow2.f32 %v2116_v26  ;;  %v2092_v0 = vsub.f32 %v7847_v45, %v2006_v4  ;;  %v2093_v31 = vsub.f32 %v7852_v48, %v2006_v4  ;;  %v2014_v40 = vrot.slane %v2013_v37, 1  ;;  %v1895_v44 = vpop.permute.xlu1 %1894 }
 0x945   :  { %6561 = vpow2.f32 %v2118_v23  ;;  %v2021_v53 = vrot.slane %v2020_v5, 2  ;;  %v2028_v49 = vrot.slane %v2027_v11, 4  ;;  %v2035_v38 = vsel %vm743_vm2, %v7909_v51, -inf  ;;  %v1897_v13 = vpop.permute.xlu0 %1896 }
 0x946   :  { %v2120_v34 = vmul.f32 1.442695, %v2092_v0  ;;  %v2122_v33 = vmul.f32 1.442695, %v2093_v31  ;;  %v2015_v21 = vmax.f32 %v2013_v37, %v2014_v40  ;;  %v2036_v41 = vmax.f32 %v2034_v61, %v2035_v38  ;;  %v9728_v40 = vld [vmem:[#allocation25_spill] sm:$0xff] }
 0x947   :  { %v2022_v62 = vmax.f32 %v2020_v5, %v2021_v53  ;;  %v2029_v32 = vmax.f32 %v2027_v11, %v2028_v49  ;;  %v1948_v59 = vadd.f32 %v1893_v30, %v7766_v39  ;;  %v1949_v45 = vadd.f32 %v1895_v44, %v7774_v60  ;;  %v9727_v39 = vld [vmem:[#allocation26_spill] sm:$0xff] }
 0x948   :  { %6563 = vpow2.f32 %v2120_v34  ;;  %v2094_v48 = vsub.f32 %v7865_v28, %v2015_v21  ;;  %v2095_v12 = vsub.f32 %v7870_v14, %v2015_v21  ;;  %v2037_v24 = vrot.slane %v2036_v41, 4  ;;  %v1899_v3 = vpop.permute.xlu1 %1898 }
 0x949   :  { %6565 = vpow2.f32 %v2122_v33  ;;  %v2023_v22 = vrot.slane %v2022_v62, 1  ;;  %v2030_v6 = vrot.slane %v2029_v32, 2  ;;  %v7920_v15 = vadd.f32 %v1948_v59, %v9726_v47 }
 0x94a   :  { %v2124_v9 = vmul.f32 1.442695, %v2094_v48  ;;  %v2126_v25 = vmul.f32 1.442695, %v2095_v12  ;;  %v2038_v42 = vmax.f32 %v2036_v41, %v2037_v24  ;;  %v7923_v26 = vadd.f32 %v1949_v45, %v9727_v39 }
 0x94b   :  { %v2024_v60 = vmax.f32 %v2022_v62, %v2023_v22  ;;  %v2031_v23 = vmax.f32 %v2029_v32, %v2030_v6  ;;  %v2052_v28 = vsel %vm351_vm0, %v7920_v15, -inf  ;;  %v1950_v14 = vadd.f32 %v1897_v13, %v7777_v8  ;;  %v9729_v8 = vld [vmem:[#allocation27_spill] sm:$0xff] }
 0x94c   :  { %6567 = vpow2.f32 %v2124_v9  ;;  %v2039_v4 = vrot.slane %v2038_v42, 2  ;;  %v2053_v37 = vsel %vm743_vm2, %v7923_v26, -inf  ;;  %v1951_v30 = vadd.f32 %v1899_v3, %v7785_v56 }
 0x94d   :  { %6569 = vpow2.f32 %v2126_v25  ;;  %v2096_v5 = vsub.f32 %v7877_v27, %v2024_v60  ;;  %v2097_v11 = vsub.f32 %v7881_v36, %v2024_v60  ;;  %v2032_v61 = vrot.slane %v2031_v23, 1 }
 0x94e   :  { %v7933_v10 = vpop.eup %6559  ;;  %v2040_v0 = vmax.f32 %v2038_v42, %v2039_v4  ;;  %v2054_v31 = vmax.f32 %v2052_v28, %v2053_v37  ;;  %v7936_v44 = vadd.f32 %v1950_v14, %v9728_v40  ;;  %v7939_v53 = vadd.f32 %v1951_v30, %v9729_v8  ;;  %v1891_v40 = vpop.permute.xlu1 %1890 }
 0x94f   :  { %v7941_v49 = vpop.eup %6561  ;;  %v2169_v56 = vsel %vm351_vm0, %v7933_v10, 0.0  ;;  %v2128_v38 = vmul.f32 1.442695, %v2096_v5  ;;  %v2033_v27 = vmax.f32 %v2031_v23, %v2032_v61  ;;  %v2130_v21 = vmul.f32 1.442695, %v2097_v11  ;;  %v1889_v61 = vpop.permute.xlu0 %1888 }
 0x950   :  { %v2170_v36 = vsel %vm743_vm2, %v7941_v49, 0.0  ;;  %v2041_v34 = vrot.slane %v2040_v0, 1  ;;  %v2055_v33 = vrot.slane %v2054_v31, 4  ;;  %v2061_v32 = vsel %vm351_vm0, %v7936_v44, -inf }
 0x951   :  { %v2098_v41 = vsub.f32 %v7889_v43, %v2033_v27  ;;  %v2099_v62 = vsub.f32 %v7895_v55, %v2033_v27  ;;  %v2171_v45 = vadd.f32 %v2170_v36, %v2169_v56  ;;  %v2062_v24 = vsel %vm743_vm2, %v7939_v53, -inf }
 0x952   :  { %v7951_v59 = vpop.eup %6563  ;;  %v2042_v48 = vmax.f32 %v2040_v0, %v2041_v34  ;;  %v2056_v12 = vmax.f32 %v2054_v31, %v2055_v33  ;;  %6571 = vpow2.f32 %v2128_v38  ;;  %v2063_v25 = vmax.f32 %v2061_v32, %v2062_v24 }
 0x953   :  { %v7955_v13 = vpop.eup %6565  ;;  %v2178_v22 = vsel %vm351_vm0, %v7951_v59, 0.0  ;;  %v2132_v43 = vmul.f32 1.442695, %v2098_v41  ;;  %v2134_v6 = vmul.f32 1.442695, %v2099_v62  ;;  %6573 = vpow2.f32 %v2130_v21 }
 0x954   :  { %v2179_v55 = vsel %vm743_vm2, %v7955_v13, 0.0  ;;  %v2100_v47 = vsub.f32 %v7903_v20, %v2042_v48  ;;  %v2101_v3 = vsub.f32 %v7909_v51, %v2042_v48  ;;  %v2057_v9 = vrot.slane %v2056_v12, 2 }
 0x955   :  { %v2172_v14 = vrot.slane %v2171_v45, 4  ;;  %v2180_v4 = vadd.f32 %v2179_v55, %v2178_v22  ;;  %6575 = vpow2.f32 %v2132_v43  ;;  %v2064_v37 = vrot.slane %v2063_v25, 4  ;;  %v9730_v22 = vld [vmem:[#allocation28_spill] sm:$0xff]  ;;  %v1861_v43 = vpop.permute.xlu1 %1860  ;;  %v9731_v55 = vld [vmem:[#allocation31_spill] sm:$0xff] }
 0x956   :  { %v7963_v42 = vpop.eup %6567  ;;  %v2136_v39 = vmul.f32 1.442695, %v2100_v47  ;;  %v2138_v60 = vmul.f32 1.442695, %v2101_v3  ;;  %v2058_v23 = vmax.f32 %v2056_v12, %v2057_v9  ;;  %6577 = vpow2.f32 %v2134_v6 }
 0x957   :  { %v7965_v28 = vpop.eup %6569  ;;  %v2187_v20 = vsel %vm351_vm0, %v7963_v42, 0.0  ;;  %v2065_v11 = vmax.f32 %v2063_v25, %v2064_v37  ;;  %v2173_v0 = vadd.f32 %v2172_v14, %v2171_v45  ;;  %v2181_v31 = vrot.slane %v2180_v4, 4 }
 0x958   :  { %v2059_v30 = vrot.slane %v2058_v23, 1  ;;  %v2188_v51 = vsel %vm743_vm2, %v7965_v28, 0.0  ;;  %6579 = vpow2.f32 %v2136_v39  ;;  %v1946_v34 = vadd.f32 %v1889_v61, %v7788_v16  ;;  %v9732_v39 = vld [vmem:[#allocation29_spill] sm:$0xff] }
 0x959   :  { %6581 = vpow2.f32 %v2138_v60  ;;  %v2189_v8 = vadd.f32 %v2188_v51, %v2187_v20  ;;  %v2066_v27 = vrot.slane %v2065_v11, 2  ;;  %v1947_v62 = vadd.f32 %v1891_v40, %v7796_v50 }
 0x95a   :  { %v2060_v5 = vmax.f32 %v2058_v23, %v2059_v30  ;;  %v1933_v45 = vadd.f32 %v7831_v19, %v7690_v35  ;;  %v2174_v48 = vrot.slane %v2173_v0, 2  ;;  %v2182_v12 = vadd.f32 %v2181_v31, %v2180_v4  ;;  %v1901_v31 = vpop.permute.xlu0 %1900 }
 0x95b   :  { %v2067_v41 = vmax.f32 %v2065_v11, %v2066_v27  ;;  %v7984_v16 = vadd.f32 %v1946_v34, %v9730_v22  ;;  %v7993_v47 = vadd.f32 %v1947_v62, %v9731_v55 }
 0x95c   :  { %v2104_v56 = vsub.f32 %v7920_v15, %v2060_v5  ;;  %v2105_v38 = vsub.f32 %v7923_v26, %v2060_v5  ;;  %v7973_v36 = vpop.eup %6571  ;;  %v2190_v15 = vrot.slane %v2189_v8, 4  ;;  %v2175_v9 = vadd.f32 %v2174_v48, %v2173_v0 }
 0x95d   :  { %v7977_v32 = vpop.eup %6573  ;;  %v2068_v26 = vrot.slane %v2067_v41, 1  ;;  %v2196_v50 = vsel %vm351_vm0, %v7973_v36, 0.0  ;;  %v8000_v60 = vadd.f32 %v1933_v45, %v9732_v39  ;;  %v2183_v23 = vrot.slane %v2182_v12, 2 }
 0x95e   :  { %v2144_v33 = vmul.f32 1.442695, %v2104_v56  ;;  %v2146_v21 = vmul.f32 1.442695, %v2105_v38  ;;  %v2197_v35 = vsel %vm743_vm2, %v7977_v32, 0.0  ;;  %v2191_v14 = vadd.f32 %v2190_v15, %v2189_v8  ;;  %v1903_v56 = vpop.permute.xlu1 %1902  ;;  %v1905_v39 = vpop.permute.xlu0 %1904 }
 0x95f   :  { %v7981_v24 = vpop.eup %6575  ;;  %v2069_v19 = vmax.f32 %v2067_v41, %v2068_v26  ;;  %v2198_v37 = vadd.f32 %v2197_v35, %v2196_v50  ;;  %v2043_v20 = vsel %vm351_vm0, %v7984_v16, -inf  ;;  %v2044_v51 = vsel %vm743_vm2, %v7993_v47, -inf  ;;  %v9733_v50 = vld [vmem:[#allocation7_spill] sm:$0xff] }
 0x960   :  { %6583 = vpow2.f32 %v2144_v33  ;;  %v7986_v6 = vpop.eup %6577  ;;  %v2205_v5 = vsel %vm351_vm0, %v7981_v24, 0.0  ;;  %v2045_v0 = vmax.f32 %v2043_v20, %v2044_v51  ;;  %v2176_v40 = vrot.slane %v2175_v9, 1  ;;  %v9734_v51 = vld [vmem:[#allocation30_spill] sm:$0xff] }
 0x961   :  { %6585 = vpow2.f32 %v2146_v21  ;;  %v2106_v4 = vsub.f32 %v7936_v44, %v2069_v19  ;;  %v2107_v30 = vsub.f32 %v7939_v53, %v2069_v19  ;;  %v2206_v11 = vsel %vm743_vm2, %v7986_v6, 0.0 }
 0x962   :  { %v7995_v3 = vpop.eup %6579  ;;  %v2184_v38 = vadd.f32 %v2183_v23, %v2182_v12  ;;  %v2192_v27 = vrot.slane %v2191_v14, 2  ;;  %v2046_v34 = vrot.slane %v2045_v0, 4  ;;  %v2199_v33 = vrot.slane %v2198_v37, 4 }
 0x963   :  { %v7997_v25 = vpop.eup %6581  ;;  %v2148_v61 = vmul.f32 1.442695, %v2106_v4  ;;  %v2214_v44 = vsel %vm351_vm0, %v7995_v3, 0.0  ;;  %v2150_v8 = vmul.f32 1.442695, %v2107_v30  ;;  %v2207_v21 = vadd.f32 %v2206_v11, %v2205_v5 }
 0x964   :  { %v2215_v53 = vsel %vm743_vm2, %v7997_v25, 0.0  ;;  %v1932_v41 = vadd.f32 %v1861_v43, %v7808_v7  ;;  %v1952_v48 = vadd.f32 %v1901_v31, %v7799_v52  ;;  %v1981_v26 = vsel %vm743_vm2, %v8000_v60, -inf }
 0x965   :  { %6587 = vpow2.f32 %v2148_v61  ;;  %v2216_v45 = vadd.f32 %v2215_v53, %v2214_v44  ;;  %v2177_v22 = vadd.f32 %v2176_v40, %v2175_v9  ;;  %v2047_v12 = vmax.f32 %v2045_v0, %v2046_v34  ;;  %v1907_v9 = vpop.permute.xlu1 %1906 }
 0x966   :  { %6589 = vpow2.f32 %v2150_v8  ;;  %v8025_v35 = vadd.f32 %v1932_v41, %v9733_v50  ;;  %v2185_v19 = vrot.slane %v2184_v38, 1  ;;  %v2193_v55 = vadd.f32 %v2192_v27, %v2191_v14 }
 0x967   :  { %v2200_v52 = vadd.f32 %v2199_v33, %v2198_v37  ;;  %v2208_v23 = vrot.slane %v2207_v21, 4  ;;  %v2048_v4 = vrot.slane %v2047_v12, 2  ;;  %v2217_v20 = vrot.slane %v2216_v45, 4 }
 0x968   :  { %v1980_v30 = vsel %vm351_vm0, %v8025_v35, -inf  ;;  %v8034_v5 = vadd.f32 %v1952_v48, %v9734_v51  ;;  %6591 = vrcp.f32 %v2177_v22  ;;  %v1954_v0 = vadd.f32 %v1905_v39, %v7811_v54 }
 0x969   :  { %v1982_v11 = vmax.f32 %v1980_v30, %v1981_v26  ;;  %v2049_v61 = vmax.f32 %v2047_v12, %v2048_v4  ;;  %v2186_v31 = vadd.f32 %v2185_v19, %v2184_v38  ;;  %v1953_v37 = vadd.f32 %v1903_v56, %v7818_v29 }
 0x96a   :  { %v8017_v62 = vpop.eup %6583  ;;  %v1955_v44 = vadd.f32 %v1907_v9, %v7825_v46  ;;  %v2194_v53 = vrot.slane %v2193_v55, 1  ;;  %v2201_v8 = vrot.slane %v2200_v52, 2  ;;  %v2209_v27 = vadd.f32 %v2208_v23, %v2207_v21 }
 0x96b   :  { %v8020_v15 = vpop.eup %6585  ;;  %v2232_v7 = vsel %vm351_vm0, %v8017_v62, 0.0  ;;  %v1983_v40 = vrot.slane %v1982_v11, 4  ;;  %v2050_v34 = vrot.slane %v2049_v61, 1  ;;  %v2218_v41 = vadd.f32 %v2217_v20, %v2216_v45 }
 0x96c   :  { %v2233_v43 = vsel %vm743_vm2, %v8020_v15, 0.0  ;;  %v2070_v48 = vsel %vm351_vm0, %v8034_v5, -inf  ;;  %v8044_v22 = vadd.f32 %v1953_v37, %v7419_v63  ;;  %v8051_v56 = vadd.f32 %v1954_v0, %v7389_v2 }
 0x96d   :  { %v2234_v14 = vadd.f32 %v2233_v43, %v2232_v7  ;;  %v1984_v26 = vmax.f32 %v1982_v11, %v1983_v40  ;;  %v2051_v46 = vmax.f32 %v2049_v61, %v2050_v34  ;;  %v8058_v63 = vadd.f32 %v1955_v44, %v7430_v17 }
 0x96e   :  { %v2071_v12 = vsel %vm743_vm2, %v8044_v22, -inf  ;;  %v2210_v50 = vrot.slane %v2209_v27, 2  ;;  %v2202_v39 = vadd.f32 %v2201_v8, %v2200_v52  ;;  %v2219_v30 = vrot.slane %v2218_v41, 2 }
 0x96f   :  { %v8039_v33 = vpop.eup %6587  ;;  %v2235_v38 = vrot.slane %v2234_v14, 4  ;;  %v1985_v45 = vrot.slane %v1984_v26, 2  ;;  %v2102_v7 = vsub.f32 %v7984_v16, %v2051_v46  ;;  %v2103_v43 = vsub.f32 %v7993_v47, %v2051_v46 }
 0x970   :  { %v8046_v54 = vpop.eup %6589  ;;  %v2241_v29 = vsel %vm351_vm0, %v8039_v33, 0.0  ;;  %v2072_v2 = vmax.f32 %v2070_v48, %v2071_v12  ;;  %v2080_v4 = vsel %vm743_vm2, %v8058_v63, -inf  ;;  %v2079_v51 = vsel %vm351_vm0, %v8051_v56, -inf }
 0x971   :  { %v2242_v21 = vsel %vm743_vm2, %v8046_v54, 0.0  ;;  %v1986_v23 = vmax.f32 %v1984_v26, %v1985_v45  ;;  %v2236_v9 = vadd.f32 %v2235_v38, %v2234_v14  ;;  %v2140_v17 = vmul.f32 1.442695, %v2102_v7 }
 0x972   :  { %v2243_v19 = vadd.f32 %v2242_v21, %v2241_v29  ;;  %v2142_v11 = vmul.f32 1.442695, %v2103_v43  ;;  %v2073_v0 = vrot.slane %v2072_v2, 4  ;;  %v6592_v40 = vpop.eup %6591  ;;  %6593 = vrcp.f32 %v2186_v31 }
 0x973   :  { %v1987_v61 = vrot.slane %v1986_v23, 1  ;;  %v2211_v16 = vadd.f32 %v2210_v50, %v2209_v27  ;;  %v2081_v47 = vmax.f32 %v2079_v51, %v2080_v4  ;;  %6595 = vpow2.f32 %v2140_v17 }
 0x974   :  { %v2244_v20 = vrot.slane %v2243_v19, 4  ;;  %v2074_v44 = vmax.f32 %v2072_v2, %v2073_v0  ;;  %v2195_v8 = vadd.f32 %v2194_v53, %v2193_v55  ;;  %v2203_v34 = vrot.slane %v2202_v39, 1 }
 0x975   :  { %v1988_v37 = vmax.f32 %v1986_v23, %v1987_v61  ;;  %v2220_v48 = vadd.f32 %v2219_v30, %v2218_v41  ;;  %v2237_v14 = vrot.slane %v2236_v9, 2  ;;  %6597 = vpow2.f32 %v2142_v11 }
 0x976   :  { %v2245_v52 = vadd.f32 %v2244_v20, %v2243_v19  ;;  %v2075_v29 = vrot.slane %v2074_v44, 2  ;;  %v2082_v46 = vrot.slane %v2081_v47, 4  ;;  %v2212_v21 = vrot.slane %v2211_v16, 1 }
 0x977   :  { %v2088_v26 = vsub.f32 %v8025_v35, %v1988_v37  ;;  %v2089_v38 = vsub.f32 %v8000_v60, %v1988_v37  ;;  %6599 = vrcp.f32 %v2195_v8  ;;  %v2204_v19 = vadd.f32 %v2203_v34, %v2202_v39 }
 0x978   :  { %v2246_v45 = vrot.slane %v2245_v52, 2  ;;  %v2076_v12 = vmax.f32 %v2074_v44, %v2075_v29  ;;  %v2083_v50 = vmax.f32 %v2081_v47, %v2082_v46  ;;  %v2221_v7 = vrot.slane %v2220_v48, 1 }
 0x979   :  { %v2112_v31 = vmul.f32 1.442695, %v2088_v26  ;;  %v2114_v27 = vmul.f32 1.442695, %v2089_v38  ;;  %v2238_v55 = vadd.f32 %v2237_v14, %v2236_v9  ;;  %v2213_v43 = vadd.f32 %v2212_v21, %v2211_v16 }
 0x97a   :  { %v2077_v53 = vrot.slane %v2076_v12, 1  ;;  %v2084_v41 = vrot.slane %v2083_v50, 2  ;;  %v2247_v35 = vadd.f32 %v2246_v45, %v2245_v52  ;;  %v2222_v30 = vadd.f32 %v2221_v7, %v2220_v48  ;;  %v8081_v48 = vpop.permute.xlu0 %2304 }
 0x97b   :  { %6601 = vpow2.f32 %v2112_v31  ;;  %v2239_v20 = vrot.slane %v2238_v55, 1  ;;  %v2282_v61 = vmul.f32 %v6592_v40, %v7933_v10  ;;  %v2283_v44 = vmul.f32 %v6592_v40, %v7941_v49  ;;  %v8093_v31 = vpop.permute.xlu1 %2306 }
 0x97c   :  { %6603 = vpow2.f32 %v2114_v27  ;;  %v6594_v23 = vpop.eup %6593  ;;  %v2078_v60 = vmax.f32 %v2076_v12, %v2077_v53  ;;  %v2085_v2 = vmax.f32 %v2083_v50, %v2084_v41  ;;  %v2248_v0 = vrot.slane %v2247_v35, 1 }
 0x97d   :  { %v8068_v4 = vpop.eup %6595  ;;  %6605 = vrcp.f32 %v2204_v19  ;;  %v2240_v8 = vadd.f32 %v2239_v20, %v2238_v55  ;;  %v2285_v38 = vmul.f32 %v6594_v23, %v7955_v13  ;;  %v2312_v49 = vmul.f32 %v8081_v48, %v2282_v61 }
 0x97e   :  { %v2223_v51 = vsel %vm351_vm0, %v8068_v4, 0.0  ;;  %v2108_v39 = vsub.f32 %v8034_v5, %v2078_v60  ;;  %v2109_v9 = vsub.f32 %v8044_v22, %v2078_v60  ;;  %v2086_v17 = vrot.slane %v2085_v2, 1 }
 0x97f   :  { %v8074_v11 = vpop.eup %6597  ;;  %6607 = vrcp.f32 %v2213_v43  ;;  %v2284_v22 = vmul.f32 %v6594_v23, %v7951_v59  ;;  %v2249_v46 = vadd.f32 %v2248_v0, %v2247_v35  ;;  %v2313_v13 = vmul.f32 %v8093_v31, %v2283_v44 }
 0x980   :  { %v2224_v16 = vsel %vm743_vm2, %v8074_v11, 0.0  ;;  %v2152_v47 = vmul.f32 1.442695, %v2108_v39  ;;  %v2154_v52 = vmul.f32 1.442695, %v2109_v9  ;;  %v2087_v37 = vmax.f32 %v2085_v2, %v2086_v17 }
 0x981   :  { %6609 = vrcp.f32 %v2222_v30  ;;  %v2225_v5 = vadd.f32 %v2224_v16, %v2223_v51  ;;  %v6600_v34 = vpop.eup %6599  ;;  %v2314_v53 = vmul.f32 %v8081_v48, %v2284_v22  ;;  %v2315_v35 = vmul.f32 %v8093_v31, %v2285_v38 }
 0x982   :  { %6611 = vpow2.f32 %v2152_v47  ;;  %v2110_v10 = vsub.f32 %v8051_v56, %v2087_v37  ;;  %v2111_v14 = vsub.f32 %v8058_v63, %v2087_v37  ;;  %v2286_v50 = vmul.f32 %v6600_v34, %v7963_v42 }
 0x983   :  { %v2226_v29 = vrot.slane %v2225_v5, 4  ;;  %6613 = vpow2.f32 %v2154_v52  ;;  %v2287_v19 = vmul.f32 %v6600_v34, %v7965_v28  ;;  %v2343_v23 = vsel %vm351_vm0, %v2312_v49, 0.0 }
 0x984   :  { %v2156_v21 = vmul.f32 1.442695, %v2110_v10  ;;  %v2158_v45 = vmul.f32 1.442695, %v2111_v14  ;;  %6615 = vrcp.f32 %v2240_v8  ;;  %v2344_v60 = vsel %vm743_vm2, %v2313_v13, 0.0 }
 0x985   :  { %v8085_v26 = vpop.eup %6601  ;;  %v2227_v56 = vadd.f32 %v2226_v29, %v2225_v5  ;;  %v2316_v51 = vmul.f32 %v8081_v48, %v2286_v50  ;;  %v2317_v39 = vmul.f32 %v8093_v31, %v2287_v19  ;;  %v2345_v16 = vadd.f32 %v2344_v60, %v2343_v23 }
 0x986   :  { %v8089_v40 = vpop.eup %6603  ;;  %v2160_v59 = vsel %vm351_vm0, %v8085_v26, 0.0  ;;  %6617 = vpow2.f32 %v2156_v21  ;;  %v2353_v37 = vsel %vm743_vm2, %v2315_v35, 0.0 }
 0x987   :  { %v2161_v63 = vsel %vm743_vm2, %v8089_v40, 0.0  ;;  %v6606_v12 = vpop.eup %6605  ;;  %v2228_v7 = vrot.slane %v2227_v56, 2  ;;  %6619 = vpow2.f32 %v2158_v45  ;;  %v2361_v22 = vsel %vm351_vm0, %v2316_v51, 0.0 }
 0x988   :  { %v2162_v27 = vadd.f32 %v2161_v63, %v2160_v59  ;;  %6621 = vrcp.f32 %v2249_v46  ;;  %v2288_v2 = vmul.f32 %v6606_v12, %v7973_v36  ;;  %v2289_v28 = vmul.f32 %v6606_v12, %v7977_v32 }
 0x989   :  { %v6608_v41 = vpop.eup %6607  ;;  %v2229_v43 = vadd.f32 %v2228_v7, %v2227_v56  ;;  %v2352_v32 = vsel %vm351_vm0, %v2314_v53, 0.0  ;;  %v2362_v10 = vsel %vm743_vm2, %v2317_v39, 0.0  ;;  %v2346_v49 = vrot.slane %v2345_v16, 4 }
 0x98a   :  { %v2163_v55 = vrot.slane %v2162_v27, 4  ;;  %v2290_v17 = vmul.f32 %v6608_v41, %v7981_v24  ;;  %v2291_v61 = vmul.f32 %v6608_v41, %v7986_v6  ;;  %v2318_v29 = vmul.f32 %v8081_v48, %v2288_v2 }
 0x98b   :  { %v6610_v42 = vpop.eup %6609  ;;  %v2230_v20 = vrot.slane %v2229_v43, 1  ;;  %v2319_v21 = vmul.f32 %v8093_v31, %v2289_v28  ;;  %v2363_v12 = vadd.f32 %v2362_v10, %v2361_v22  ;;  %v8139_v41 = vadd.f32 %v2346_v49, %v2345_v16 }
 0x98c   :  { %v2164_v30 = vadd.f32 %v2163_v55, %v2162_v27  ;;  %v8108_v9 = vpop.eup %6611  ;;  %v2292_v44 = vmul.f32 %v6610_v42, %v7995_v3  ;;  %v2293_v8 = vmul.f32 %v6610_v42, %v7997_v25  ;;  %v2354_v3 = vadd.f32 %v2353_v37, %v2352_v32 }
 0x98d   :  { %v8112_v47 = vpop.eup %6613  ;;  %v2231_v36 = vadd.f32 %v2230_v20, %v2229_v43  ;;  %v2250_v52 = vsel %vm351_vm0, %v8108_v9, 0.0  ;;  %v2320_v45 = vmul.f32 %v8081_v48, %v2290_v17  ;;  %v2321_v27 = vmul.f32 %v8093_v31, %v2291_v61 }
 0x98e   :  { %v2165_v0 = vrot.slane %v2164_v30, 2  ;;  %v2251_v24 = vsel %vm743_vm2, %v8112_v47, 0.0  ;;  %v6616_v6 = vpop.eup %6615  ;;  %v2322_v7 = vmul.f32 %v8081_v48, %v2292_v44  ;;  %v2323_v55 = vmul.f32 %v8093_v31, %v2293_v8 }
 0x98f   :  { %6623 = vrcp.f32 %v2231_v36  ;;  %v2252_v34 = vadd.f32 %v2251_v24, %v2250_v52  ;;  %v2296_v53 = vmul.f32 %v6616_v6, %v8017_v62  ;;  %v2355_v43 = vrot.slane %v2354_v3, 4 }
 0x990   :  { %v2166_v5 = vadd.f32 %v2165_v0, %v2164_v30  ;;  %v8124_v14 = vpop.eup %6617  ;;  %v2297_v30 = vmul.f32 %v6616_v6, %v8020_v15  ;;  %v2364_v42 = vrot.slane %v2363_v12, 4  ;;  %v2370_v28 = vsel %vm351_vm0, %v2318_v29, 0.0 }
 0x991   :  { %v8127_v46 = vpop.eup %6619  ;;  %v2253_v25 = vrot.slane %v2252_v34, 4  ;;  %v2259_v59 = vsel %vm351_vm0, %v8124_v14, 0.0  ;;  %v2371_v20 = vsel %vm743_vm2, %v2319_v21, 0.0  ;;  %v2379_v62 = vsel %vm351_vm0, %v2320_v45, 0.0 }
 0x992   :  { %v2167_v38 = vrot.slane %v2166_v5, 1  ;;  %v6622_v56 = vpop.eup %6621  ;;  %v2260_v13 = vsel %vm743_vm2, %v8127_v46, 0.0  ;;  %v2380_v17 = vsel %vm743_vm2, %v2321_v27, 0.0  ;;  %v2348_v61 = vrot.slane %v8139_v41, 2 }
 0x993   :  { %v2254_v50 = vadd.f32 %v2253_v25, %v2252_v34  ;;  %v2261_v19 = vadd.f32 %v2260_v13, %v2259_v59  ;;  %v2298_v35 = vmul.f32 %v6622_v56, %v8039_v33  ;;  %v2299_v23 = vmul.f32 %v6622_v56, %v8046_v54 }
 0x994   :  { %v2168_v63 = vadd.f32 %v2167_v38, %v2166_v5  ;;  %v2356_v33 = vadd.f32 %v2355_v43, %v2354_v3  ;;  %v2388_v54 = vsel %vm351_vm0, %v2322_v7, 0.0  ;;  %v2389_v0 = vsel %vm743_vm2, %v2323_v55, 0.0 }
 0x995   :  { %v2255_v60 = vrot.slane %v2254_v50, 2  ;;  %v2262_v2 = vrot.slane %v2261_v19, 4  ;;  %v2328_v52 = vmul.f32 %v8081_v48, %v2298_v35  ;;  %v2329_v32 = vmul.f32 %v8093_v31, %v2299_v23 }
 0x996   :  { %6625 = vrcp.f32 %v2168_v63  ;;  %v2372_v8 = vadd.f32 %v2371_v20, %v2370_v28  ;;  %v2381_v5 = vadd.f32 %v2380_v17, %v2379_v62  ;;  %v2365_v34 = vadd.f32 %v2364_v42, %v2363_v12 }
 0x997   :  { %v2256_v51 = vadd.f32 %v2255_v60, %v2254_v50  ;;  %v2263_v39 = vadd.f32 %v2262_v2, %v2261_v19  ;;  %v2390_v22 = vadd.f32 %v2389_v0, %v2388_v54  ;;  %v2326_v29 = vmul.f32 %v8081_v48, %v2296_v53 }
 0x998   :  { %v2327_v49 = vmul.f32 %v8093_v31, %v2297_v30  ;;  %v2373_v59 = vrot.slane %v2372_v8, 4  ;;  %v2382_v21 = vrot.slane %v2381_v5, 4  ;;  %v2357_v23 = vrot.slane %v2356_v33, 2 }
 0x999   :  { %v6624_v16 = vpop.eup %6623  ;;  %v2257_v15 = vrot.slane %v2256_v51, 1  ;;  %v2264_v36 = vrot.slane %v2263_v39, 2  ;;  %v2391_v50 = vrot.slane %v2390_v22, 4  ;;  %v2406_v19 = vsel %vm351_vm0, %v2326_v29, 0.0 }
 0x99a   :  { %v2295_v37 = vmul.f32 %v6624_v16, %v8074_v11  ;;  %v2294_v44 = vmul.f32 %v6624_v16, %v8068_v4  ;;  %v2415_v11 = vsel %vm351_vm0, %v2328_v52, 0.0  ;;  %v2416_v4 = vsel %vm743_vm2, %v2329_v32, 0.0 }
 0x99b   :  { %v2258_v24 = vadd.f32 %v2257_v15, %v2256_v51  ;;  %v2265_v6 = vadd.f32 %v2264_v36, %v2263_v39  ;;  %v2407_v7 = vsel %vm743_vm2, %v2327_v49, 0.0  ;;  %v2417_v55 = vadd.f32 %v2416_v4, %v2415_v11 }
 0x99c   :  { %v2324_v10 = vmul.f32 %v8081_v48, %v2294_v44  ;;  %v2325_v38 = vmul.f32 %v8093_v31, %v2295_v37  ;;  %v2366_v60 = vrot.slane %v2365_v34, 2  ;;  %v2374_v2 = vadd.f32 %v2373_v59, %v2372_v8 }
 0x99d   :  { %6627 = vrcp.f32 %v2258_v24  ;;  %v2266_v3 = vrot.slane %v2265_v6, 1  ;;  %v2383_v30 = vadd.f32 %v2382_v21, %v2381_v5  ;;  %v2408_v42 = vadd.f32 %v2407_v7, %v2406_v19 }
 0x99e   :  { %v2397_v45 = vsel %vm351_vm0, %v2324_v10, 0.0  ;;  %v2398_v56 = vsel %vm743_vm2, %v2325_v38, 0.0  ;;  %v2349_v20 = vadd.f32 %v2348_v61, %v8139_v41  ;;  %v2392_v51 = vadd.f32 %v2391_v50, %v2390_v22 }
 0x99f   :  { %v2267_v27 = vadd.f32 %v2266_v3, %v2265_v6  ;;  %v2399_v12 = vadd.f32 %v2398_v56, %v2397_v45  ;;  %v2418_v62 = vrot.slane %v2417_v55, 4  ;;  %v2358_v54 = vadd.f32 %v2357_v23, %v2356_v33 }
 0x9a0   :  { %v6626_v25 = vpop.eup %6625  ;;  %v2367_v16 = vadd.f32 %v2366_v60, %v2365_v34  ;;  %v2375_v15 = vrot.slane %v2374_v2, 2  ;;  %v2384_v36 = vrot.slane %v2383_v30, 2  ;;  %v2409_v52 = vrot.slane %v2408_v42, 4 }
 0x9a1   :  { %v2280_v63 = vmul.f32 %v6626_v25, %v8085_v26  ;;  %v2281_v13 = vmul.f32 %v6626_v25, %v8089_v40  ;;  %6629 = vrcp.f32 %v2267_v27  ;;  %v2400_v35 = vrot.slane %v2399_v12, 4 }
 0x9a2   :  { %v2350_v8 = vrot.slane %v2349_v20, 1  ;;  %v2393_v5 = vrot.slane %v2392_v51, 2  ;;  %v2419_v6 = vadd.f32 %v2418_v62, %v2417_v55  ;;  %v2359_v61 = vrot.slane %v2358_v54, 1 }
 0x9a3   :  { %v2310_v53 = vmul.f32 %v8081_v48, %v2280_v63  ;;  %v2311_v43 = vmul.f32 %v8093_v31, %v2281_v13  ;;  %v2401_v39 = vadd.f32 %v2400_v35, %v2399_v12  ;;  %v2368_v34 = vrot.slane %v2367_v16, 1 }
 0x9a4   :  { %v2376_v38 = vadd.f32 %v2375_v15, %v2374_v2  ;;  %v2385_v29 = vadd.f32 %v2384_v36, %v2383_v30  ;;  %v2410_v49 = vadd.f32 %v2409_v52, %v2408_v42  ;;  %v2394_v4 = vadd.f32 %v2393_v5, %v2392_v51 }
 0x9a5   :  { %v2334_v26 = vsel %vm351_vm0, %v2310_v53, 0.0  ;;  %v2335_v40 = vsel %vm743_vm2, %v2311_v43, 0.0  ;;  %v2402_v24 = vrot.slane %v2401_v39, 2  ;;  %v2420_v59 = vrot.slane %v2419_v6, 2 }
 0x9a6   :  { %v2336_v28 = vadd.f32 %v2335_v40, %v2334_v26  ;;  %v2351_v27 = vadd.f32 %v2350_v8, %v2349_v20  ;;  %v2377_v12 = vrot.slane %v2376_v38, 1  ;;  %v2386_v50 = vrot.slane %v2385_v29, 1 }
 0x9a7   :  { %v6628_v0 = vpop.eup %6627  ;;  %v2403_v25 = vadd.f32 %v2402_v24, %v2401_v39  ;;  %v2360_v53 = vadd.f32 %v2359_v61, %v2358_v54  ;;  %v2395_v43 = vrot.slane %v2394_v4, 1  ;;  %v2421_v35 = vadd.f32 %v2420_v59, %v2419_v6 }
 0x9a8   :  { %v2337_v17 = vrot.slane %v2336_v28, 4  ;;  %v2300_v32 = vmul.f32 %v6628_v0, %v8108_v9  ;;  %v2301_v37 = vmul.f32 %v6628_v0, %v8112_v47  ;;  %v2369_v60 = vadd.f32 %v2368_v34, %v2367_v16  ;;  %v6117_v34 = vld [vmem:[%s9619_s0 + $0x61] ss:$0 sm:$0xff] }
 0x9a9   :  { %v2404_v2 = vrot.slane %v2403_v25, 1  ;;  %v2378_v26 = vadd.f32 %v2377_v12, %v2376_v38  ;;  %v2396_v39 = vadd.f32 %v2395_v43, %v2394_v4 }
 0x9aa   :  { %v2338_v44 = vadd.f32 %v2337_v17, %v2336_v28  ;;  %v2330_v22 = vmul.f32 %v8081_v48, %v2300_v32  ;;  %v2331_v33 = vmul.f32 %v8093_v31, %v2301_v37  ;;  %v2387_v28 = vadd.f32 %v2386_v50, %v2385_v29  ;;  %v2590_v50 = vld [vmem:[%s9619_s0 + $0x6a] sm:$0xff] }
 0x9ab   :  { %v6630_v10 = vpop.eup %6629  ;;  %v2422_v17 = vrot.slane %v2421_v35, 1  ;;  %v2405_v0 = vadd.f32 %v2404_v2, %v2403_v25 }
 0x9ac   :  { %v2339_v41 = vrot.slane %v2338_v44, 2  ;;  %v2302_v9 = vmul.f32 %v6630_v10, %v8124_v14  ;;  %v2303_v47 = vmul.f32 %v6630_v10, %v8127_v46  ;;  %v2424_v11 = vsel %vm351_vm0, %v2330_v22, 0.0 }
 0x9ad   :  { %v2425_v21 = vsel %vm743_vm2, %v2331_v33, 0.0  ;;  %v2411_v14 = vrot.slane %v2410_v49, 2  ;;  %v2423_v8 = vadd.f32 %v2422_v17, %v2421_v35  ;;  %v9735_v17 = vmov 0.0  }
 0x9ae   :  { %v2340_v3 = vadd.f32 %v2339_v41, %v2338_v44  ;;  %v2332_v56 = vmul.f32 %v8081_v48, %v2302_v9  ;;  %v2333_v63 = vmul.f32 %v8093_v31, %v2303_v47  ;;  %v2426_v13 = vadd.f32 %v2425_v21, %v2424_v11 }
 0x9af   :  { %v2412_v30 = vadd.f32 %v2411_v14, %v2410_v49 }
 0x9b0   :  { %v2341_v45 = vrot.slane %v2340_v3, 1  ;;  %v2427_v46 = vrot.slane %v2426_v13, 4  ;;  %v2433_v7 = vsel %vm351_vm0, %v2332_v56, 0.0  ;;  %v2434_v55 = vsel %vm743_vm2, %v2333_v63, 0.0 }
 0x9b1   :  { %v2435_v23 = vadd.f32 %v2434_v55, %v2433_v7  ;;  %v2413_v52 = vrot.slane %v2412_v30, 1 }
 0x9b2   :  { %v2342_v19 = vadd.f32 %v2341_v45, %v2340_v3  ;;  %v2428_v31 = vadd.f32 %v2427_v46, %v2426_v13 }
 0x9b3   :  { %v2436_v42 = vrot.slane %v2435_v23, 4  ;;  %v2414_v6 = vadd.f32 %v2413_v52, %v2412_v30 }
 0x9b4   :  { %v2458_v48 = vsel %vm1221_vm4, %v2351_v27, %v2342_v19  ;;  %v2429_v51 = vrot.slane %v2428_v31, 2  ;;  %v9664_v19 = vmov 0.0|0.0  }
 0x9b5   :  { %v2459_v40 = vsel %vm1223_vm3, %v2360_v53, %v2458_v48  ;;  %v2437_v54 = vadd.f32 %v2436_v42, %v2435_v23  ;;  %v2465_v22 = vsel %vm1221_vm4, %v2423_v8, %v2414_v6  ;;  %v6121_v48 = vld [vmem:[%s9619_s0 + $0x7d] ss:$0 sm:$0xff]  ;;  %v2848_v42 = vld [vmem:[%s9619_s0 + $0x80] sm:$0xff] }
 0x9b6   :  { %v2460_v20 = vsel %vm1225_vm5, %v2369_v60, %v2459_v40  ;;  %v2430_v15 = vadd.f32 %v2429_v51, %v2428_v31  ;;  %v6120_v60 = vld [vmem:[%s9619_s0 + $0x7c] ss:$0 sm:$0xff] }
 0x9b7   :  { %v2461_v62 = vsel %vm1227_vm6, %v2378_v26, %v2460_v20  ;;  %v2438_v32 = vrot.slane %v2437_v54, 2 }
 0x9b8   :  { %v2462_v16 = vsel %vm1229_vm7, %v2387_v28, %v2461_v62  ;;  %v2431_v44 = vrot.slane %v2430_v15, 1  ;;  %v2849_v28 = vld [vmem:[%s9619_s0 + $0x88] sm:$0xff]  ;;  %v8235_v62 = vld [vmem:[%s9620_s1 + $0x10] sm:$0xff] }
 0x9b9   :  { %v2463_v36 = vsel %vm1231_vm8, %v2396_v39, %v2462_v16  ;;  %v2439_v5 = vadd.f32 %v2438_v32, %v2437_v54  ;;  %v6431_v51 = vpack.c.bf16 %v2849_v28, %v2848_v42  ;;  %v2592_v54 = vld [vmem:[%s9619_s0 + $0x73] sm:$0xff]  ;;  %v6132_v32 = vld [vmem:[%s9619_s0 + $0x90] ss:$0 sm:$0xff] }
 0x9ba   :  { %v2464_v37 = vsel %vm1233_vm9, %v2405_v0, %v2463_v36  ;;  %v2432_v24 = vadd.f32 %v2431_v44, %v2430_v15  ;;  %6300 = vmatprep.subr.mxu1 %v2592_v54  ;;  %v6122_v0 = vld [vmem:[%s9619_s0 + $0x72] ss:$0 sm:$0xff] }
 0x9bb   :  { %6290 = vmatprep.mubr.msk.f32.mxu1 %vm351_vm0, %v2464_v37  ;;  %v2440_v41 = vrot.slane %v2439_v5, 1  ;;  %v9737_v28 = vld [vmem:[#allocation12_spill] sm:$0xff] }
 0x9bc   :  { %v2466_v33 = vsel %vm1223_vm3, %v2432_v24, %v2465_v22 }
 0x9bd   :  { %v2441_v61 = vadd.f32 %v2440_v41, %v2439_v5 }
 0x9bf   :  { %v2467_v10 = vsel %vm1225_vm5, %v2441_v61, %v2466_v33 }
 0x9c0   :  { %6291 = vmatmul.mubr.msk.f32.vlgmr.msra.gmra.mrb[4].mxu1 %vm351_vm0, %v2467_v10 }
 0x9c1   :  { %6301 = vmatpush3.msra.mxu1 %v2592_v54 }
 0x9c2   :  { %6433 = vmatprep.subr.bf16.mxu1 %v9664_v19 }
 0xa93   :  { %v6292_v38 = vpop.f32.mrb[4].mxu1 }
 0xa94   :  { %v2544_v29 = vadd.f32 %v6292_v38, %v6117_v34  ;;  %v2538_v49 = vpop.f32.mrb[5].mxu1 }
 0xa95   :  { %v2539_v9 = vadd.f32 %v6117_v34, %v2538_v49 }
 0xa96   :  { %v2548_v47 = vadd.f32 %v2544_v29, %v7657_v58 }
 0xa97   :  { %v2547_v3 = vadd.f32 %v2539_v9, %v7655_v18  ;;  %v2589_v18 = vld [vmem:[%s9619_s0 + $0x62] sm:$0xff] }
 0xa98   :  { %v2554_v11 = vsel %vm743_vm2, %v2548_v47, 0.0  ;;  %v6426_v14 = vpack.c.bf16 %v2590_v50, %v2589_v18 }
 0xa99   :  { %2555 = vadd.xlane.f32.xlu1 %v2554_v11  ;;  %v2551_v4 = vsel %vm351_vm0, %v2547_v3, 0.0 }
 0xa9a   :  { %2552 = vadd.xlane.f32.xlu0 %v2551_v4  ;;  %6427 = vmatprep.subr.bf16.mxu0 %v6426_v14 }
 0xa9b   :  { %6429 = vmatpush3.bf16.msra.mxu0 %v6426_v14 }
 0xa9c   :  { %6430 = vmatprep.subr.bf16.mxu0 %v9664_v19 }
 0xb26   :  { %v2556_v25 = vpop.xlane.xlu1 %2555 }
 0xb27   :  { %v2558_v59 = vmul.f32 0.0625, %v2556_v25  ;;  %v2553_v21 = vpop.xlane.xlu0 %2552 }
 0xb28   :  { %v2557_v45 = vmul.f32 0.0625, %v2553_v21 }
 0xb29   :  { %v2560_v56 = vsub.f32 %v2548_v47, %v2558_v59 }
 0xb2a   :  { %v2559_v63 = vsub.f32 %v2547_v3, %v2557_v45 }
 0xb2b   :  { %v2562_v12 = vmul.f32 %v2560_v56, %v2560_v56 }
 0xb2c   :  { %v2561_v13 = vmul.f32 %v2559_v63, %v2559_v63 }
 0xb2d   :  { %v2566_v58 = vsel %vm743_vm2, %v2562_v12, 0.0 }
 0xb2e   :  { %v2563_v27 = vsel %vm351_vm0, %v2561_v13, 0.0 }
 0xb2f   :  { %2564 = vadd.xlane.f32.xlu0 %v2563_v27 }
 0xb33   :  { %2567 = vadd.xlane.f32.xlu0 %v2566_v58 }
 0xbbc   :  { %v2565_v46 = vpop.xlane.xlu0 %2564 }
 0xbbd   :  { %v2569_v7 = vmul.f32 0.0625, %v2565_v46 }
 0xbbf   :  { %v2571_v55 = vadd.f32 1e-05, %v2569_v7 }
 0xbc0   :  { %v2568_v53 = vpop.xlane.xlu0 %2567 }
 0xbc1   :  { %6631 = vrsqrt.f32 %v2571_v55  ;;  %v2570_v43 = vmul.f32 0.0625, %v2568_v53  ;;  %v2851_v55 = vld [vmem:[%s9619_s0 + $0x91] sm:$0xff]  ;;  %v2852_v53 = vld [vmem:[%s9619_s0 + $0x99] sm:$0xff] }
 0xbc3   :  { %v2572_v35 = vadd.f32 1e-05, %v2570_v43  ;;  %v6434_v43 = vpack.c.bf16 %v2852_v53, %v2851_v55 }
 0xbc5   :  { %6633 = vrsqrt.f32 %v2572_v35  ;;  %v9736_v35 = vld [vmem:[#allocation2_spill] sm:$0xff] }
 0xbc6   :  { %vm193_vm12 = vcmp.ge.s32.totalorder %v9736_v35, 4 }
 0xbcb   :  { %v6632_v23 = vpop.eup %6631 }
 0xbcc   :  { %v2575_v2 = vmul.f32 %v6632_v23, %v2559_v63  ;;  %v6125_v23 = vld [vmem:[%s9619_s0 + $0x7b] ss:$0 sm:$0xff] }
 0xbce   :  { %v2581_v31 = vmul.f32 %v6120_v60, %v2575_v2  ;;  %v6097_v2 = vsel %vm193_vm12, 1.0, %v9735_v17 }
 0xbcf   :  { %v6634_v26 = vpop.eup %6633  ;;  %v8321_v42 = vrot.slane %v6097_v2, %v9718_v57 }
 0xbd0   :  { %v2576_v40 = vmul.f32 %v6634_v26, %v2560_v56  ;;  %v8218_v30 = vadd.f32 %v6121_v48, %v2581_v31 }
 0xbd2   :  { %v2582_v20 = vmul.f32 %v6120_v60, %v2576_v40  ;;  %6297 = vmatprep.mubr.msk.f32.mxu0 %vm351_vm0, %v8218_v30 }
 0xbd4   :  { %v8228_v39 = vadd.f32 %v6121_v48, %v2582_v20  ;;  %v8324_v20 = vrot.slane %v6097_v2, %v9737_v28 }
 0xbd6   :  { %6298 = vmatmul.mubr.msk.f32.vlgmr.msra.gmra.mrb[6].mxu0 %vm351_vm0, %v8228_v39 }
 0xbd7   :  { %6432 = vmatpush3.bf16.msra.mxu0 %v6431_v51  ;;  %6309 = vmatprep.mubr.msk.f32.mxu0 %vm6826_vm11, %v9735_v17 }
 0xbd8   :  { %6436 = vmatprep.subr.bf16.mxu0 %v9664_v19 }
 0xbda   :  { %6310 = vmatmul.mubr.msk.f32.vlgmr.msra.gmra.mrb[8].mxu0 %vm351_vm0, %v8235_v62 }
 0xbdb   :  { %6323 = vmatprep.mubr.msk.f32.mxu0 %vm6826_vm11, %v9735_v17 }
 0xca9   :  { %v6299_v16 = vpop.f32.mrb[6].mxu0 }
 0xcaa   :  { %v2676_v15 = vadd.f32 %v6299_v16, %v6122_v0  ;;  %v2670_v36 = vpop.f32.mrb[7].mxu0 }
 0xcab   :  { %v2671_v52 = vadd.f32 %v6122_v0, %v2670_v36  ;;  %v9738_v0 = vld [vmem:[#allocation14_spill] sm:$0xff] }
 0xcac   :  { %v2680_v8 = vmax.f32 %v2676_v15, 0.0  ;;  %v8332_v16 = vrot.slane %v6097_v2, %v9738_v0  ;;  %v9739_v15 = vld [vmem:[#allocation15_spill] sm:$0xff] }
 0xcad   :  { %v2679_v37 = vmax.f32 %v2671_v52, 0.0  ;;  %v2927_v44 = vpop.f32.mrb[8].mxu0  ;;  %v8335_v36 = vrot.slane %v6097_v2, %v9739_v15  ;;  %v8340_v52 = vmul.f32 2.0, %v8321_v42 }
 0xcae   :  { %v2928_v5 = vadd.f32 %v6132_v32, %v2927_v44  ;;  %v6311_v24 = vpop.f32.mrb[9].mxu0  ;;  %v8346_v32 = vmul.f32 2.0, %v8332_v16  ;;  %v9740_v44 = vsub.s32 4, %v9736_v35 }
 0xcaf   :  { %6302 = vmatprep.mubr.msk.f32.mxu1 %vm1456_vm10, %v2679_v37  ;;  %v8349_v37 = vmul.f32 2.0, %v8335_v36 }
 0xcb0   :  { %3021 = vrot.lane.b32.xlu1 %v2928_v5, %s6819_s19  ;;  %6303 = vmatmul.mubr.msk.f32.vlgmr.msra.gmra.mrb[6].mxu1 %vm1456_vm10, %v2680_v8  ;;  %v2939_v6 = vrot.slane %v2928_v5, %v9717_v1  ;;  %v2932_v41 = vcombine.high %v2928_v5, %v2928_v5  ;;  %v8353_v8 = vrot.slane %v6097_v2, %v9740_v44 }
 0xcb1   :  { %6316 = vmatprep.mubr.msk.f32.mxu1 %vm6826_vm11, %v9735_v17  ;;  %6435 = vmatpush3.bf16.msra.mxu1 %v6434_v43 }
 0xcb2   :  { %v2947_v61 = vcombine.high %v2939_v6, %v2939_v6  ;;  %v2955_v22 = vrot.slane %v2939_v6, %v9717_v1  ;;  %v2946_v10 = vrot.slane %v2932_v41, %v9717_v1  ;;  %v237_v6 = vadd.f32 %v6097_v2, %v8321_v42 }
 0xcb3   :  { %v253_v41 = vmul.f32 %v6097_v2, %v8340_v52 }
 0xcb4   :  { %v2969_v33 = vrot.slane %v2947_v61, %v9717_v1  ;;  %v2984_v34 = vrot.slane %v2955_v22, %v9718_v57  ;;  %v2977_v29 = vcombine.high %v2955_v22, %v2955_v22  ;;  %v2948_v9 = vcombine.high %v2946_v10, %v2946_v10 }
 0xcb5   :  { %v2962_v4 = vrot.slane %v2946_v10, %v9717_v1  ;;  %v238_v61 = vadd.f32 %v6097_v2, %v8324_v20  ;;  %v255_v10 = vmul.f32 %v6097_v2, %v8346_v32 }
 0xcb6   :  { %v2988_v38 = vrot.slane %v2969_v33, %v9718_v57  ;;  %v2979_v49 = vcombine.high %v2969_v33, %v2969_v33  ;;  %v2992_v25 = vrot.slane %v2977_v29, %v9718_v57  ;;  %v2976_v21 = vrot.slane %v2948_v9, %v9717_v1 }
 0xcb7   :  { %v3000_v63 = vrot.slane %v2962_v4, %v9718_v57  ;;  %v2978_v27 = vcombine.high %v2962_v4, %v2962_v4  ;;  %v239_v33 = vadd.f32 %v6097_v2, %v8332_v16  ;;  %v8368_v29 = vmul.f32 2.0, %v8353_v8 }
 0xcb8   :  { %v2996_v59 = vrot.slane %v2979_v49, %v9718_v57  ;;  %v3004_v13 = vrot.slane %v2976_v21, %v9718_v57  ;;  %v2980_v12 = vcombine.high %v2976_v21, %v2976_v21  ;;  %v9742_v9 = vsub.s32 6, %v9736_v35 }
 0xcb9   :  { %v3008_v50 = vrot.slane %v2978_v27, %v9718_v57  ;;  %v261_v4 = vsub.f32 %v237_v6, %v253_v41  ;;  %v241_v27 = vadd.f32 %v6097_v2, %v8353_v8 }
 0xcba   :  { %v3012_v14 = vrot.slane %v2980_v12, %v9718_v57  ;;  %v257_v12 = vmul.f32 %v6097_v2, %v8368_v29 }
 0xcbb   :  { %v8388_v53 = vmul.f32 -1e+30, %v261_v4 }
 0xd22   :  { %v3022_v47 = vpop.permute.xlu1 %3021 }
 0xd23   :  { %v8265_v3 = vmul.f32 %v3022_v47, %v2984_v34  ;;  %v8267_v11 = vmul.f32 %v3022_v47, %v2988_v38  ;;  %v8277_v45 = vmul.f32 %v3022_v47, %v2992_v25  ;;  %v8279_v56 = vmul.f32 %v3022_v47, %v2996_v59 }
 0xd24   :  { %v8287_v58 = vmul.f32 %v3022_v47, %v3000_v63  ;;  %v8289_v18 = vmul.f32 %v3022_v47, %v3004_v13  ;;  %v8297_v46 = vmul.f32 %v3022_v47, %v3008_v50  ;;  %v8299_v7 = vmul.f32 %v3022_v47, %v3012_v14 }
 0xd25   :  { %3040 = vrot.lane.b32.xlu0 %v8265_v3, %s6821_s20  ;;  %3042 = vrot.lane.b32.xlu1 %v8267_v11, %s6821_s20  ;;  %v240_v34 = vadd.f32 %v6097_v2, %v8335_v36  ;;  %v256_v38 = vmul.f32 %v6097_v2, %v8349_v37  ;;  %v8375_v47 = vrot.slane %v6097_v2, %v9742_v9  ;;  %v9743_v59 = vsub.s32 7, %v9736_v35 }
 0xd26   :  { %v263_v63 = vsub.f32 %v239_v33, %v255_v10 }
 0xd27   :  { %v8379_v21 = vrot.slane %v6097_v2, %v9743_v59  ;;  %v264_v13 = vsub.f32 %v240_v34, %v256_v38  ;;  %v8386_v55 = vmul.f32 2.0, %v8375_v47  ;;  %v243_v15 = vadd.f32 %v6097_v2, %v8375_v47 }
 0xd29   :  { %3044 = vrot.lane.b32.xlu1 %v8277_v45, %s6821_s20  ;;  %3046 = vrot.lane.b32.xlu0 %v8279_v56, %s6821_s20  ;;  %v8399_v28 = vmul.f32 -1e+30, %v264_v13 }
 0xd2d   :  { %3048 = vrot.lane.b32.xlu1 %v8287_v58, %s6821_s20  ;;  %3050 = vrot.lane.b32.xlu0 %v8289_v18, %s6821_s20 }
 0xd31   :  { %3052 = vrot.lane.b32.xlu1 %v8297_v46, %s6821_s20  ;;  %3054 = vrot.lane.b32.xlu0 %v8299_v7, %s6821_s20 }
 0xd35   :  { %3232 = vrot.lane.b32.xlu1 %v2928_v5, %s6822_s21  ;;  %v9741_v5 = vsub.s32 5, %v9736_v35  ;;  %v8393_v35 = vmul.f32 2.0, %v8379_v21 }
 0xd37   :  { %v8357_v24 = vrot.slane %v6097_v2, %v9741_v5 }
 0xd39   :  { %v8371_v49 = vmul.f32 2.0, %v8357_v24  ;;  %v242_v50 = vadd.f32 %v6097_v2, %v8357_v24 }
 0xd3b   :  { %v258_v14 = vmul.f32 %v6097_v2, %v8371_v49 }
 0xd3d   :  { %v266_v0 = vsub.f32 %v242_v50, %v258_v14 }
 0xd3f   :  { %v8419_v4 = vmul.f32 -1e+30, %v266_v0 }
 0xd41   :  { %9745 = vst [vmem:[#allocation16_spill] sm:$0xff] %v8419_v4 }
 0xd83   :  { %v6304_v60 = vpop.f32.mrb[6].mxu1 }
 0xd84   :  { %v2763_v48 = vadd.f32 %v6304_v60, %v6125_v23  ;;  %v2757_v31 = vpop.f32.mrb[7].mxu1 }
 0xd85   :  { %v2758_v26 = vadd.f32 %v6125_v23, %v2757_v31 }
 0xd86   :  { %v8318_v40 = vadd.f32 %v2763_v48, %v8228_v39 }
 0xd87   :  { %v8327_v51 = vadd.f32 %v2758_v26, %v8218_v30  ;;  %v8343_v30 = vmul.f32 2.0, %v8324_v20  ;;  %v8397_v26 = vmul.f32 -1e+30, %v263_v63 }
 0xd88   :  { %v2773_v54 = vsel %vm743_vm2, %v8318_v40, 0.0 }
 0xd89   :  { %2774 = vadd.xlane.f32.xlu1 %v2773_v54  ;;  %v2770_v39 = vsel %vm351_vm0, %v8327_v51, 0.0  ;;  %v254_v22 = vmul.f32 %v6097_v2, %v8343_v30  ;;  %v265_v54 = vsub.f32 %v241_v27, %v257_v12 }
 0xd8a   :  { %2771 = vadd.xlane.f32.xlu0 %v2770_v39  ;;  %v259_v39 = vmul.f32 %v6097_v2, %v8386_v55 }
 0xd8b   :  { %v262_v25 = vsub.f32 %v238_v61, %v254_v22  ;;  %v8417_v9 = vmul.f32 -1e+30, %v265_v54 }
 0xd8c   :  { %v267_v59 = vsub.f32 %v243_v15, %v259_v39 }
 0xd8d   :  { %v8390_v43 = vmul.f32 -1e+30, %v262_v25  ;;  %9744 = vst [vmem:[#allocation5_spill] sm:$0xff] %v8417_v9 }
 0xd8e   :  { %v8439_v39 = vmul.f32 -1e+30, %v267_v59 }
 0xd90   :  { %9746 = vst [vmem:[#allocation6_spill] sm:$0xff] %v8439_v39 }
 0xd97   :  { %v3041_v23 = vpop.permute.xlu0 %3040  ;;  %v3043_v60 = vpop.permute.xlu1 %3042 }
 0xd98   :  { %v3064_v48 = vadd.f32 %v3041_v23, %v8265_v3  ;;  %v3065_v31 = vadd.f32 %v3043_v60, %v8267_v11  ;;  %v244_v3 = vadd.f32 %v6097_v2, %v8379_v21  ;;  %v260_v11 = vmul.f32 %v6097_v2, %v8393_v35 }
 0xd9a   :  { %v8404_v44 = vadd.f32 %v3064_v48, %v8388_v53  ;;  %v8407_v5 = vadd.f32 %v3065_v31, %v8390_v43  ;;  %v268_v63 = vsub.f32 %v244_v3, %v260_v11 }
 0xd9b   :  { %v3045_v6 = vpop.permute.xlu1 %3044  ;;  %v3047_v41 = vpop.permute.xlu0 %3046 }
 0xd9c   :  { %v3080_v61 = vsel %vm351_vm0, %v8404_v44, -inf  ;;  %v3087_v22 = vsel %vm351_vm0, %v8407_v5, -inf  ;;  %v3066_v33 = vadd.f32 %v3045_v6, %v8277_v45  ;;  %v3067_v10 = vadd.f32 %v3047_v41, %v8279_v56 }
 0xd9d   :  { %v3081_v34 = vrot.slane %v3080_v61, 4  ;;  %v3088_v38 = vrot.slane %v3087_v22, 4  ;;  %v8441_v3 = vmul.f32 -1e+30, %v268_v63 }
 0xd9e   :  { %v8422_v2 = vadd.f32 %v3066_v33, %v8397_v26  ;;  %v8425_v25 = vadd.f32 %v3067_v10, %v8399_v28 }
 0xd9f   :  { %v3082_v13 = vmax.f32 %v3080_v61, %v3081_v34  ;;  %v3089_v27 = vmax.f32 %v3087_v22, %v3088_v38  ;;  %v3049_v12 = vpop.permute.xlu1 %3048  ;;  %v3051_v45 = vpop.permute.xlu0 %3050  ;;  %9747 = vst [vmem:[#allocation9_spill] sm:$0xff] %v8441_v3 }
 0xda0   :  { %v3094_v56 = vsel %vm351_vm0, %v8422_v2, -inf  ;;  %v3101_v50 = vsel %vm351_vm0, %v8425_v25, -inf  ;;  %v3068_v14 = vadd.f32 %v3049_v12, %v8287_v58  ;;  %v3069_v23 = vadd.f32 %v3051_v45, %v8289_v18 }
 0xda1   :  { %v3083_v60 = vrot.slane %v3082_v13, 2  ;;  %v3090_v48 = vrot.slane %v3089_v27, 2  ;;  %v3095_v31 = vrot.slane %v3094_v56, 4  ;;  %v3102_v54 = vrot.slane %v3101_v50, 4 }
 0xda2   :  { %v8434_v0 = vadd.f32 %v3068_v14, %v8417_v9  ;;  %v8437_v15 = vadd.f32 %v3069_v23, %v8419_v4 }
 0xda3   :  { %v3084_v11 = vmax.f32 %v3082_v13, %v3083_v60  ;;  %v3091_v6 = vmax.f32 %v3089_v27, %v3090_v48  ;;  %v3096_v41 = vmax.f32 %v3094_v56, %v3095_v31  ;;  %v3103_v58 = vmax.f32 %v3101_v50, %v3102_v54  ;;  %v3053_v61 = vpop.permute.xlu1 %3052  ;;  %v3055_v18 = vpop.permute.xlu0 %3054 }
 0xda4   :  { %v3108_v22 = vsel %vm351_vm0, %v8434_v0, -inf  ;;  %v3115_v33 = vsel %vm351_vm0, %v8437_v15, -inf  ;;  %v3070_v10 = vadd.f32 %v3053_v61, %v8297_v46  ;;  %v3071_v34 = vadd.f32 %v3055_v18, %v8299_v7 }
 0xda5   :  { %v3085_v38 = vrot.slane %v3084_v11, 1  ;;  %v3092_v59 = vrot.slane %v3091_v6, 1  ;;  %v3097_v63 = vrot.slane %v3096_v41, 2  ;;  %v3104_v12 = vrot.slane %v3103_v58, 2 }
 0xda6   :  { %v3109_v13 = vrot.slane %v3108_v22, 4  ;;  %v3116_v27 = vrot.slane %v3115_v33, 4  ;;  %v3078_v45 = vadd.f32 %v3070_v10, %v8439_v39  ;;  %v3079_v56 = vadd.f32 %v3071_v34, %v8441_v3 }
 0xda7   :  { %v3086_v50 = vmax.f32 %v3084_v11, %v3085_v38  ;;  %v3093_v14 = vmax.f32 %v3091_v6, %v3092_v59  ;;  %v3098_v23 = vmax.f32 %v3096_v41, %v3097_v63  ;;  %v3105_v60 = vmax.f32 %v3103_v58, %v3104_v12 }
 0xda8   :  { %v3110_v48 = vmax.f32 %v3108_v22, %v3109_v13  ;;  %v3117_v31 = vmax.f32 %v3115_v33, %v3116_v27  ;;  %v3122_v46 = vsel %vm351_vm0, %v3078_v45, -inf  ;;  %v3129_v7 = vsel %vm351_vm0, %v3079_v56, -inf }
 0xda9   :  { %v3136_v54 = vsub.f32 %v8404_v44, %v3086_v50  ;;  %v3137_v61 = vsub.f32 %v8407_v5, %v3093_v14  ;;  %v3099_v18 = vrot.slane %v3098_v23, 1  ;;  %v3106_v19 = vrot.slane %v3105_v60, 1 }
 0xdaa   :  { %v3111_v4 = vrot.slane %v3110_v48, 2  ;;  %v3118_v10 = vrot.slane %v3117_v31, 2  ;;  %v3123_v39 = vrot.slane %v3122_v46, 4  ;;  %v3130_v34 = vrot.slane %v3129_v7, 4 }
 0xdab   :  { %v3144_v11 = vmul.f32 1.442695, %v3136_v54  ;;  %v3146_v6 = vmul.f32 1.442695, %v3137_v61  ;;  %v3100_v41 = vmax.f32 %v3098_v23, %v3099_v18  ;;  %v3107_v58 = vmax.f32 %v3105_v60, %v3106_v19 }
 0xdac   :  { %v3112_v22 = vmax.f32 %v3110_v48, %v3111_v4  ;;  %v3119_v33 = vmax.f32 %v3117_v31, %v3118_v10  ;;  %v3124_v38 = vmax.f32 %v3122_v46, %v3123_v39  ;;  %v3131_v59 = vmax.f32 %v3129_v7, %v3130_v34 }
 0xdad   :  { %6635 = vpow2.f32 %v3144_v11  ;;  %v3138_v63 = vsub.f32 %v8422_v2, %v3100_v41  ;;  %v3139_v44 = vsub.f32 %v8425_v25, %v3107_v58 }
 0xdae   :  { %6637 = vpow2.f32 %v3146_v6  ;;  %v3113_v5 = vrot.slane %v3112_v22, 1  ;;  %v3120_v12 = vrot.slane %v3119_v33, 1  ;;  %v3125_v13 = vrot.slane %v3124_v38, 2 }
 0xdaf   :  { %v3148_v27 = vmul.f32 1.442695, %v3138_v63  ;;  %v3150_v50 = vmul.f32 1.442695, %v3139_v44  ;;  %v3132_v14 = vrot.slane %v3131_v59, 2 }
 0xdb0   :  { %v3114_v54 = vmax.f32 %v3112_v22, %v3113_v5  ;;  %v3121_v61 = vmax.f32 %v3119_v33, %v3120_v12  ;;  %v3126_v23 = vmax.f32 %v3124_v38, %v3125_v13 }
 0xdb1   :  { %6639 = vpow2.f32 %v3148_v27  ;;  %v3133_v19 = vmax.f32 %v3131_v59, %v3132_v14 }
 0xdb2   :  { %6641 = vpow2.f32 %v3150_v50  ;;  %v3140_v4 = vsub.f32 %v8434_v0, %v3114_v54  ;;  %v3141_v39 = vsub.f32 %v8437_v15, %v3121_v61  ;;  %v3127_v2 = vrot.slane %v3126_v23, 1 }
 0xdb3   :  { %v3134_v60 = vrot.slane %v3133_v19, 1 }
 0xdb4   :  { %v3152_v25 = vmul.f32 1.442695, %v3140_v4  ;;  %v3154_v48 = vmul.f32 1.442695, %v3141_v39  ;;  %v3128_v31 = vmax.f32 %v3126_v23, %v3127_v2 }
 0xdb5   :  { %v3135_v46 = vmax.f32 %v3133_v19, %v3134_v60 }
 0xdb6   :  { %6643 = vpow2.f32 %v3152_v25  ;;  %v3142_v7 = vsub.f32 %v3078_v45, %v3128_v31 }
 0xdb7   :  { %v8459_v18 = vpop.eup %6635  ;;  %6645 = vpow2.f32 %v3154_v48  ;;  %v3143_v10 = vsub.f32 %v3079_v56, %v3135_v46 }
 0xdb8   :  { %v8461_v34 = vpop.eup %6637  ;;  %v3160_v11 = vsel %vm351_vm0, %v8459_v18, 0.0  ;;  %v3156_v0 = vmul.f32 1.442695, %v3142_v7 }
 0xdb9   :  { %v3161_v6 = vrot.slane %v3160_v11, 4  ;;  %v3167_v15 = vsel %vm351_vm0, %v8461_v34, 0.0  ;;  %v3158_v41 = vmul.f32 1.442695, %v3143_v10 }
 0xdba   :  { %v3168_v58 = vrot.slane %v3167_v15, 4  ;;  %6647 = vpow2.f32 %v3156_v0 }
 0xdbb   :  { %v8467_v22 = vpop.eup %6639  ;;  %v3162_v45 = vadd.f32 %v3161_v6, %v3160_v11  ;;  %6649 = vpow2.f32 %v3158_v41 }
 0xdbc   :  { %v8469_v33 = vpop.eup %6641  ;;  %v3169_v56 = vadd.f32 %v3168_v58, %v3167_v15  ;;  %v3174_v38 = vsel %vm351_vm0, %v8467_v22, 0.0 }
 0xdbd   :  { %v3163_v59 = vrot.slane %v3162_v45, 2  ;;  %v3175_v63 = vrot.slane %v3174_v38, 4  ;;  %v3181_v44 = vsel %vm351_vm0, %v8469_v33, 0.0 }
 0xdbe   :  { %v3170_v5 = vrot.slane %v3169_v56, 2  ;;  %v3182_v12 = vrot.slane %v3181_v44, 4 }
 0xdbf   :  { %v3164_v13 = vadd.f32 %v3163_v59, %v3162_v45  ;;  %v3176_v27 = vadd.f32 %v3175_v63, %v3174_v38 }
 0xdc0   :  { %v8475_v50 = vpop.eup %6643  ;;  %v3171_v14 = vadd.f32 %v3170_v5, %v3169_v56  ;;  %v3183_v54 = vadd.f32 %v3182_v12, %v3181_v44 }
 0xdc1   :  { %v8477_v61 = vpop.eup %6645  ;;  %v3165_v23 = vrot.slane %v3164_v13, 1  ;;  %v3177_v19 = vrot.slane %v3176_v27, 2  ;;  %v3188_v4 = vsel %vm351_vm0, %v8475_v50, 0.0 }
 0xdc2   :  { %v3172_v39 = vrot.slane %v3171_v14, 1  ;;  %v3184_v2 = vrot.slane %v3183_v54, 2  ;;  %v3189_v60 = vrot.slane %v3188_v4, 4  ;;  %v3195_v25 = vsel %vm351_vm0, %v8477_v61, 0.0 }
 0xdc3   :  { %v3166_v48 = vadd.f32 %v3165_v23, %v3164_v13  ;;  %v3178_v31 = vadd.f32 %v3177_v19, %v3176_v27  ;;  %v3196_v46 = vrot.slane %v3195_v25, 4 }
 0xdc4   :  { %v8483_v7 = vpop.eup %6647  ;;  %v3173_v10 = vadd.f32 %v3172_v39, %v3171_v14  ;;  %v3185_v11 = vadd.f32 %v3184_v2, %v3183_v54  ;;  %v3190_v0 = vadd.f32 %v3189_v60, %v3188_v4 }
 0xdc5   :  { %v8485_v6 = vpop.eup %6649  ;;  %6651 = vrcp.f32 %v3166_v48  ;;  %v3179_v15 = vrot.slane %v3178_v31, 1  ;;  %v3197_v41 = vadd.f32 %v3196_v46, %v3195_v25  ;;  %v3202_v58 = vsel %vm351_vm0, %v8483_v7, 0.0 }
 0xdc6   :  { %6653 = vrcp.f32 %v3173_v10  ;;  %v3186_v45 = vrot.slane %v3185_v11, 1  ;;  %v3191_v56 = vrot.slane %v3190_v0, 2  ;;  %v3203_v38 = vrot.slane %v3202_v58, 4 }
 0xdc7   :  { %v3180_v59 = vadd.f32 %v3179_v15, %v3178_v31  ;;  %v3198_v63 = vrot.slane %v3197_v41, 2  ;;  %v3209_v44 = vsel %vm351_vm0, %v8485_v6, 0.0 }
 0xdc8   :  { %v3187_v5 = vadd.f32 %v3186_v45, %v3185_v11  ;;  %v3192_v12 = vadd.f32 %v3191_v56, %v3190_v0  ;;  %v3204_v13 = vadd.f32 %v3203_v38, %v3202_v58  ;;  %v3210_v27 = vrot.slane %v3209_v44, 4  ;;  %v3233_v58 = vpop.permute.xlu1 %3232 }
 0xdc9   :  { %6655 = vrcp.f32 %v3180_v59  ;;  %v3199_v14 = vadd.f32 %v3198_v63, %v3197_v41 }
 0xdca   :  { %6657 = vrcp.f32 %v3187_v5  ;;  %v3193_v54 = vrot.slane %v3192_v12, 1  ;;  %v3205_v23 = vrot.slane %v3204_v13, 2  ;;  %v3211_v19 = vadd.f32 %v3210_v27, %v3209_v44 }
 0xdcb   :  { %v3200_v4 = vrot.slane %v3199_v14, 1 }
 0xdcc   :  { %v3194_v39 = vadd.f32 %v3193_v54, %v3192_v12  ;;  %v3206_v2 = vadd.f32 %v3205_v23, %v3204_v13  ;;  %v3212_v60 = vrot.slane %v3211_v19, 2 }
 0xdcd   :  { %v3201_v25 = vadd.f32 %v3200_v4, %v3199_v14 }
 0xdce   :  { %6659 = vrcp.f32 %v3194_v39  ;;  %v3207_v48 = vrot.slane %v3206_v2, 1  ;;  %v3213_v31 = vadd.f32 %v3212_v60, %v3211_v19 }
 0xdcf   :  { %v6652_v46 = vpop.eup %6651  ;;  %6661 = vrcp.f32 %v3201_v25 }
 0xdd0   :  { %v6654_v10 = vpop.eup %6653  ;;  %v3224_v11 = vmul.f32 %v6652_v46, %v8459_v18  ;;  %v3208_v0 = vadd.f32 %v3207_v48, %v3206_v2  ;;  %v3214_v15 = vrot.slane %v3213_v31, 1 }
 0xdd1   :  { %v3225_v41 = vmul.f32 %v6654_v10, %v8461_v34 }
 0xdd2   :  { %6663 = vrcp.f32 %v3208_v0  ;;  %v3215_v45 = vadd.f32 %v3214_v15, %v3213_v31  ;;  %v3235_v56 = vmul.f32 %v3233_v58, %v3224_v11 }
 0xdd3   :  { %v6656_v38 = vpop.eup %6655  ;;  %v3236_v59 = vmul.f32 %v3233_v58, %v3225_v41 }
 0xdd4   :  { %v6658_v63 = vpop.eup %6657  ;;  %v3226_v44 = vmul.f32 %v6656_v38, %v8467_v22  ;;  %6665 = vrcp.f32 %v3215_v45  ;;  %v3243_v5 = vsel %vm351_vm0, %v3235_v56, 0.0 }
 0xdd5   :  { %v3227_v12 = vmul.f32 %v6658_v63, %v8469_v33  ;;  %v3244_v13 = vrot.slane %v3243_v5, 4  ;;  %v3250_v18 = vsel %vm351_vm0, %v3236_v59, 0.0 }
 0xdd6   :  { %v3237_v27 = vmul.f32 %v3233_v58, %v3226_v44  ;;  %v3251_v14 = vrot.slane %v3250_v18, 4 }
 0xdd7   :  { %v3238_v34 = vmul.f32 %v3233_v58, %v3227_v12  ;;  %v3245_v54 = vadd.f32 %v3244_v13, %v3243_v5 }
 0xdd8   :  { %v6660_v23 = vpop.eup %6659  ;;  %v3252_v19 = vadd.f32 %v3251_v14, %v3250_v18  ;;  %v3257_v4 = vsel %vm351_vm0, %v3237_v27, 0.0 }
 0xdd9   :  { %v6662_v39 = vpop.eup %6661  ;;  %v3228_v2 = vmul.f32 %v6660_v23, %v8475_v50  ;;  %v3246_v22 = vrot.slane %v3245_v54, 2  ;;  %v3258_v60 = vrot.slane %v3257_v4, 4  ;;  %v3264_v25 = vsel %vm351_vm0, %v3238_v34, 0.0 }
 0xdda   :  { %v3229_v33 = vmul.f32 %v6662_v39, %v8477_v61  ;;  %v3253_v48 = vrot.slane %v3252_v19, 2  ;;  %v3265_v31 = vrot.slane %v3264_v25, 4 }
 0xddb   :  { %v3239_v46 = vmul.f32 %v3233_v58, %v3228_v2  ;;  %v3247_v10 = vadd.f32 %v3246_v22, %v3245_v54  ;;  %v3259_v11 = vadd.f32 %v3258_v60, %v3257_v4 }
 0xddc   :  { %v6664_v0 = vpop.eup %6663  ;;  %v3240_v15 = vmul.f32 %v3233_v58, %v3229_v33  ;;  %v3254_v41 = vadd.f32 %v3253_v48, %v3252_v19  ;;  %v3266_v45 = vadd.f32 %v3265_v31, %v3264_v25 }
 0xddd   :  { %v3230_v56 = vmul.f32 %v6664_v0, %v8483_v7  ;;  %v3260_v38 = vrot.slane %v3259_v11, 2  ;;  %v3271_v50 = vsel %vm351_vm0, %v3239_v46, 0.0  ;;  %v3248_v59 = vrot.slane %v3247_v10, 1 }
 0xdde   :  { %v6666_v63 = vpop.eup %6665  ;;  %v3272_v44 = vrot.slane %v3271_v50, 4  ;;  %v3255_v5 = vrot.slane %v3254_v41, 1  ;;  %v3267_v12 = vrot.slane %v3266_v45, 2  ;;  %v3278_v61 = vsel %vm351_vm0, %v3240_v15, 0.0 }
 0xddf   :  { %v3231_v13 = vmul.f32 %v6666_v63, %v8485_v6  ;;  %v3241_v18 = vmul.f32 %v3233_v58, %v3230_v56  ;;  %v3261_v27 = vadd.f32 %v3260_v38, %v3259_v11  ;;  %v3249_v14 = vadd.f32 %v3248_v59, %v3247_v10 }
 0xde0   :  { %v3268_v34 = vadd.f32 %v3267_v12, %v3266_v45  ;;  %v3273_v54 = vadd.f32 %v3272_v44, %v3271_v50  ;;  %v3279_v23 = vrot.slane %v3278_v61, 4  ;;  %v3256_v7 = vadd.f32 %v3255_v5, %v3254_v41 }
 0xde1   :  { %v3242_v19 = vmul.f32 %v3233_v58, %v3231_v13  ;;  %v3262_v4 = vrot.slane %v3261_v27, 1  ;;  %v3285_v39 = vsel %vm351_vm0, %v3241_v18, 0.0 }
 0xde2   :  { %v3269_v2 = vrot.slane %v3268_v34, 1  ;;  %v3274_v22 = vrot.slane %v3273_v54, 2  ;;  %v3280_v60 = vadd.f32 %v3279_v23, %v3278_v61  ;;  %v3286_v25 = vrot.slane %v3285_v39, 4 }
 0xde3   :  { %v3263_v33 = vadd.f32 %v3262_v4, %v3261_v27  ;;  %v3292_v48 = vsel %vm351_vm0, %v3242_v19, 0.0  ;;  %v3311_v0 = vsel %vm1221_vm4, %v3256_v7, %v3249_v14 }
 0xde4   :  { %v3275_v31 = vadd.f32 %v3274_v22, %v3273_v54  ;;  %v3281_v6 = vrot.slane %v3280_v60, 2  ;;  %v3287_v46 = vadd.f32 %v3286_v25, %v3285_v39  ;;  %v3270_v11 = vadd.f32 %v3269_v2, %v3268_v34 }
 0xde5   :  { %v3293_v10 = vrot.slane %v3292_v48, 4  ;;  %v3312_v45 = vsel %vm1223_vm3, %v3263_v33, %v3311_v0 }
 0xde6   :  { %v3276_v15 = vrot.slane %v3275_v31, 1  ;;  %v3282_v58 = vadd.f32 %v3281_v6, %v3280_v60  ;;  %v3288_v41 = vrot.slane %v3287_v46, 2  ;;  %v3313_v44 = vsel %vm1225_vm5, %v3270_v11, %v3312_v45 }
 0xde7   :  { %v3294_v56 = vadd.f32 %v3293_v10, %v3292_v48 }
 0xde8   :  { %v3277_v38 = vadd.f32 %v3276_v15, %v3275_v31  ;;  %v3283_v50 = vrot.slane %v3282_v58, 1  ;;  %v3289_v59 = vadd.f32 %v3288_v41, %v3287_v46 }
 0xde9   :  { %v3295_v63 = vrot.slane %v3294_v56, 2 }
 0xdea   :  { %v3284_v5 = vadd.f32 %v3283_v50, %v3282_v58  ;;  %v3290_v12 = vrot.slane %v3289_v59, 1  ;;  %v3314_v61 = vsel %vm1227_vm6, %v3277_v38, %v3313_v44  ;;  %v6129_v58 = vld [vmem:[%s9619_s0 + $0x7f] ss:$0 sm:$0xff] }
 0xdeb   :  { %v3296_v13 = vadd.f32 %v3295_v63, %v3294_v56  ;;  %v6134_v63 = vld [vmem:[%s9619_s0 + $0xa1] ss:$0 sm:$0xff] }
 0xdec   :  { %v3291_v18 = vadd.f32 %v3290_v12, %v3289_v59  ;;  %v3315_v14 = vsel %vm1229_vm7, %v3284_v5, %v3314_v61 }
 0xded   :  { %v3297_v27 = vrot.slane %v3296_v13, 1 }
 0xdee   :  { %v3316_v34 = vsel %vm1231_vm8, %v3291_v18, %v3315_v14 }
 0xdef   :  { %v3298_v54 = vadd.f32 %v3297_v27, %v3296_v13 }
 0xdf1   :  { %v3317_v23 = vsel %vm1233_vm9, %v3298_v54, %v3316_v34 }
 0xdf2   :  { %6317 = vmatmul.mubr.msk.f32.vlgmr.msra.gmra.mrb[8].mxu1 %vm351_vm0, %v3317_v23 }
 0xe16   :  { %v2775_v19 = vpop.xlane.xlu1 %2774 }
 0xe17   :  { %v2777_v7 = vmul.f32 0.0625, %v2775_v19  ;;  %v2772_v4 = vpop.xlane.xlu0 %2771 }
 0xe18   :  { %v2776_v39 = vmul.f32 0.0625, %v2772_v4 }
 0xe19   :  { %v2779_v2 = vsub.f32 %v8318_v40, %v2777_v7  ;;  %v6128_v40 = vld [vmem:[%s9619_s0 + $0x7e] ss:$0 sm:$0xff] }
 0xe1a   :  { %v2778_v22 = vsub.f32 %v8327_v51, %v2776_v39 }
 0xe1b   :  { %v2781_v33 = vmul.f32 %v2779_v2, %v2779_v2 }
 0xe1c   :  { %v2780_v60 = vmul.f32 %v2778_v22, %v2778_v22 }
 0xe1d   :  { %v2785_v48 = vsel %vm743_vm2, %v2781_v33, 0.0 }
 0xe1e   :  { %v2782_v25 = vsel %vm351_vm0, %v2780_v60, 0.0 }
 0xe1f   :  { %2783 = vadd.xlane.f32.xlu0 %v2782_v25 }
 0xe23   :  { %2786 = vadd.xlane.f32.xlu0 %v2785_v48 }
 0xeac   :  { %v2784_v31 = vpop.xlane.xlu0 %2783 }
 0xead   :  { %v2788_v6 = vmul.f32 0.0625, %v2784_v31  ;;  %v3419_v31 = vld [vmem:[%s9619_s0 + $0xb3] sm:$0xff] }
 0xeaf   :  { %v2790_v46 = vadd.f32 1e-05, %v2788_v6  ;;  %v3420_v6 = vld [vmem:[%s9619_s0 + $0xbb] sm:$0xff] }
 0xeb0   :  { %v2787_v11 = vpop.xlane.xlu0 %2786 }
 0xeb1   :  { %6667 = vrsqrt.f32 %v2790_v46  ;;  %v2789_v10 = vmul.f32 0.0625, %v2787_v11  ;;  %v6439_v46 = vpack.c.bf16 %v3420_v6, %v3419_v31  ;;  %v3416_v11 = vld [vmem:[%s9619_s0 + $0xa2] sm:$0xff]  ;;  %v6138_v31 = vld [vmem:[%s9619_s0 + $0xb2] ss:$0 sm:$0xff] }
 0xeb3   :  { %v2791_v0 = vadd.f32 1e-05, %v2789_v10  ;;  %v3417_v10 = vld [vmem:[%s9619_s0 + $0xaa] sm:$0xff]  ;;  %6440 = vmatprep.subr.bf16.mxu1 %v6439_v46 }
 0xeb4   :  { %6442 = vmatpush3.bf16.msra.mxu1 %v6439_v46 }
 0xeb5   :  { %6669 = vrsqrt.f32 %v2791_v0  ;;  %v6437_v0 = vpack.c.bf16 %v3417_v10, %v3416_v11 }
 0xeb7   :  { %6438 = vmatpush3.bf16.msra.mxu0 %v6437_v0 }
 0xebb   :  { %v6668_v15 = vpop.eup %6667 }
 0xebc   :  { %v2794_v51 = vmul.f32 %v6668_v15, %v2778_v22  ;;  %v9748_v15 = vmov 0.0|0.0  }
 0xebd   :  { %6443 = vmatprep.subr.bf16.mxu0 %v9748_v15  ;;  %6446 = vmatprep.subr.bf16.mxu1 %v9748_v15 }
 0xebe   :  { %v2800_v41 = vmul.f32 %v6128_v40, %v2794_v51 }
 0xebf   :  { %v6670_v45 = vpop.eup %6669 }
 0xec0   :  { %v2806_v56 = vadd.f32 %v6129_v58, %v2800_v41  ;;  %v2795_v38 = vmul.f32 %v6670_v45, %v2779_v2 }
 0xec2   :  { %v2810_v50 = vsel %vm351_vm0, %v2806_v56, 0.0  ;;  %v2801_v59 = vmul.f32 %v6128_v40, %v2795_v38 }
 0xec3   :  { %2811 = vadd.xlane.f32.xlu1 %v2810_v50 }
 0xec4   :  { %v2807_v44 = vadd.f32 %v6129_v58, %v2801_v59 }
 0xec5   :  { %v3386_v5 = vpop.f32.mrb[8].mxu1 }
 0xec6   :  { %v3387_v12 = vadd.f32 %v6134_v63, %v3386_v5  ;;  %v6318_v61 = vpop.f32.mrb[9].mxu1  ;;  %v2813_v13 = vsel %vm743_vm2, %v2807_v44, 0.0 }
 0xec7   :  { %2814 = vadd.xlane.f32.xlu0 %v2813_v13 }
 0xec8   :  { %v3390_v18 = vadd.f32 %v3387_v12, %v8235_v62  ;;  %v6131_v12 = vld [vmem:[%s9619_s0 + $0x16b] ss:$0 sm:$0xff] }
 0xeca   :  { %v3393_v27 = vsel %vm351_vm0, %v3390_v18, 0.0 }
 0xecb   :  { %3394 = vadd.xlane.f32.xlu1 %v3393_v27 }
 0xf50   :  { %v2812_v14 = vpop.xlane.xlu1 %2811 }
 0xf51   :  { %v2816_v34 = vmul.f32 0.0625, %v2812_v14 }
 0xf53   :  { %v2818_v54 = vsub.f32 %v2806_v56, %v2816_v34 }
 0xf54   :  { %v2815_v23 = vpop.xlane.xlu0 %2814 }
 0xf55   :  { %v2817_v19 = vmul.f32 0.0625, %v2815_v23  ;;  %v2820_v7 = vmul.f32 %v2818_v54, %v2818_v54  ;;  %v6136_v23 = vld [vmem:[%s9619_s0 + $0xef] ss:$0 sm:$0xff] }
 0xf57   :  { %v2819_v4 = vsub.f32 %v2807_v44, %v2817_v19  ;;  %v2822_v39 = vsel %vm351_vm0, %v2820_v7, 0.0  ;;  %v6130_v44 = vld [vmem:[%s9619_s0 + $0x16a] ss:$0 sm:$0xff]  ;;  %v6137_v7 = vld [vmem:[%s9619_s0 + $0xf0] ss:$0 sm:$0xff] }
 0xf58   :  { %v3395_v2 = vpop.xlane.xlu1 %3394  ;;  %2823 = vadd.xlane.f32.xlu0 %v2822_v39 }
 0xf59   :  { %v3396_v22 = vmul.f32 0.0625, %v3395_v2  ;;  %v2821_v60 = vmul.f32 %v2819_v4, %v2819_v4  ;;  %v6140_v2 = vld [vmem:[%s9619_s0 + $0xc3] ss:$0 sm:$0xff] }
 0xf5b   :  { %v3397_v25 = vsub.f32 %v3390_v18, %v3396_v22  ;;  %v2825_v33 = vsel %vm743_vm2, %v2821_v60, 0.0 }
 0xf5c   :  { %2826 = vadd.xlane.f32.xlu1 %v2825_v33 }
 0xf5d   :  { %v3398_v62 = vmul.f32 %v3397_v25, %v3397_v25 }
 0xf5f   :  { %v3399_v48 = vsel %vm351_vm0, %v3398_v62, 0.0 }
 0xf60   :  { %3400 = vadd.xlane.f32.xlu0 %v3399_v48 }
 0xfe5   :  { %v2824_v40 = vpop.xlane.xlu0 %2823 }
 0xfe6   :  { %v2828_v51 = vmul.f32 0.0625, %v2824_v40 }
 0xfe8   :  { %v2830_v58 = vadd.f32 1e-05, %v2828_v51 }
 0xfe9   :  { %v2827_v41 = vpop.xlane.xlu1 %2826 }
 0xfea   :  { %6671 = vrsqrt.f32 %v2830_v58  ;;  %v2829_v45 = vmul.f32 0.0625, %v2827_v41 }
 0xfec   :  { %v2831_v56 = vadd.f32 1e-05, %v2829_v45 }
 0xfed   :  { %v3401_v38 = vpop.xlane.xlu0 %3400 }
 0xfee   :  { %6673 = vrsqrt.f32 %v2831_v56  ;;  %v3402_v50 = vmul.f32 0.0625, %v3401_v38 }
 0xff0   :  { %v3403_v59 = vadd.f32 1e-05, %v3402_v50 }
 0xff2   :  { %6675 = vrsqrt.f32 %v3403_v59 }
 0xff4   :  { %v6672_v63 = vpop.eup %6671 }
 0xff5   :  { %v2834_v5 = vmul.f32 %v6672_v63, %v2818_v54 }
 0xff7   :  { %v2840_v61 = vmul.f32 %v6130_v44, %v2834_v5 }
 0xff8   :  { %v6674_v13 = vpop.eup %6673 }
 0xff9   :  { %v2835_v18 = vmul.f32 %v6674_v13, %v2819_v4  ;;  %v8555_v27 = vadd.f32 %v6131_v12, %v2840_v61 }
 0xffb   :  { %9749 = vst [vmem:[#allocation10_spill] sm:$0xff] %v8555_v27  ;;  %v2841_v14 = vmul.f32 %v6130_v44, %v2835_v18  ;;  %6330 = vmatprep.mubr.msk.f32.mxu1 %vm351_vm0, %v8555_v27  ;;  %v286_v27 = vadd.f32 1.0, %v8353_v8 }
 0xffc   :  { %v6676_v34 = vpop.eup %6675 }
 0xffd   :  { %v3405_v19 = vmul.f32 %v6676_v34, %v3397_v25  ;;  %v8562_v54 = vadd.f32 %v6131_v12, %v2841_v14 }
 0xfff   :  { %9750 = vst [vmem:[#allocation8_spill] sm:$0xff] %v8562_v54  ;;  %6331 = vmatmul.mubr.msk.f32.vlgmr.msra.gmra.mrb[10].mxu1 %vm351_vm0, %v8562_v54  ;;  %v3410_v4 = vmul.f32 %v6136_v23, %v3405_v19 }
0x1000   :  { %6344 = vmatprep.mubr.msk.f32.mxu1 %vm6826_vm11, %v9735_v17 }
0x1001   :  { %v8571_v39 = vadd.f32 %v6137_v7, %v3410_v4 }
0x1003   :  { %6324 = vmatmul.mubr.msk.f32.vlgmr.msra.gmra.mrb[10].mxu0 %vm351_vm0, %v8571_v39 }
0x1004   :  { %6337 = vmatprep.mubr.msk.f32.mxu0 %vm6826_vm11, %v9735_v17 }
0x10d2   :  { %v6332_v22 = vpop.f32.mrb[10].mxu1 }
0x10d3   :  { %v8580_v60 = vadd.f32 %v6332_v22, %v6140_v2  ;;  %v3578_v25 = vpop.f32.mrb[11].mxu1 }
0x10d4   :  { %v8582_v33 = vadd.f32 %v6140_v2, %v3578_v25 }
0x10d5   :  { %3697 = vrot.lane.b32.xlu0 %v8580_v60, %s6819_s19 }
0x10d6   :  { %v3498_v62 = vpop.f32.mrb[10].mxu0  ;;  %3695 = vrot.lane.b32.xlu1 %v8582_v33, %s6819_s19 }
0x10d7   :  { %v6325_v48 = vpop.f32.mrb[11].mxu0  ;;  %v3499_v6 = vadd.f32 %v6138_v31, %v3498_v62 }
0x10d9   :  { %v3595_v46 = vrot.slane %v3499_v6, %v9717_v1  ;;  %v3588_v51 = vcombine.high %v3499_v6, %v3499_v6 }
0x10db   :  { %v3603_v11 = vcombine.high %v3595_v46, %v3595_v46  ;;  %v3611_v10 = vrot.slane %v3595_v46, %v9717_v1  ;;  %v3602_v59 = vrot.slane %v3588_v51, %v9717_v1 }
0x10dd   :  { %v3625_v0 = vrot.slane %v3603_v11, %v9717_v1  ;;  %v3640_v40 = vrot.slane %v3611_v10, %v9718_v57  ;;  %v3633_v58 = vcombine.high %v3611_v10, %v3611_v10  ;;  %v3604_v61 = vcombine.high %v3602_v59, %v3602_v59 }
0x10de   :  { %v3618_v13 = vrot.slane %v3602_v59, %v9717_v1 }
0x10df   :  { %v3644_v41 = vrot.slane %v3625_v0, %v9718_v57  ;;  %v3635_v63 = vcombine.high %v3625_v0, %v3625_v0  ;;  %v3648_v44 = vrot.slane %v3633_v58, %v9718_v57  ;;  %v3632_v23 = vrot.slane %v3604_v61, %v9717_v1 }
0x10e0   :  { %v3656_v19 = vrot.slane %v3618_v13, %v9718_v57  ;;  %v3634_v2 = vcombine.high %v3618_v13, %v3618_v13  ;;  %v8653_v61 = vmul.f32 %v3640_v40, %v8580_v60  ;;  %v8656_v13 = vmul.f32 %v3640_v40, %v8582_v33 }
0x10e1   :  { %v3652_v18 = vrot.slane %v3635_v63, %v9718_v57  ;;  %v3660_v22 = vrot.slane %v3632_v23, %v9718_v57  ;;  %v3636_v48 = vcombine.high %v3632_v23, %v3632_v23  ;;  %v9751_v63 = vld [vmem:[#allocation13_spill] sm:$0xff]  ;;  %v3680_v23 = vmul.f32 %v3644_v41, %v8580_v60 }
0x10e2   :  { %v3664_v31 = vrot.slane %v3634_v2, %v9718_v57  ;;  %v3682_v2 = vmul.f32 %v3648_v44, %v8580_v60  ;;  %v287_v9 = vadd.f32 %v9751_v63, %v8357_v24 }
0x10e3   :  { %v3668_v11 = vrot.slane %v3636_v48, %v9718_v57 }
0x1147   :  { %v8596_v45 = vpop.permute.xlu0 %3697 }
0x1148   :  { %v8598_v56 = vpop.permute.xlu1 %3695  ;;  %v3702_v38 = vmul.f32 %v8596_v45, %v3640_v40  ;;  %v3704_v5 = vmul.f32 %v8596_v45, %v3644_v41  ;;  %v3706_v14 = vmul.f32 %v8596_v45, %v3648_v44  ;;  %v3708_v7 = vmul.f32 %v8596_v45, %v3652_v18 }
0x1149   :  { %v3703_v50 = vmul.f32 %v8598_v56, %v3644_v41  ;;  %v3705_v12 = vmul.f32 %v8598_v56, %v3648_v44  ;;  %v3707_v34 = vmul.f32 %v8598_v56, %v3652_v18  ;;  %v3709_v4 = vmul.f32 %v8598_v56, %v3656_v19 }
0x114a   :  { %3735 = vrot.lane.b32.xlu1 %v3702_v38, %s6819_s19  ;;  %v3710_v25 = vmul.f32 %v8596_v45, %v3656_v19  ;;  %v3711_v62 = vmul.f32 %v8598_v56, %v3660_v22  ;;  %v3712_v6 = vmul.f32 %v8596_v45, %v3660_v22  ;;  %v3713_v46 = vmul.f32 %v8598_v56, %v3664_v31  ;;  %v3422_v38 = vld [vmem:[%s9619_s0 + $0xc4] sm:$0xff] }
0x114b   :  { %3737 = vrot.lane.b32.xlu0 %v3703_v50, %s6819_s19  ;;  %v3701_v10 = vmul.f32 %v8598_v56, %v3640_v40  ;;  %v3715_v0 = vmul.f32 %v8598_v56, %v3668_v11  ;;  %v3714_v51 = vmul.f32 %v8596_v45, %v3664_v31  ;;  %v3716_v58 = vmul.f32 %v8596_v45, %v3668_v11  ;;  %v3423_v50 = vld [vmem:[%s9619_s0 + $0xcc] sm:$0xff] }
0x114c   :  { %v6444_v59 = vpack.c.bf16 %v3423_v50, %v3422_v38  ;;  %v281_v40 = vadd.f32 %v9751_v63, %v8332_v16  ;;  %v301_v50 = vmul.f32 %v9751_v63, %v8368_v29 }
0x114e   :  { %3739 = vrot.lane.b32.xlu1 %v3704_v5, %s6819_s19  ;;  %6445 = vmatpush3.bf16.msra.mxu0 %v6444_v59  ;;  %v279_v5 = vadd.f32 %v9751_v63, %v8324_v20 }
0x114f   :  { %3741 = vrot.lane.b32.xlu0 %v3705_v12, %s6819_s19  ;;  %6347 = vmatprep.subr.mxu0 %v9735_v17  ;;  %v295_v12 = vmul.f32 %v9751_v63, %v8343_v30 }
0x1151   :  { %v311_v48 = vsub.f32 %v279_v5, %v295_v12  ;;  %v8705_v12 = vmul.f32 %v3668_v11, %v8582_v33 }
0x1152   :  { %3743 = vrot.lane.b32.xlu1 %v3706_v14, %s6819_s19  ;;  %v3679_v14 = vmul.f32 %v3644_v41, %v8582_v33  ;;  %v282_v41 = vadd.f32 1.0, %v8332_v16  ;;  %v8689_v16 = vmul.f32 %v3660_v22, %v8580_v60 }
0x1153   :  { %3745 = vrot.lane.b32.xlu0 %v3707_v34, %s6819_s19  ;;  %v280_v34 = vadd.f32 1.0, %v8324_v20  ;;  %v297_v20 = vmul.f32 %v9751_v63, %v8346_v32 }
0x1155   :  { %v313_v5 = vsub.f32 %v281_v40, %v297_v20  ;;  %v8716_v40 = vmul.f32 %v3664_v31, %v8580_v60  ;;  %v288_v20 = vadd.f32 1.0, %v8357_v24 }
0x1156   :  { %3747 = vrot.lane.b32.xlu1 %v3708_v7, %s6819_s19  ;;  %v3681_v7 = vmul.f32 %v3648_v44, %v8582_v33  ;;  %v299_v44 = vmul.f32 %v9751_v63, %v8349_v37 }
0x1157   :  { %3749 = vrot.lane.b32.xlu0 %v3709_v4, %s6819_s19  ;;  %v278_v4 = vadd.f32 1.0, %v8321_v42 }
0x115a   :  { %3751 = vrot.lane.b32.xlu1 %v3710_v25, %s6819_s19  ;;  %v3683_v25 = vmul.f32 %v3652_v18, %v8582_v33 }
0x115b   :  { %3753 = vrot.lane.b32.xlu0 %v3711_v62, %s6819_s19  ;;  %v8666_v62 = vmul.f32 %v3652_v18, %v8580_v60  ;;  %v8679_v18 = vmul.f32 %v3656_v19, %v8582_v33 }
0x115e   :  { %3755 = vrot.lane.b32.xlu1 %v3712_v6, %s6819_s19  ;;  %v283_v6 = vadd.f32 %v9751_v63, %v8335_v36 }
0x115f   :  { %3757 = vrot.lane.b32.xlu0 %v3713_v46, %s6819_s19  ;;  %v284_v46 = vadd.f32 1.0, %v8335_v36  ;;  %v285_v36 = vadd.f32 %v9751_v63, %v8353_v8 }
0x1161   :  { %v316_v54 = vsub.f32 %v284_v46, %v8349_v37  ;;  %v8722_v37 = vmul.f32 %v3668_v11, %v8580_v60  ;;  %v289_v11 = vadd.f32 %v9751_v63, %v8375_v47 }
0x1162   :  { %3733 = vrot.lane.b32.xlu1 %v3701_v10, %s6819_s19  ;;  %v312_v10 = vsub.f32 %v280_v34, %v8343_v30  ;;  %v8699_v30 = vmul.f32 %v3664_v31, %v8582_v33 }
0x1163   :  { %3761 = vrot.lane.b32.xlu0 %v3715_v0, %s6819_s19  ;;  %v8683_v0 = vmul.f32 %v3656_v19, %v8580_v60  ;;  %v8701_v19 = vmul.f32 -1e+30, %v311_v48  ;;  %v303_v48 = vmul.f32 %v9751_v63, %v8371_v49 }
0x1164   :  { %v8709_v3 = vmul.f32 -1e+30, %v312_v10 }
0x1165   :  { %v319_v60 = vsub.f32 %v287_v9, %v303_v48 }
0x1166   :  { %3759 = vrot.lane.b32.xlu1 %v3714_v51, %s6819_s19  ;;  %v8686_v51 = vmul.f32 %v3660_v22, %v8582_v33  ;;  %v314_v22 = vsub.f32 %v282_v41, %v8346_v32 }
0x1168   :  { %v8729_v46 = vmul.f32 -1e+30, %v314_v22 }
0x116a   :  { %3763 = vrot.lane.b32.xlu1 %v3716_v58, %s6819_s19  ;;  %v310_v58 = vsub.f32 %v278_v4, %v8340_v52  ;;  %v315_v4 = vsub.f32 %v283_v6, %v299_v44  ;;  %v8727_v6 = vmul.f32 -1e+30, %v313_v5 }
0x116c   :  { %v8718_v32 = vmul.f32 -1e+30, %v310_v58  ;;  %v8731_v10 = vmul.f32 -1e+30, %v315_v4  ;;  %v8733_v58 = vmul.f32 -1e+30, %v316_v54  ;;  %v277_v54 = vadd.f32 %v9751_v63, %v8321_v42 }
0x116d   :  { %v307_v42 = vmul.f32 %v9751_v63, %v8393_v35 }
0x116e   :  { %9752 = vst [vmem:[#allocation11_spill] sm:$0xff] %v8731_v10 }
0x11bc   :  { %v8692_v38 = vpop.permute.xlu1 %3735 }
0x11bd   :  { %v3738_v59 = vpop.permute.xlu0 %3737 }
0x11be   :  { %v3783_v34 = vadd.f32 %v3738_v59, %v3679_v14  ;;  %v317_v14 = vsub.f32 %v285_v36, %v301_v50  ;;  %v318_v36 = vsub.f32 %v286_v27, %v8368_v29  ;;  %v293_v29 = vmul.f32 %v9751_v63, %v8340_v52 }
0x11c0   :  { %v3740_v33 = vpop.permute.xlu1 %3739  ;;  %v8725_v8 = vadd.f32 %v3783_v34, %v8701_v19  ;;  %v8743_v59 = vmul.f32 -1e+30, %v317_v14  ;;  %v8766_v14 = vmul.f32 -1e+30, %v319_v60 }
0x11c1   :  { %v3784_v41 = vadd.f32 %v3740_v33, %v3680_v23  ;;  %v3742_v44 = vpop.permute.xlu0 %3741  ;;  %v305_v23 = vmul.f32 %v9751_v63, %v8386_v55  ;;  %v8764_v33 = vmul.f32 -1e+30, %v318_v36 }
0x11c2   :  { %v3785_v31 = vadd.f32 %v3742_v44, %v3681_v7  ;;  %v320_v7 = vsub.f32 %v288_v20, %v8371_v49  ;;  %v3822_v9 = vsel %vm351_vm0, %v8725_v8, -inf  ;;  %v291_v49 = vadd.f32 %v9751_v63, %v8379_v21  ;;  %9753 = vst [vmem:[#allocation3_spill] sm:$0xff] %v8766_v14 }
0x11c3   :  { %v8737_v24 = vadd.f32 %v3784_v41, %v8709_v3  ;;  %v321_v20 = vsub.f32 %v289_v11, %v305_v23 }
0x11c4   :  { %v3744_v50 = vpop.permute.xlu1 %3743  ;;  %v8755_v5 = vadd.f32 %v3785_v31, %v8727_v6  ;;  %v309_v31 = vsub.f32 %v277_v54, %v293_v29 }
0x11c5   :  { %v3823_v27 = vsel %vm743_vm2, %v8737_v24, -inf  ;;  %v3786_v22 = vadd.f32 %v3744_v50, %v3682_v2  ;;  %v3746_v34 = vpop.permute.xlu0 %3745  ;;  %v8768_v2 = vmul.f32 -1e+30, %v320_v7  ;;  %v8785_v29 = vmul.f32 -1e+30, %v321_v20 }
0x11c6   :  { %v3824_v4 = vmax.f32 %v3822_v9, %v3823_v27  ;;  %v3787_v48 = vadd.f32 %v3746_v34, %v3683_v25  ;;  %v290_v25 = vadd.f32 1.0, %v8375_v47  ;;  %v3831_v50 = vsel %vm351_vm0, %v8755_v5, -inf }
0x11c7   :  { %v8762_v52 = vadd.f32 %v3786_v22, %v8729_v46  ;;  %v323_v27 = vsub.f32 %v291_v49, %v307_v42  ;;  %v3782_v47 = vadd.f32 %v8692_v38, %v8653_v61  ;;  %v292_v22 = vadd.f32 1.0, %v8379_v21 }
0x11c8   :  { %v3825_v41 = vrot.slane %v3824_v4, 4  ;;  %v3748_v44 = vpop.permute.xlu1 %3747  ;;  %v8776_v9 = vadd.f32 %v3787_v48, %v8731_v10 }
0x11c9   :  { %v3832_v63 = vsel %vm743_vm2, %v8762_v52, -inf  ;;  %v3788_v36 = vadd.f32 %v3748_v44, %v8666_v62  ;;  %v3750_v60 = vpop.permute.xlu0 %3749  ;;  %v8788_v62 = vmul.f32 -1e+30, %v309_v31  ;;  %v8799_v44 = vmul.f32 -1e+30, %v323_v27 }
0x11ca   :  { %v3826_v11 = vmax.f32 %v3824_v4, %v3825_v41  ;;  %v3833_v23 = vmax.f32 %v3831_v50, %v3832_v63  ;;  %v3789_v7 = vadd.f32 %v3750_v60, %v8679_v18  ;;  %v322_v4 = vsub.f32 %v290_v25, %v8386_v55 }
0x11cb   :  { %v8783_v54 = vadd.f32 %v3788_v36, %v8733_v58  ;;  %v3840_v18 = vsel %vm351_vm0, %v8776_v9, -inf  ;;  %v8802_v31 = vadd.f32 %v3782_v47, %v8718_v32  ;;  %v324_v50 = vsub.f32 %v292_v22, %v8393_v35 }
0x11cc   :  { %v3827_v34 = vrot.slane %v3826_v11, 2  ;;  %v3834_v48 = vrot.slane %v3833_v23, 4  ;;  %v3752_v10 = vpop.permute.xlu1 %3751  ;;  %v8796_v38 = vadd.f32 %v3789_v7, %v8743_v59 }
0x11cd   :  { %v3841_v61 = vsel %vm743_vm2, %v8783_v54, -inf  ;;  %v3790_v49 = vadd.f32 %v3752_v10, %v8683_v0  ;;  %v3754_v42 = vpop.permute.xlu0 %3753  ;;  %v8809_v10 = vmul.f32 -1e+30, %v322_v4 }
0x11ce   :  { %v3828_v21 = vmax.f32 %v3826_v11, %v3827_v34  ;;  %v3835_v20 = vmax.f32 %v3833_v23, %v3834_v48  ;;  %v3842_v41 = vmax.f32 %v3840_v18, %v3841_v61  ;;  %v3791_v25 = vadd.f32 %v3754_v42, %v8686_v51 }
0x11cf   :  { %v8805_v55 = vadd.f32 %v3790_v49, %v8764_v33  ;;  %v3849_v11 = vsel %vm351_vm0, %v8796_v38, -inf  ;;  %v3814_v48 = vsel %vm743_vm2, %v8802_v31, -inf  ;;  %v8825_v61 = vmul.f32 -1e+30, %v324_v50 }
0x11d0   :  { %v3829_v63 = vrot.slane %v3828_v21, 1  ;;  %v3836_v36 = vrot.slane %v3835_v20, 2  ;;  %v3843_v60 = vrot.slane %v3842_v41, 4  ;;  %v3756_v0 = vpop.permute.xlu1 %3755  ;;  %v8816_v7 = vadd.f32 %v3791_v25, %v8766_v14 }
0x11d1   :  { %v3850_v23 = vsel %vm743_vm2, %v8805_v55, -inf  ;;  %v3792_v27 = vadd.f32 %v3756_v0, %v8689_v16  ;;  %v3758_v51 = vpop.permute.xlu0 %3757 }
0x11d2   :  { %v3830_v47 = vmax.f32 %v3828_v21, %v3829_v63  ;;  %v3837_v35 = vmax.f32 %v3835_v20, %v3836_v36  ;;  %v3844_v22 = vmax.f32 %v3842_v41, %v3843_v60  ;;  %v3851_v34 = vmax.f32 %v3849_v11, %v3850_v23 }
0x11d3   :  { %v8822_v4 = vadd.f32 %v3792_v27, %v8768_v2  ;;  %v3793_v18 = vadd.f32 %v3758_v51, %v8699_v30  ;;  %v3858_v41 = vsel %vm351_vm0, %v8816_v7, -inf }
0x11d4   :  { %v3887_v49 = vsub.f32 %v8725_v8, %v3830_v47  ;;  %v3888_v42 = vsub.f32 %v8737_v24, %v3830_v47  ;;  %v3838_v16 = vrot.slane %v3837_v35, 1  ;;  %v3845_v25 = vrot.slane %v3844_v22, 2  ;;  %v3734_v21 = vpop.permute.xlu1 %3733 }
0x11d5   :  { %v3852_v20 = vrot.slane %v3851_v34, 4  ;;  %v3859_v63 = vsel %vm743_vm2, %v8822_v4, -inf  ;;  %v3781_v36 = vadd.f32 %v3734_v21, %v8656_v13  ;;  %v8835_v24 = vadd.f32 %v3793_v18, %v8785_v29  ;;  %v3762_v14 = vpop.permute.xlu0 %3761 }
0x11d6   :  { %v3905_v60 = vmul.f32 1.442695, %v3887_v49  ;;  %v3907_v30 = vmul.f32 1.442695, %v3888_v42  ;;  %v3839_v50 = vmax.f32 %v3837_v35, %v3838_v16  ;;  %v3846_v0 = vmax.f32 %v3844_v22, %v3845_v25 }
0x11d7   :  { %v3853_v11 = vmax.f32 %v3851_v34, %v3852_v20  ;;  %v3860_v8 = vmax.f32 %v3858_v41, %v3859_v63  ;;  %v8838_v23 = vadd.f32 %v3781_v36, %v8788_v62  ;;  %v3795_v20 = vadd.f32 %v3762_v14, %v8705_v12 }
0x11d8   :  { %6677 = vpow2.f32 %v3905_v60  ;;  %v3889_v27 = vsub.f32 %v8755_v5, %v3839_v50  ;;  %v3890_v51 = vsub.f32 %v8762_v52, %v3839_v50  ;;  %v3847_v47 = vrot.slane %v3846_v0, 1  ;;  %v3760_v13 = vpop.permute.xlu1 %3759 }
0x11d9   :  { %6679 = vpow2.f32 %v3907_v30  ;;  %v3854_v49 = vrot.slane %v3853_v11, 2  ;;  %v3861_v35 = vrot.slane %v3860_v8, 4  ;;  %v3813_v22 = vsel %vm351_vm0, %v8838_v23, -inf }
0x11da   :  { %v3909_v34 = vmul.f32 1.442695, %v3889_v27  ;;  %v3911_v18 = vmul.f32 1.442695, %v3890_v51  ;;  %v3848_v42 = vmax.f32 %v3846_v0, %v3847_v47  ;;  %v3815_v16 = vmax.f32 %v3813_v22, %v3814_v48 }
0x11db   :  { %v3855_v25 = vmax.f32 %v3853_v11, %v3854_v49  ;;  %v3862_v21 = vmax.f32 %v3860_v8, %v3861_v35  ;;  %v3794_v5 = vadd.f32 %v3760_v13, %v8716_v40  ;;  %v8849_v50 = vadd.f32 %v3795_v20, %v8799_v44 }
0x11dc   :  { %6681 = vpow2.f32 %v3909_v34  ;;  %v3891_v52 = vsub.f32 %v8776_v9, %v3848_v42  ;;  %v3892_v41 = vsub.f32 %v8783_v54, %v3848_v42  ;;  %v3816_v63 = vrot.slane %v3815_v16, 4  ;;  %v3764_v36 = vpop.permute.xlu1 %3763 }
0x11dd   :  { %6683 = vpow2.f32 %v3911_v18  ;;  %v3856_v60 = vrot.slane %v3855_v25, 1  ;;  %v3863_v30 = vrot.slane %v3862_v21, 2  ;;  %v8852_v12 = vadd.f32 %v3794_v5, %v8809_v10 }
0x11de   :  { %v3913_v48 = vmul.f32 1.442695, %v3891_v52  ;;  %v3915_v0 = vmul.f32 1.442695, %v3892_v41  ;;  %v3817_v11 = vmax.f32 %v3815_v16, %v3816_v63  ;;  %v3796_v9 = vadd.f32 %v3764_v36, %v8722_v37 }
0x11df   :  { %v3857_v40 = vmax.f32 %v3855_v25, %v3856_v60  ;;  %v3864_v14 = vmax.f32 %v3862_v21, %v3863_v30  ;;  %v3867_v54 = vsel %vm351_vm0, %v8835_v24, -inf  ;;  %v3868_v27 = vsel %vm743_vm2, %v8852_v12, -inf }
0x11e0   :  { %6685 = vpow2.f32 %v3913_v48  ;;  %v3818_v8 = vrot.slane %v3817_v11, 2  ;;  %v3876_v37 = vsel %vm351_vm0, %v8849_v50, -inf  ;;  %v3869_v22 = vmax.f32 %v3867_v54, %v3868_v27 }
0x11e1   :  { %6687 = vpow2.f32 %v3915_v0  ;;  %v3893_v51 = vsub.f32 %v8796_v38, %v3857_v40  ;;  %v3894_v47 = vsub.f32 %v8805_v55, %v3857_v40  ;;  %v3865_v13 = vrot.slane %v3864_v14, 1 }
0x11e2   :  { %v8861_v49 = vpop.eup %6677  ;;  %v3819_v35 = vmax.f32 %v3817_v11, %v3818_v8  ;;  %v8866_v34 = vadd.f32 %v3796_v9, %v8825_v61  ;;  %v3870_v20 = vrot.slane %v3869_v22, 4 }
0x11e3   :  { %v8868_v18 = vpop.eup %6679  ;;  %v3942_v42 = vsel %vm351_vm0, %v8861_v49, 0.0  ;;  %v3917_v16 = vmul.f32 1.442695, %v3893_v51  ;;  %v3919_v38 = vmul.f32 1.442695, %v3894_v47  ;;  %v3866_v25 = vmax.f32 %v3864_v14, %v3865_v13 }
0x11e4   :  { %v3943_v55 = vsel %vm743_vm2, %v8868_v18, 0.0  ;;  %v3820_v21 = vrot.slane %v3819_v35, 1  ;;  %v3877_v5 = vsel %vm743_vm2, %v8866_v34, -inf  ;;  %v3871_v30 = vmax.f32 %v3869_v22, %v3870_v20 }
0x11e5   :  { %v3944_v52 = vadd.f32 %v3943_v55, %v3942_v42  ;;  %6689 = vpow2.f32 %v3917_v16  ;;  %v3895_v41 = vsub.f32 %v8816_v7, %v3866_v25  ;;  %v3896_v63 = vsub.f32 %v8822_v4, %v3866_v25 }
0x11e6   :  { %v8878_v36 = vpop.eup %6681  ;;  %6691 = vpow2.f32 %v3919_v38  ;;  %v3821_v60 = vmax.f32 %v3819_v35, %v3820_v21  ;;  %v3878_v48 = vmax.f32 %v3876_v37, %v3877_v5  ;;  %v3872_v8 = vrot.slane %v3871_v30, 2 }
0x11e7   :  { %v8880_v0 = vpop.eup %6683  ;;  %v3945_v11 = vrot.slane %v3944_v52, 4  ;;  %v3951_v40 = vsel %vm351_vm0, %v8878_v36, 0.0  ;;  %v3921_v14 = vmul.f32 1.442695, %v3895_v41  ;;  %v3923_v9 = vmul.f32 1.442695, %v3896_v63 }
0x11e8   :  { %v3952_v54 = vsel %vm743_vm2, %v8880_v0, 0.0  ;;  %v3885_v7 = vsub.f32 %v8838_v23, %v3821_v60  ;;  %v3886_v4 = vsub.f32 %v8802_v31, %v3821_v60  ;;  %v3879_v47 = vrot.slane %v3878_v48, 4 }
0x11e9   :  { %v3946_v27 = vadd.f32 %v3945_v11, %v3944_v52  ;;  %v3953_v51 = vadd.f32 %v3952_v54, %v3951_v40  ;;  %6693 = vpow2.f32 %v3921_v14  ;;  %v3873_v22 = vmax.f32 %v3871_v30, %v3872_v8 }
0x11ea   :  { %v8888_v13 = vpop.eup %6685  ;;  %6695 = vpow2.f32 %v3923_v9  ;;  %v3901_v35 = vmul.f32 1.442695, %v3885_v7  ;;  %v3903_v37 = vmul.f32 1.442695, %v3886_v4  ;;  %v3880_v25 = vmax.f32 %v3878_v48, %v3879_v47 }
0x11eb   :  { %v8890_v42 = vpop.eup %6687  ;;  %v3947_v16 = vrot.slane %v3946_v27, 2  ;;  %v3954_v38 = vrot.slane %v3953_v51, 4  ;;  %v3960_v23 = vsel %vm351_vm0, %v8888_v13, 0.0  ;;  %v3874_v55 = vrot.slane %v3873_v22, 1 }
0x11ec   :  { %v3961_v31 = vsel %vm743_vm2, %v8890_v42, 0.0  ;;  %6697 = vpow2.f32 %v3901_v35  ;;  %v3881_v41 = vrot.slane %v3880_v25, 2 }
0x11ed   :  { %v3948_v21 = vadd.f32 %v3947_v16, %v3946_v27  ;;  %v3955_v20 = vadd.f32 %v3954_v38, %v3953_v51  ;;  %v3962_v5 = vadd.f32 %v3961_v31, %v3960_v23  ;;  %6699 = vpow2.f32 %v3903_v37 }
0x11ee   :  { %v3875_v52 = vmax.f32 %v3873_v22, %v3874_v55  ;;  %v3882_v54 = vmax.f32 %v3880_v25, %v3881_v41 }
0x11ef   :  { %v8896_v63 = vpop.eup %6689  ;;  %v3949_v60 = vrot.slane %v3948_v21, 1  ;;  %v3956_v30 = vrot.slane %v3955_v20, 2  ;;  %v3963_v11 = vrot.slane %v3962_v5, 4 }
0x11f0   :  { %v8898_v40 = vpop.eup %6691  ;;  %v3969_v48 = vsel %vm351_vm0, %v8896_v63, 0.0  ;;  %v3897_v14 = vsub.f32 %v8835_v24, %v3875_v52  ;;  %v3898_v9 = vsub.f32 %v8852_v12, %v3875_v52  ;;  %v3883_v37 = vrot.slane %v3882_v54, 1 }
0x11f1   :  { %v3950_v7 = vadd.f32 %v3949_v60, %v3948_v21  ;;  %v3957_v4 = vadd.f32 %v3956_v30, %v3955_v20  ;;  %v3964_v8 = vadd.f32 %v3963_v11, %v3962_v5  ;;  %v3970_v27 = vsel %vm743_vm2, %v8898_v40, 0.0 }
0x11f2   :  { %v3971_v51 = vadd.f32 %v3970_v27, %v3969_v48  ;;  %v3925_v47 = vmul.f32 1.442695, %v3897_v14  ;;  %v3927_v35 = vmul.f32 1.442695, %v3898_v9  ;;  %v3884_v25 = vmax.f32 %v3882_v54, %v3883_v37 }
0x11f3   :  { %v8906_v22 = vpop.eup %6693  ;;  %6701 = vrcp.f32 %v3950_v7  ;;  %v3958_v16 = vrot.slane %v3957_v4, 1  ;;  %v3965_v38 = vrot.slane %v3964_v8, 2 }
0x11f4   :  { %v8908_v23 = vpop.eup %6695  ;;  %v3972_v24 = vrot.slane %v3971_v51, 4  ;;  %v3978_v12 = vsel %vm351_vm0, %v8906_v22, 0.0  ;;  %6703 = vpow2.f32 %v3925_v47  ;;  %v3899_v41 = vsub.f32 %v8849_v50, %v3884_v25 }
0x11f5   :  { %v3959_v31 = vadd.f32 %v3958_v16, %v3957_v4  ;;  %v3966_v55 = vadd.f32 %v3965_v38, %v3964_v8  ;;  %v3979_v21 = vsel %vm743_vm2, %v8908_v23, 0.0  ;;  %6705 = vpow2.f32 %v3927_v35 }
0x11f6   :  { %v8914_v20 = vpop.eup %6697  ;;  %v3973_v5 = vadd.f32 %v3972_v24, %v3971_v51  ;;  %v3980_v52 = vadd.f32 %v3979_v21, %v3978_v12  ;;  %v3900_v60 = vsub.f32 %v8866_v34, %v3884_v25  ;;  %v3929_v7 = vmul.f32 1.442695, %v3899_v41 }
0x11f7   :  { %v8918_v30 = vpop.eup %6699  ;;  %6707 = vrcp.f32 %v3959_v31  ;;  %v3967_v11 = vrot.slane %v3966_v55, 1  ;;  %v3933_v48 = vsel %vm351_vm0, %v8914_v20, 0.0 }
0x11f8   :  { %v3974_v14 = vrot.slane %v3973_v5, 2  ;;  %v3981_v9 = vrot.slane %v3980_v52, 4  ;;  %v3934_v54 = vsel %vm743_vm2, %v8918_v30, 0.0  ;;  %v3931_v27 = vmul.f32 1.442695, %v3900_v60 }
0x11f9   :  { %v3968_v4 = vadd.f32 %v3967_v11, %v3966_v55  ;;  %v3935_v8 = vadd.f32 %v3934_v54, %v3933_v48  ;;  %6709 = vpow2.f32 %v3929_v7 }
0x11fa   :  { %v3975_v51 = vadd.f32 %v3974_v14, %v3973_v5  ;;  %v3982_v50 = vadd.f32 %v3981_v9, %v3980_v52 }
0x11fb   :  { %6711 = vrcp.f32 %v3968_v4  ;;  %v3936_v34 = vrot.slane %v3935_v8, 4 }
0x11fc   :  { %v3976_v47 = vrot.slane %v3975_v51, 1  ;;  %v3983_v35 = vrot.slane %v3982_v50, 2  ;;  %6713 = vpow2.f32 %v3931_v27 }
0x11fd   :  { %v6702_v37 = vpop.eup %6701  ;;  %v3937_v16 = vadd.f32 %v3936_v34, %v3935_v8 }
0x11fe   :  { %v8924_v38 = vpop.eup %6703  ;;  %v4015_v24 = vmul.f32 %v6702_v37, %v8861_v49  ;;  %v4016_v12 = vmul.f32 %v6702_v37, %v8868_v18  ;;  %v3977_v25 = vadd.f32 %v3976_v47, %v3975_v51  ;;  %v3984_v31 = vadd.f32 %v3983_v35, %v3982_v50 }
0x11ff   :  { %v8928_v55 = vpop.eup %6705  ;;  %v3938_v21 = vrot.slane %v3937_v16, 2  ;;  %v3987_v5 = vsel %vm351_vm0, %v8924_v38, 0.0 }
0x1200   :  { %v4031_v52 = vmul.f32 %v4015_v24, %v8598_v56  ;;  %v4032_v41 = vmul.f32 %v4016_v12, %v8596_v45  ;;  %6715 = vrcp.f32 %v3977_v25  ;;  %v3985_v60 = vrot.slane %v3984_v31, 1 }
0x1201   :  { %v6708_v11 = vpop.eup %6707  ;;  %v3939_v48 = vadd.f32 %v3938_v21, %v3937_v16  ;;  %v3988_v49 = vsel %vm743_vm2, %v8928_v55, 0.0 }
0x1202   :  { %v4054_v18 = vsel %vm351_vm0, %v4031_v52, 0.0  ;;  %v4055_v14 = vsel %vm743_vm2, %v4032_v41, 0.0  ;;  %v4017_v9 = vmul.f32 %v6708_v11, %v8878_v36  ;;  %v4018_v54 = vmul.f32 %v6708_v11, %v8880_v0 }
0x1203   :  { %v4056_v7 = vadd.f32 %v4055_v14, %v4054_v18  ;;  %v3986_v4 = vadd.f32 %v3985_v60, %v3984_v31  ;;  %v3940_v8 = vrot.slane %v3939_v48, 1  ;;  %v3989_v27 = vadd.f32 %v3988_v49, %v3987_v5  ;;  %v8940_v51 = vpop.eup %6709 }
0x1204   :  { %v4033_v50 = vmul.f32 %v4017_v9, %v8598_v56  ;;  %v4034_v34 = vmul.f32 %v4018_v54, %v8596_v45  ;;  %v3996_v52 = vsel %vm351_vm0, %v8940_v51, 0.0 }
0x1205   :  { %v6712_v47 = vpop.eup %6711  ;;  %6717 = vrcp.f32 %v3986_v4  ;;  %v3941_v35 = vadd.f32 %v3940_v8, %v3939_v48  ;;  %v3990_v37 = vrot.slane %v3989_v27, 4 }
0x1206   :  { %v8944_v16 = vpop.eup %6713  ;;  %v4063_v36 = vsel %vm351_vm0, %v4033_v50, 0.0  ;;  %v4064_v0 = vsel %vm743_vm2, %v4034_v34, 0.0  ;;  %v4019_v24 = vmul.f32 %v6712_v47, %v8888_v13  ;;  %v4020_v12 = vmul.f32 %v6712_v47, %v8890_v42 }
0x1207   :  { %v4065_v25 = vadd.f32 %v4064_v0, %v4063_v36  ;;  %6719 = vrcp.f32 %v3941_v35  ;;  %v3991_v31 = vadd.f32 %v3990_v37, %v3989_v27  ;;  %v3997_v41 = vsel %vm743_vm2, %v8944_v16, 0.0 }
0x1208   :  { %v4035_v21 = vmul.f32 %v4019_v24, %v8598_v56  ;;  %v4036_v5 = vmul.f32 %v4020_v12, %v8596_v45  ;;  %v3998_v11 = vadd.f32 %v3997_v41, %v3996_v52  ;;  %v4057_v47 = vrot.slane %v4056_v7, 4 }
0x1209   :  { %v3992_v60 = vrot.slane %v3991_v31, 2  ;;  %v4066_v35 = vrot.slane %v4065_v25, 4 }
0x120a   :  { %v6716_v48 = vpop.eup %6715  ;;  %v4072_v13 = vsel %vm351_vm0, %v4035_v21, 0.0  ;;  %v4073_v42 = vsel %vm743_vm2, %v4036_v5, 0.0  ;;  %v3999_v54 = vrot.slane %v3998_v11, 4 }
0x120b   :  { %v4074_v49 = vadd.f32 %v4073_v42, %v4072_v13  ;;  %v4021_v18 = vmul.f32 %v6716_v48, %v8896_v63  ;;  %v4022_v14 = vmul.f32 %v6716_v48, %v8898_v40  ;;  %v3993_v9 = vadd.f32 %v3992_v60, %v3991_v31 }
0x120c   :  { %v4000_v50 = vadd.f32 %v3999_v54, %v3998_v11  ;;  %v4058_v11 = vadd.f32 %v4057_v47, %v4056_v7  ;;  %v4067_v48 = vadd.f32 %v4066_v35, %v4065_v25 }
0x120d   :  { %v4037_v4 = vmul.f32 %v4021_v18, %v8598_v56  ;;  %v4038_v8 = vmul.f32 %v4022_v14, %v8596_v45  ;;  %v3994_v27 = vrot.slane %v3993_v9, 1  ;;  %v4075_v12 = vrot.slane %v4074_v49, 4 }
0x120e   :  { %v4001_v21 = vrot.slane %v4000_v50, 2  ;;  %v4059_v25 = vrot.slane %v4058_v11, 2 }
0x120f   :  { %v6718_v34 = vpop.eup %6717  ;;  %v4081_v37 = vsel %vm351_vm0, %v4037_v4, 0.0  ;;  %v4082_v36 = vsel %vm743_vm2, %v4038_v8, 0.0  ;;  %v3995_v40 = vadd.f32 %v3994_v27, %v3993_v9  ;;  %v4076_v9 = vadd.f32 %v4075_v12, %v4074_v49 }
0x1210   :  { %v4023_v0 = vmul.f32 %v6718_v34, %v8906_v22  ;;  %v4024_v63 = vmul.f32 %v6718_v34, %v8908_v23  ;;  %v4083_v31 = vadd.f32 %v4082_v36, %v4081_v37  ;;  %v4002_v13 = vadd.f32 %v4001_v21, %v4000_v50 }
0x1211   :  { %v6720_v24 = vpop.eup %6719  ;;  %6721 = vrcp.f32 %v3995_v40  ;;  %v4068_v50 = vrot.slane %v4067_v48, 2  ;;  %v4077_v35 = vrot.slane %v4076_v9, 2 }
0x1212   :  { %v4039_v5 = vmul.f32 %v4023_v0, %v8598_v56  ;;  %v4040_v52 = vmul.f32 %v4024_v63, %v8596_v45  ;;  %v4013_v41 = vmul.f32 %v6720_v24, %v8914_v20  ;;  %v4014_v60 = vmul.f32 %v6720_v24, %v8918_v30 }
0x1213   :  { %v4084_v18 = vrot.slane %v4083_v31, 4  ;;  %v4003_v14 = vrot.slane %v4002_v13, 1  ;;  %v4060_v0 = vadd.f32 %v4059_v25, %v4058_v11  ;;  %v4069_v63 = vadd.f32 %v4068_v50, %v4067_v48 }
0x1214   :  { %v4091_v22 = vsel %vm743_vm2, %v4040_v52, 0.0  ;;  %v4029_v23 = vmul.f32 %v4013_v41, %v8598_v56  ;;  %v4030_v42 = vmul.f32 %v4014_v60, %v8596_v45  ;;  %v4090_v54 = vsel %vm351_vm0, %v4039_v5, 0.0 }
0x1215   :  { %v4085_v30 = vadd.f32 %v4084_v18, %v4083_v31  ;;  %v4092_v7 = vadd.f32 %v4091_v22, %v4090_v54  ;;  %v4004_v27 = vadd.f32 %v4003_v14, %v4002_v13  ;;  %v4078_v21 = vadd.f32 %v4077_v35, %v4076_v9 }
0x1216   :  { %v4045_v4 = vsel %vm351_vm0, %v4029_v23, 0.0  ;;  %v4046_v20 = vsel %vm743_vm2, %v4030_v42, 0.0  ;;  %v4061_v60 = vrot.slane %v4060_v0, 1  ;;  %v4070_v42 = vrot.slane %v4069_v63, 1 }
0x1217   :  { %v4047_v8 = vadd.f32 %v4046_v20, %v4045_v4  ;;  %v4093_v34 = vrot.slane %v4092_v7, 4  ;;  %6723 = vrcp.f32 %v4004_v27  ;;  %v4086_v37 = vrot.slane %v4085_v30, 2 }
0x1218   :  { %v4079_v18 = vrot.slane %v4078_v21, 1  ;;  %v4062_v4 = vadd.f32 %v4061_v60, %v4060_v0  ;;  %v4071_v25 = vadd.f32 %v4070_v42, %v4069_v63  ;;  %v6143_v42 = vld [vmem:[%s9619_s0 + $0xd4] ss:$0 sm:$0xff] }
0x1219   :  { %v4048_v47 = vrot.slane %v4047_v8, 4  ;;  %v4094_v36 = vadd.f32 %v4093_v34, %v4092_v7  ;;  %v4087_v52 = vadd.f32 %v4086_v37, %v4085_v30 }
0x121b   :  { %v4049_v49 = vadd.f32 %v4048_v47, %v4047_v8  ;;  %v4095_v40 = vrot.slane %v4094_v36, 2  ;;  %v6722_v24 = vpop.eup %6721  ;;  %v4088_v48 = vrot.slane %v4087_v52, 1  ;;  %v4080_v8 = vadd.f32 %v4079_v18, %v4078_v21 }
0x121c   :  { %v4025_v31 = vmul.f32 %v6722_v24, %v8924_v38  ;;  %v4026_v5 = vmul.f32 %v6722_v24, %v8928_v55 }
0x121d   :  { %v4050_v12 = vrot.slane %v4049_v49, 2  ;;  %v4096_v13 = vadd.f32 %v4095_v40, %v4094_v36  ;;  %v4089_v35 = vadd.f32 %v4088_v48, %v4087_v52 }
0x121e   :  { %v4042_v22 = vmul.f32 %v4026_v5, %v8596_v45  ;;  %v4041_v23 = vmul.f32 %v4025_v31, %v8598_v56 }
0x121f   :  { %v4051_v41 = vadd.f32 %v4050_v12, %v4049_v49  ;;  %v4097_v55 = vrot.slane %v4096_v13, 1 }
0x1220   :  { %v4099_v14 = vsel %vm351_vm0, %v4041_v23, 0.0  ;;  %v4100_v9 = vsel %vm743_vm2, %v4042_v22, 0.0 }
0x1221   :  { %v4052_v11 = vrot.slane %v4051_v41, 1  ;;  %v6724_v54 = vpop.eup %6723  ;;  %v4101_v20 = vadd.f32 %v4100_v9, %v4099_v14  ;;  %v4098_v36 = vadd.f32 %v4097_v55, %v4096_v13 }
0x1222   :  { %v4027_v30 = vmul.f32 %v6724_v54, %v8940_v51  ;;  %v4028_v7 = vmul.f32 %v6724_v54, %v8944_v16 }
0x1223   :  { %v4053_v38 = vadd.f32 %v4052_v11, %v4051_v41  ;;  %v4102_v27 = vrot.slane %v4101_v20, 4 }
0x1224   :  { %v4044_v34 = vmul.f32 %v4028_v7, %v8596_v45  ;;  %v4043_v47 = vmul.f32 %v4027_v30, %v8598_v56  ;;  %v4234_v30 = vld [vmem:[%s9619_s0 + $0xd5] sm:$0xff]  ;;  %v4235_v7 = vld [vmem:[%s9619_s0 + $0xdd] sm:$0xff] }
0x1225   :  { %v4129_v50 = vsel %vm1221_vm4, %v4062_v4, %v4053_v38  ;;  %v4103_v0 = vadd.f32 %v4102_v27, %v4101_v20 }
0x1226   :  { %v4130_v37 = vsel %vm1223_vm3, %v4071_v25, %v4129_v50  ;;  %v4108_v51 = vsel %vm351_vm0, %v4043_v47, 0.0  ;;  %v4109_v16 = vsel %vm743_vm2, %v4044_v34, 0.0  ;;  %v6447_v25 = vpack.c.bf16 %v4235_v7, %v4234_v30  ;;  %v6145_v34 = vld [vmem:[%s9619_s0 + $0xf1] ss:$0 sm:$0xff] }
0x1227   :  { %v4131_v49 = vsel %vm1225_vm5, %v4080_v8, %v4130_v37  ;;  %v4104_v40 = vrot.slane %v4103_v0, 2  ;;  %v4110_v24 = vadd.f32 %v4109_v16, %v4108_v51 }
0x1228   :  { %v4132_v63 = vsel %vm1227_vm6, %v4089_v35, %v4131_v49  ;;  %6448 = vmatpush3.bf16.msra.mxu1 %v6447_v25  ;;  %v6146_v35 = vld [vmem:[%s9619_s0 + $0xf2] ss:$0 sm:$0xff]  ;;  %v6147_v49 = vld [vmem:[%s9619_s0 + $0xe5] ss:$0 sm:$0xff] }
0x1229   :  { %v4133_v12 = vsel %vm1229_vm7, %v4098_v36, %v4132_v63  ;;  %v4105_v45 = vadd.f32 %v4104_v40, %v4103_v0  ;;  %v4111_v21 = vrot.slane %v4110_v24, 4  ;;  %6449 = vmatprep.subr.bf16.mxu1 %v9748_v15  ;;  %v4237_v0 = vld [vmem:[%s9619_s0 + $0xe6] sm:$0xff] }
0x122b   :  { %v4106_v56 = vrot.slane %v4105_v45, 1  ;;  %v4112_v31 = vadd.f32 %v4111_v21, %v4110_v24  ;;  %v6149_v24 = vld [vmem:[%s9619_s0 + $0xee] ss:$0 sm:$0xff] }
0x122d   :  { %v4107_v5 = vadd.f32 %v4106_v56, %v4105_v45  ;;  %v4113_v52 = vrot.slane %v4112_v31, 2 }
0x122f   :  { %v4114_v41 = vadd.f32 %v4113_v52, %v4112_v31  ;;  %v4134_v60 = vsel %vm1231_vm8, %v4107_v5, %v4133_v12 }
0x1231   :  { %v4115_v13 = vrot.slane %v4114_v41, 1 }
0x1233   :  { %v4116_v22 = vadd.f32 %v4115_v13, %v4114_v41 }
0x1235   :  { %v4135_v23 = vsel %vm1233_vm9, %v4116_v22, %v4134_v60  ;;  %v4420_v22 = vld [vmem:[%s9619_s0 + $0xf5] sm:$0xff] }
0x1236   :  { %6338 = vmatmul.mubr.msk.f32.vlgmr.msra.gmra.mrb[12].mxu0 %vm351_vm0, %v4135_v23  ;;  %v4421_v23 = vld [vmem:[%s9619_s0 + $0xfd] sm:$0xff] }
0x1237   :  { %6349 = vmatprep.mubr.msk.f32.mxu0 %vm6826_vm11, %v9735_v17  ;;  %6348 = vmatpush3.msra.mxu0 %v4237_v0 }
0x1238   :  { %6452 = vmatprep.subr.bf16.mxu0 %v9748_v15 }
0x1309   :  { %v4204_v11 = vpop.f32.mrb[12].mxu0 }
0x130a   :  { %v4205_v18 = vadd.f32 %v6143_v42, %v4204_v11  ;;  %v6339_v48 = vpop.f32.mrb[13].mxu0  ;;  %v6450_v42 = vpack.c.bf16 %v4421_v23, %v4420_v22 }
0x130c   :  { %v4208_v14 = vadd.f32 %v4205_v18, %v8571_v39 }
0x130e   :  { %v4211_v9 = vsel %vm351_vm0, %v4208_v14, 0.0 }
0x130f   :  { %4212 = vadd.xlane.f32.xlu0 %v4211_v9  ;;  %v6151_v9 = vld [vmem:[%s9619_s0 + $0xf3] ss:$0 sm:$0xff] }
0x139c   :  { %v4213_v54 = vpop.xlane.xlu0 %4212 }
0x139d   :  { %v4214_v38 = vmul.f32 0.0625, %v4213_v54 }
0x139f   :  { %v4215_v4 = vsub.f32 %v4208_v14, %v4214_v38  ;;  %v6152_v38 = vld [vmem:[%s9619_s0 + $0xf4] ss:$0 sm:$0xff] }
0x13a1   :  { %v4216_v55 = vmul.f32 %v4215_v4, %v4215_v4 }
0x13a3   :  { %v4217_v20 = vsel %vm351_vm0, %v4216_v55, 0.0 }
0x13a4   :  { %4218 = vadd.xlane.f32.xlu1 %v4217_v20  ;;  %v6153_v20 = vld [vmem:[%s9619_s0 + $0x105] ss:$0 sm:$0xff] }
0x1431   :  { %v4219_v39 = vpop.xlane.xlu1 %4218 }
0x1432   :  { %v4220_v8 = vmul.f32 0.0625, %v4219_v39 }
0x1434   :  { %v4221_v27 = vadd.f32 1e-05, %v4220_v8 }
0x1436   :  { %6725 = vrsqrt.f32 %v4221_v27 }
0x1440   :  { %v6726_v50 = vpop.eup %6725 }
0x1441   :  { %v4223_v47 = vmul.f32 %v6726_v50, %v4215_v4 }
0x1443   :  { %v4228_v37 = vmul.f32 %v6145_v34, %v4223_v47 }
0x1445   :  { %v4233_v36 = vadd.f32 %v6146_v35, %v4228_v37 }
0x1447   :  { %6345 = vmatmul.mubr.msk.f32.vlgmr.msra.gmra.mrb[12].mxu1 %vm351_vm0, %v4233_v36 }
0x1448   :  { %6356 = vmatprep.mubr.msk.f32.mxu1 %vm6826_vm11, %v9735_v17  ;;  %6451 = vmatpush3.bf16.msra.mxu1 %v6450_v42 }
0x1449   :  { %6455 = vmatprep.subr.bf16.mxu1 %v9748_v15 }
0x151a   :  { %v4312_v51 = vpop.f32.mrb[12].mxu1 }
0x151b   :  { %v4313_v16 = vadd.f32 %v6147_v49, %v4312_v51  ;;  %v6346_v63 = vpop.f32.mrb[13].mxu1 }
0x151d   :  { %v4316_v40 = vmax.f32 %v4313_v16, 0.0 }
0x151f   :  { %6350 = vmatmul.mubr.msk.f32.vlgmr.msra.gmra.mrb[14].mxu0 %vm1456_vm10, %v4316_v40 }
0x1520   :  { %6363 = vmatprep.mubr.msk.f32.mxu0 %vm6826_vm11, %v9735_v17 }
0x15f2   :  { %v4390_v12 = vpop.f32.mrb[14].mxu0 }
0x15f3   :  { %v4391_v45 = vadd.f32 %v6149_v24, %v4390_v12  ;;  %v6351_v21 = vpop.f32.mrb[15].mxu0 }
0x15f5   :  { %v4394_v56 = vadd.f32 %v4391_v45, %v4233_v36 }
0x15f7   :  { %v4397_v31 = vsel %vm351_vm0, %v4394_v56, 0.0 }
0x15f8   :  { %4398 = vadd.xlane.f32.xlu0 %v4397_v31 }
0x1685   :  { %v4399_v5 = vpop.xlane.xlu0 %4398 }
0x1686   :  { %v4400_v52 = vmul.f32 0.0625, %v4399_v5 }
0x1688   :  { %v4401_v41 = vsub.f32 %v4394_v56, %v4400_v52 }
0x168a   :  { %v4402_v60 = vmul.f32 %v4401_v41, %v4401_v41 }
0x168c   :  { %v4403_v13 = vsel %vm351_vm0, %v4402_v60, 0.0 }
0x168d   :  { %4404 = vadd.xlane.f32.xlu0 %v4403_v13 }
0x171a   :  { %v4405_v11 = vpop.xlane.xlu0 %4404 }
0x171b   :  { %v4406_v18 = vmul.f32 0.0625, %v4405_v11 }
0x171d   :  { %v4407_v48 = vadd.f32 1e-05, %v4406_v18  ;;  %v4423_v18 = vld [vmem:[%s9619_s0 + $0x106] sm:$0xff] }
0x171f   :  { %6727 = vrsqrt.f32 %v4407_v48  ;;  %v4424_v48 = vld [vmem:[%s9619_s0 + $0x10e] sm:$0xff] }
0x1729   :  { %v6728_v14 = vpop.eup %6727 }
0x172a   :  { %v4409_v54 = vmul.f32 %v6728_v14, %v4401_v41  ;;  %v6453_v14 = vpack.c.bf16 %v4424_v48, %v4423_v18 }
0x172c   :  { %v4414_v4 = vmul.f32 %v6151_v9, %v4409_v54  ;;  %6454 = vmatpush3.bf16.msra.mxu0 %v6453_v14  ;;  %v4991_v9 = vld [vmem:[%s9619_s0 + $0x128] sm:$0xff]  ;;  %v4992_v54 = vld [vmem:[%s9619_s0 + $0x130] sm:$0xff] }
0x172e   :  { %v9048_v55 = vadd.f32 %v6152_v38, %v4414_v4  ;;  %v9093_v38 = vpack.c.bf16 %v4992_v54, %v4991_v9 }
0x1730   :  { %6357 = vmatmul.mubr.msk.f32.vlgmr.msra.gmra.mrb[14].mxu1 %vm351_vm0, %v9048_v55  ;;  %6459 = vmatprep.subr.bf16.mxu0 %v9093_v38 }
0x1731   :  { %6370 = vmatprep.mubr.msk.f32.mxu1 %vm6826_vm11, %v9735_v17 }
0x1803   :  { %v4499_v30 = vpop.f32.mrb[14].mxu1 }
0x1804   :  { %v4500_v7 = vadd.f32 %v6153_v20, %v4499_v30  ;;  %v6358_v25 = vpop.f32.mrb[15].mxu1 }
0x1806   :  { %4593 = vrot.lane.b32.xlu1 %v4500_v7, %s6819_s19  ;;  %v4511_v39 = vrot.slane %v4500_v7, %v9717_v1  ;;  %v4504_v8 = vcombine.high %v4500_v7, %v4500_v7 }
0x1808   :  { %v4519_v27 = vcombine.high %v4511_v39, %v4511_v39  ;;  %v4518_v50 = vrot.slane %v4504_v8, %v9717_v1  ;;  %v4527_v34 = vrot.slane %v4511_v39, %v9717_v1 }
0x180a   :  { %v4541_v47 = vrot.slane %v4519_v27, %v9717_v1  ;;  %v4520_v35 = vcombine.high %v4518_v50, %v4518_v50  ;;  %v4556_v37 = vrot.slane %v4527_v34, %v9718_v57  ;;  %v4549_v0 = vcombine.high %v4527_v34, %v4527_v34 }
0x180b   :  { %v4534_v40 = vrot.slane %v4518_v50, %v9717_v1 }
0x180c   :  { %v4560_v36 = vrot.slane %v4541_v47, %v9718_v57  ;;  %v4551_v49 = vcombine.high %v4541_v47, %v4541_v47  ;;  %v4564_v24 = vrot.slane %v4549_v0, %v9718_v57  ;;  %v4548_v45 = vrot.slane %v4520_v35, %v9717_v1 }
0x180d   :  { %v4572_v31 = vrot.slane %v4534_v40, %v9718_v57  ;;  %v4550_v52 = vcombine.high %v4534_v40, %v4534_v40 }
0x180e   :  { %v4568_v12 = vrot.slane %v4551_v49, %v9718_v57  ;;  %v4576_v5 = vrot.slane %v4548_v45, %v9718_v57  ;;  %v4552_v41 = vcombine.high %v4548_v45, %v4548_v45 }
0x180f   :  { %v4580_v22 = vrot.slane %v4550_v52, %v9718_v57 }
0x1810   :  { %v4584_v23 = vrot.slane %v4552_v41, %v9718_v57 }
0x1878   :  { %v4594_v51 = vpop.permute.xlu1 %4593 }
0x1879   :  { %v4596_v16 = vmul.f32 %v4594_v51, %v4556_v37  ;;  %v4597_v63 = vmul.f32 %v4594_v51, %v4560_v36  ;;  %v4598_v21 = vmul.f32 %v4594_v51, %v4564_v24  ;;  %v4599_v56 = vmul.f32 %v4594_v51, %v4568_v12 }
0x187a   :  { %v4600_v60 = vmul.f32 %v4594_v51, %v4572_v31  ;;  %v4601_v13 = vmul.f32 %v4594_v51, %v4576_v5  ;;  %v4602_v42 = vmul.f32 %v4594_v51, %v4580_v22  ;;  %v4603_v11 = vmul.f32 %v4594_v51, %v4584_v23  ;;  %v9754_v31 = vld [vmem:[#allocation5_spill] sm:$0xff] }
0x187b   :  { %4612 = vrot.lane.b32.xlu0 %v4596_v16, %s6821_s20  ;;  %4614 = vrot.lane.b32.xlu1 %v4597_v63, %s6821_s20 }
0x187f   :  { %4616 = vrot.lane.b32.xlu1 %v4598_v21, %s6821_s20  ;;  %4618 = vrot.lane.b32.xlu0 %v4599_v56, %s6821_s20 }
0x1883   :  { %4620 = vrot.lane.b32.xlu1 %v4600_v60, %s6821_s20  ;;  %4622 = vrot.lane.b32.xlu0 %v4601_v13, %s6821_s20 }
0x1887   :  { %4624 = vrot.lane.b32.xlu1 %v4602_v42, %s6821_s20  ;;  %4626 = vrot.lane.b32.xlu0 %v4603_v11, %s6821_s20 }
0x188b   :  { %4804 = vrot.lane.b32.xlu1 %v4500_v7, %s6822_s21 }
0x18ed   :  { %v4613_v4 = vpop.permute.xlu0 %4612  ;;  %v4615_v20 = vpop.permute.xlu1 %4614 }
0x18ee   :  { %v4636_v30 = vadd.f32 %v4613_v4, %v4596_v16  ;;  %v4637_v7 = vadd.f32 %v4615_v20, %v4597_v63 }
0x18f0   :  { %v4644_v25 = vadd.f32 %v4636_v30, %v8388_v53  ;;  %v4645_v39 = vadd.f32 %v4637_v7, %v8390_v43 }
0x18f1   :  { %v4617_v8 = vpop.permute.xlu1 %4616  ;;  %v4619_v27 = vpop.permute.xlu0 %4618 }
0x18f2   :  { %v4652_v50 = vsel %vm351_vm0, %v4644_v25, -inf  ;;  %v4659_v34 = vsel %vm351_vm0, %v4645_v39, -inf  ;;  %v4638_v47 = vadd.f32 %v4617_v8, %v4598_v21  ;;  %v4639_v35 = vadd.f32 %v4619_v27, %v4599_v56 }
0x18f3   :  { %v4653_v37 = vrot.slane %v4652_v50, 4  ;;  %v4660_v36 = vrot.slane %v4659_v34, 4 }
0x18f4   :  { %v9101_v0 = vadd.f32 %v4638_v47, %v8397_v26  ;;  %v9104_v49 = vadd.f32 %v4639_v35, %v8399_v28  ;;  %v9755_v28 = vld [vmem:[#allocation16_spill] sm:$0xff]  ;;  %v9757_v47 = vld [vmem:[#allocation9_spill] sm:$0xff] }
0x18f5   :  { %v4654_v51 = vmax.f32 %v4652_v50, %v4653_v37  ;;  %v4661_v53 = vmax.f32 %v4659_v34, %v4660_v36  ;;  %v4621_v16 = vpop.permute.xlu1 %4620  ;;  %v4623_v43 = vpop.permute.xlu0 %4622  ;;  %v9756_v50 = vld [vmem:[#allocation6_spill] sm:$0xff] }
0x18f6   :  { %v4666_v63 = vsel %vm351_vm0, %v9101_v0, -inf  ;;  %v4673_v40 = vsel %vm351_vm0, %v9104_v49, -inf  ;;  %v4640_v24 = vadd.f32 %v4621_v16, %v4600_v60  ;;  %v4641_v12 = vadd.f32 %v4623_v43, %v4601_v13 }
0x18f7   :  { %v4655_v45 = vrot.slane %v4654_v51, 2  ;;  %v4662_v21 = vrot.slane %v4661_v53, 2  ;;  %v4667_v56 = vrot.slane %v4666_v63, 4  ;;  %v4674_v26 = vrot.slane %v4673_v40, 4 }
0x18f8   :  { %v9111_v5 = vadd.f32 %v4640_v24, %v9754_v31  ;;  %v9114_v52 = vadd.f32 %v4641_v12, %v9755_v28 }
0x18f9   :  { %v4656_v41 = vmax.f32 %v4654_v51, %v4655_v45  ;;  %v4663_v22 = vmax.f32 %v4661_v53, %v4662_v21  ;;  %v4668_v23 = vmax.f32 %v4666_v63, %v4667_v56  ;;  %v4675_v18 = vmax.f32 %v4673_v40, %v4674_v26  ;;  %v4625_v48 = vpop.permute.xlu1 %4624  ;;  %v4627_v14 = vpop.permute.xlu0 %4626 }
0x18fa   :  { %v4680_v60 = vsel %vm351_vm0, %v9111_v5, -inf  ;;  %v4687_v13 = vsel %vm351_vm0, %v9114_v52, -inf  ;;  %v4642_v9 = vadd.f32 %v4625_v48, %v4602_v42  ;;  %v4643_v54 = vadd.f32 %v4627_v14, %v4603_v11 }
0x18fb   :  { %v4657_v4 = vrot.slane %v4656_v41, 1  ;;  %v4664_v20 = vrot.slane %v4663_v22, 1  ;;  %v4669_v30 = vrot.slane %v4668_v23, 2  ;;  %v4676_v7 = vrot.slane %v4675_v18, 2 }
0x18fc   :  { %v4681_v8 = vrot.slane %v4680_v60, 4  ;;  %v4688_v27 = vrot.slane %v4687_v13, 4  ;;  %v4650_v34 = vadd.f32 %v4642_v9, %v9756_v50  ;;  %v4651_v35 = vadd.f32 %v4643_v54, %v9757_v47 }
0x18fd   :  { %v4658_v37 = vmax.f32 %v4656_v41, %v4657_v4  ;;  %v4665_v36 = vmax.f32 %v4663_v22, %v4664_v20  ;;  %v4670_v51 = vmax.f32 %v4668_v23, %v4669_v30  ;;  %v4677_v53 = vmax.f32 %v4675_v18, %v4676_v7 }
0x18fe   :  { %v4682_v16 = vmax.f32 %v4680_v60, %v4681_v8  ;;  %v4689_v43 = vmax.f32 %v4687_v13, %v4688_v27  ;;  %v4694_v63 = vsel %vm351_vm0, %v4650_v34, -inf  ;;  %v4701_v42 = vsel %vm351_vm0, %v4651_v35, -inf }
0x18ff   :  { %v4708_v11 = vsub.f32 %v4644_v25, %v4658_v37  ;;  %v4709_v40 = vsub.f32 %v4645_v39, %v4665_v36  ;;  %v4671_v24 = vrot.slane %v4670_v51, 1  ;;  %v4678_v12 = vrot.slane %v4677_v53, 1 }
0x1900   :  { %v4683_v45 = vrot.slane %v4682_v16, 2  ;;  %v4690_v21 = vrot.slane %v4689_v43, 2  ;;  %v4695_v56 = vrot.slane %v4694_v63, 4  ;;  %v4702_v26 = vrot.slane %v4701_v42, 4 }
0x1901   :  { %v4716_v31 = vmul.f32 1.442695, %v4708_v11  ;;  %v4718_v28 = vmul.f32 1.442695, %v4709_v40  ;;  %v4672_v41 = vmax.f32 %v4670_v51, %v4671_v24  ;;  %v4679_v22 = vmax.f32 %v4677_v53, %v4678_v12 }
0x1902   :  { %v4684_v23 = vmax.f32 %v4682_v16, %v4683_v45  ;;  %v4691_v18 = vmax.f32 %v4689_v43, %v4690_v21  ;;  %v4696_v48 = vmax.f32 %v4694_v63, %v4695_v56  ;;  %v4703_v14 = vmax.f32 %v4701_v42, %v4702_v26 }
0x1903   :  { %6729 = vpow2.f32 %v4716_v31  ;;  %v4710_v60 = vsub.f32 %v9101_v0, %v4672_v41  ;;  %v4711_v25 = vsub.f32 %v9104_v49, %v4679_v22 }
0x1904   :  { %6731 = vpow2.f32 %v4718_v28  ;;  %v4685_v39 = vrot.slane %v4684_v23, 1  ;;  %v4692_v13 = vrot.slane %v4691_v18, 1  ;;  %v4697_v9 = vrot.slane %v4696_v48, 2 }
0x1905   :  { %v4720_v54 = vmul.f32 1.442695, %v4710_v60  ;;  %v4722_v4 = vmul.f32 1.442695, %v4711_v25  ;;  %v4704_v20 = vrot.slane %v4703_v14, 2 }
0x1906   :  { %v4686_v30 = vmax.f32 %v4684_v23, %v4685_v39  ;;  %v4693_v7 = vmax.f32 %v4691_v18, %v4692_v13  ;;  %v4698_v8 = vmax.f32 %v4696_v48, %v4697_v9 }
0x1907   :  { %6733 = vpow2.f32 %v4720_v54  ;;  %v4705_v27 = vmax.f32 %v4703_v14, %v4704_v20 }
0x1908   :  { %6735 = vpow2.f32 %v4722_v4  ;;  %v4712_v50 = vsub.f32 %v9111_v5, %v4686_v30  ;;  %v4713_v47 = vsub.f32 %v9114_v52, %v4693_v7  ;;  %v4699_v0 = vrot.slane %v4698_v8, 1 }
0x1909   :  { %v4706_v37 = vrot.slane %v4705_v27, 1 }
0x190a   :  { %v4724_v49 = vmul.f32 1.442695, %v4712_v50  ;;  %v4726_v36 = vmul.f32 1.442695, %v4713_v47  ;;  %v4700_v51 = vmax.f32 %v4698_v8, %v4699_v0 }
0x190b   :  { %v4707_v53 = vmax.f32 %v4705_v27, %v4706_v37 }
0x190c   :  { %6737 = vpow2.f32 %v4724_v49  ;;  %v4714_v16 = vsub.f32 %v4650_v34, %v4700_v51 }
0x190d   :  { %v9128_v43 = vpop.eup %6729  ;;  %6739 = vpow2.f32 %v4726_v36  ;;  %v4715_v63 = vsub.f32 %v4651_v35, %v4707_v53 }
0x190e   :  { %v9130_v42 = vpop.eup %6731  ;;  %v4732_v11 = vsel %vm351_vm0, %v9128_v43, 0.0  ;;  %v4728_v5 = vmul.f32 1.442695, %v4714_v16 }
0x190f   :  { %v4733_v40 = vrot.slane %v4732_v11, 4  ;;  %v4739_v52 = vsel %vm351_vm0, %v9130_v42, 0.0  ;;  %v4730_v24 = vmul.f32 1.442695, %v4715_v63 }
0x1910   :  { %v4740_v12 = vrot.slane %v4739_v52, 4  ;;  %6741 = vpow2.f32 %v4728_v5 }
0x1911   :  { %v9136_v45 = vpop.eup %6733  ;;  %v4734_v34 = vadd.f32 %v4733_v40, %v4732_v11  ;;  %6743 = vpow2.f32 %v4730_v24 }
0x1912   :  { %v9138_v21 = vpop.eup %6735  ;;  %v4741_v35 = vadd.f32 %v4740_v12, %v4739_v52  ;;  %v4746_v56 = vsel %vm351_vm0, %v9136_v45, 0.0 }
0x1913   :  { %v4735_v26 = vrot.slane %v4734_v34, 2  ;;  %v4747_v31 = vrot.slane %v4746_v56, 4  ;;  %v4753_v28 = vsel %vm351_vm0, %v9138_v21, 0.0 }
0x1914   :  { %v4742_v41 = vrot.slane %v4741_v35, 2  ;;  %v4754_v22 = vrot.slane %v4753_v28, 4 }
0x1915   :  { %v4736_v23 = vadd.f32 %v4735_v26, %v4734_v34  ;;  %v4748_v18 = vadd.f32 %v4747_v31, %v4746_v56 }
0x1916   :  { %v9144_v48 = vpop.eup %6737  ;;  %v4743_v14 = vadd.f32 %v4742_v41, %v4741_v35  ;;  %v4755_v60 = vadd.f32 %v4754_v22, %v4753_v28 }
0x1917   :  { %v9146_v25 = vpop.eup %6739  ;;  %v4737_v39 = vrot.slane %v4736_v23, 1  ;;  %v4749_v13 = vrot.slane %v4748_v18, 2  ;;  %v4760_v9 = vsel %vm351_vm0, %v9144_v48, 0.0 }
0x1918   :  { %v4744_v54 = vrot.slane %v4743_v14, 1  ;;  %v4756_v4 = vrot.slane %v4755_v60, 2  ;;  %v4761_v20 = vrot.slane %v4760_v9, 4  ;;  %v4767_v30 = vsel %vm351_vm0, %v9146_v25, 0.0 }
0x1919   :  { %v4738_v7 = vadd.f32 %v4737_v39, %v4736_v23  ;;  %v4750_v8 = vadd.f32 %v4749_v13, %v4748_v18  ;;  %v4768_v27 = vrot.slane %v4767_v30, 4 }
0x191a   :  { %v9152_v50 = vpop.eup %6741  ;;  %v4745_v47 = vadd.f32 %v4744_v54, %v4743_v14  ;;  %v4757_v0 = vadd.f32 %v4756_v4, %v4755_v60  ;;  %v4762_v37 = vadd.f32 %v4761_v20, %v4760_v9 }
0x191b   :  { %v9154_v49 = vpop.eup %6743  ;;  %6745 = vrcp.f32 %v4738_v7  ;;  %v4751_v36 = vrot.slane %v4750_v8, 1  ;;  %v4769_v51 = vadd.f32 %v4768_v27, %v4767_v30  ;;  %v4774_v53 = vsel %vm351_vm0, %v9152_v50, 0.0  ;;  %v4805_v7 = vpop.permute.xlu1 %4804 }
0x191c   :  { %6747 = vrcp.f32 %v4745_v47  ;;  %v4758_v16 = vrot.slane %v4757_v0, 1  ;;  %v4763_v63 = vrot.slane %v4762_v37, 2  ;;  %v4775_v11 = vrot.slane %v4774_v53, 4 }
0x191d   :  { %v4752_v5 = vadd.f32 %v4751_v36, %v4750_v8  ;;  %v4770_v40 = vrot.slane %v4769_v51, 2  ;;  %v4781_v52 = vsel %vm351_vm0, %v9154_v49, 0.0 }
0x191e   :  { %v4759_v24 = vadd.f32 %v4758_v16, %v4757_v0  ;;  %v4764_v12 = vadd.f32 %v4763_v63, %v4762_v37  ;;  %v4776_v34 = vadd.f32 %v4775_v11, %v4774_v53  ;;  %v4782_v35 = vrot.slane %v4781_v52, 4 }
0x191f   :  { %6749 = vrcp.f32 %v4752_v5  ;;  %v4771_v56 = vadd.f32 %v4770_v40, %v4769_v51 }
0x1920   :  { %6751 = vrcp.f32 %v4759_v24  ;;  %v4765_v26 = vrot.slane %v4764_v12, 1  ;;  %v4777_v31 = vrot.slane %v4776_v34, 2  ;;  %v4783_v28 = vadd.f32 %v4782_v35, %v4781_v52 }
0x1921   :  { %v4772_v41 = vrot.slane %v4771_v56, 1 }
0x1922   :  { %v4766_v22 = vadd.f32 %v4765_v26, %v4764_v12  ;;  %v4778_v23 = vadd.f32 %v4777_v31, %v4776_v34  ;;  %v4784_v18 = vrot.slane %v4783_v28, 2 }
0x1923   :  { %v4773_v14 = vadd.f32 %v4772_v41, %v4771_v56 }
0x1924   :  { %6753 = vrcp.f32 %v4766_v22  ;;  %v4779_v60 = vrot.slane %v4778_v23, 1  ;;  %v4785_v39 = vadd.f32 %v4784_v18, %v4783_v28 }
0x1925   :  { %v6746_v13 = vpop.eup %6745  ;;  %6755 = vrcp.f32 %v4773_v14 }
0x1926   :  { %v6748_v9 = vpop.eup %6747  ;;  %v4796_v54 = vmul.f32 %v6746_v13, %v9128_v43  ;;  %v4780_v4 = vadd.f32 %v4779_v60, %v4778_v23  ;;  %v4786_v20 = vrot.slane %v4785_v39, 1 }
0x1927   :  { %v4797_v30 = vmul.f32 %v6748_v9, %v9130_v42 }
0x1928   :  { %6757 = vrcp.f32 %v4780_v4  ;;  %v4787_v8 = vadd.f32 %v4786_v20, %v4785_v39  ;;  %v4807_v27 = vmul.f32 %v4805_v7, %v4796_v54 }
0x1929   :  { %v6750_v47 = vpop.eup %6749  ;;  %v4808_v0 = vmul.f32 %v4805_v7, %v4797_v30 }
0x192a   :  { %v6752_v37 = vpop.eup %6751  ;;  %v4798_v36 = vmul.f32 %v6750_v47, %v9136_v45  ;;  %6759 = vrcp.f32 %v4787_v8  ;;  %v4815_v51 = vsel %vm351_vm0, %v4807_v27, 0.0 }
0x192b   :  { %v4799_v53 = vmul.f32 %v6752_v37, %v9138_v21  ;;  %v4816_v16 = vrot.slane %v4815_v51, 4  ;;  %v4822_v43 = vsel %vm351_vm0, %v4808_v0, 0.0 }
0x192c   :  { %v4809_v63 = vmul.f32 %v4805_v7, %v4798_v36  ;;  %v4823_v11 = vrot.slane %v4822_v43, 4 }
0x192d   :  { %v4810_v42 = vmul.f32 %v4805_v7, %v4799_v53  ;;  %v4817_v5 = vadd.f32 %v4816_v16, %v4815_v51 }
0x192e   :  { %v6754_v40 = vpop.eup %6753  ;;  %v4824_v52 = vadd.f32 %v4823_v11, %v4822_v43  ;;  %v4829_v24 = vsel %vm351_vm0, %v4809_v63, 0.0 }
0x192f   :  { %v6756_v12 = vpop.eup %6755  ;;  %v4800_v34 = vmul.f32 %v6754_v40, %v9144_v48  ;;  %v4818_v45 = vrot.slane %v4817_v5, 2  ;;  %v4830_v35 = vrot.slane %v4829_v24, 4  ;;  %v4836_v56 = vsel %vm351_vm0, %v4810_v42, 0.0 }
0x1930   :  { %v4801_v21 = vmul.f32 %v6756_v12, %v9146_v25  ;;  %v4825_v26 = vrot.slane %v4824_v52, 2  ;;  %v4837_v31 = vrot.slane %v4836_v56, 4 }
0x1931   :  { %v4811_v28 = vmul.f32 %v4805_v7, %v4800_v34  ;;  %v4819_v41 = vadd.f32 %v4818_v45, %v4817_v5  ;;  %v4831_v22 = vadd.f32 %v4830_v35, %v4829_v24 }
0x1932   :  { %v6758_v23 = vpop.eup %6757  ;;  %v4812_v18 = vmul.f32 %v4805_v7, %v4801_v21  ;;  %v4826_v14 = vadd.f32 %v4825_v26, %v4824_v52  ;;  %v4838_v60 = vadd.f32 %v4837_v31, %v4836_v56 }
0x1933   :  { %v4802_v39 = vmul.f32 %v6758_v23, %v9152_v50  ;;  %v4832_v13 = vrot.slane %v4831_v22, 2  ;;  %v4843_v48 = vsel %vm351_vm0, %v4811_v28, 0.0  ;;  %v4820_v9 = vrot.slane %v4819_v41, 1 }
0x1934   :  { %v6760_v54 = vpop.eup %6759  ;;  %v4844_v4 = vrot.slane %v4843_v48, 4  ;;  %v4827_v20 = vrot.slane %v4826_v14, 1  ;;  %v4839_v30 = vrot.slane %v4838_v60, 2  ;;  %v4850_v25 = vsel %vm351_vm0, %v4812_v18, 0.0 }
0x1935   :  { %v4803_v8 = vmul.f32 %v6760_v54, %v9154_v49  ;;  %v4813_v27 = vmul.f32 %v4805_v7, %v4802_v39  ;;  %v4833_v47 = vadd.f32 %v4832_v13, %v4831_v22  ;;  %v4821_v0 = vadd.f32 %v4820_v9, %v4819_v41 }
0x1936   :  { %v4840_v37 = vadd.f32 %v4839_v30, %v4838_v60  ;;  %v4845_v36 = vadd.f32 %v4844_v4, %v4843_v48  ;;  %v4851_v51 = vrot.slane %v4850_v25, 4  ;;  %v4828_v50 = vadd.f32 %v4827_v20, %v4826_v14 }
0x1937   :  { %v4814_v53 = vmul.f32 %v4805_v7, %v4803_v8  ;;  %v4834_v16 = vrot.slane %v4833_v47, 1  ;;  %v4857_v43 = vsel %vm351_vm0, %v4813_v27, 0.0  ;;  %v9759_v8 = vld [vmem:[#allocation8_spill] sm:$0xff] }
0x1938   :  { %v4841_v63 = vrot.slane %v4840_v37, 1  ;;  %v4846_v11 = vrot.slane %v4845_v36, 2  ;;  %v4852_v42 = vadd.f32 %v4851_v51, %v4850_v25  ;;  %v4858_v5 = vrot.slane %v4857_v43, 4  ;;  %v9758_v25 = vld [vmem:[#allocation10_spill] sm:$0xff]  ;;  %v6155_v27 = vld [vmem:[%s9619_s0 + $0x116] ss:$0 sm:$0xff] }
0x1939   :  { %v4835_v40 = vadd.f32 %v4834_v16, %v4833_v47  ;;  %v4864_v52 = vsel %vm351_vm0, %v4814_v53, 0.0  ;;  %v4883_v35 = vsel %vm1221_vm4, %v4828_v50, %v4821_v0 }
0x193a   :  { %v4847_v24 = vadd.f32 %v4846_v11, %v4845_v36  ;;  %v4853_v49 = vrot.slane %v4852_v42, 2  ;;  %v4859_v12 = vadd.f32 %v4858_v5, %v4857_v43  ;;  %v4842_v34 = vadd.f32 %v4841_v63, %v4840_v37 }
0x193b   :  { %v4865_v45 = vrot.slane %v4864_v52, 4  ;;  %v4884_v26 = vsel %vm1223_vm3, %v4835_v40, %v4883_v35  ;;  %v6157_v35 = vld [vmem:[%s9619_s0 + $0x164] ss:$0 sm:$0xff] }
0x193c   :  { %v4848_v56 = vrot.slane %v4847_v24, 1  ;;  %v4854_v7 = vadd.f32 %v4853_v49, %v4852_v42  ;;  %v4860_v21 = vrot.slane %v4859_v12, 2  ;;  %v4885_v18 = vsel %vm1225_vm5, %v4842_v34, %v4884_v26 }
0x193d   :  { %v4866_v31 = vadd.f32 %v4865_v45, %v4864_v52  ;;  %v4989_v52 = vld [vmem:[%s9619_s0 + $0x11f] sm:$0xff] }
0x193e   :  { %v4849_v28 = vadd.f32 %v4848_v56, %v4847_v24  ;;  %v4855_v41 = vrot.slane %v4854_v7, 1  ;;  %v4861_v22 = vadd.f32 %v4860_v21, %v4859_v12 }
0x193f   :  { %v4867_v23 = vrot.slane %v4866_v31, 2 }
0x1940   :  { %v4856_v14 = vadd.f32 %v4855_v41, %v4854_v7  ;;  %v4862_v60 = vrot.slane %v4861_v22, 1  ;;  %v4886_v39 = vsel %vm1227_vm6, %v4849_v28, %v4885_v18  ;;  %v6158_v7 = vld [vmem:[%s9619_s0 + $0x165] ss:$0 sm:$0xff] }
0x1941   :  { %v4868_v13 = vadd.f32 %v4867_v23, %v4866_v31  ;;  %v6159_v31 = vld [vmem:[%s9619_s0 + $0x127] ss:$0 sm:$0xff] }
0x1942   :  { %v4863_v48 = vadd.f32 %v4862_v60, %v4861_v22  ;;  %v4887_v54 = vsel %vm1229_vm7, %v4856_v14, %v4886_v39 }
0x1943   :  { %v4869_v9 = vrot.slane %v4868_v13, 1 }
0x1944   :  { %v4888_v4 = vsel %vm1231_vm8, %v4863_v48, %v4887_v54 }
0x1945   :  { %v4870_v20 = vadd.f32 %v4869_v9, %v4868_v13 }
0x1947   :  { %v4889_v30 = vsel %vm1233_vm9, %v4870_v20, %v4888_v4 }
0x1948   :  { %6364 = vmatmul.mubr.msk.f32.vlgmr.msra.gmra.mrb[16].mxu0 %vm351_vm0, %v4889_v30 }
0x1949   :  { %6461 = vmatpush3.bf16.msra.mxu0 %v9093_v38  ;;  %6377 = vmatprep.mubr.msk.f32.mxu0 %vm351_vm0, %v9758_v25  ;;  %v6161_v38 = vld [vmem:[%s9619_s0 + $0x138] ss:$0 sm:$0xff] }
0x194a   :  { %6465 = vmatprep.subr.bf16.mxu0 %v9748_v15 }
0x194c   :  { %6378 = vmatmul.mubr.msk.f32.vlgmr.msra.gmra.mrb[18].mxu0 %vm351_vm0, %v9759_v8 }
0x194d   :  { %6391 = vmatprep.mubr.msk.f32.mxu0 %vm6826_vm11, %v9735_v17 }
0x1a1b   :  { %v4958_v47 = vpop.f32.mrb[16].mxu0 }
0x1a1c   :  { %v4959_v0 = vadd.f32 %v6155_v27, %v4958_v47  ;;  %v6365_v37 = vpop.f32.mrb[17].mxu0 }
0x1a1e   :  { %v4962_v36 = vadd.f32 %v4959_v0, %v9048_v55  ;;  %v4988_v55 = vld [vmem:[%s9619_s0 + $0x117] sm:$0xff] }
0x1a1f   :  { %v6379_v51 = vpop.f32.mrb[18].mxu0  ;;  %v6456_v24 = vpack.c.bf16 %v4989_v52, %v4988_v55 }
0x1a20   :  { %v9199_v53 = vadd.f32 %v6379_v51, %v6161_v38  ;;  %v5144_v50 = vpop.f32.mrb[19].mxu0  ;;  %v4965_v16 = vsel %vm351_vm0, %v4962_v36, 0.0 }
0x1a21   :  { %4966 = vadd.xlane.f32.xlu0 %v4965_v16  ;;  %v9202_v43 = vadd.f32 %v6161_v38, %v5144_v50  ;;  %6457 = vmatpush3.bf16.msra.mxu1 %v6456_v24 }
0x1a22   :  { %6462 = vmatprep.subr.bf16.mxu1 %v9748_v15 }
0x1a37   :  { %5261 = vrot.lane.b32.xlu0 %v9202_v43, %s6819_s19 }
0x1aae   :  { %v4967_v63 = vpop.xlane.xlu0 %4966 }
0x1aaf   :  { %v4968_v11 = vmul.f32 0.0625, %v4967_v63 }
0x1ab1   :  { %v4969_v42 = vsub.f32 %v4962_v36, %v4968_v11 }
0x1ab2   :  { %v9235_v48 = vpop.permute.xlu0 %5261 }
0x1ab3   :  { %v4970_v5 = vmul.f32 %v4969_v42, %v4969_v42 }
0x1ab5   :  { %v4971_v40 = vsel %vm351_vm0, %v4970_v5, 0.0 }
0x1ab6   :  { %4972 = vadd.xlane.f32.xlu1 %v4971_v40 }
0x1ac7   :  { %5263 = vrot.lane.b32.xlu1 %v9199_v53, %s6819_s19 }
0x1b43   :  { %v4973_v49 = vpop.xlane.xlu1 %4972 }
0x1b44   :  { %v4974_v12 = vmul.f32 0.0625, %v4973_v49 }
0x1b46   :  { %v4975_v34 = vadd.f32 1e-05, %v4974_v12 }
0x1b47   :  { %v9237_v9 = vpop.permute.xlu1 %5263 }
0x1b48   :  { %6761 = vrsqrt.f32 %v4975_v34 }
0x1b52   :  { %v6762_v45 = vpop.eup %6761 }
0x1b53   :  { %v4977_v56 = vmul.f32 %v6762_v45, %v4969_v42 }
0x1b55   :  { %v4982_v21 = vmul.f32 %v6157_v35, %v4977_v56 }
0x1b57   :  { %v9222_v26 = vadd.f32 %v6158_v7, %v4982_v21  ;;  %v4995_v21 = vld [vmem:[%s9619_s0 + $0x141] sm:$0xff] }
0x1b59   :  { %6371 = vmatmul.mubr.msk.f32.vlgmr.msra.gmra.mrb[16].mxu1 %vm351_vm0, %v9222_v26 }
0x1b5a   :  { %6384 = vmatprep.mubr.msk.f32.mxu1 %vm6826_vm11, %v9735_v17 }
0x1c2c   :  { %v5070_v28 = vpop.f32.mrb[16].mxu1 }
0x1c2d   :  { %v5071_v41 = vadd.f32 %v6159_v31, %v5070_v28  ;;  %v6372_v22 = vpop.f32.mrb[17].mxu1 }
0x1c2f   :  { %v5161_v23 = vrot.slane %v5071_v41, %v9717_v1  ;;  %v5154_v18 = vcombine.high %v5071_v41, %v5071_v41 }
0x1c31   :  { %v5169_v14 = vcombine.high %v5161_v23, %v5161_v23  ;;  %v5177_v60 = vrot.slane %v5161_v23, %v9717_v1  ;;  %v5168_v54 = vrot.slane %v5154_v18, %v9717_v1 }
0x1c33   :  { %v5191_v39 = vrot.slane %v5169_v14, %v9717_v1  ;;  %v5206_v13 = vrot.slane %v5177_v60, %v9718_v57  ;;  %v5199_v4 = vcombine.high %v5177_v60, %v5177_v60  ;;  %v5184_v8 = vrot.slane %v5168_v54, %v9717_v1 }
0x1c34   :  { %v5170_v37 = vcombine.high %v5168_v54, %v5168_v54 }
0x1c35   :  { %v5210_v20 = vrot.slane %v5191_v39, %v9718_v57  ;;  %v5268_v30 = vmul.f32 %v9237_v9, %v5206_v13  ;;  %v5267_v25 = vmul.f32 %v9235_v48, %v5206_v13  ;;  %v9247_v27 = vrot.slane %v5199_v4, %v9718_v57 }
0x1c36   :  { %v5201_v38 = vcombine.high %v5191_v39, %v5191_v39  ;;  %v9254_v36 = vrot.slane %v5184_v8, %v9718_v57  ;;  %v5198_v16 = vrot.slane %v5170_v37, %v9717_v1  ;;  %v5200_v5 = vcombine.high %v5184_v8, %v5184_v8 }
0x1c37   :  { %5301 = vrot.lane.b32.xlu1 %v5268_v30, %s6819_s19  ;;  %5299 = vrot.lane.b32.xlu0 %v5267_v25, %s6819_s19  ;;  %v5270_v47 = vmul.f32 %v9237_v9, %v5210_v20  ;;  %v5269_v0 = vmul.f32 %v9235_v48, %v5210_v20  ;;  %v5272_v51 = vmul.f32 %v9237_v9, %v9247_v27 }
0x1c38   :  { %v5271_v50 = vmul.f32 %v9235_v48, %v9247_v27  ;;  %v9264_v63 = vrot.slane %v5201_v38, %v9718_v57  ;;  %v5276_v11 = vmul.f32 %v9237_v9, %v9254_v36  ;;  %v5275_v42 = vmul.f32 %v9235_v48, %v9254_v36 }
0x1c39   :  { %v9273_v40 = vrot.slane %v5198_v16, %v9718_v57  ;;  %v5202_v52 = vcombine.high %v5198_v16, %v5198_v16  ;;  %v9282_v24 = vrot.slane %v5200_v5, %v9718_v57  ;;  %v5244_v28 = vmul.f32 %v5206_v13, %v9199_v53 }
0x1c3a   :  { %v5274_v1 = vmul.f32 %v9237_v9, %v9264_v63  ;;  %v5273_v55 = vmul.f32 %v9235_v48, %v9264_v63  ;;  %v5243_v41 = vmul.f32 %v5206_v13, %v9202_v43  ;;  %v5246_v54 = vmul.f32 %v5210_v20, %v9199_v53 }
0x1c3b   :  { %5305 = vrot.lane.b32.xlu1 %v5270_v47, %s6819_s19  ;;  %5303 = vrot.lane.b32.xlu0 %v5269_v0, %s6819_s19  ;;  %v5278_v49 = vmul.f32 %v9237_v9, %v9273_v40  ;;  %v5277_v12 = vmul.f32 %v9235_v48, %v9273_v40  ;;  %v9291_v34 = vrot.slane %v5202_v52, %v9718_v57  ;;  %v4994_v57 = vld [vmem:[%s9619_s0 + $0x139] sm:$0xff] }
0x1c3c   :  { %v5280_v45 = vmul.f32 %v9237_v9, %v9282_v24  ;;  %v5279_v35 = vmul.f32 %v9235_v48, %v9282_v24  ;;  %v6463_v31 = vpack.c.bf16 %v4995_v21, %v4994_v57  ;;  %v5245_v4 = vmul.f32 %v5210_v20, %v9202_v43 }
0x1c3d   :  { %v5282_v56 = vmul.f32 %v9237_v9, %v9291_v34  ;;  %v5281_v7 = vmul.f32 %v9235_v48, %v9291_v34  ;;  %v5248_v20 = vmul.f32 %v9247_v27, %v9199_v53  ;;  %v5247_v38 = vmul.f32 %v9247_v27, %v9202_v43 }
0x1c3e   :  { %6464 = vmatpush3.bf16.msra.mxu1 %v6463_v31  ;;  %v5252_v27 = vmul.f32 %v9254_v36, %v9199_v53 }
0x1c3f   :  { %5309 = vrot.lane.b32.xlu1 %v5272_v51, %s6819_s19  ;;  %5307 = vrot.lane.b32.xlu0 %v5271_v50, %s6819_s19 }
0x1c40   :  { %6394 = vmatprep.subr.mxu1 %v9735_v17 }
0x1c43   :  { %5317 = vrot.lane.b32.xlu1 %v5276_v11, %s6819_s19  ;;  %5315 = vrot.lane.b32.xlu0 %v5275_v42, %s6819_s19 }
0x1c47   :  { %5313 = vrot.lane.b32.xlu1 %v5274_v1, %s6819_s19  ;;  %5311 = vrot.lane.b32.xlu0 %v5273_v55, %s6819_s19 }
0x1c4b   :  { %5321 = vrot.lane.b32.xlu1 %v5278_v49, %s6819_s19  ;;  %5319 = vrot.lane.b32.xlu0 %v5277_v12, %s6819_s19  ;;  %v5251_v49 = vmul.f32 %v9254_v36, %v9202_v43 }
0x1c4f   :  { %5325 = vrot.lane.b32.xlu1 %v5280_v45, %s6819_s19  ;;  %5323 = vrot.lane.b32.xlu0 %v5279_v35, %s6819_s19 }
0x1c53   :  { %5329 = vrot.lane.b32.xlu1 %v5282_v56, %s6819_s19  ;;  %5327 = vrot.lane.b32.xlu0 %v5281_v7, %s6819_s19  ;;  %v5250_v7 = vmul.f32 %v9264_v63, %v9199_v53 }
0x1ca9   :  { %v5302_v22 = vpop.permute.xlu1 %5301  ;;  %v5300_v23 = vpop.permute.xlu0 %5299 }
0x1caa   :  { %v5348_v18 = vadd.f32 %v5302_v22, %v5244_v28  ;;  %v5347_v14 = vadd.f32 %v5300_v23, %v5243_v41  ;;  %v5254_v22 = vmul.f32 %v9273_v40, %v9199_v53 }
0x1cac   :  { %v9315_v60 = vadd.f32 %v5348_v18, %v8718_v32  ;;  %v9318_v39 = vadd.f32 %v5347_v14, %v8788_v62  ;;  %v5256_v14 = vmul.f32 %v9282_v24, %v9199_v53 }
0x1cad   :  { %v5306_v30 = vpop.permute.xlu1 %5305  ;;  %v5304_v25 = vpop.permute.xlu0 %5303 }
0x1cae   :  { %v5380_v8 = vsel %vm743_vm2, %v9315_v60, -inf  ;;  %v5379_v13 = vsel %vm351_vm0, %v9318_v39, -inf  ;;  %v5350_v47 = vadd.f32 %v5306_v30, %v5246_v54  ;;  %v5349_v0 = vadd.f32 %v5304_v25, %v5245_v4 }
0x1caf   :  { %v5381_v37 = vmax.f32 %v5379_v13, %v5380_v8  ;;  %v5255_v13 = vmul.f32 %v9282_v24, %v9202_v43  ;;  %v5258_v24 = vmul.f32 %v9291_v34, %v9199_v53 }
0x1cb0   :  { %v9327_v32 = vadd.f32 %v5350_v47, %v8709_v3  ;;  %v9330_v62 = vadd.f32 %v5349_v0, %v8701_v19 }
0x1cb1   :  { %v5382_v51 = vrot.slane %v5381_v37, 4  ;;  %v5310_v50 = vpop.permute.xlu1 %5309  ;;  %v5308_v16 = vpop.permute.xlu0 %5307 }
0x1cb2   :  { %v5389_v11 = vsel %vm743_vm2, %v9327_v32, -inf  ;;  %v5388_v42 = vsel %vm351_vm0, %v9330_v62, -inf  ;;  %v5352_v3 = vadd.f32 %v5310_v50, %v5248_v20  ;;  %v5351_v5 = vadd.f32 %v5308_v16, %v5247_v38  ;;  %v9760_v50 = vld [vmem:[#allocation11_spill] sm:$0xff] }
0x1cb3   :  { %v5383_v1 = vmax.f32 %v5381_v37, %v5382_v51  ;;  %v5390_v19 = vmax.f32 %v5388_v42, %v5389_v11  ;;  %v5257_v11 = vmul.f32 %v9291_v34, %v9202_v43 }
0x1cb4   :  { %v9341_v55 = vadd.f32 %v5352_v3, %v8729_v46  ;;  %v9344_v52 = vadd.f32 %v5351_v5, %v8727_v6  ;;  %v5249_v46 = vmul.f32 %v9264_v63, %v9202_v43  ;;  %v5253_v63 = vmul.f32 %v9273_v40, %v9202_v43 }
0x1cb5   :  { %v5384_v12 = vrot.slane %v5383_v1, 2  ;;  %v5391_v45 = vrot.slane %v5390_v19, 4  ;;  %v5318_v35 = vpop.permute.xlu1 %5317  ;;  %v5316_v56 = vpop.permute.xlu0 %5315 }
0x1cb6   :  { %v5398_v6 = vsel %vm743_vm2, %v9341_v55, -inf  ;;  %v5397_v57 = vsel %vm351_vm0, %v9344_v52, -inf  ;;  %v5356_v21 = vadd.f32 %v5318_v35, %v5252_v27  ;;  %v5355_v31 = vadd.f32 %v5316_v56, %v5251_v49 }
0x1cb7   :  { %v5385_v28 = vmax.f32 %v5383_v1, %v5384_v12  ;;  %v5392_v36 = vmax.f32 %v5390_v19, %v5391_v45  ;;  %v5399_v41 = vmax.f32 %v5397_v57, %v5398_v6 }
0x1cb8   :  { %v9361_v23 = vadd.f32 %v5356_v21, %v8764_v33  ;;  %v9364_v18 = vadd.f32 %v5355_v31, %v8743_v59 }
0x1cb9   :  { %v5386_v54 = vrot.slane %v5385_v28, 1  ;;  %v5393_v4 = vrot.slane %v5392_v36, 2  ;;  %v5400_v30 = vrot.slane %v5399_v41, 4  ;;  %v5314_v25 = vpop.permute.xlu1 %5313  ;;  %v5312_v8 = vpop.permute.xlu0 %5311 }
0x1cba   :  { %v5416_v33 = vsel %vm743_vm2, %v9361_v23, -inf  ;;  %v5415_v59 = vsel %vm351_vm0, %v9364_v18, -inf  ;;  %v5354_v47 = vadd.f32 %v5314_v25, %v5250_v7  ;;  %v5353_v0 = vadd.f32 %v5312_v8, %v5249_v46 }
0x1cbb   :  { %v5387_v40 = vmax.f32 %v5385_v28, %v5386_v54  ;;  %v5394_v37 = vmax.f32 %v5392_v36, %v5393_v4  ;;  %v5401_v20 = vmax.f32 %v5399_v41, %v5400_v30  ;;  %v5417_v38 = vmax.f32 %v5415_v59, %v5416_v33 }
0x1cbc   :  { %v9377_v51 = vadd.f32 %v5354_v47, %v8733_v58  ;;  %v9380_v16 = vadd.f32 %v5353_v0, %v9760_v50 }
0x1cbd   :  { %v5451_v42 = vsub.f32 %v9318_v39, %v5387_v40  ;;  %v5452_v3 = vsub.f32 %v9315_v60, %v5387_v40  ;;  %v5395_v5 = vrot.slane %v5394_v37, 1  ;;  %v5402_v1 = vrot.slane %v5401_v20, 2  ;;  %v5322_v19 = vpop.permute.xlu1 %5321  ;;  %v5320_v27 = vpop.permute.xlu0 %5319 }
0x1cbe   :  { %v5418_v49 = vrot.slane %v5417_v38, 4  ;;  %v5407_v58 = vsel %vm743_vm2, %v9377_v51, -inf  ;;  %v5406_v12 = vsel %vm351_vm0, %v9380_v16, -inf  ;;  %v5358_v45 = vadd.f32 %v5322_v19, %v5254_v22 }
0x1cbf   :  { %v5467_v53 = vmul.f32 1.442695, %v5451_v42  ;;  %v5469_v35 = vmul.f32 1.442695, %v5452_v3  ;;  %v5396_v56 = vmax.f32 %v5394_v37, %v5395_v5  ;;  %v5403_v43 = vmax.f32 %v5401_v20, %v5402_v1 }
0x1cc0   :  { %v5419_v34 = vmax.f32 %v5417_v38, %v5418_v49  ;;  %v5408_v39 = vmax.f32 %v5406_v12, %v5407_v58  ;;  %v9393_v60 = vadd.f32 %v5358_v45, %v8768_v2  ;;  %v5357_v7 = vadd.f32 %v5320_v27, %v5253_v63  ;;  %v9761_v2 = vld [vmem:[#allocation3_spill] sm:$0xff] }
0x1cc1   :  { %6763 = vpow2.f32 %v5467_v53  ;;  %v5453_v46 = vsub.f32 %v9330_v62, %v5396_v56  ;;  %v5454_v6 = vsub.f32 %v9327_v32, %v5396_v56  ;;  %v5404_v57 = vrot.slane %v5403_v43, 1  ;;  %v5326_v21 = vpop.permute.xlu1 %5325  ;;  %v5324_v31 = vpop.permute.xlu0 %5323 }
0x1cc2   :  { %6765 = vpow2.f32 %v5469_v35  ;;  %v5420_v28 = vrot.slane %v5419_v34, 2  ;;  %v5409_v36 = vrot.slane %v5408_v39, 4  ;;  %v5425_v41 = vsel %vm743_vm2, %v9393_v60, -inf }
0x1cc3   :  { %v5471_v22 = vmul.f32 1.442695, %v5453_v46  ;;  %v5473_v54 = vmul.f32 1.442695, %v5454_v6  ;;  %v5405_v4 = vmax.f32 %v5403_v43, %v5404_v57  ;;  %v9400_v30 = vadd.f32 %v5357_v7, %v9761_v2 }
0x1cc4   :  { %v5421_v63 = vmax.f32 %v5419_v34, %v5420_v28  ;;  %v5410_v25 = vmax.f32 %v5408_v39, %v5409_v36  ;;  %v5360_v62 = vadd.f32 %v5326_v21, %v5256_v14  ;;  %v5359_v8 = vadd.f32 %v5324_v31, %v5255_v13 }
0x1cc5   :  { %6767 = vpow2.f32 %v5471_v22  ;;  %v5455_v32 = vsub.f32 %v9344_v52, %v5405_v4  ;;  %v5456_v33 = vsub.f32 %v9341_v55, %v5405_v4  ;;  %v5424_v59 = vsel %vm351_vm0, %v9400_v30, -inf  ;;  %v5330_v47 = vpop.permute.xlu1 %5329  ;;  %v5328_v20 = vpop.permute.xlu0 %5327 }
0x1cc6   :  { %6769 = vpow2.f32 %v5473_v54  ;;  %v5422_v0 = vrot.slane %v5421_v63, 1  ;;  %v5411_v40 = vrot.slane %v5410_v25, 2  ;;  %v5426_v37 = vmax.f32 %v5424_v59, %v5425_v41 }
0x1cc7   :  { %v5475_v38 = vmul.f32 1.442695, %v5455_v32  ;;  %v5477_v50 = vmul.f32 1.442695, %v5456_v33  ;;  %v9407_v42 = vadd.f32 %v5360_v62, %v8809_v10  ;;  %v9410_v14 = vadd.f32 %v5359_v8, %v8785_v29 }
0x1cc8   :  { %v5423_v52 = vmax.f32 %v5421_v63, %v5422_v0  ;;  %v5412_v13 = vmax.f32 %v5410_v25, %v5411_v40  ;;  %v5427_v55 = vrot.slane %v5426_v37, 4  ;;  %v5362_v3 = vadd.f32 %v5330_v47, %v5258_v24 }
0x1cc9   :  { %6771 = vpow2.f32 %v5475_v38  ;;  %v5434_v5 = vsel %vm743_vm2, %v9407_v42, -inf  ;;  %v5433_v1 = vsel %vm351_vm0, %v9410_v14, -inf  ;;  %v5361_v19 = vadd.f32 %v5328_v20, %v5257_v11 }
0x1cca   :  { %6773 = vpow2.f32 %v5477_v50  ;;  %v5459_v27 = vsub.f32 %v9364_v18, %v5423_v52  ;;  %v5460_v10 = vsub.f32 %v9361_v23, %v5423_v52  ;;  %v5413_v49 = vrot.slane %v5412_v13, 1 }
0x1ccb   :  { %v9418_v29 = vpop.eup %6763  ;;  %v5428_v58 = vmax.f32 %v5426_v37, %v5427_v55  ;;  %v5435_v12 = vmax.f32 %v5433_v1, %v5434_v5  ;;  %v9421_v24 = vadd.f32 %v5362_v3, %v8825_v61  ;;  %v9424_v45 = vadd.f32 %v5361_v19, %v8799_v44 }
0x1ccc   :  { %v9426_v53 = vpop.eup %6765  ;;  %v5499_v11 = vsel %vm351_vm0, %v9418_v29, 0.0  ;;  %v5483_v35 = vmul.f32 1.442695, %v5459_v27  ;;  %v5485_v18 = vmul.f32 1.442695, %v5460_v10  ;;  %v5414_v56 = vmax.f32 %v5412_v13, %v5413_v49 }
0x1ccd   :  { %v5500_v23 = vsel %vm743_vm2, %v9426_v53, 0.0  ;;  %v5429_v43 = vrot.slane %v5428_v58, 2  ;;  %v5436_v34 = vrot.slane %v5435_v12, 4  ;;  %v5443_v61 = vsel %vm743_vm2, %v9421_v24, -inf }
0x1cce   :  { %v5501_v39 = vadd.f32 %v5500_v23, %v5499_v11  ;;  %6775 = vpow2.f32 %v5483_v35  ;;  %v5457_v44 = vsub.f32 %v9380_v16, %v5414_v56  ;;  %v5458_v7 = vsub.f32 %v9377_v51, %v5414_v56 }
0x1ccf   :  { %v9436_v46 = vpop.eup %6767  ;;  %6777 = vpow2.f32 %v5485_v18  ;;  %v5430_v6 = vmax.f32 %v5428_v58, %v5429_v43  ;;  %v5437_v57 = vmax.f32 %v5435_v12, %v5436_v34  ;;  %v5442_v21 = vsel %vm351_vm0, %v9424_v45, -inf }
0x1cd0   :  { %v9440_v31 = vpop.eup %6769  ;;  %v5502_v28 = vrot.slane %v5501_v39, 4  ;;  %v5508_v36 = vsel %vm351_vm0, %v9436_v46, 0.0  ;;  %v5479_v41 = vmul.f32 1.442695, %v5457_v44  ;;  %v5481_v22 = vmul.f32 1.442695, %v5458_v7 }
0x1cd1   :  { %v5509_v16 = vsel %vm743_vm2, %v9440_v31, 0.0  ;;  %v5431_v51 = vrot.slane %v5430_v6, 1  ;;  %v5438_v54 = vrot.slane %v5437_v57, 2  ;;  %v5444_v4 = vmax.f32 %v5442_v21, %v5443_v61 }
0x1cd2   :  { %v5503_v2 = vadd.f32 %v5502_v28, %v5501_v39  ;;  %v5510_v63 = vadd.f32 %v5509_v16, %v5508_v36  ;;  %6779 = vpow2.f32 %v5479_v41 }
0x1cd3   :  { %v9446_v25 = vpop.eup %6771  ;;  %6781 = vpow2.f32 %v5481_v22  ;;  %v5432_v62 = vmax.f32 %v5430_v6, %v5431_v51  ;;  %v5439_v8 = vmax.f32 %v5437_v57, %v5438_v54  ;;  %v5445_v32 = vrot.slane %v5444_v4, 4 }
0x1cd4   :  { %v9448_v33 = vpop.eup %6773  ;;  %v5504_v59 = vrot.slane %v5503_v2, 2  ;;  %v5511_v47 = vrot.slane %v5510_v63, 4  ;;  %v5517_v0 = vsel %vm351_vm0, %v9446_v25, 0.0 }
0x1cd5   :  { %v5518_v40 = vsel %vm743_vm2, %v9448_v33, 0.0  ;;  %v5461_v37 = vsub.f32 %v9400_v30, %v5432_v62  ;;  %v5462_v20 = vsub.f32 %v9393_v60, %v5432_v62  ;;  %v5440_v38 = vrot.slane %v5439_v8, 1 }
0x1cd6   :  { %v5505_v50 = vadd.f32 %v5504_v59, %v5503_v2  ;;  %v5512_v52 = vadd.f32 %v5511_v47, %v5510_v63  ;;  %v5519_v13 = vadd.f32 %v5518_v40, %v5517_v0  ;;  %v5446_v55 = vmax.f32 %v5444_v4, %v5445_v32 }
0x1cd7   :  { %v5487_v3 = vmul.f32 1.442695, %v5461_v37  ;;  %v5489_v5 = vmul.f32 1.442695, %v5462_v20  ;;  %v5441_v1 = vmax.f32 %v5439_v8, %v5440_v38 }
0x1cd8   :  { %v9456_v19 = vpop.eup %6775  ;;  %v5506_v27 = vrot.slane %v5505_v50, 1  ;;  %v5513_v10 = vrot.slane %v5512_v52, 2  ;;  %v5520_v49 = vrot.slane %v5519_v13, 4  ;;  %v5447_v58 = vrot.slane %v5446_v55, 2 }
0x1cd9   :  { %v9458_v12 = vpop.eup %6777  ;;  %v5535_v30 = vsel %vm351_vm0, %v9456_v19, 0.0  ;;  %6783 = vpow2.f32 %v5487_v3  ;;  %v5463_v60 = vsub.f32 %v9410_v14, %v5441_v1  ;;  %v5464_v11 = vsub.f32 %v9407_v42, %v5441_v1 }
0x1cda   :  { %v5507_v35 = vadd.f32 %v5506_v27, %v5505_v50  ;;  %v5514_v18 = vadd.f32 %v5513_v10, %v5512_v52  ;;  %v5521_v56 = vadd.f32 %v5520_v49, %v5519_v13  ;;  %v5536_v23 = vsel %vm743_vm2, %v9458_v12, 0.0 }
0x1cdb   :  { %v5537_v43 = vadd.f32 %v5536_v23, %v5535_v30  ;;  %6785 = vpow2.f32 %v5489_v5  ;;  %v5491_v34 = vmul.f32 1.442695, %v5463_v60  ;;  %v5493_v61 = vmul.f32 1.442695, %v5464_v11 }
0x1cdc   :  { %v9466_v39 = vpop.eup %6779  ;;  %6787 = vrcp.f32 %v5507_v35  ;;  %v5515_v44 = vrot.slane %v5514_v18, 1  ;;  %v5522_v7 = vrot.slane %v5521_v56, 2  ;;  %v5448_v6 = vmax.f32 %v5446_v55, %v5447_v58 }
0x1cdd   :  { %v9468_v57 = vpop.eup %6781  ;;  %v5538_v14 = vrot.slane %v5537_v43, 4  ;;  %v5526_v42 = vsel %vm351_vm0, %v9466_v39, 0.0  ;;  %6789 = vpow2.f32 %v5491_v34 }
0x1cde   :  { %v5516_v21 = vadd.f32 %v5515_v44, %v5514_v18  ;;  %v5523_v28 = vadd.f32 %v5522_v7, %v5521_v56  ;;  %v5527_v36 = vsel %vm743_vm2, %v9468_v57, 0.0  ;;  %6791 = vpow2.f32 %v5493_v61 }
0x1cdf   :  { %v5539_v41 = vadd.f32 %v5538_v14, %v5537_v43  ;;  %v5528_v22 = vadd.f32 %v5527_v36, %v5526_v42  ;;  %v5449_v16 = vrot.slane %v5448_v6, 1 }
0x1ce0   :  { %6793 = vrcp.f32 %v5516_v21  ;;  %v5524_v51 = vrot.slane %v5523_v28, 1 }
0x1ce1   :  { %v5540_v54 = vrot.slane %v5539_v41, 2  ;;  %v5529_v4 = vrot.slane %v5528_v22, 4  ;;  %v5450_v2 = vmax.f32 %v5448_v6, %v5449_v16 }
0x1ce2   :  { %v5525_v63 = vadd.f32 %v5524_v51, %v5523_v28 }
0x1ce3   :  { %v9474_v62 = vpop.eup %6783  ;;  %v5541_v8 = vadd.f32 %v5540_v54, %v5539_v41  ;;  %v5530_v32 = vadd.f32 %v5529_v4, %v5528_v22  ;;  %v5465_v59 = vsub.f32 %v9424_v45, %v5450_v2  ;;  %v5466_v47 = vsub.f32 %v9421_v24, %v5450_v2 }
0x1ce4   :  { %6795 = vrcp.f32 %v5525_v63  ;;  %v5544_v20 = vsel %vm351_vm0, %v9474_v62, 0.0 }
0x1ce5   :  { %v9478_v0 = vpop.eup %6785  ;;  %v5542_v40 = vrot.slane %v5541_v8, 1  ;;  %v5531_v37 = vrot.slane %v5530_v32, 2  ;;  %v5495_v38 = vmul.f32 1.442695, %v5465_v59  ;;  %v5497_v13 = vmul.f32 1.442695, %v5466_v47 }
0x1ce6   :  { %v6788_v50 = vpop.eup %6787  ;;  %v5545_v52 = vsel %vm743_vm2, %v9478_v0, 0.0 }
0x1ce7   :  { %v9484_v55 = vpop.eup %6789  ;;  %v5579_v45 = vmul.f32 %v6788_v50, %v9418_v29  ;;  %v5580_v24 = vmul.f32 %v6788_v50, %v9426_v53  ;;  %v5543_v3 = vadd.f32 %v5542_v40, %v5541_v8  ;;  %v5532_v5 = vadd.f32 %v5531_v37, %v5530_v32 }
0x1ce8   :  { %v9488_v1 = vpop.eup %6791  ;;  %v5546_v27 = vadd.f32 %v5545_v52, %v5544_v20  ;;  %v5553_v10 = vsel %vm351_vm0, %v9484_v55, 0.0  ;;  %6797 = vpow2.f32 %v5495_v38 }
0x1ce9   :  { %v5595_v49 = vmul.f32 %v5579_v45, %v9235_v48  ;;  %v5596_v58 = vmul.f32 %v5580_v24, %v9237_v9  ;;  %6799 = vrcp.f32 %v5543_v3  ;;  %v5533_v30 = vrot.slane %v5532_v5, 1 }
0x1cea   :  { %v6794_v60 = vpop.eup %6793  ;;  %v5547_v11 = vrot.slane %v5546_v27, 4  ;;  %v5554_v29 = vsel %vm743_vm2, %v9488_v1, 0.0  ;;  %6801 = vpow2.f32 %v5497_v13 }
0x1ceb   :  { %v5611_v53 = vsel %vm351_vm0, %v5595_v49, 0.0  ;;  %v5612_v35 = vsel %vm743_vm2, %v5596_v58, 0.0  ;;  %v5581_v18 = vmul.f32 %v6794_v60, %v9436_v46  ;;  %v5582_v56 = vmul.f32 %v6794_v60, %v9440_v31 }
0x1cec   :  { %v5613_v23 = vadd.f32 %v5612_v35, %v5611_v53  ;;  %v5534_v43 = vadd.f32 %v5533_v30, %v5532_v5  ;;  %v5548_v34 = vadd.f32 %v5547_v11, %v5546_v27  ;;  %v5555_v61 = vadd.f32 %v5554_v29, %v5553_v10 }
0x1ced   :  { %v5597_v44 = vmul.f32 %v5581_v18, %v9235_v48  ;;  %v5598_v7 = vmul.f32 %v5582_v56, %v9237_v9 }
0x1cee   :  { %v6796_v6 = vpop.eup %6795  ;;  %v5614_v14 = vrot.slane %v5613_v23, 4  ;;  %6803 = vrcp.f32 %v5534_v43  ;;  %v5549_v42 = vrot.slane %v5548_v34, 2  ;;  %v5556_v21 = vrot.slane %v5555_v61, 4 }
0x1cef   :  { %v5620_v28 = vsel %vm351_vm0, %v5597_v44, 0.0  ;;  %v5621_v36 = vsel %vm743_vm2, %v5598_v7, 0.0  ;;  %v5583_v46 = vmul.f32 %v6796_v6, %v9446_v25  ;;  %v5584_v31 = vmul.f32 %v6796_v6, %v9448_v33 }
0x1cf0   :  { %v5615_v41 = vadd.f32 %v5614_v14, %v5613_v23  ;;  %v5622_v22 = vadd.f32 %v5621_v36, %v5620_v28  ;;  %v5550_v16 = vadd.f32 %v5549_v42, %v5548_v34  ;;  %v5557_v51 = vadd.f32 %v5556_v21, %v5555_v61 }
0x1cf1   :  { %v5599_v54 = vmul.f32 %v5583_v46, %v9235_v48  ;;  %v5600_v4 = vmul.f32 %v5584_v31, %v9237_v9 }
0x1cf2   :  { %v9508_v2 = vpop.eup %6797  ;;  %v5616_v63 = vrot.slane %v5615_v41, 2  ;;  %v5623_v8 = vrot.slane %v5622_v22, 4  ;;  %v5551_v32 = vrot.slane %v5550_v16, 1  ;;  %v5558_v59 = vrot.slane %v5557_v51, 2 }
0x1cf3   :  { %v6800_v47 = vpop.eup %6799  ;;  %v5629_v40 = vsel %vm351_vm0, %v5599_v54, 0.0  ;;  %v5630_v25 = vsel %vm743_vm2, %v5600_v4, 0.0  ;;  %v5562_v33 = vsel %vm351_vm0, %v9508_v2, 0.0 }
0x1cf4   :  { %v9514_v37 = vpop.eup %6801  ;;  %v5617_v20 = vadd.f32 %v5616_v63, %v5615_v41  ;;  %v5624_v38 = vadd.f32 %v5623_v8, %v5622_v22  ;;  %v5631_v50 = vadd.f32 %v5630_v25, %v5629_v40  ;;  %v5587_v52 = vmul.f32 %v6800_v47, %v9456_v19 }
0x1cf5   :  { %v5588_v13 = vmul.f32 %v6800_v47, %v9458_v12  ;;  %v5552_v45 = vadd.f32 %v5551_v32, %v5550_v16  ;;  %v5559_v24 = vadd.f32 %v5558_v59, %v5557_v51  ;;  %v5563_v3 = vsel %vm743_vm2, %v9514_v37, 0.0 }
0x1cf6   :  { %v5625_v5 = vrot.slane %v5624_v38, 2  ;;  %v5632_v27 = vrot.slane %v5631_v50, 4  ;;  %v5603_v10 = vmul.f32 %v5587_v52, %v9235_v48  ;;  %v5564_v49 = vadd.f32 %v5563_v3, %v5562_v33 }
0x1cf7   :  { %v5604_v58 = vmul.f32 %v5588_v13, %v9237_v9  ;;  %6805 = vrcp.f32 %v5552_v45  ;;  %v5560_v30 = vrot.slane %v5559_v24, 1  ;;  %v5618_v60 = vrot.slane %v5617_v20, 1 }
0x1cf8   :  { %v6804_v11 = vpop.eup %6803  ;;  %v5626_v29 = vadd.f32 %v5625_v5, %v5624_v38  ;;  %v5633_v19 = vadd.f32 %v5632_v27, %v5631_v50  ;;  %v5647_v12 = vsel %vm351_vm0, %v5603_v10, 0.0  ;;  %v5565_v53 = vrot.slane %v5564_v49, 4 }
0x1cf9   :  { %v5648_v35 = vsel %vm743_vm2, %v5604_v58, 0.0  ;;  %v5585_v18 = vmul.f32 %v6804_v11, %v9466_v39  ;;  %v5586_v56 = vmul.f32 %v6804_v11, %v9468_v57  ;;  %v5561_v23 = vadd.f32 %v5560_v30, %v5559_v24 }
0x1cfa   :  { %v5649_v43 = vadd.f32 %v5648_v35, %v5647_v12  ;;  %v5566_v34 = vadd.f32 %v5565_v53, %v5564_v49  ;;  %v5627_v61 = vrot.slane %v5626_v29, 1  ;;  %v5634_v6 = vrot.slane %v5633_v19, 2 }
0x1cfb   :  { %v5601_v44 = vmul.f32 %v5585_v18, %v9235_v48  ;;  %v5602_v7 = vmul.f32 %v5586_v56, %v9237_v9  ;;  %6807 = vrcp.f32 %v5561_v23  ;;  %v5619_v42 = vadd.f32 %v5618_v60, %v5617_v20 }
0x1cfc   :  { %v5567_v14 = vrot.slane %v5566_v34, 2  ;;  %v5628_v21 = vadd.f32 %v5627_v61, %v5626_v29  ;;  %v5650_v28 = vrot.slane %v5649_v43, 4  ;;  %v5635_v46 = vadd.f32 %v5634_v6, %v5633_v19 }
0x1cfd   :  { %v5638_v36 = vsel %vm351_vm0, %v5601_v44, 0.0  ;;  %v5639_v39 = vsel %vm743_vm2, %v5602_v7, 0.0 }
0x1cfe   :  { %v5640_v57 = vadd.f32 %v5639_v39, %v5638_v36  ;;  %v5568_v31 = vadd.f32 %v5567_v14, %v5566_v34  ;;  %v5651_v41 = vadd.f32 %v5650_v28, %v5649_v43  ;;  %v5695_v22 = vsel %vm1221_vm4, %v5628_v21, %v5619_v42 }
0x1cff   :  { %v5636_v16 = vrot.slane %v5635_v46, 1 }
0x1d00   :  { %v5641_v51 = vrot.slane %v5640_v57, 4  ;;  %v5569_v54 = vrot.slane %v5568_v31, 1  ;;  %v5652_v4 = vrot.slane %v5651_v41, 2 }
0x1d01   :  { %v6806_v63 = vpop.eup %6805  ;;  %v5637_v8 = vadd.f32 %v5636_v16, %v5635_v46 }
0x1d02   :  { %v5589_v32 = vmul.f32 %v6806_v63, %v9474_v62  ;;  %v5590_v59 = vmul.f32 %v6806_v63, %v9478_v0  ;;  %v5570_v47 = vadd.f32 %v5569_v54, %v5568_v31  ;;  %v5642_v40 = vadd.f32 %v5641_v51, %v5640_v57  ;;  %v6164_v51 = vld [vmem:[%s9619_s0 + $0x149] ss:$0 sm:$0xff] }
0x1d03   :  { %v5653_v25 = vadd.f32 %v5652_v4, %v5651_v41  ;;  %v5696_v33 = vsel %vm1223_vm3, %v5637_v8, %v5695_v22 }
0x1d04   :  { %v5605_v20 = vmul.f32 %v5589_v32, %v9235_v48  ;;  %v5606_v38 = vmul.f32 %v5590_v59, %v9237_v9  ;;  %6809 = vrcp.f32 %v5570_v47  ;;  %v5643_v50 = vrot.slane %v5642_v40, 2 }
0x1d05   :  { %v6808_v52 = vpop.eup %6807  ;;  %v5654_v0 = vrot.slane %v5653_v25, 1 }
0x1d06   :  { %v5656_v13 = vsel %vm351_vm0, %v5605_v20, 0.0  ;;  %v5591_v45 = vmul.f32 %v6808_v52, %v9484_v55  ;;  %v5592_v62 = vmul.f32 %v6808_v52, %v9488_v1  ;;  %v5644_v24 = vadd.f32 %v5643_v50, %v5642_v40  ;;  %v5800_v20 = vld [vmem:[%s9619_s0 + $0x14a] sm:$0xff] }
0x1d07   :  { %v5657_v3 = vsel %vm743_vm2, %v5606_v38, 0.0  ;;  %v5655_v29 = vadd.f32 %v5654_v0, %v5653_v25  ;;  %v5801_v38 = vld [vmem:[%s9619_s0 + $0x152] sm:$0xff]  ;;  %v6167_v0 = vld [vmem:[%s9619_s0 + $0x167] ss:$0 sm:$0xff] }
0x1d08   :  { %v5607_v5 = vmul.f32 %v5591_v45, %v9235_v48  ;;  %v5608_v27 = vmul.f32 %v5592_v62, %v9237_v9  ;;  %v5645_v10 = vrot.slane %v5644_v24, 1  ;;  %v5658_v49 = vadd.f32 %v5657_v3, %v5656_v13  ;;  %v6166_v62 = vld [vmem:[%s9619_s0 + $0x166] ss:$0 sm:$0xff] }
0x1d09   :  { %v6466_v50 = vpack.c.bf16 %v5801_v38, %v5800_v20 }
0x1d0a   :  { %v5646_v58 = vadd.f32 %v5645_v10, %v5644_v24  ;;  %v5659_v30 = vrot.slane %v5658_v49, 4  ;;  %v5665_v60 = vsel %vm351_vm0, %v5607_v5, 0.0  ;;  %v5666_v11 = vsel %vm743_vm2, %v5608_v27, 0.0  ;;  %v6168_v27 = vld [vmem:[%s9619_s0 + $0x15a] ss:$0 sm:$0xff] }
0x1d0b   :  { %v5667_v55 = vadd.f32 %v5666_v11, %v5665_v60  ;;  %6467 = vmatpush3.bf16.msra.mxu0 %v6466_v50  ;;  %v6170_v60 = vld [vmem:[%s9619_s0 + $0x163] ss:$0 sm:$0xff] }
0x1d0c   :  { %v5660_v19 = vadd.f32 %v5659_v30, %v5658_v49  ;;  %v5697_v1 = vsel %vm1225_vm5, %v5646_v58, %v5696_v33  ;;  %6468 = vmatprep.subr.bf16.mxu0 %v9748_v15  ;;  %v5803_v15 = vld [vmem:[%s9619_s0 + $0x15b] sm:$0xff] }
0x1d0d   :  { %v5668_v12 = vrot.slane %v5667_v55, 4  ;;  %v5698_v53 = vsel %vm1227_vm6, %v5655_v29, %v5697_v1 }
0x1d0e   :  { %v6810_v35 = vpop.eup %6809  ;;  %v5661_v18 = vrot.slane %v5660_v19, 2 }
0x1d0f   :  { %v5593_v56 = vmul.f32 %v6810_v35, %v9508_v2  ;;  %v5594_v23 = vmul.f32 %v6810_v35, %v9514_v37  ;;  %v5669_v43 = vadd.f32 %v5668_v12, %v5667_v55 }
0x1d10   :  { %v5662_v34 = vadd.f32 %v5661_v18, %v5660_v19 }
0x1d11   :  { %v5609_v61 = vmul.f32 %v5593_v56, %v9235_v48  ;;  %v5610_v44 = vmul.f32 %v5594_v23, %v9237_v9  ;;  %v5670_v7 = vrot.slane %v5669_v43, 2 }
0x1d12   :  { %v5663_v6 = vrot.slane %v5662_v34, 1 }
0x1d13   :  { %v5671_v14 = vadd.f32 %v5670_v7, %v5669_v43  ;;  %v5674_v42 = vsel %vm351_vm0, %v5609_v61, 0.0  ;;  %v5675_v21 = vsel %vm743_vm2, %v5610_v44, 0.0  ;;  %v6172_v61 = vld [vmem:[%s9619_s0 + $0x168] ss:$0 sm:$0xff]  ;;  %v6173_v7 = vld [vmem:[%s9619_s0 + $0x169] ss:$0 sm:$0xff] }
0x1d14   :  { %v5664_v28 = vadd.f32 %v5663_v6, %v5662_v34  ;;  %v5676_v36 = vadd.f32 %v5675_v21, %v5674_v42 }
0x1d15   :  { %v5672_v39 = vrot.slane %v5671_v14, 1 }
0x1d16   :  { %v5677_v46 = vrot.slane %v5676_v36, 4  ;;  %v5699_v2 = vsel %vm1229_vm7, %v5664_v28, %v5698_v53 }
0x1d17   :  { %v5673_v37 = vadd.f32 %v5672_v39, %v5671_v14 }
0x1d18   :  { %v5678_v57 = vadd.f32 %v5677_v46, %v5676_v36 }
0x1d19   :  { %v5700_v31 = vsel %vm1231_vm8, %v5673_v37, %v5699_v2  ;;  %v6011_v2 = vld [vmem:[%s9619_s0 + $0x16e] sm:$0xff]  ;;  %v6012_v37 = vld [vmem:[%s9619_s0 + $0x176] sm:$0xff] }
0x1d1a   :  { %v5679_v48 = vrot.slane %v5678_v57, 2 }
0x1d1c   :  { %v5680_v41 = vadd.f32 %v5679_v48, %v5678_v57  ;;  %v6469_v57 = vpack.c.bf16 %v6012_v37, %v6011_v2 }
0x1d1e   :  { %v5681_v9 = vrot.slane %v5680_v41, 1 }
0x1d20   :  { %v5682_v22 = vadd.f32 %v5681_v9, %v5680_v41 }
0x1d22   :  { %v5701_v16 = vsel %vm1233_vm9, %v5682_v22, %v5700_v31  ;;  %v6174_v22 = vld [vmem:[%s9619_s0 + $0x16c] ss:$0 sm:$0xff] }
0x1d23   :  { %6385 = vmatmul.mubr.msk.f32.vlgmr.msra.gmra.mrb[18].mxu1 %vm351_vm0, %v5701_v16 }
0x1d24   :  { %6396 = vmatprep.mubr.msk.f32.mxu1 %vm6826_vm11, %v9735_v17  ;;  %6395 = vmatpush3.msra.mxu1 %v5803_v15 }
0x1df6   :  { %v5770_v54 = vpop.f32.mrb[18].mxu1 }
0x1df7   :  { %v5771_v4 = vadd.f32 %v6164_v51, %v5770_v54  ;;  %v6386_v63 = vpop.f32.mrb[19].mxu1  ;;  %v6175_v51 = vld [vmem:[%s9619_s0 + $0x16d] ss:$0 sm:$0xff] }
0x1df8   :  { %v6176_v63 = vld [vmem:[%s9619_s0 + $0x17e] ss:$0 sm:$0xff] }
0x1df9   :  { %v5774_v8 = vadd.f32 %v5771_v4, %v9222_v26 }
0x1dfb   :  { %v5777_v32 = vsel %vm351_vm0, %v5774_v8, 0.0 }
0x1dfc   :  { %5778 = vadd.xlane.f32.xlu0 %v5777_v32 }
0x1e89   :  { %v5779_v59 = vpop.xlane.xlu0 %5778 }
0x1e8a   :  { %v5780_v47 = vmul.f32 0.0625, %v5779_v59 }
0x1e8c   :  { %v5781_v40 = vsub.f32 %v5774_v8, %v5780_v47 }
0x1e8e   :  { %v5782_v25 = vmul.f32 %v5781_v40, %v5781_v40 }
0x1e90   :  { %v5783_v33 = vsel %vm351_vm0, %v5782_v25, 0.0 }
0x1e91   :  { %5784 = vadd.xlane.f32.xlu1 %v5783_v33 }
0x1f1e   :  { %v5785_v26 = vpop.xlane.xlu1 %5784 }
0x1f1f   :  { %v5786_v52 = vmul.f32 0.0625, %v5785_v26 }
0x1f21   :  { %v5787_v13 = vadd.f32 1e-05, %v5786_v52 }
0x1f23   :  { %6811 = vrsqrt.f32 %v5787_v13 }
0x1f2d   :  { %v6812_v45 = vpop.eup %6811 }
0x1f2e   :  { %v5789_v24 = vmul.f32 %v6812_v45, %v5781_v40 }
0x1f30   :  { %v5794_v3 = vmul.f32 %v6166_v62, %v5789_v24 }
0x1f32   :  { %v5799_v5 = vadd.f32 %v6167_v0, %v5794_v3 }
0x1f34   :  { %6392 = vmatmul.mubr.msk.f32.vlgmr.msra.gmra.mrb[20].mxu0 %vm351_vm0, %v5799_v5 }
0x1f35   :  { %6403 = vmatprep.mubr.msk.f32.mxu0 %vm6826_vm11, %v9735_v17  ;;  %6470 = vmatpush3.bf16.msra.mxu0 %v6469_v57 }
0x2007   :  { %v5878_v10 = vpop.f32.mrb[20].mxu0 }
0x2008   :  { %v5879_v49 = vadd.f32 %v6168_v27, %v5878_v10  ;;  %v6393_v58 = vpop.f32.mrb[21].mxu0 }
0x200a   :  { %v5882_v30 = vmax.f32 %v5879_v49, 0.0 }
0x200c   :  { %6397 = vmatmul.mubr.msk.f32.vlgmr.msra.gmra.mrb[20].mxu1 %vm1456_vm10, %v5882_v30 }
0x20df   :  { %v5956_v17 = vpop.f32.mrb[20].mxu1 }
0x20e0   :  { %v5957_v11 = vadd.f32 %v6170_v60, %v5956_v17  ;;  %v6398_v29 = vpop.f32.mrb[21].mxu1 }
0x20e2   :  { %v5960_v55 = vadd.f32 %v5957_v11, %v5799_v5 }
0x20e4   :  { %v5963_v19 = vsel %vm351_vm0, %v5960_v55, 0.0 }
0x20e5   :  { %5964 = vadd.xlane.f32.xlu0 %v5963_v19 }
0x2172   :  { %v5965_v1 = vpop.xlane.xlu0 %5964 }
0x2173   :  { %v5966_v12 = vmul.f32 0.0625, %v5965_v1 }
0x2175   :  { %v5967_v53 = vsub.f32 %v5960_v55, %v5966_v12 }
0x2177   :  { %v5968_v35 = vmul.f32 %v5967_v53, %v5967_v53 }
0x2179   :  { %v5969_v18 = vsel %vm351_vm0, %v5968_v35, 0.0 }
0x217a   :  { %5970 = vadd.xlane.f32.xlu0 %v5969_v18 }
0x2207   :  { %v5971_v56 = vpop.xlane.xlu0 %5970 }
0x2208   :  { %v5972_v23 = vmul.f32 0.0625, %v5971_v56 }
0x220a   :  { %v5973_v43 = vadd.f32 1e-05, %v5972_v23 }
0x220c   :  { %6813 = vrsqrt.f32 %v5973_v43 }
0x2216   :  { %v6814_v34 = vpop.eup %6813 }
0x2217   :  { %v5975_v44 = vmul.f32 %v6814_v34, %v5967_v53 }
0x2219   :  { %v5980_v6 = vmul.f32 %v6172_v61, %v5975_v44 }
0x221b   :  { %v5985_v14 = vadd.f32 %v6173_v7, %v5980_v6 }
0x221d   :  { %v5988_v42 = vsel %vm351_vm0, %v5985_v14, 0.0 }
0x221e   :  { %5989 = vadd.xlane.f32.xlu1 %v5988_v42 }
0x22ab   :  { %v5990_v21 = vpop.xlane.xlu1 %5989 }
0x22ac   :  { %v5991_v28 = vmul.f32 0.0625, %v5990_v21 }
0x22ae   :  { %v5992_v36 = vsub.f32 %v5985_v14, %v5991_v28 }
0x22b0   :  { %v5993_v39 = vmul.f32 %v5992_v36, %v5992_v36 }
0x22b2   :  { %v5994_v46 = vsel %vm351_vm0, %v5993_v39, 0.0 }
0x22b3   :  { %5995 = vadd.xlane.f32.xlu0 %v5994_v46 }
0x2340   :  { %v5996_v31 = vpop.xlane.xlu0 %5995 }
0x2341   :  { %v5997_v48 = vmul.f32 0.0625, %v5996_v31 }
0x2343   :  { %v5998_v41 = vadd.f32 1e-05, %v5997_v48 }
0x2345   :  { %6815 = vrsqrt.f32 %v5998_v41 }
0x234f   :  { %v6816_v9 = vpop.eup %6815 }
0x2350   :  { %v6000_v16 = vmul.f32 %v6816_v9, %v5992_v36 }
0x2352   :  { %v6005_v54 = vmul.f32 %v6174_v22, %v6000_v16 }
0x2354   :  { %v6010_v4 = vadd.f32 %v6175_v51, %v6005_v54 }
0x2356   :  { %6404 = vmatmul.mubr.msk.f32.vlgmr.msra.gmra.mrb[22].mxu0 %vm351_vm0, %v6010_v4 }
0x2429   :  { %v6087_v8 = vpop.f32.mrb[22].mxu0 }
0x242a   :  { %v6088_v32 = vadd.f32 %v6176_v63, %v6087_v8  ;;  %v6405_v59 = vpop.f32.mrb[23].mxu0 }
0x242c   :  { %6091 = vst [vmem:[%s9621_s2] sm:$0xff] %v6088_v32 }

</bundles_post_ra>
